<compile_context>
chip_gen: v7x
topology: tpu7x:2x2x1
jax: 0.10.0
libtpu: 0.0.40
codegen_flags: <defaults>
</compile_context>

<pallas_src>
import functools

import jax
import jax.numpy as jnp
from jax.experimental import pallas as pl
from jax.experimental.pallas import tpu as pltpu


def _round_up(x, k):
    return (x + k - 1) // k * k


# ----------------------------- fused Pallas kernel ---------------------------

def _bottleneck_kernel(x_ref, w1_ref, b1_ref, w2_ref, b2_ref, w3_ref, b3_ref,
                       o_ref, hp_ref, *, height, width):
    """Fused Bottleneck forward for a block of images.

    x_ref : (B, H*W, Cin)   bf16  input rows (NHWC flattened per image)
    w1_ref: (Cin, P)        bf16  conv1 1x1 weight, bn1 scale folded in
    b1_ref: (1, P)          f32   bn1 shift
    w2_ref: (9, P, P)       bf16  conv2 3x3 taps (ky-major, kx-minor; tap[t] is
                                  (Cin, Cout) = torch w[o, i, ky, kx] transposed),
                                  bn2 scale folded in
    b2_ref: (1, P)          f32   bn2 shift
    w3_ref: (P, Cout)       bf16  conv3 1x1 weight, bn3 scale folded in
    b3_ref: (1, Cout)       f32   bn3 shift
    o_ref : (B, H*W, Cout)  bf16  output rows
    hp_ref: (B, H+2, Wp, P) bf16  VMEM scratch: zero-padded h1 image
    """
    b_blk, m, cin = x_ref.shape
    planes = w1_ref.shape[1]
    cout = w3_ref.shape[1]
    bm = b_blk * m

    x = x_ref[...].reshape(bm, cin)                           # (BM, Cin) bf16

    # ---- stage 1: 1x1 conv (scale folded) + shift + ReLU (f32 epilogue) ----
    h1 = jnp.dot(x, w1_ref[...], preferred_element_type=jnp.float32)
    h1 = jnp.maximum(h1 + b1_ref[...], 0.0).astype(jnp.bfloat16)

    # ---- stage 2: 3x3 conv (pad=1, stride=1) --------------------------------
    # Store h1 into a zero-padded VMEM image (halo stays zero), then accumulate
    # 9 ref-sliced tap matmuls.  All slicing is on leading/sublane axes only;
    # no channel-axis concatenation and no HBM traffic for the intermediate.
    hp_ref[...] = jnp.zeros_like(hp_ref)   # re-zero each step: megacore-safe
    hp_ref[:, 1:height + 1, 1:width + 1, :] = (
        h1.reshape(b_blk, height, width, planes))

    acc = jnp.zeros((bm, planes), jnp.float32)
    for ky in range(3):
        for kx in range(3):
            tap = hp_ref[:, ky:ky + height, kx:kx + width, :]   # (B, H, W, P)
            acc = acc + jnp.dot(tap.reshape(bm, planes),
                                w2_ref[ky * 3 + kx],
                                preferred_element_type=jnp.float32)
    h2 = jnp.maximum(acc + b2_ref[...], 0.0).astype(jnp.bfloat16)

    # ---- stage 3: 1x1 conv + shift + residual add + ReLU --------------------
    h3 = jnp.dot(h2, w3_ref[...], preferred_element_type=jnp.float32)
    out = jnp.maximum(h3 + b3_ref[...] + x.astype(jnp.float32), 0.0)
    o_ref[...] = out.reshape(b_blk, m, cout).astype(o_ref.dtype)


# ------------------------------ param preparation ----------------------------

def _fold_bn(gamma, beta, mean, var, eps=1e-5):
    scale = (gamma / jnp.sqrt(var + eps)).astype(jnp.float32)
    shift = (beta - mean * scale).astype(jnp.float32)
    return scale, shift


def prepare_params(params):
    """Fold inference-mode BN into the conv weights (f32 fold, cast bf16 last)."""
    w1, w2_taps, w3 = params["w1"], params["w2_taps"], params["w3"]
    planes = w1.shape[1]
    cout = w3.shape[1]
    s1, b1 = _fold_bn(*params["bn1"])
    s2, b2 = _fold_bn(*params["bn2"])
    s3, b3 = _fold_bn(*params["bn3"])
    return {
        "w1": (w1 * s1[None, :]).astype(jnp.bfloat16),                 # (Cin, P)
        "b1": b1.reshape(1, planes),
        "w2": (w2_taps * s2[None, None, :]).astype(jnp.bfloat16),      # (9, P, P)
        "b2": b2.reshape(1, planes),
        "w3": (w3 * s3[None, :]).astype(jnp.bfloat16),                 # (P, 4P)
        "b3": b3.reshape(1, cout),
    }


# ------------------------------ forward wrapper -------------------------------

@functools.partial(jax.jit, static_argnames=("height", "width", "batch_block"))
def bottleneck_forward(x_rows, prep, *, height, width, batch_block=2):
    """x_rows: (N, H*W, Cin) bf16 NHWC-flattened activations. Returns bf16."""
    n, m, cin = x_rows.shape
    planes = prep["b1"].shape[1]
    cout = prep["b3"].shape[1]
    assert cin == cout, "residual path requires inplanes == 4*planes (no downsample)"
    assert m == height * width
    assert n % batch_block == 0
    wp = _round_up(width + 2, 8)   # pad padded-W to a sublane multiple

    kernel = functools.partial(_bottleneck_kernel, height=height, width=width)

    return pl.pallas_call(
        kernel,
        out_shape=jax.ShapeDtypeStruct((n, m, cout), jnp.bfloat16),
        grid_spec=pltpu.PrefetchScalarGridSpec(
            num_scalar_prefetch=0,
            grid=(n // batch_block,),
            in_specs=[
                pl.BlockSpec((batch_block, m, cin), lambda i: (i, 0, 0)),
                pl.BlockSpec((cin, planes), lambda i: (0, 0)),
                pl.BlockSpec((1, planes), lambda i: (0, 0)),
                pl.BlockSpec((9, planes, planes), lambda i: (0, 0, 0)),
                pl.BlockSpec((1, planes), lambda i: (0, 0)),
                pl.BlockSpec((planes, cout), lambda i: (0, 0)),
                pl.BlockSpec((1, cout), lambda i: (0, 0)),
            ],
            out_specs=pl.BlockSpec((batch_block, m, cout), lambda i: (i, 0, 0)),
            scratch_shapes=[
                pltpu.VMEM((batch_block, height + 2, wp, planes), jnp.bfloat16),
            ],
        ),
        compiler_params=pltpu.CompilerParams(
            dimension_semantics=("parallel",),
            vmem_limit_bytes=32 * 1024 * 1024,
        ),
    )(x_rows, prep["w1"], prep["b1"], prep["w2"], prep["b2"],
      prep["w3"], prep["b3"])


# ------------------------------ JAX references --------------------------------

def bottleneck_reference_matched(x_nhwc_bf16, prep):
    """Matched-precision reference (same folded bf16 weights, f32 accumulate)."""
    planes = prep["b1"].shape[1]
    x = x_nhwc_bf16
    h1 = jnp.einsum("nhwc,cp->nhwp", x, prep["w1"],
                    preferred_element_type=jnp.float32)
    h1 = jnp.maximum(h1 + prep["b1"][0], 0.0).astype(jnp.bfloat16)

    w2_hwio = prep["w2"].reshape(3, 3, planes, planes)
    h2 = jax.lax.conv_general_dilated(
        h1, w2_hwio, window_strides=(1, 1), padding=((1, 1), (1, 1)),
        dimension_numbers=("NHWC", "HWIO", "NHWC"),
        preferred_element_type=jnp.float32)
    h2 = jnp.maximum(h2 + prep["b2"][0], 0.0).astype(jnp.bfloat16)

    h3 = jnp.einsum("nhwp,pc->nhwc", h2, prep["w3"],
                    preferred_element_type=jnp.float32)
    out = jnp.maximum(h3 + prep["b3"][0] + x.astype(jnp.float32), 0.0)
    return out.astype(jnp.bfloat16)


def bottleneck_reference_f32(x_nchw, params):
    """Pure-f32 reference matching the PyTorch module math exactly (NHWC out)."""
    x = jnp.transpose(x_nchw, (0, 2, 3, 1)).astype(jnp.float32)
    planes = params["w1"].shape[1]
    s1, b1 = _fold_bn(*params["bn1"])
    s2, b2 = _fold_bn(*params["bn2"])
    s3, b3 = _fold_bn(*params["bn3"])

    h1 = jnp.maximum(jnp.einsum("nhwc,cp->nhwp", x, params["w1"]) * s1 + b1, 0.0)
    w2_hwio = params["w2_taps"].reshape(3, 3, planes, planes)
    h2 = jax.lax.conv_general_dilated(
        h1, w2_hwio, window_strides=(1, 1), padding=((1, 1), (1, 1)),
        dimension_numbers=("NHWC", "HWIO", "NHWC"))
    h2 = jnp.maximum(h2 * s2 + b2, 0.0)
    h3 = jnp.einsum("nhwp,pc->nhwc", h2, params["w3"]) * s3 + b3
    return jnp.maximum(h3 + x, 0.0)


# ------------------------------------ main ------------------------------------

if __name__ == "__main__":
    # Bottleneck(inplanes=128, planes=32): residual requires inplanes == 4*planes.
    N, H, W = 8, 16, 16            # 8 images / 2 per block -> grid of 4 steps
    PLANES = 32
    INPLANES = COUT = 4 * PLANES   # 128 -> lane-dense output channels
    BATCH_BLOCK = 2

    key = jax.random.PRNGKey(0)
    ks = jax.random.split(key, 16)

    def bn_params(i, c):
        gamma = 1.0 + 0.1 * jax.random.normal(ks[i], (c,), jnp.float32)
        beta = 0.1 * jax.random.normal(ks[i + 1], (c,), jnp.float32)
        mean = 0.05 * jax.random.normal(ks[i + 2], (c,), jnp.float32)
        var = 1.0 + 0.1 * jax.random.uniform(ks[i + 3], (c,), jnp.float32)
        return (gamma, beta, mean, var)

    params = {
        # conv1: torch weight (P, Cin, 1, 1) -> stored as (Cin, P)
        "w1": 0.1 * jax.random.normal(ks[0], (INPLANES, PLANES), jnp.float32),
        "bn1": bn_params(3, PLANES),
        # conv2: torch weight (P, P, 3, 3) -> stored as taps (9, Cin=P, Cout=P)
        "w2_taps": 0.1 * jax.random.normal(ks[1], (9, PLANES, PLANES), jnp.float32),
        "bn2": bn_params(7, PLANES),
        # conv3: torch weight (4P, P, 1, 1) -> stored as (P, 4P)
        "w3": 0.1 * jax.random.normal(ks[2], (PLANES, COUT), jnp.float32),
        "bn3": bn_params(11, COUT),
    }

    x_nchw = jax.random.normal(ks[15], (N, INPLANES, H, W), jnp.float32)

    prep = prepare_params(params)

    # NCHW f32 -> NHWC-flattened bf16 rows.  In an end-to-end NHWC/bf16 ResNet
    # this conversion does not exist; it is test-harness adapter code only.
    x_nhwc_bf16 = jnp.transpose(x_nchw, (0, 2, 3, 1)).astype(jnp.bfloat16)
    x_rows = x_nhwc_bf16.reshape(N, H * W, INPLANES)

    out_rows = jax.block_until_ready(
        bottleneck_forward(x_rows, prep, height=H, width=W,
                           batch_block=BATCH_BLOCK))
    assert out_rows.shape == (N, H * W, COUT)
    assert out_rows.dtype == jnp.bfloat16
    out = out_rows.astype(jnp.float32).reshape(N, H, W, COUT)   # NHWC f32

    # Structural correctness: matched-precision reference (same bf16 folded
    # weights / bf16 activations / bf16 output, f32 accumulation).
    ref_m = jax.block_until_ready(
        bottleneck_reference_matched(x_nhwc_bf16, prep)).astype(jnp.float32)
    err_m = float(jnp.max(jnp.abs(out - ref_m)))
    assert jnp.allclose(out, ref_m, atol=5e-2, rtol=5e-2), (
        "mismatch vs matched-precision reference, max abs err %e" % err_m)

    # Semantic sanity vs the pure-f32 PyTorch-equivalent math; tolerance only
    # accounts for bf16 quantization of matmul inputs and the bf16 output.
    ref32 = jax.block_until_ready(bottleneck_reference_f32(x_nchw, params))
    err32 = float(jnp.max(jnp.abs(out - ref32)))
    assert jnp.allclose(out, ref32, atol=2.5e-1, rtol=5e-2), (
        "mismatch vs f32 reference, max abs err %e" % err32)

    print("KERNEL_OK")
</pallas_src>

<mosaic_0001>
module attributes {stable_mosaic.version = 11 : i64} {
  func.func @_bottleneck_kernel(%arg0: i32, %arg1: memref<2x256x128xbf16, #tpu.memory_space<vmem>>, %arg2: memref<128x32xbf16, #tpu.memory_space<vmem>>, %arg3: memref<1x32xf32, #tpu.memory_space<vmem>>, %arg4: memref<9x32x32xbf16, #tpu.memory_space<vmem>>, %arg5: memref<1x32xf32, #tpu.memory_space<vmem>>, %arg6: memref<32x128xbf16, #tpu.memory_space<vmem>>, %arg7: memref<1x128xf32, #tpu.memory_space<vmem>>, %arg8: memref<2x256x128xbf16, #tpu.memory_space<vmem>>, %arg9: memref<2x18x24x32xbf16, #tpu.memory_space<vmem>>) attributes {dimension_semantics = [#tpu.dimension_semantics<parallel>], iteration_bounds = array<i64: 4>, scalar_prefetch = 0 : i64, scratch_operands = 1 : i64, tpu.core_type = #tpu.core_type<tc>, window_params = [{transform_indices = @transform_0, window_bounds = array<i64: 2, 256, 128>}, {pipeline_mode = #tpu.pipeline_mode<synchronous>, transform_indices = @transform_1, window_bounds = array<i64: 128, 32>}, {pipeline_mode = #tpu.pipeline_mode<synchronous>, transform_indices = @transform_2, window_bounds = array<i64: 1, 32>}, {pipeline_mode = #tpu.pipeline_mode<synchronous>, transform_indices = @transform_3, window_bounds = array<i64: 9, 32, 32>}, {pipeline_mode = #tpu.pipeline_mode<synchronous>, transform_indices = @transform_4, window_bounds = array<i64: 1, 32>}, {pipeline_mode = #tpu.pipeline_mode<synchronous>, transform_indices = @transform_5, window_bounds = array<i64: 32, 128>}, {pipeline_mode = #tpu.pipeline_mode<synchronous>, transform_indices = @transform_6, window_bounds = array<i64: 1, 128>}, {transform_indices = @transform_7, window_bounds = array<i64: 2, 256, 128>}]} {
    %c0 = arith.constant 0 : index
    %c0_0 = arith.constant 0 : index
    %c0_1 = arith.constant 0 : index
    %0 = vector.load %arg1[%c0, %c0_0, %c0_1] : memref<2x256x128xbf16, #tpu.memory_space<vmem>>, vector<2x256x128xbf16>
    %1 = vector.shape_cast %0 : vector<2x256x128xbf16> to vector<512x128xbf16>
    %c0_2 = arith.constant 0 : index
    %c0_3 = arith.constant 0 : index
    %2 = vector.load %arg2[%c0_2, %c0_3] : memref<128x32xbf16, #tpu.memory_space<vmem>>, vector<128x32xbf16>
    %cst = arith.constant dense<0.000000e+00> : vector<512x32xf32>
    %3 = tpu.matmul %1, %2, %cst {dimension_numbers = #tpu.dot_dimension_numbers<[1], [0], [0], [1], [0, 0, 1, 1], [], []>} : vector<512x128xbf16>, vector<128x32xbf16>, vector<512x32xf32> -> vector<512x32xf32>
    %c0_4 = arith.constant 0 : index
    %c0_5 = arith.constant 0 : index
    %4 = vector.load %arg3[%c0_4, %c0_5] : memref<1x32xf32, #tpu.memory_space<vmem>>, vector<1x32xf32>
    %5 = vector.broadcast %4 : vector<1x32xf32> to vector<512x32xf32>
    %6 = arith.addf %3, %5 : vector<512x32xf32>
    %cst_6 = arith.constant 0.000000e+00 : f32
    %7 = vector.broadcast %cst_6 : f32 to vector<512x32xf32>
    %8 = arith.maximumf %6, %7 : vector<512x32xf32>
    %9 = arith.truncf %8 : vector<512x32xf32> to vector<512x32xbf16>
    %cst_7 = arith.constant 0.000000e+00 : bf16
    %10 = vector.broadcast %cst_7 : bf16 to vector<2x18x24x32xbf16>
    %c0_8 = arith.constant 0 : index
    %c0_9 = arith.constant 0 : index
    %c0_10 = arith.constant 0 : index
    %c0_11 = arith.constant 0 : index
    %11 = vector.load %arg9[%c0_8, %c0_9, %c0_10, %c0_11] : memref<2x18x24x32xbf16, #tpu.memory_space<vmem>>, vector<2x18x24x32xbf16>
    tpu.vector_store %arg9[%c0_8, %c0_9, %c0_10, %c0_11], %10 {strides = array<i32>} : memref<2x18x24x32xbf16, #tpu.memory_space<vmem>>, vector<2x18x24x32xbf16>,
    %12 = vector.shape_cast %9 : vector<512x32xbf16> to vector<2x16x16x32xbf16>
    %c0_12 = arith.constant 0 : index
    %c1 = arith.constant 1 : index
    %c1_13 = arith.constant 1 : index
    %c0_14 = arith.constant 0 : index
    %13 = vector.load %arg9[%c0_12, %c1, %c1_13, %c0_14] : memref<2x18x24x32xbf16, #tpu.memory_space<vmem>>, vector<2x16x16x32xbf16>
    tpu.vector_store %arg9[%c0_12, %c1, %c1_13, %c0_14], %12 {strides = array<i32>} : memref<2x18x24x32xbf16, #tpu.memory_space<vmem>>, vector<2x16x16x32xbf16>,
    %cst_15 = arith.constant 0.000000e+00 : f32
    %14 = vector.broadcast %cst_15 : f32 to vector<512x32xf32>
    %c0_16 = arith.constant 0 : index
    %c0_17 = arith.constant 0 : index
    %c0_18 = arith.constant 0 : index
    %c0_19 = arith.constant 0 : index
    %15 = vector.load %arg9[%c0_16, %c0_17, %c0_18, %c0_19] : memref<2x18x24x32xbf16, #tpu.memory_space<vmem>>, vector<2x16x16x32xbf16>
    %16 = vector.shape_cast %15 : vector<2x16x16x32xbf16> to vector<512x32xbf16>
    %c0_20 = arith.constant 0 : index
    %c0_21 = arith.constant 0 : index
    %c0_22 = arith.constant 0 : index
    %17 = vector.load %arg4[%c0_20, %c0_21, %c0_22] : memref<9x32x32xbf16, #tpu.memory_space<vmem>>, vector<1x32x32xbf16>
    %18 = vector.shape_cast %17 : vector<1x32x32xbf16> to vector<32x32xbf16>
    %cst_23 = arith.constant dense<0.000000e+00> : vector<512x32xf32>
    %19 = tpu.matmul %16, %18, %cst_23 {dimension_numbers = #tpu.dot_dimension_numbers<[1], [0], [0], [1], [0, 0, 1, 1], [], []>} : vector<512x32xbf16>, vector<32x32xbf16>, vector<512x32xf32> -> vector<512x32xf32>
    %20 = arith.addf %14, %19 : vector<512x32xf32>
    %c0_24 = arith.constant 0 : index
    %c0_25 = arith.constant 0 : index
    %c1_26 = arith.constant 1 : index
    %c0_27 = arith.constant 0 : index
    %21 = vector.load %arg9[%c0_24, %c0_25, %c1_26, %c0_27] : memref<2x18x24x32xbf16, #tpu.memory_space<vmem>>, vector<2x16x16x32xbf16>
    %22 = vector.shape_cast %21 : vector<2x16x16x32xbf16> to vector<512x32xbf16>
    %c1_28 = arith.constant 1 : index
    %c0_29 = arith.constant 0 : index
    %c0_30 = arith.constant 0 : index
    %23 = vector.load %arg4[%c1_28, %c0_29, %c0_30] : memref<9x32x32xbf16, #tpu.memory_space<vmem>>, vector<1x32x32xbf16>
    %24 = vector.shape_cast %23 : vector<1x32x32xbf16> to vector<32x32xbf16>
    %cst_31 = arith.constant dense<0.000000e+00> : vector<512x32xf32>
    %25 = tpu.matmul %22, %24, %cst_31 {dimension_numbers = #tpu.dot_dimension_numbers<[1], [0], [0], [1], [0, 0, 1, 1], [], []>} : vector<512x32xbf16>, vector<32x32xbf16>, vector<512x32xf32> -> vector<512x32xf32>
    %26 = arith.addf %20, %25 : vector<512x32xf32>
    %c0_32 = arith.constant 0 : index
    %c0_33 = arith.constant 0 : index
    %c2 = arith.constant 2 : index
    %c0_34 = arith.constant 0 : index
    %27 = vector.load %arg9[%c0_32, %c0_33, %c2, %c0_34] : memref<2x18x24x32xbf16, #tpu.memory_space<vmem>>, vector<2x16x16x32xbf16>
    %28 = vector.shape_cast %27 : vector<2x16x16x32xbf16> to vector<512x32xbf16>
    %c2_35 = arith.constant 2 : index
    %c0_36 = arith.constant 0 : index
    %c0_37 = arith.constant 0 : index
    %29 = vector.load %arg4[%c2_35, %c0_36, %c0_37] : memref<9x32x32xbf16, #tpu.memory_space<vmem>>, vector<1x32x32xbf16>
    %30 = vector.shape_cast %29 : vector<1x32x32xbf16> to vector<32x32xbf16>
    %cst_38 = arith.constant dense<0.000000e+00> : vector<512x32xf32>
    %31 = tpu.matmul %28, %30, %cst_38 {dimension_numbers = #tpu.dot_dimension_numbers<[1], [0], [0], [1], [0, 0, 1, 1], [], []>} : vector<512x32xbf16>, vector<32x32xbf16>, vector<512x32xf32> -> vector<512x32xf32>
    %32 = arith.addf %26, %31 : vector<512x32xf32>
    %c0_39 = arith.constant 0 : index
    %c1_40 = arith.constant 1 : index
    %c0_41 = arith.constant 0 : index
    %c0_42 = arith.constant 0 : index
    %33 = vector.load %arg9[%c0_39, %c1_40, %c0_41, %c0_42] : memref<2x18x24x32xbf16, #tpu.memory_space<vmem>>, vector<2x16x16x32xbf16>
    %34 = vector.shape_cast %33 : vector<2x16x16x32xbf16> to vector<512x32xbf16>
    %c3 = arith.constant 3 : index
    %c0_43 = arith.constant 0 : index
    %c0_44 = arith.constant 0 : index
    %35 = vector.load %arg4[%c3, %c0_43, %c0_44] : memref<9x32x32xbf16, #tpu.memory_space<vmem>>, vector<1x32x32xbf16>
    %36 = vector.shape_cast %35 : vector<1x32x32xbf16> to vector<32x32xbf16>
    %cst_45 = arith.constant dense<0.000000e+00> : vector<512x32xf32>
    %37 = tpu.matmul %34, %36, %cst_45 {dimension_numbers = #tpu.dot_dimension_numbers<[1], [0], [0], [1], [0, 0, 1, 1], [], []>} : vector<512x32xbf16>, vector<32x32xbf16>, vector<512x32xf32> -> vector<512x32xf32>
    %38 = arith.addf %32, %37 : vector<512x32xf32>
    %c0_46 = arith.constant 0 : index
    %c1_47 = arith.constant 1 : index
    %c1_48 = arith.constant 1 : index
    %c0_49 = arith.constant 0 : index
    %39 = vector.load %arg9[%c0_46, %c1_47, %c1_48, %c0_49] : memref<2x18x24x32xbf16, #tpu.memory_space<vmem>>, vector<2x16x16x32xbf16>
    %40 = vector.shape_cast %39 : vector<2x16x16x32xbf16> to vector<512x32xbf16>
    %c4 = arith.constant 4 : index
    %c0_50 = arith.constant 0 : index
    %c0_51 = arith.constant 0 : index
    %41 = vector.load %arg4[%c4, %c0_50, %c0_51] : memref<9x32x32xbf16, #tpu.memory_space<vmem>>, vector<1x32x32xbf16>
    %42 = vector.shape_cast %41 : vector<1x32x32xbf16> to vector<32x32xbf16>
    %cst_52 = arith.constant dense<0.000000e+00> : vector<512x32xf32>
    %43 = tpu.matmul %40, %42, %cst_52 {dimension_numbers = #tpu.dot_dimension_numbers<[1], [0], [0], [1], [0, 0, 1, 1], [], []>} : vector<512x32xbf16>, vector<32x32xbf16>, vector<512x32xf32> -> vector<512x32xf32>
    %44 = arith.addf %38, %43 : vector<512x32xf32>
    %c0_53 = arith.constant 0 : index
    %c1_54 = arith.constant 1 : index
    %c2_55 = arith.constant 2 : index
    %c0_56 = arith.constant 0 : index
    %45 = vector.load %arg9[%c0_53, %c1_54, %c2_55, %c0_56] : memref<2x18x24x32xbf16, #tpu.memory_space<vmem>>, vector<2x16x16x32xbf16>
    %46 = vector.shape_cast %45 : vector<2x16x16x32xbf16> to vector<512x32xbf16>
    %c5 = arith.constant 5 : index
    %c0_57 = arith.constant 0 : index
    %c0_58 = arith.constant 0 : index
    %47 = vector.load %arg4[%c5, %c0_57, %c0_58] : memref<9x32x32xbf16, #tpu.memory_space<vmem>>, vector<1x32x32xbf16>
    %48 = vector.shape_cast %47 : vector<1x32x32xbf16> to vector<32x32xbf16>
    %cst_59 = arith.constant dense<0.000000e+00> : vector<512x32xf32>
    %49 = tpu.matmul %46, %48, %cst_59 {dimension_numbers = #tpu.dot_dimension_numbers<[1], [0], [0], [1], [0, 0, 1, 1], [], []>} : vector<512x32xbf16>, vector<32x32xbf16>, vector<512x32xf32> -> vector<512x32xf32>
    %50 = arith.addf %44, %49 : vector<512x32xf32>
    %c0_60 = arith.constant 0 : index
    %c2_61 = arith.constant 2 : index
    %c0_62 = arith.constant 0 : index
    %c0_63 = arith.constant 0 : index
    %51 = vector.load %arg9[%c0_60, %c2_61, %c0_62, %c0_63] : memref<2x18x24x32xbf16, #tpu.memory_space<vmem>>, vector<2x16x16x32xbf16>
    %52 = vector.shape_cast %51 : vector<2x16x16x32xbf16> to vector<512x32xbf16>
    %c6 = arith.constant 6 : index
    %c0_64 = arith.constant 0 : index
    %c0_65 = arith.constant 0 : index
    %53 = vector.load %arg4[%c6, %c0_64, %c0_65] : memref<9x32x32xbf16, #tpu.memory_space<vmem>>, vector<1x32x32xbf16>
    %54 = vector.shape_cast %53 : vector<1x32x32xbf16> to vector<32x32xbf16>
    %cst_66 = arith.constant dense<0.000000e+00> : vector<512x32xf32>
    %55 = tpu.matmul %52, %54, %cst_66 {dimension_numbers = #tpu.dot_dimension_numbers<[1], [0], [0], [1], [0, 0, 1, 1], [], []>} : vector<512x32xbf16>, vector<32x32xbf16>, vector<512x32xf32> -> vector<512x32xf32>
    %56 = arith.addf %50, %55 : vector<512x32xf32>
    %c0_67 = arith.constant 0 : index
    %c2_68 = arith.constant 2 : index
    %c1_69 = arith.constant 1 : index
    %c0_70 = arith.constant 0 : index
    %57 = vector.load %arg9[%c0_67, %c2_68, %c1_69, %c0_70] : memref<2x18x24x32xbf16, #tpu.memory_space<vmem>>, vector<2x16x16x32xbf16>
    %58 = vector.shape_cast %57 : vector<2x16x16x32xbf16> to vector<512x32xbf16>
    %c7 = arith.constant 7 : index
    %c0_71 = arith.constant 0 : index
    %c0_72 = arith.constant 0 : index
    %59 = vector.load %arg4[%c7, %c0_71, %c0_72] : memref<9x32x32xbf16, #tpu.memory_space<vmem>>, vector<1x32x32xbf16>
    %60 = vector.shape_cast %59 : vector<1x32x32xbf16> to vector<32x32xbf16>
    %cst_73 = arith.constant dense<0.000000e+00> : vector<512x32xf32>
    %61 = tpu.matmul %58, %60, %cst_73 {dimension_numbers = #tpu.dot_dimension_numbers<[1], [0], [0], [1], [0, 0, 1, 1], [], []>} : vector<512x32xbf16>, vector<32x32xbf16>, vector<512x32xf32> -> vector<512x32xf32>
    %62 = arith.addf %56, %61 : vector<512x32xf32>
    %c0_74 = arith.constant 0 : index
    %c2_75 = arith.constant 2 : index
    %c2_76 = arith.constant 2 : index
    %c0_77 = arith.constant 0 : index
    %63 = vector.load %arg9[%c0_74, %c2_75, %c2_76, %c0_77] : memref<2x18x24x32xbf16, #tpu.memory_space<vmem>>, vector<2x16x16x32xbf16>
    %64 = vector.shape_cast %63 : vector<2x16x16x32xbf16> to vector<512x32xbf16>
    %c8 = arith.constant 8 : index
    %c0_78 = arith.constant 0 : index
    %c0_79 = arith.constant 0 : index
    %65 = vector.load %arg4[%c8, %c0_78, %c0_79] : memref<9x32x32xbf16, #tpu.memory_space<vmem>>, vector<1x32x32xbf16>
    %66 = vector.shape_cast %65 : vector<1x32x32xbf16> to vector<32x32xbf16>
    %cst_80 = arith.constant dense<0.000000e+00> : vector<512x32xf32>
    %67 = tpu.matmul %64, %66, %cst_80 {dimension_numbers = #tpu.dot_dimension_numbers<[1], [0], [0], [1], [0, 0, 1, 1], [], []>} : vector<512x32xbf16>, vector<32x32xbf16>, vector<512x32xf32> -> vector<512x32xf32>
    %68 = arith.addf %62, %67 : vector<512x32xf32>
    %c0_81 = arith.constant 0 : index
    %c0_82 = arith.constant 0 : index
    %69 = vector.load %arg5[%c0_81, %c0_82] : memref<1x32xf32, #tpu.memory_space<vmem>>, vector<1x32xf32>
    %70 = vector.broadcast %69 : vector<1x32xf32> to vector<512x32xf32>
    %71 = arith.addf %68, %70 : vector<512x32xf32>
    %cst_83 = arith.constant 0.000000e+00 : f32
    %72 = vector.broadcast %cst_83 : f32 to vector<512x32xf32>
    %73 = arith.maximumf %71, %72 : vector<512x32xf32>
    %74 = arith.truncf %73 : vector<512x32xf32> to vector<512x32xbf16>
    %c0_84 = arith.constant 0 : index
    %c0_85 = arith.constant 0 : index
    %75 = vector.load %arg6[%c0_84, %c0_85] : memref<32x128xbf16, #tpu.memory_space<vmem>>, vector<32x128xbf16>
    %cst_86 = arith.constant dense<0.000000e+00> : vector<512x128xf32>
    %76 = tpu.matmul %74, %75, %cst_86 {dimension_numbers = #tpu.dot_dimension_numbers<[1], [0], [0], [1], [0, 0, 1, 1], [], []>} : vector<512x32xbf16>, vector<32x128xbf16>, vector<512x128xf32> -> vector<512x128xf32>
    %c0_87 = arith.constant 0 : index
    %c0_88 = arith.constant 0 : index
    %77 = vector.load %arg7[%c0_87, %c0_88] : memref<1x128xf32, #tpu.memory_space<vmem>>, vector<1x128xf32>
    %78 = vector.broadcast %77 : vector<1x128xf32> to vector<512x128xf32>
    %79 = arith.addf %76, %78 : vector<512x128xf32>
    %80 = arith.extf %1 : vector<512x128xbf16> to vector<512x128xf32>
    %81 = arith.addf %79, %80 : vector<512x128xf32>
    %cst_89 = arith.constant 0.000000e+00 : f32
    %82 = vector.broadcast %cst_89 : f32 to vector<512x128xf32>
    %83 = arith.maximumf %81, %82 : vector<512x128xf32>
    %84 = vector.shape_cast %83 : vector<512x128xf32> to vector<2x256x128xf32>
    %85 = arith.truncf %84 : vector<2x256x128xf32> to vector<2x256x128xbf16>
    %c0_90 = arith.constant 0 : index
    %c0_91 = arith.constant 0 : index
    %c0_92 = arith.constant 0 : index
    %86 = vector.load %arg8[%c0_90, %c0_91, %c0_92] : memref<2x256x128xbf16, #tpu.memory_space<vmem>>, vector<2x256x128xbf16>
    tpu.vector_store %arg8[%c0_90, %c0_91, %c0_92], %85 {strides = array<i32>} : memref<2x256x128xbf16, #tpu.memory_space<vmem>>, vector<2x256x128xbf16>,
    return
  }
  func.func @transform_0(%arg0: i32) -> (i32, i32, i32) {
    %c0_i32 = arith.constant 0 : i32
    %c0_i32_0 = arith.constant 0 : i32
    %c0_i32_1 = arith.constant 0 : i32
    return %arg0, %c0_i32, %c0_i32_0 : i32, i32, i32
  }
  func.func @transform_1(%arg0: i32) -> (i32, i32) {
    %c0_i32 = arith.constant 0 : i32
    %c0_i32_0 = arith.constant 0 : i32
    %c0_i32_1 = arith.constant 0 : i32
    return %c0_i32, %c0_i32_0 : i32, i32
  }
  func.func @transform_2(%arg0: i32) -> (i32, i32) {
    %c0_i32 = arith.constant 0 : i32
    %c0_i32_0 = arith.constant 0 : i32
    %c0_i32_1 = arith.constant 0 : i32
    return %c0_i32, %c0_i32_0 : i32, i32
  }
  func.func @transform_3(%arg0: i32) -> (i32, i32, i32) {
    %c0_i32 = arith.constant 0 : i32
    %c0_i32_0 = arith.constant 0 : i32
    %c0_i32_1 = arith.constant 0 : i32
    %c0_i32_2 = arith.constant 0 : i32
    return %c0_i32, %c0_i32_0, %c0_i32_1 : i32, i32, i32
  }
  func.func @transform_4(%arg0: i32) -> (i32, i32) {
    %c0_i32 = arith.constant 0 : i32
    %c0_i32_0 = arith.constant 0 : i32
    %c0_i32_1 = arith.constant 0 : i32
    return %c0_i32, %c0_i32_0 : i32, i32
  }
  func.func @transform_5(%arg0: i32) -> (i32, i32) {
    %c0_i32 = arith.constant 0 : i32
    %c0_i32_0 = arith.constant 0 : i32
    %c0_i32_1 = arith.constant 0 : i32
    return %c0_i32, %c0_i32_0 : i32, i32
  }
  func.func @transform_6(%arg0: i32) -> (i32, i32) {
    %c0_i32 = arith.constant 0 : i32
    %c0_i32_0 = arith.constant 0 : i32
    %c0_i32_1 = arith.constant 0 : i32
    return %c0_i32, %c0_i32_0 : i32, i32
  }
  func.func @transform_7(%arg0: i32) -> (i32, i32, i32) {
    %c0_i32 = arith.constant 0 : i32
    %c0_i32_0 = arith.constant 0 : i32
    %c0_i32_1 = arith.constant 0 : i32
    return %arg0, %c0_i32, %c0_i32_0 : i32, i32, i32
  }
}

</mosaic_0001>

<bundles_post_ra>
// kernel: bottleneck_forward.1
= control target key start
LH: loop header
LB: loop body
LE: loop exit
PB: predicated region body
PF: predicated region fallthrough
CT: control target
= control target key end

     0   :  { %12 = vsyncpa [#allocation4], 0  ;;  %s18610_s0 = inlined_call_operand.hbm [shape: bf16[8,256,128], index: 0, kind: input, shape index: {}]   ;;  %s18611_s1 = inlined_call_operand.vmem [shape: bf16[128,32], index: 1, kind: input, shape index: {}]   ;;  %s18612_s2 = inlined_call_operand.vmem [shape: f32[1,32], index: 2, kind: input, shape index: {}]   ;;  %s18613_s3 = inlined_call_operand.hbm [shape: bf16[9,32,32], index: 3, kind: input, shape index: {}]   ;;  %s18614_s4 = inlined_call_operand.vmem [shape: f32[1,32], index: 4, kind: input, shape index: {}]   ;;  %s18615_s5 = inlined_call_operand.vmem [shape: bf16[32,128], index: 5, kind: input, shape index: {}]   ;;  %s18616_s6 = inlined_call_operand.vmem [shape: f32[1,128], index: 6, kind: input, shape index: {}]   ;;  %s18617_s7 = inlined_call_operand.hbm [shape: bf16[8,256,128], index: 7, kind: output, shape index: {}]  }
   0x1   :  { %14 = vsyncpa [#allocation4 + $0x1], 0 }
   0x2   :  { %15 = vsyncpa [#allocation7], 0 }
   0x3   :  { %16 = vsyncpa [#allocation5], 0 }
   0x4   :  { %18 = vsyncpa [#allocation5 + $0x1], 0  ;;  %s15796_s24 = smov 0   ;;  %s15798_s25 = smov 0  }
   0x5   :  { %s15800_s26 = smov 0   ;;  %s15802_s27 = smov 0  }
   0x6 LB: > { %s15817_s28 = sadd.s32 4294967295, %s15746_s27   ;;  %s12228_s29 = sadd.s32 4294967294, %s15746_s27   ;;  %s15746_s27 = sphi %s15802_s27, %s18752_s27   ;;  %s15742_s26 = sphi %s15800_s26, %s18751_s26   ;;  %s15738_s25 = sphi %s15798_s25, %s18750_s25   ;;  %s15734_s24 = sphi %s15796_s24, %s18749_s24  }
   0x7   : > { %p44_p0 = scmp.ne.s32.totalorder %s15738_s25, %s15734_s24  ;;  %p18618_p1 = scmp.eq.s32.totalorder %s15817_s28, 0 }
   0x8   : > { %p200_p3 = scmp.eq.s32.totalorder %s12228_s29, 3  ;;  %p12229_p5 = scmp.ge.s32.totalorder %s15746_s27, 1 }
   0x9   : > { %p15826_p4 = por %p18618_p1, %p44_p0  ;;  %p207_p7 = scmp.lt.s32.totalorder %s15746_s27, 5 }
   0xa   : > { %p15831_p6 = por %p200_p3, %p44_p0  ;;  %s15748_s10 = smov [#allocation6]  }
   0xb   : > { %s18622_s30 = scalar_select %p15826_p4, 1, 0 }
   0xc   : > { %s18623_s8 = scalar_select %p15831_p6, 1, 0 }
   0xd   : > { %p15836_p8 = pnand %p12229_p5, %p207_p7  ;;  %s225_s11 = sshll.u32 %s15748_s10, 4  ;;  %s226_s11 = int_to_ptr.vmem [resolvable:$true] %s225_s11 }
   0xe   : > { %s15849_s13 = sadd.s32 1, %s15746_s27   ;;  %s31_s14 = sadd.s32 1, %s15742_s26 }
   0xf   : > { %s18624_s9 = scalar_select %p15836_p8, 1, 0 }
  0x10   : > { %p15128_p9 = pneg %p15836_p8  ;;  %s28_s15 = ssub.s32 %s15746_s27, %s15849_s13 }
  0x11   : > { %s15618_s18 = scalar_lea.hbm %s18613_s3, 2304 }
  0x12   : > { %p15844_p10 = pnand %p15128_p9, %p18618_p1  ;;  %p15619_p11 = scmp.ne.s32.totalorder %s18613_s3, %s15618_s18 }
  0x13   : > { %p15625_p3 = scmp.lt.u32.totalorder %s15618_s18, %s18613_s3 }
  0x14   : > { %p15620_p12 = pneg %p15844_p10 }
  0x16   : > { %p15621_p13 = pnand %p15620_p12, %p15619_p11 }
  0x18   : > { %p15622_p0 = pneg %p15621_p13 }
  0x1a   : > { %p15627_p5 = pnand %p15625_p3, %p15622_p0 }
  0x1c   : > { %15630 = shalt.err (!%p15627_p5)
}
  0x1d   : > { %s15631_s23 = scalar_lea.vmem %s226_s11, 2304  ;;  %p15639_p2 = scmp.lt.s32.totalorder %s226_s11, %s226_s11 }
  0x1e   : > { %p15632_p7 = scmp.ne.s32.totalorder %s226_s11, %s15631_s23  ;;  %p15640_p6 = scmp.lt.s32.totalorder %s15631_s23, %s15631_s23 }
  0x20   : > { %p15634_p9 = pnand %p15632_p7, %p15620_p12  ;;  %p15641_p4 = por %p15640_p6, %p15639_p2 }
  0x22   : > { %p15635_p1 = pneg %p15634_p9 }
  0x24   : > { %p15642_p8 = pnand %p15641_p4, %p15635_p1 }
  0x26   : > { %15645 = shalt.err (!%p15642_p8)
}
  0x27   : > { %s18621_s29 = smov 64   ;;  %s15750_s10 = smov 4  }
  0x28   : > { %15131 = dma.hbm_to_vmem [thread:$0]  (!%p15844_p10), %s18613_s3, 2304, %s226_s11, [#allocation7], %s18621_s29, %s18621_s29, %s15750_s10  }
  0x29   : > { %p29_p1 = scmp.eq.s32.totalorder %s28_s15, 0  ;;  %p38_p2 = scmp.ne.s32.totalorder %s15742_s26, %s15738_s25 }
  0x2a   : > { %p39_p4 = scmp.eq.s32.totalorder %s15746_s27, 0  ;;  %p15141_p6 = scmp.lt.s32.totalorder %s15746_s27, 4 }
  0x2b   : > { %s15878_s18 = scalar_select %p29_p1, %s15742_s26, %s31_s14  }
  0x2c   : > { %p40_p8 = por %p39_p4, %p38_p2  ;;  %p18626_p11 = scmp.eq.s32.totalorder %s15817_s28, 3 }
  0x2d   : > { %s248_s12 = sand.u32 1, %s15742_s26   ;;  %s13142_s20 = sshll.u32 %s15746_s27, 12 }
  0x2e   : > { %p15882_p12 = por %p18626_p11, %p38_p2  ;;  %s12232_s21 = sshll.u32 %s248_s12, 8 }
  0x2f   : > { %s15891_s16 = scalar_lea.hbm %s18610_s0, %s13142_s20  ;;  %s252_s11 = scalar_lea.vmem [#allocation3], %s12232_s21 }
  0x30   : > { %s260_s14 = sshll.u32 %s252_s11, 4  ;;  %p15893_p10 = pnand %p15141_p6, %p40_p8  ;;  %s15897_s14 = int_to_ptr.vmem [resolvable:$true] %s260_s14 }
  0x31   : > { %s15899_s17 = scalar_lea.sflag [#allocation4], %s248_s12  ;;  %s15646_s29 = scalar_lea.hbm %s15891_s16, 4096 }
  0x32   : > { %p15647_p13 = scmp.ne.s32.totalorder %s15891_s16, %s15646_s29  ;;  %p15648_p0 = pneg %p15893_p10 }
  0x33   : > { %s15651_s22 = scalar_lea.hbm %s18610_s0, 16384  ;;  %p15652_p7 = scmp.lt.u32.totalorder %s15891_s16, %s18610_s0 }
  0x34   : > { %p15649_p3 = pnand %p15648_p0, %p15647_p13  ;;  %p15653_p9 = scmp.lt.u32.totalorder %s15651_s22, %s15646_s29 }
  0x35   : > { %p15655_p2 = scmp.lt.u32.totalorder %s15646_s29, %s15891_s16 }
  0x36   : > { %p15650_p5 = pneg %p15649_p3  ;;  %p15654_p1 = por %p15653_p9, %p15652_p7 }
  0x38   : > { %p15656_p4 = por %p15655_p2, %p15654_p1 }
  0x3a   : > { %p15657_p6 = pnand %p15656_p4, %p15650_p5 }
  0x3c   : > { %15660 = shalt.err (!%p15657_p6)
}
  0x3d   : > { %s15661_s12 = scalar_lea.vmem %s15897_s14, 4096  ;;  %s15751_s20 = smov [#allocation3]  }
  0x3e   : > { %p15662_p8 = scmp.ne.s32.totalorder %s15897_s14, %s15661_s12  ;;  %s15666_s21 = sshll.u32 %s15751_s20, 4  ;;  %s15667_s21 = int_to_ptr.vmem [resolvable:$false] %s15666_s21 }
  0x3f   : > { %s15668_s23 = scalar_lea.vmem %s15667_s21, 8192  ;;  %p15669_p3 = scmp.lt.s32.totalorder %s15897_s14, %s15667_s21 }
  0x40   : > { %p15664_p11 = pnand %p15662_p8, %p15648_p0  ;;  %p15670_p7 = scmp.lt.s32.totalorder %s15668_s23, %s15661_s12 }
  0x42   : > { %p15665_p13 = pneg %p15664_p11  ;;  %p15671_p9 = por %p15670_p7, %p15669_p3 }
  0x44   : > { %p15672_p1 = pnand %p15671_p9, %p15665_p13 }
  0x46   : > { %15675 = shalt.err (!%p15672_p1)
}
  0x47   : > { %s18629_s29 = smov 64   ;;  %p18630_p0 = scmp.ne.s32.totalorder %s18624_s9, 0 }
  0x48   : > { %15135 = dma.hbm_to_vmem [thread:$0]  (!%p15893_p10), %s15891_s16, 4096, %s15897_s14, %s15899_s17, %s18629_s29, %s18629_s29, %s15750_s10  }
  0x49   : > { %272 = sbr.rel (%p18630_p0) target bundleno = 1745 (0x6d1), region = 48 }
  0x50   : > { %s15933_s22 = sand.u32 1, %s15738_s25   ;;  %p18631_p5 = scmp.ne.s32.totalorder %s18622_s30, 0 }
  0x51   : > { %s12237_s11 = sshll.u32 %s15933_s22, 8  ;;  %s275_s12 = scalar_lea.sflag [#allocation4], %s15933_s22 }
  0x52   : > { %s15939_s15 = scalar_lea.vmem [#allocation3], %s12237_s11 }
  0x53   : > { %15721 = dma.done.wait (%p18631_p5), %s275_s12, 4096  }
  0x54   : > { %15723 = vsyncadd (%p18631_p5), %s275_s12, 4294963200  ;;  %p18632_p10 = scmp.eq.s32.totalorder %s15817_s28, 0 }
  0x56   : > { %15725 = dma.done.wait (%p18632_p10), [#allocation7], 2304   ;;  %p18633_p2 = pmov %p18632_p10 }
  0x57   : > { %v15182_v0 = vld [vmem:[%s18611_s1] sm:$0xff]   ;;  %v15183_v1 = vld [vmem:[%s18611_s1 + $0x8] sm:$0xff]   ;;  %v15184_v2 = vld [vmem:[%s18611_s1 + $0x10] sm:$0xff]   ;;  %vm1028_vm0 = vcmask 257024   ;;  %v15752_v33 = vmov 0   ;;  %vm3154_vm4 = vcmask 261120  }
  0x58   : > { %15727 = vsyncadd (%p18633_p2), [#allocation7], 4294964992  ;;  %13844 = vmatprep.subr.bf16.mxu0 %v15182_v0  ;;  %v15185_v3 = vld [vmem:[%s18611_s1 + $0x18] sm:$0xff]   ;;  %v316_v4 = vld [vmem:[%s15939_s15] sm:$0xff]   ;;  %1035 = vst.msk [vmem:[#allocation2 + $0x18] sm:$0xf] %vm1028_vm0, %v15752_v33 }
  0x59   : > { %13845 = vmatpush3.bf16.msra.mxu0 %v15182_v0  ;;  %13860 = vmatprep.mubr.bf16.mxu0 %v316_v4  ;;  %v15186_v5 = vld [vmem:[%s18611_s1 + $0x20] sm:$0xff]   ;;  %v15187_v6 = vld [vmem:[%s18611_s1 + $0x28] sm:$0xff]   ;;  %v15188_v7 = vld [vmem:[%s18611_s1 + $0x30] sm:$0xff]   ;;  %1029 = vst.msk [vmem:[#allocation2] sm:$0xf] %vm1028_vm0, %v15752_v33  ;;  %vm1948_vm8 = vcmask 253952  }
  0x5a   : > { %13846 = vmatprep.subr.bf16.mxu0 %v15183_v1  ;;  %v15189_v8 = vld [vmem:[%s18611_s1 + $0x38] sm:$0xff]   ;;  %v320_v10 = vld [vmem:[%s15939_s15 + $0x10] sm:$0xff]   ;;  %v322_v11 = vld [vmem:[%s15939_s15 + $0x18] sm:$0xff]   ;;  %1030 = vst.msk [vmem:[#allocation2 + $0x4] sm:$0xf] %vm1028_vm0, %v15752_v33  ;;  %vm4193_vm12 = vcmask 1042432  }
  0x5b   : > { %v318_v9 = vld [vmem:[%s15939_s15 + $0x8] sm:$0xff]   ;;  %v324_v12 = vld [vmem:[%s15939_s15 + $0x20] sm:$0xff]   ;;  %v328_v14 = vld [vmem:[%s15939_s15 + $0x30] sm:$0xff]   ;;  %1031 = vst.msk [vmem:[#allocation2 + $0x8] sm:$0xf] %vm1028_vm0, %v15752_v33  ;;  %vm4194_vm13 = vcmask 1046532  }
  0x5c   : > { %v326_v13 = vld [vmem:[%s15939_s15 + $0x28] sm:$0xff]   ;;  %v330_v15 = vld [vmem:[%s15939_s15 + $0x38] sm:$0xff]   ;;  %v332_v16 = vld [vmem:[%s15939_s15 + $0x40] sm:$0xff]   ;;  %1032 = vst.msk [vmem:[#allocation2 + $0xc] sm:$0xf] %vm1028_vm0, %v15752_v33  ;;  %s18440_s23 = scalar_lea.vmem [#allocation8], %s12237_s11 }
  0x5d   : > { %13847 = vmatpush3.bf16.msra.mxu0 %v15183_v1  ;;  %v334_v17 = vld [vmem:[%s15939_s15 + $0x48] sm:$0xff]   ;;  %v336_v18 = vld [vmem:[%s15939_s15 + $0x50] sm:$0xff]   ;;  %v338_v19 = vld [vmem:[%s15939_s15 + $0x58] sm:$0xff]   ;;  %1033 = vst.msk [vmem:[#allocation2 + $0x10] sm:$0xf] %vm1028_vm0, %v15752_v33  ;;  %s13272_s11 = sshll.u32 %s15817_s28, 12 }
  0x5e   : > { %13848 = vmatprep.subr.bf16.mxu0 %v15184_v2  ;;  %v340_v20 = vld [vmem:[%s15939_s15 + $0x60] sm:$0xff]   ;;  %v342_v21 = vld [vmem:[%s15939_s15 + $0x68] sm:$0xff]   ;;  %v344_v22 = vld [vmem:[%s15939_s15 + $0x70] sm:$0xff]   ;;  %1034 = vst.msk [vmem:[#allocation2 + $0x14] sm:$0xf] %vm1028_vm0, %v15752_v33  ;;  %s18563_s9 = scalar_lea.hbm %s18617_s7, %s13272_s11  ;;  %s12131_s28 = scalar_lea.sflag [#allocation5], %s15933_s22 }
  0x5f   : > { %v346_v23 = vld [vmem:[%s15939_s15 + $0x78] sm:$0xff]   ;;  %v348_v24 = vld [vmem:[%s15939_s15 + $0x80] sm:$0xff]   ;;  %v350_v25 = vld [vmem:[%s15939_s15 + $0x88] sm:$0xff]   ;;  %1036 = vst.msk [vmem:[#allocation2 + $0x1c] sm:$0xf] %vm1028_vm0, %v15752_v33  ;;  %s15753_s16 = smov [#allocation8]  }
  0x60   : > { %v352_v26 = vld [vmem:[%s15939_s15 + $0x90] sm:$0xff]   ;;  %v354_v27 = vld [vmem:[%s15939_s15 + $0x98] sm:$0xff]   ;;  %v356_v28 = vld [vmem:[%s15939_s15 + $0xa0] sm:$0xff]   ;;  %1037 = vst.msk [vmem:[#allocation2 + $0x20] sm:$0xf] %vm1028_vm0, %v15752_v33  ;;  %s15680_s14 = sshll.u32 %s15753_s16, 4  ;;  %s15681_s14 = int_to_ptr.vmem [resolvable:$false] %s15680_s14 }
  0x61   : > { %13849 = vmatpush3.bf16.msra.mxu0 %v15184_v2  ;;  %v358_v29 = vld [vmem:[%s15939_s15 + $0xa8] sm:$0xff]   ;;  %v360_v30 = vld [vmem:[%s15939_s15 + $0xb0] sm:$0xff]   ;;  %v15997_v31 = vld [vmem:[%s15939_s15 + $0xb8] sm:$0xff]   ;;  %1038 = vst.msk [vmem:[#allocation2 + $0x24] sm:$0xf] %vm1028_vm0, %v15752_v33  ;;  %s15682_s30 = scalar_lea.vmem %s15681_s14, 8192 }
  0x62   : > { %13850 = vmatprep.subr.bf16.mxu0 %v15185_v3  ;;  %v16000_v32 = vld [vmem:[%s15939_s15 + $0xc0] sm:$0xff]   ;;  %1039 = vst.msk [vmem:[#allocation2 + $0x28] sm:$0xf] %vm1028_vm0, %v15752_v33  ;;  %1040 = vst.msk [vmem:[#allocation2 + $0x2c] sm:$0xf] %vm1028_vm0, %v15752_v33  ;;  %v366_v34 = vld [vmem:[%s15939_s15 + $0xc8] sm:$0xff]  }
  0x63   : > { %1041 = vst.msk [vmem:[#allocation2 + $0x30] sm:$0xf] %vm1028_vm0, %v15752_v33  ;;  %1042 = vst.msk [vmem:[#allocation2 + $0x34] sm:$0xf] %vm1028_vm0, %v15752_v33  ;;  %v368_v35 = vld [vmem:[%s15939_s15 + $0xd0] sm:$0xff]   ;;  %v370_v36 = vld [vmem:[%s15939_s15 + $0xd8] sm:$0xff]  }
  0x64   : > { %1043 = vst.msk [vmem:[#allocation2 + $0x38] sm:$0xf] %vm1028_vm0, %v15752_v33  ;;  %1044 = vst.msk [vmem:[#allocation2 + $0x3c] sm:$0xf] %vm1028_vm0, %v15752_v33  ;;  %v372_v37 = vld [vmem:[%s15939_s15 + $0xe0] sm:$0xff]   ;;  %v374_v38 = vld [vmem:[%s15939_s15 + $0xe8] sm:$0xff]  }
  0x65   : > { %13851 = vmatpush3.bf16.msra.mxu0 %v15185_v3  ;;  %1045 = vst.msk [vmem:[#allocation2 + $0x40] sm:$0xf] %vm1028_vm0, %v15752_v33  ;;  %1046 = vst.msk [vmem:[#allocation2 + $0x44] sm:$0xf] %vm1028_vm0, %v15752_v33  ;;  %v376_v39 = vld [vmem:[%s15939_s15 + $0xf0] sm:$0xff]   ;;  %v378_v40 = vld [vmem:[%s15939_s15 + $0xf8] sm:$0xff]  }
  0x66   : > { %13852 = vmatprep.subr.bf16.mxu0 %v15186_v5  ;;  %1047 = vst.msk [vmem:[#allocation2 + $0x48] sm:$0xf] %vm1028_vm0, %v15752_v33  ;;  %1048 = vst.msk [vmem:[#allocation2 + $0x4c] sm:$0xf] %vm1028_vm0, %v15752_v33  ;;  %v15222_v41 = vld [vmem:[#allocation6 + $0x10] sm:$0xff]   ;;  %v15223_v48 = vld [vmem:[#allocation6 + $0x18] sm:$0xff]  }
  0x67   : > { %1049 = vst.msk [vmem:[#allocation2 + $0x50] sm:$0xf] %vm1028_vm0, %v15752_v33  ;;  %1050 = vst.msk [vmem:[#allocation2 + $0x54] sm:$0xf] %vm1028_vm0, %v15752_v33  ;;  %v2170_v42 = vld [vmem:[#allocation2] sm:$0xf] }
  0x68   : > { %1051 = vst.msk [vmem:[#allocation2 + $0x58] sm:$0xf] %vm1028_vm0, %v15752_v33  ;;  %1052 = vst.msk [vmem:[#allocation2 + $0x5c] sm:$0xf] %vm1028_vm0, %v15752_v33  ;;  %v2171_v43 = vld [vmem:[#allocation2 + $0x4] sm:$0xf] }
  0x69   : > { %13853 = vmatpush3.bf16.msra.mxu0 %v15186_v5  ;;  %1053 = vst.msk [vmem:[#allocation2 + $0x60] sm:$0xf] %vm1028_vm0, %v15752_v33  ;;  %1054 = vst.msk [vmem:[#allocation2 + $0x64] sm:$0xf] %vm1028_vm0, %v15752_v33  ;;  %v2274_v44 = vshrl.u32 %v2170_v42, 16  ;;  %v2277_v45 = vshll.u32 %v2170_v42, 16 }
  0x6a   : > { %13854 = vmatprep.subr.bf16.mxu0 %v15187_v6  ;;  %1055 = vst.msk [vmem:[#allocation2 + $0x68] sm:$0xf] %vm1028_vm0, %v15752_v33  ;;  %1056 = vst.msk [vmem:[#allocation2 + $0x6c] sm:$0xf] %vm1028_vm0, %v15752_v33  ;;  %v2283_v46 = vshll.u32 %v2171_v43, 16  ;;  %v2287_v47 = vshrl.u32 %v2171_v43, 16 }
  0x6b   : > { %1057 = vst.msk [vmem:[#allocation2 + $0x70] sm:$0xf] %vm1028_vm0, %v15752_v33  ;;  %1058 = vst.msk [vmem:[#allocation2 + $0x74] sm:$0xf] %vm1028_vm0, %v15752_v33  ;;  %v2276_v49 = vrot.slane %v2274_v44, 4  ;;  %v2279_v50 = vrot.slane %v2277_v45, 5 }
  0x6c   : > { %1059 = vst.msk [vmem:[#allocation2 + $0x78] sm:$0xf] %vm1028_vm0, %v15752_v33  ;;  %1060 = vst.msk [vmem:[#allocation2 + $0x7c] sm:$0xf] %vm1028_vm0, %v15752_v33  ;;  %v2285_v51 = vrot.slane %v2283_v46, 5  ;;  %v2289_v53 = vrot.slane %v2287_v47, 4 }
  0x6d   : > { %13855 = vmatpush3.bf16.msra.mxu0 %v15187_v6  ;;  %1061 = vst.msk [vmem:[#allocation2 + $0x80] sm:$0xf] %vm1028_vm0, %v15752_v33  ;;  %1062 = vst.msk [vmem:[#allocation2 + $0x84] sm:$0xf] %vm1028_vm0, %v15752_v33  ;;  %v2238_v52 = vld [vmem:[#allocation2 + $0x8] sm:$0x1]  ;;  %v2280_v54 = vor.u32 %v2279_v50, %v2276_v49 }
  0x6e   : > { %13856 = vmatprep.subr.bf16.mxu0 %v15188_v7  ;;  %1063 = vst.msk [vmem:[#allocation2 + $0x88] sm:$0xf] %vm1028_vm0, %v15752_v33  ;;  %1064 = vst.msk [vmem:[#allocation2 + $0x8c] sm:$0xf] %vm1028_vm0, %v15752_v33  ;;  %vm2270_vm1 = vsmask.f32 3328  ;;  %v2290_v55 = vor.u32 %v2289_v53, %v2285_v51 }
  0x6f   : > { %1065 = vst.msk [vmem:[#allocation2 + $0x90] sm:$0xf] %vm1028_vm0, %v15752_v33  ;;  %1066 = vst.msk [vmem:[#allocation2 + $0x94] sm:$0xf] %vm1028_vm0, %v15752_v33  ;;  %vm2271_vm2 = vsmask.f32 7440 }
  0x70   : > { %1067 = vst.msk [vmem:[#allocation2 + $0x98] sm:$0xf] %vm1028_vm0, %v15752_v33  ;;  %1068 = vst.msk [vmem:[#allocation2 + $0x9c] sm:$0xf] %vm1028_vm0, %v15752_v33  ;;  %v2293_v56 = vshll.u32 %v2238_v52, 16  ;;  %v2281_v57 = vrot.slane %v2280_v54, 4 }
  0x71   : > { %13857 = vmatpush3.bf16.msra.mxu0 %v15188_v7  ;;  %1069 = vst.msk [vmem:[#allocation2 + $0xa0] sm:$0xf] %vm1028_vm0, %v15752_v33  ;;  %1070 = vst.msk [vmem:[#allocation2 + $0xa4] sm:$0xf] %vm1028_vm0, %v15752_v33  ;;  %v2291_v59 = vrot.slane %v2290_v55, 4  ;;  %v15224_v2 = vld [vmem:[#allocation6 + $0x30] sm:$0xff]  }
  0x72   : > { %13858 = vmatprep.subr.bf16.mxu0 %v15189_v8  ;;  %1071 = vst.msk [vmem:[#allocation2 + $0xa8] sm:$0xf] %vm1028_vm0, %v15752_v33  ;;  %1072 = vst.msk [vmem:[#allocation2 + $0xac] sm:$0xf] %vm1028_vm0, %v15752_v33  ;;  %v2295_v60 = vrot.slane %v2293_v56, 5  ;;  %14604 = vmatprep.subr.bf16.mxu1 %v15224_v2 }
  0x73   : > { %1073 = vst.msk [vmem:[#allocation2 + $0xb0] sm:$0xf] %vm1028_vm0, %v15752_v33  ;;  %1074 = vst.msk [vmem:[#allocation2 + $0xb4] sm:$0xf] %vm1028_vm0, %v15752_v33  ;;  %v16239_v0 = vld [vmem:[%s18612_s2] ss:$0 sm:$0xff]  ;;  %14606 = vmatpush3.bf16.msra.mxu1 %v15224_v2 }
  0x74   : > { %1075 = vst.msk [vmem:[#allocation2 + $0xb8] sm:$0xf] %vm1028_vm0, %v15752_v33  ;;  %1076 = vst.msk [vmem:[#allocation2 + $0xbc] sm:$0xf] %vm1028_vm0, %v15752_v33  ;;  %vm1942_vm5 = vsmask.f32 7938 }
  0x75   : > { %13859 = vmatpush3.bf16.msra.mxu0 %v15189_v8  ;;  %1077 = vst.msk [vmem:[#allocation2 + $0xc0] sm:$0xf] %vm1028_vm0, %v15752_v33  ;;  %1078 = vst.msk [vmem:[#allocation2 + $0xc4] sm:$0xf] %vm1028_vm0, %v15752_v33  ;;  %vm1297_vm6 = vsmask.f32 256 }
  0x76   : > { %1079 = vst.msk [vmem:[#allocation2 + $0xc8] sm:$0xf] %vm1028_vm0, %v15752_v33  ;;  %1080 = vst.msk [vmem:[#allocation2 + $0xcc] sm:$0xf] %vm1028_vm0, %v15752_v33  ;;  %13924 = vmatprep.subr.bf16.mxu0 %v15222_v41  ;;  %vm1298_vm7 = vsmask.f32 4368 }
  0x77   : > { %1081 = vst.msk [vmem:[#allocation2 + $0xd0] sm:$0xf] %vm1028_vm0, %v15752_v33  ;;  %1082 = vst.msk [vmem:[#allocation2 + $0xd4] sm:$0xf] %vm1028_vm0, %v15752_v33  ;;  %v1957_v45 = vld [vmem:[#allocation2 + $0x20] sm:$0x1] }
  0x78   : > { %13861 = vmatmul.mubr.bf16.vlgmr.msra.gmra.mrb[0].mxu0 %v318_v9  ;;  %1083 = vst.msk [vmem:[#allocation2 + $0xd8] sm:$0xf] %vm1028_vm0, %v15752_v33  ;;  %1084 = vst.msk [vmem:[#allocation2 + $0xdc] sm:$0xf] %vm1028_vm0, %v15752_v33  ;;  %v1950_v52 = vld [vmem:[#allocation2 + $0x14] sm:$0x1] }
  0x79   : > { %13864 = vmatprep.mubr.bf16.mxu0 %v320_v10  ;;  %1085 = vst.msk [vmem:[#allocation2 + $0xe0] sm:$0xf] %vm1028_vm0, %v15752_v33  ;;  %1086 = vst.msk [vmem:[#allocation2 + $0xe4] sm:$0xf] %vm1028_vm0, %v15752_v33  ;;  %13925 = vmatpush3.bf16.msra.mxu0 %v15222_v41 }
  0x7a   : > { %1087 = vst.msk [vmem:[#allocation2 + $0xe8] sm:$0xf] %vm1028_vm0, %v15752_v33  ;;  %1088 = vst.msk [vmem:[#allocation2 + $0xec] sm:$0xf] %vm1028_vm0, %v15752_v33  ;;  %13926 = vmatprep.subr.bf16.mxu0 %v15223_v48 }
  0x7b   : > { %1089 = vst.msk [vmem:[#allocation2 + $0xf0] sm:$0xf] %vm1028_vm0, %v15752_v33  ;;  %1090 = vst.msk [vmem:[#allocation2 + $0xf4] sm:$0xf] %vm1028_vm0, %v15752_v33 }
  0x7c   : > { %1091 = vst.msk [vmem:[#allocation2 + $0xf8] sm:$0xf] %vm1028_vm0, %v15752_v33  ;;  %1092 = vst.msk [vmem:[#allocation2 + $0xfc] sm:$0xf] %vm1028_vm0, %v15752_v33 }
  0x7d   : > { %1093 = vst.msk [vmem:[#allocation2 + $0x100] sm:$0xf] %vm1028_vm0, %v15752_v33  ;;  %1094 = vst.msk [vmem:[#allocation2 + $0x104] sm:$0xf] %vm1028_vm0, %v15752_v33  ;;  %13927 = vmatpush3.bf16.msra.mxu0 %v15223_v48  ;;  %v15225_v48 = vld [vmem:[#allocation6 + $0x38] sm:$0xff]  }
  0x7e   : > { %1095 = vst.msk [vmem:[#allocation2 + $0x108] sm:$0xf] %vm1028_vm0, %v15752_v33  ;;  %1096 = vst.msk [vmem:[#allocation2 + $0x10c] sm:$0xf] %vm1028_vm0, %v15752_v33  ;;  %14605 = vmatprep.subr.bf16.mxu1 %v15225_v48 }
  0x7f   : > { %1097 = vst.msk [vmem:[#allocation2 + $0x110] sm:$0xf] %vm1028_vm0, %v15752_v33  ;;  %1098 = vst.msk [vmem:[#allocation2 + $0x114] sm:$0xf] %vm1028_vm0, %v15752_v33  ;;  %14607 = vmatpush3.bf16.msra.mxu1 %v15225_v48 }
  0x80   : > { %13865 = vmatmul.mubr.bf16.gmra.mrb[4].mxu0 %v322_v11  ;;  %1099 = vst.msk [vmem:[#allocation2 + $0x118] sm:$0xf] %vm1028_vm0, %v15752_v33  ;;  %1100 = vst.msk [vmem:[#allocation2 + $0x11c] sm:$0xf] %vm1028_vm0, %v15752_v33 }
  0x81   : > { %13868 = vmatprep.mubr.bf16.mxu0 %v324_v12  ;;  %1101 = vst.msk [vmem:[#allocation2 + $0x120] sm:$0xf] %vm1028_vm0, %v15752_v33  ;;  %1102 = vst.msk [vmem:[#allocation2 + $0x124] sm:$0xf] %vm1028_vm0, %v15752_v33 }
  0x82   : > { %1103 = vst.msk [vmem:[#allocation2 + $0x128] sm:$0xf] %vm1028_vm0, %v15752_v33  ;;  %1104 = vst.msk [vmem:[#allocation2 + $0x12c] sm:$0xf] %vm1028_vm0, %v15752_v33 }
  0x83   : > { %1105 = vst.msk [vmem:[#allocation2 + $0x130] sm:$0xf] %vm1028_vm0, %v15752_v33  ;;  %1106 = vst.msk [vmem:[#allocation2 + $0x134] sm:$0xf] %vm1028_vm0, %v15752_v33 }
  0x84   : > { %1107 = vst.msk [vmem:[#allocation2 + $0x138] sm:$0xf] %vm1028_vm0, %v15752_v33  ;;  %1108 = vst.msk [vmem:[#allocation2 + $0x13c] sm:$0xf] %vm1028_vm0, %v15752_v33 }
  0x85   : > { %1109 = vst.msk [vmem:[#allocation2 + $0x140] sm:$0xf] %vm1028_vm0, %v15752_v33  ;;  %1110 = vst.msk [vmem:[#allocation2 + $0x144] sm:$0xf] %vm1028_vm0, %v15752_v33 }
  0x86   : > { %1111 = vst.msk [vmem:[#allocation2 + $0x148] sm:$0xf] %vm1028_vm0, %v15752_v33  ;;  %1112 = vst.msk [vmem:[#allocation2 + $0x14c] sm:$0xf] %vm1028_vm0, %v15752_v33 }
  0x87   : > { %1113 = vst.msk [vmem:[#allocation2 + $0x150] sm:$0xf] %vm1028_vm0, %v15752_v33  ;;  %1114 = vst.msk [vmem:[#allocation2 + $0x154] sm:$0xf] %vm1028_vm0, %v15752_v33 }
  0x88   : > { %13869 = vmatmul.mubr.bf16.gmra.mrb[8].mxu0 %v326_v13  ;;  %1115 = vst.msk [vmem:[#allocation2 + $0x158] sm:$0xf] %vm1028_vm0, %v15752_v33  ;;  %1116 = vst.msk [vmem:[#allocation2 + $0x15c] sm:$0xf] %vm1028_vm0, %v15752_v33 }
  0x89   : > { %13872 = vmatprep.mubr.bf16.mxu0 %v328_v14  ;;  %1117 = vst.msk [vmem:[#allocation2 + $0x160] sm:$0xf] %vm1028_vm0, %v15752_v33  ;;  %1118 = vst.msk [vmem:[#allocation2 + $0x164] sm:$0xf] %vm1028_vm0, %v15752_v33 }
  0x8a   : > { %1119 = vst.msk [vmem:[#allocation2 + $0x168] sm:$0xf] %vm1028_vm0, %v15752_v33  ;;  %1120 = vst.msk [vmem:[#allocation2 + $0x16c] sm:$0xf] %vm1028_vm0, %v15752_v33 }
  0x8b   : > { %1121 = vst.msk [vmem:[#allocation2 + $0x170] sm:$0xf] %vm1028_vm0, %v15752_v33  ;;  %1122 = vst.msk [vmem:[#allocation2 + $0x174] sm:$0xf] %vm1028_vm0, %v15752_v33 }
  0x8c   : > { %1123 = vst.msk [vmem:[#allocation2 + $0x178] sm:$0xf] %vm1028_vm0, %v15752_v33  ;;  %1124 = vst.msk [vmem:[#allocation2 + $0x17c] sm:$0xf] %vm1028_vm0, %v15752_v33 }
  0x8d   : > { %1125 = vst.msk [vmem:[#allocation2 + $0x180] sm:$0xf] %vm1028_vm0, %v15752_v33  ;;  %1126 = vst.msk [vmem:[#allocation2 + $0x184] sm:$0xf] %vm1028_vm0, %v15752_v33 }
  0x8e   : > { %1127 = vst.msk [vmem:[#allocation2 + $0x188] sm:$0xf] %vm1028_vm0, %v15752_v33  ;;  %1128 = vst.msk [vmem:[#allocation2 + $0x18c] sm:$0xf] %vm1028_vm0, %v15752_v33 }
  0x8f   : > { %1129 = vst.msk [vmem:[#allocation2 + $0x190] sm:$0xf] %vm1028_vm0, %v15752_v33  ;;  %1130 = vst.msk [vmem:[#allocation2 + $0x194] sm:$0xf] %vm1028_vm0, %v15752_v33 }
  0x90   : > { %13873 = vmatmul.mubr.bf16.gmra.mrb[12].mxu0 %v330_v15  ;;  %1131 = vst.msk [vmem:[#allocation2 + $0x198] sm:$0xf] %vm1028_vm0, %v15752_v33  ;;  %1132 = vst.msk [vmem:[#allocation2 + $0x19c] sm:$0xf] %vm1028_vm0, %v15752_v33 }
  0x91   : > { %13876 = vmatprep.mubr.bf16.mxu0 %v332_v16  ;;  %1133 = vst.msk [vmem:[#allocation2 + $0x1a0] sm:$0xf] %vm1028_vm0, %v15752_v33  ;;  %1134 = vst.msk [vmem:[#allocation2 + $0x1a4] sm:$0xf] %vm1028_vm0, %v15752_v33 }
  0x92   : > { %1135 = vst.msk [vmem:[#allocation2 + $0x1a8] sm:$0xf] %vm1028_vm0, %v15752_v33  ;;  %1136 = vst.msk [vmem:[#allocation2 + $0x1ac] sm:$0xf] %vm1028_vm0, %v15752_v33 }
  0x93   : > { %vm16227_vm3 = vmor %vm2270_vm1, %vm2271_vm2 }
  0x94   : > { %v2286_v61 = vsel %vm16227_vm3, %v2281_v57, %v2285_v51  ;;  %v2296_v62 = vsel %vm16227_vm3, %v2291_v59, %v2295_v60  ;;  %vm16248_vm9 = vmand %vm1028_vm0, %vm1942_vm5 }
  0x95   : > { %v12345_v63 = vcombine.low %v2286_v61, %v2296_v62  ;;  %vm16255_vm10 = vmor %vm1297_vm6, %vm1298_vm7 }
  0x96   : > { %vm16261_vm11 = vmand %vm1948_vm8, %vm1297_vm6 }
  0x97   : > { %vm17073_vm14 = vmor %vm4193_vm12, %vm4194_vm13 }
  0x98   : > { %13877 = vmatmul.mubr.bf16.gmra.mrb[16].mxu0 %v334_v17 }
  0x99   : > { %13880 = vmatprep.mubr.bf16.mxu0 %v336_v18 }
  0xa0   : > { %13881 = vmatmul.mubr.bf16.gmra.mrb[20].mxu0 %v338_v19 }
  0xa1   : > { %13884 = vmatprep.mubr.bf16.mxu0 %v340_v20 }
  0xa8   : > { %13885 = vmatmul.mubr.bf16.gmra.mrb[24].mxu0 %v342_v21 }
  0xa9   : > { %13888 = vmatprep.mubr.bf16.mxu0 %v344_v22 }
  0xb0   : > { %13889 = vmatmul.mubr.bf16.gmra.mrb[28].mxu0 %v346_v23 }
  0xb1   : > { %13892 = vmatprep.mubr.bf16.mxu0 %v348_v24 }
  0xb8   : > { %13893 = vmatmul.mubr.bf16.gmra.mrb[32].mxu0 %v350_v25 }
  0xb9   : > { %13896 = vmatprep.mubr.bf16.mxu0 %v352_v26 }
  0xc0   : > { %13897 = vmatmul.mubr.bf16.gmra.mrb[36].mxu0 %v354_v27 }
  0xc1   : > { %13900 = vmatprep.mubr.bf16.mxu0 %v356_v28 }
  0xc8   : > { %13901 = vmatmul.mubr.bf16.gmra.mrb[40].mxu0 %v358_v29  ;;  %v1953_v29 = vld [vmem:[#allocation2 + $0x18] sm:$0xf] }
  0xc9   : > { %13904 = vmatprep.mubr.bf16.mxu0 %v360_v30 }
  0xd0   : > { %13905 = vmatmul.mubr.bf16.gmra.mrb[44].mxu0 %v15997_v31 }
  0xd1   : > { %13908 = vmatprep.mubr.bf16.mxu0 %v16000_v32 }
  0xd8   : > { %13909 = vmatmul.mubr.bf16.gmra.mrb[48].mxu0 %v366_v34 }
  0xd9   : > { %13912 = vmatprep.mubr.bf16.mxu0 %v368_v35 }
  0xe0   : > { %13913 = vmatmul.mubr.bf16.gmra.mrb[52].mxu0 %v370_v36 }
  0xe1   : > { %13916 = vmatprep.mubr.bf16.mxu0 %v372_v37  ;;  %v1944_v37 = vld [vmem:[#allocation2 + $0xc] sm:$0xf] }
  0xe8   : > { %13917 = vmatmul.mubr.bf16.gmra.mrb[56].mxu0 %v374_v38 }
  0xe9   : > { %13920 = vmatprep.mubr.bf16.mxu0 %v376_v39 }
  0xf0   : > { %13921 = vmatmul.mubr.bf16.gmra.mrb[60].mxu0 %v378_v40 }
  0xf1   : > { %13928 = vmatprep.mubr.msk.bf16.mxu0 %vm3154_vm4, %v12345_v63 }
 0x14b   : > { %v13862_v1 = vpop.f32.mrb[0].mxu0 }
 0x14c   : > { %v686_v3 = vadd.f32 %v13862_v1, %v16239_v0  ;;  %v677_v4 = vpop.f32.mrb[1].mxu0 }
 0x14d   : > { %v678_v5 = vadd.f32 %v16239_v0, %v677_v4  ;;  %v13863_v6 = vpop.f32.mrb[2].mxu0 }
 0x14e   : > { %v934_v7 = vmax.f32 %v686_v3, 0.0  ;;  %v689_v8 = vadd.f32 %v13863_v6, %v16239_v0  ;;  %v680_v9 = vpop.f32.mrb[3].mxu0 }
 0x14f   : > { %v932_v10 = vmax.f32 %v678_v5, 0.0  ;;  %v681_v11 = vadd.f32 %v16239_v0, %v680_v9  ;;  %v1967_v9 = vld [vmem:[#allocation2 + $0x30] sm:$0xf] }
 0x150   : > { %v13145_v12 = vpack.c.bf16 %v934_v7, %v934_v7  ;;  %v935_v13 = vmax.f32 %v689_v8, 0.0 }
 0x151   : > { %v13143_v14 = vpack.c.bf16 %v932_v10, %v932_v10  ;;  %v933_v15 = vmax.f32 %v681_v11, 0.0 }
 0x152   : > { %v1318_v16 = vshrl.u32 %v13145_v12, 16  ;;  %v13146_v17 = vpack.c.bf16 %v935_v13, %v935_v13  ;;  %v1321_v18 = vshll.u32 %v13145_v12, 16 }
 0x153   : > { %v1301_v19 = vshrl.u32 %v13143_v14, 16  ;;  %v1304_v20 = vshll.u32 %v13143_v14, 16  ;;  %v13144_v21 = vpack.c.bf16 %v933_v15, %v933_v15  ;;  %v13866_v22 = vpop.f32.mrb[4].mxu0  ;;  %v15227_v14 = vld [vmem:[#allocation6 + $0x40] sm:$0xff]  }
 0x154   : > { %v1320_v23 = vrot.slane %v1318_v16, 7  ;;  %v1326_v24 = vshrl.u32 %v13146_v17, 16  ;;  %v1329_v25 = vshll.u32 %v13146_v17, 16  ;;  %v702_v26 = vadd.f32 %v13866_v22, %v16239_v0  ;;  %v693_v27 = vpop.f32.mrb[5].mxu0  ;;  %v1960_v17 = vld [vmem:[#allocation2 + $0x24] sm:$0xf]  ;;  %14196 = vmatprep.subr.bf16.mxu1 %v15227_v14 }
 0x155   : > { %v1303_v30 = vrot.slane %v1301_v19, 7  ;;  %v1309_v31 = vshrl.u32 %v13144_v21, 16  ;;  %v1312_v32 = vshll.u32 %v13144_v21, 16  ;;  %v694_v33 = vadd.f32 %v16239_v0, %v693_v27  ;;  %v13867_v34 = vpop.f32.mrb[6].mxu0 }
 0x156   : > { %v1323_v35 = vor.u32 %v1321_v18, %v1320_v23  ;;  %v1324_v36 = vrot.slane %v1320_v23, 4  ;;  %v1328_v39 = vrot.slane %v1326_v24, 7  ;;  %v938_v40 = vmax.f32 %v702_v26, 0.0  ;;  %v696_v41 = vpop.f32.mrb[7].mxu0 }
 0x157   : > { %v1306_v42 = vor.u32 %v1304_v20, %v1303_v30  ;;  %v1307_v43 = vrot.slane %v1303_v30, 4  ;;  %v1311_v46 = vrot.slane %v1309_v31, 7  ;;  %v936_v47 = vmax.f32 %v694_v33, 0.0 }
 0x158   : > { %v1954_v49 = vsel %vm16248_vm9, %v1323_v35, %v1953_v29  ;;  %v1331_v50 = vor.u32 %v1329_v25, %v1328_v39  ;;  %v1333_v51 = vrot.slane %v1328_v39, 4  ;;  %v13149_v53 = vpack.c.bf16 %v938_v40, %v938_v40  ;;  %v1971_v39 = vld [vmem:[#allocation2 + $0x38] sm:$0x1]  ;;  %v1964_v40 = vld [vmem:[#allocation2 + $0x2c] sm:$0x1] }
 0x159   : > { %1955 = vst [vmem:[#allocation2 + $0x18] sm:$0xf] %v1954_v49  ;;  %v1945_v54 = vsel %vm16248_vm9, %v1306_v42, %v1944_v37  ;;  %v1314_v55 = vor.u32 %v1312_v32, %v1311_v46  ;;  %v1316_v56 = vrot.slane %v1311_v46, 4  ;;  %v13147_v57 = vpack.c.bf16 %v936_v47, %v936_v47 }
 0x15a   : > { %1946 = vst [vmem:[#allocation2 + $0xc] sm:$0xf] %v1945_v54  ;;  %v1332_v59 = vsel %vm16255_vm10, %v1324_v36, %v1331_v50  ;;  %v1958_v60 = vsel %vm16261_vm11, %v1333_v51, %v1957_v45  ;;  %v1352_v61 = vshrl.u32 %v13149_v53, 16  ;;  %v1355_v1 = vshll.u32 %v13149_v53, 16  ;;  %v1981_v53 = vld [vmem:[#allocation2 + $0x48] sm:$0xf] }
 0x15b   : > { %1956 = vst.msk [vmem:[#allocation2 + $0x1c] sm:$0xf] %vm1028_vm0, %v1332_v59  ;;  %1959 = vst [vmem:[#allocation2 + $0x20] sm:$0x1] %v1958_v60  ;;  %v1315_v62 = vsel %vm16255_vm10, %v1307_v43, %v1314_v55  ;;  %v1951_v63 = vsel %vm16261_vm11, %v1316_v56, %v1950_v52  ;;  %v1335_v2 = vshrl.u32 %v13147_v57, 16  ;;  %v13870_v3 = vpop.f32.mrb[8].mxu0  ;;  %v705_v5 = vadd.f32 %v13867_v34, %v16239_v0 }
 0x15c   : > { %1947 = vst.msk [vmem:[#allocation2 + $0x10] sm:$0xf] %vm1028_vm0, %v1315_v62  ;;  %1952 = vst [vmem:[#allocation2 + $0x14] sm:$0x1] %v1951_v63  ;;  %v16279_v4 = vrot.slane %v1352_v61, 7  ;;  %v697_v6 = vadd.f32 %v16239_v0, %v696_v41  ;;  %v718_v7 = vadd.f32 %v13870_v3, %v16239_v0  ;;  %v709_v8 = vpop.f32.mrb[9].mxu0 }
 0x15d   : > { %v1337_v10 = vrot.slane %v1335_v2, 7  ;;  %v1338_v11 = vshll.u32 %v13147_v57, 16  ;;  %v710_v12 = vadd.f32 %v16239_v0, %v709_v8  ;;  %v13871_v13 = vpop.f32.mrb[10].mxu0  ;;  %v939_v18 = vmax.f32 %v705_v5, 0.0  ;;  %v1974_v63 = vld [vmem:[#allocation2 + $0x3c] sm:$0xf] }
 0x15e   : > { %v1357_v15 = vor.u32 %v1355_v1, %v16279_v4  ;;  %v1358_v16 = vrot.slane %v16279_v4, 4  ;;  %v937_v19 = vmax.f32 %v697_v6, 0.0  ;;  %v712_v20 = vpop.f32.mrb[11].mxu0  ;;  %v942_v23 = vmax.f32 %v718_v7, 0.0 }
 0x15f   : > { %v1340_v21 = vor.u32 %v1338_v11, %v1337_v10  ;;  %v1341_v22 = vrot.slane %v1337_v10, 4  ;;  %v940_v24 = vmax.f32 %v710_v12, 0.0  ;;  %v13150_v26 = vpack.c.bf16 %v939_v18, %v939_v18 }
 0x160   : > { %v1968_v25 = vsel %vm16248_vm9, %v1357_v15, %v1967_v9  ;;  %v13148_v27 = vpack.c.bf16 %v937_v19, %v937_v19  ;;  %v721_v29 = vadd.f32 %v13871_v13, %v16239_v0  ;;  %v13153_v31 = vpack.c.bf16 %v942_v23, %v942_v23  ;;  %v1985_v23 = vld [vmem:[#allocation2 + $0x50] sm:$0x1] }
 0x161   : > { %1969 = vst [vmem:[#allocation2 + $0x30] sm:$0xf] %v1968_v25  ;;  %v1961_v30 = vsel %vm16248_vm9, %v1340_v21, %v1960_v17  ;;  %v13151_v32 = vpack.c.bf16 %v940_v24, %v940_v24  ;;  %v713_v33 = vadd.f32 %v16239_v0, %v712_v20  ;;  %v1360_v34 = vshrl.u32 %v13150_v26, 16  ;;  %v1978_v24 = vld [vmem:[#allocation2 + $0x44] sm:$0x1] }
 0x162   : > { %1962 = vst [vmem:[#allocation2 + $0x24] sm:$0xf] %v1961_v30  ;;  %v1363_v35 = vshll.u32 %v13150_v26, 16  ;;  %v1343_v36 = vshrl.u32 %v13148_v27, 16  ;;  %v1346_v37 = vshll.u32 %v13148_v27, 16  ;;  %v1386_v41 = vshrl.u32 %v13153_v31, 16 }
 0x163   : > { %v1389_v42 = vshll.u32 %v13153_v31, 16  ;;  %v1369_v43 = vshrl.u32 %v13151_v32, 16  ;;  %v1372_v45 = vshll.u32 %v13151_v32, 16  ;;  %v13874_v46 = vpop.f32.mrb[12].mxu0  ;;  %v1362_v47 = vrot.slane %v1360_v34, 7 }
 0x164   : > { %v1345_v48 = vrot.slane %v1343_v36, 7  ;;  %v943_v49 = vmax.f32 %v721_v29, 0.0  ;;  %v941_v50 = vmax.f32 %v713_v33, 0.0  ;;  %v725_v51 = vpop.f32.mrb[13].mxu0  ;;  %v16293_v52 = vrot.slane %v1386_v41, 7 }
 0x165   : > { %v16295_v54 = vrot.slane %v1369_v43, 7  ;;  %v734_v55 = vadd.f32 %v13874_v46, %v16239_v0  ;;  %v726_v56 = vadd.f32 %v16239_v0, %v725_v51  ;;  %v13875_v57 = vpop.f32.mrb[14].mxu0  ;;  %v1365_v59 = vor.u32 %v1363_v35, %v1362_v47 }
 0x166   : > { %v1367_v60 = vrot.slane %v1362_v47, 4  ;;  %v1348_v61 = vor.u32 %v1346_v37, %v1345_v48  ;;  %v1350_v62 = vrot.slane %v1345_v48, 4  ;;  %v728_v1 = vpop.f32.mrb[15].mxu0  ;;  %v1391_v2 = vor.u32 %v1389_v42, %v16293_v52 }
 0x167   : > { %v1392_v3 = vrot.slane %v16293_v52, 4  ;;  %v1374_v4 = vor.u32 %v1372_v45, %v16295_v54  ;;  %v1375_v5 = vrot.slane %v16295_v54, 4  ;;  %v1366_v6 = vsel %vm16255_vm10, %v1358_v16, %v1365_v59 }
 0x168   : > { %v1972_v7 = vsel %vm16261_vm11, %v1367_v60, %v1971_v39  ;;  %v1349_v8 = vsel %vm16255_vm10, %v1341_v22, %v1348_v61  ;;  %v1965_v9 = vsel %vm16261_vm11, %v1350_v62, %v1964_v40  ;;  %1970 = vst.msk [vmem:[#allocation2 + $0x34] sm:$0xf] %vm1028_vm0, %v1366_v6  ;;  %v1982_v10 = vsel %vm16248_vm9, %v1391_v2, %v1981_v53  ;;  %v2172_v62 = vld [vmem:[#allocation2 + $0xc] sm:$0xf] }
 0x169   : > { %1973 = vst [vmem:[#allocation2 + $0x38] sm:$0x1] %v1972_v7  ;;  %1963 = vst.msk [vmem:[#allocation2 + $0x28] sm:$0xf] %vm1028_vm0, %v1349_v8  ;;  %v1975_v11 = vsel %vm16248_vm9, %v1374_v4, %v1974_v63  ;;  %v13154_v12 = vpack.c.bf16 %v943_v49, %v943_v49  ;;  %v13152_v13 = vpack.c.bf16 %v941_v50, %v941_v50  ;;  %v946_v14 = vmax.f32 %v734_v55, 0.0 }
 0x16a   : > { %1966 = vst [vmem:[#allocation2 + $0x2c] sm:$0x1] %v1965_v9  ;;  %1983 = vst [vmem:[#allocation2 + $0x48] sm:$0xf] %v1982_v10  ;;  %v944_v15 = vmax.f32 %v726_v56, 0.0  ;;  %v737_v16 = vadd.f32 %v13875_v57, %v16239_v0  ;;  %v729_v17 = vadd.f32 %v16239_v0, %v728_v1 }
 0x16b   : > { %1976 = vst [vmem:[#allocation2 + $0x3c] sm:$0xf] %v1975_v11  ;;  %v1394_v18 = vshrl.u32 %v13154_v12, 16  ;;  %v1397_v19 = vshll.u32 %v13154_v12, 16  ;;  %v1377_v20 = vshrl.u32 %v13152_v13, 16  ;;  %v1380_v21 = vshll.u32 %v13152_v13, 16 }
 0x16c   : > { %v13878_v22 = vpop.f32.mrb[16].mxu0  ;;  %v13157_v25 = vpack.c.bf16 %v946_v14, %v946_v14  ;;  %v13155_v26 = vpack.c.bf16 %v944_v15, %v944_v15  ;;  %v947_v27 = vmax.f32 %v737_v16, 0.0  ;;  %v945_v29 = vmax.f32 %v729_v17, 0.0  ;;  %v1995_v55 = vld [vmem:[#allocation2 + $0x60] sm:$0xf] }
 0x16d   : > { %v741_v30 = vpop.f32.mrb[17].mxu0  ;;  %v1396_v31 = vrot.slane %v1394_v18, 7  ;;  %v1379_v32 = vrot.slane %v1377_v20, 7  ;;  %v750_v33 = vadd.f32 %v13878_v22, %v16239_v0  ;;  %v1988_v56 = vld [vmem:[#allocation2 + $0x54] sm:$0xf]  ;;  %v2298_v20 = vshrl.u32 %v2172_v62, 16 }
 0x16e   : > { %v742_v34 = vadd.f32 %v16239_v0, %v741_v30  ;;  %v13879_v35 = vpop.f32.mrb[18].mxu0  ;;  %v1420_v36 = vshrl.u32 %v13157_v25, 16  ;;  %v1423_v37 = vshll.u32 %v13157_v25, 16  ;;  %v1403_v39 = vshrl.u32 %v13155_v26, 16  ;;  %v1999_v7 = vld [vmem:[#allocation2 + $0x68] sm:$0x1] }
 0x16f   : > { %v1406_v40 = vshll.u32 %v13155_v26, 16  ;;  %v744_v41 = vpop.f32.mrb[19].mxu0  ;;  %v1399_v42 = vor.u32 %v1397_v19, %v1396_v31  ;;  %v1401_v43 = vrot.slane %v1396_v31, 4  ;;  %v1382_v45 = vor.u32 %v1380_v21, %v1379_v32  ;;  %v1992_v13 = vld [vmem:[#allocation2 + $0x5c] sm:$0x1] }
 0x170   : > { %v1384_v46 = vrot.slane %v1379_v32, 4  ;;  %v1422_v47 = vrot.slane %v1420_v36, 7  ;;  %v1405_v48 = vrot.slane %v1403_v39, 7  ;;  %v13158_v49 = vpack.c.bf16 %v947_v27, %v947_v27  ;;  %v2173_v19 = vld [vmem:[#allocation2 + $0x10] sm:$0xf] }
 0x171   : > { %v13156_v50 = vpack.c.bf16 %v945_v29, %v945_v29  ;;  %v1400_v51 = vsel %vm16255_vm10, %v1392_v3, %v1399_v42  ;;  %v1986_v52 = vsel %vm16261_vm11, %v1401_v43, %v1985_v23  ;;  %v1383_v53 = vsel %vm16255_vm10, %v1375_v5, %v1382_v45  ;;  %v2009_v36 = vld [vmem:[#allocation2 + $0x78] sm:$0xf]  ;;  %v2239_v43 = vld [vmem:[#allocation2 + $0x14] sm:$0x1] }
 0x172   : > { %v1979_v54 = vsel %vm16261_vm11, %v1384_v46, %v1978_v24  ;;  %1984 = vst.msk [vmem:[#allocation2 + $0x4c] sm:$0xf] %vm1028_vm0, %v1400_v51  ;;  %1987 = vst [vmem:[#allocation2 + $0x50] sm:$0x1] %v1986_v52  ;;  %v1425_v57 = vor.u32 %v1423_v37, %v1422_v47  ;;  %v1426_v59 = vrot.slane %v1422_v47, 4  ;;  %v1408_v60 = vor.u32 %v1406_v40, %v1405_v48 }
 0x173   : > { %1977 = vst.msk [vmem:[#allocation2 + $0x40] sm:$0xf] %vm1028_vm0, %v1383_v53  ;;  %1980 = vst [vmem:[#allocation2 + $0x44] sm:$0x1] %v1979_v54  ;;  %v1409_v61 = vrot.slane %v1405_v48, 4  ;;  %v1428_v63 = vshrl.u32 %v13158_v49, 16  ;;  %v753_v14 = vadd.f32 %v13879_v35, %v16239_v0  ;;  %v745_v15 = vadd.f32 %v16239_v0, %v744_v41 }
 0x174   : > { %v1431_v1 = vshll.u32 %v13158_v49, 16  ;;  %v1411_v2 = vshrl.u32 %v13156_v50, 16  ;;  %v1414_v3 = vshll.u32 %v13156_v50, 16  ;;  %v16331_v4 = vpop.f32.mrb[20].mxu0  ;;  %v1996_v5 = vsel %vm16248_vm9, %v1425_v57, %v1995_v55  ;;  %v2002_v37 = vld [vmem:[#allocation2 + $0x6c] sm:$0xf] }
 0x175   : > { %v1989_v6 = vsel %vm16248_vm9, %v1408_v60, %v1988_v56  ;;  %v950_v8 = vmax.f32 %v750_v33, 0.0  ;;  %v948_v9 = vmax.f32 %v742_v34, 0.0  ;;  %v16337_v10 = vpop.f32.mrb[21].mxu0  ;;  %1997 = vst [vmem:[#allocation2 + $0x60] sm:$0xf] %v1996_v5  ;;  %v1430_v11 = vrot.slane %v1428_v63, 7 }
 0x176   : > { %1990 = vst [vmem:[#allocation2 + $0x54] sm:$0xf] %v1989_v6  ;;  %v1413_v12 = vrot.slane %v1411_v2, 7  ;;  %v16341_v16 = vpop.f32.mrb[22].mxu0  ;;  %v2301_v21 = vshll.u32 %v2172_v62, 16  ;;  %v951_v41 = vmax.f32 %v753_v14, 0.0 }
 0x177   : > { %v13161_v17 = vpack.c.bf16 %v950_v8, %v950_v8  ;;  %v13159_v18 = vpack.c.bf16 %v948_v9, %v948_v9  ;;  %v16343_v22 = vpop.f32.mrb[23].mxu0  ;;  %v1433_v23 = vor.u32 %v1431_v1, %v1430_v11  ;;  %v1435_v24 = vrot.slane %v1430_v11, 4  ;;  %v2174_v60 = vld [vmem:[#allocation2 + $0x18] sm:$0xf] }
 0x178   : > { %v1416_v25 = vor.u32 %v1414_v3, %v1413_v12  ;;  %v1418_v26 = vrot.slane %v1413_v12, 4  ;;  %v949_v42 = vmax.f32 %v745_v15, 0.0  ;;  %v2300_v45 = vrot.slane %v2298_v20, 4  ;;  %v2175_v3 = vld [vmem:[#allocation2 + $0x1c] sm:$0xf] }
 0x179   : > { %v1454_v27 = vshrl.u32 %v13161_v17, 16  ;;  %v1457_v29 = vshll.u32 %v13161_v17, 16  ;;  %v1437_v30 = vshrl.u32 %v13159_v18, 16  ;;  %v1440_v31 = vshll.u32 %v13159_v18, 16  ;;  %v2013_v17 = vld [vmem:[#allocation2 + $0x80] sm:$0x1] }
 0x17a   : > { %v1434_v32 = vsel %vm16255_vm10, %v1426_v59, %v1433_v23  ;;  %v2000_v33 = vsel %vm16261_vm11, %v1435_v24, %v1999_v7  ;;  %v1417_v34 = vsel %vm16255_vm10, %v1409_v61, %v1416_v25  ;;  %v1993_v35 = vsel %vm16261_vm11, %v1418_v26, %v1992_v13 }
 0x17b   : > { %1998 = vst.msk [vmem:[#allocation2 + $0x64] sm:$0xf] %vm1028_vm0, %v1434_v32  ;;  %2001 = vst [vmem:[#allocation2 + $0x68] sm:$0x1] %v2000_v33  ;;  %v1456_v39 = vrot.slane %v1454_v27, 7  ;;  %v1439_v40 = vrot.slane %v1437_v30, 7  ;;  %v13162_v55 = vpack.c.bf16 %v951_v41, %v951_v41  ;;  %v13160_v56 = vpack.c.bf16 %v949_v42, %v949_v42 }
 0x17c   : > { %1991 = vst.msk [vmem:[#allocation2 + $0x58] sm:$0xf] %vm1028_vm0, %v1417_v34  ;;  %1994 = vst [vmem:[#allocation2 + $0x5c] sm:$0x1] %v1993_v35  ;;  %v2303_v46 = vrot.slane %v2301_v21, 5  ;;  %v2307_v47 = vshll.u32 %v2173_v19, 16 }
 0x17d   : > { %v2311_v48 = vshrl.u32 %v2173_v19, 16  ;;  %v16355_v49 = vpop.f32.mrb[24].mxu0  ;;  %v1459_v50 = vor.u32 %v1457_v29, %v1456_v39  ;;  %v1460_v51 = vrot.slane %v1456_v39, 4  ;;  %v1442_v52 = vor.u32 %v1440_v31, %v1439_v40  ;;  %v2006_v21 = vld [vmem:[#allocation2 + $0x74] sm:$0x1] }
 0x17e   : > { %v1443_v53 = vrot.slane %v1439_v40, 4  ;;  %v16357_v54 = vpop.f32.mrb[25].mxu0  ;;  %v2304_v57 = vor.u32 %v2303_v46, %v2300_v45  ;;  %v2309_v59 = vrot.slane %v2307_v47, 5  ;;  %v2317_v2 = vshll.u32 %v2239_v43, 16  ;;  %v2240_v32 = vld [vmem:[#allocation2 + $0x20] sm:$0x1] }
 0x17f   : > { %v16359_v61 = vpop.f32.mrb[26].mxu0  ;;  %v2010_v62 = vsel %vm16248_vm9, %v1459_v50, %v2009_v36  ;;  %v2003_v63 = vsel %vm16248_vm9, %v1442_v52, %v2002_v37  ;;  %v2313_v1 = vrot.slane %v2311_v48, 4  ;;  %v1462_v6 = vshrl.u32 %v13162_v55, 16  ;;  %v2176_v45 = vld [vmem:[#allocation2 + $0x24] sm:$0xf] }
 0x180   : > { %v16365_v5 = vpop.f32.mrb[27].mxu0  ;;  %2011 = vst [vmem:[#allocation2 + $0x78] sm:$0xf] %v2010_v62  ;;  %2004 = vst [vmem:[#allocation2 + $0x6c] sm:$0xf] %v2003_v63  ;;  %v1465_v7 = vshll.u32 %v13162_v55, 16  ;;  %v758_v55 = vadd.f32 %v16239_v0, %v16337_v10 }
 0x181   : > { %v1445_v8 = vshrl.u32 %v13160_v56, 16  ;;  %v1448_v9 = vshll.u32 %v13160_v56, 16  ;;  %v2305_v11 = vrot.slane %v2304_v57, 4  ;;  %v2314_v12 = vor.u32 %v2313_v1, %v2309_v59 }
 0x182   : > { %v2319_v13 = vrot.slane %v2317_v2, 5  ;;  %v2322_v14 = vshrl.u32 %v2174_v60, 16  ;;  %v1464_v15 = vrot.slane %v1462_v6, 7  ;;  %v2325_v19 = vshll.u32 %v2174_v60, 16 }
 0x183   : > { %v1447_v18 = vrot.slane %v1445_v8, 7  ;;  %v2331_v20 = vshll.u32 %v2175_v3, 16  ;;  %v2310_v23 = vsel %vm16227_vm3, %v2305_v11, %v2309_v59  ;;  %v2315_v24 = vrot.slane %v2314_v12, 4  ;;  %v16369_v33 = vpop.f32.mrb[28].mxu0 }
 0x184   : > { %v2324_v25 = vrot.slane %v2322_v14, 4  ;;  %v2335_v26 = vshrl.u32 %v2175_v3, 16  ;;  %v1467_v27 = vor.u32 %v1465_v7, %v1464_v15  ;;  %v1469_v29 = vrot.slane %v1464_v15, 4  ;;  %v16373_v39 = vpop.f32.mrb[29].mxu0 }
 0x185   : > { %v1450_v30 = vor.u32 %v1448_v9, %v1447_v18  ;;  %v1452_v31 = vrot.slane %v1447_v18, 4  ;;  %v2320_v34 = vsel %vm16227_vm3, %v2315_v24, %v2319_v13  ;;  %v2327_v35 = vrot.slane %v2325_v19, 5  ;;  %v16383_v46 = vpop.f32.mrb[30].mxu0  ;;  %v2241_v13 = vld [vmem:[#allocation2 + $0x2c] sm:$0x1] }
 0x186   : > { %v2333_v36 = vrot.slane %v2331_v20, 5  ;;  %v2337_v37 = vrot.slane %v2335_v26, 4  ;;  %v1468_v40 = vsel %vm16255_vm10, %v1460_v51, %v1467_v27  ;;  %v2014_v41 = vsel %vm16261_vm11, %v1469_v29, %v2013_v17  ;;  %v16387_v52 = vpop.f32.mrb[31].mxu0 }
 0x187   : > { %v1451_v42 = vsel %vm16255_vm10, %v1443_v53, %v1450_v30  ;;  %v2007_v43 = vsel %vm16261_vm11, %v1452_v31, %v2006_v21  ;;  %2012 = vst.msk [vmem:[#allocation2 + $0x7c] sm:$0xf] %vm1028_vm0, %v1468_v40  ;;  %2015 = vst [vmem:[#allocation2 + $0x80] sm:$0x1] %v2014_v41  ;;  %v12346_v47 = vcombine.low %v2310_v23, %v2320_v34  ;;  %v2341_v51 = vshll.u32 %v2240_v32, 16 }
 0x188   : > { %2005 = vst.msk [vmem:[#allocation2 + $0x70] sm:$0xf] %vm1028_vm0, %v1451_v42  ;;  %2008 = vst [vmem:[#allocation2 + $0x74] sm:$0x1] %v2007_v43  ;;  %v2328_v48 = vor.u32 %v2327_v35, %v2324_v25  ;;  %v2338_v50 = vor.u32 %v2337_v37, %v2333_v36  ;;  %v766_v53 = vadd.f32 %v16331_v4, %v16239_v0  ;;  %v2346_v63 = vshrl.u32 %v2176_v45, 16 }
 0x189   : > { %v769_v56 = vadd.f32 %v16341_v16, %v16239_v0  ;;  %v761_v57 = vadd.f32 %v16239_v0, %v16343_v22  ;;  %13929 = vmatmul.mubr.msk.bf16.vlgmr.msra.gmra.mrb[64].mxu0 %vm3154_vm4, %v12346_v47  ;;  %v2343_v62 = vrot.slane %v2341_v51, 5  ;;  %v952_v2 = vmax.f32 %v758_v55, 0.0  ;;  %v2177_v4 = vld [vmem:[#allocation2 + $0x28] sm:$0xf]  ;;  %v2023_v35 = vld [vmem:[#allocation2 + $0x90] sm:$0xf] }
 0x18a   : > { %v2329_v59 = vrot.slane %v2328_v48, 4  ;;  %v2339_v60 = vrot.slane %v2338_v50, 4  ;;  %v954_v1 = vmax.f32 %v766_v53, 0.0  ;;  %v2348_v7 = vrot.slane %v2346_v63, 4  ;;  %v2016_v41 = vld [vmem:[#allocation2 + $0x84] sm:$0xf] }
 0x18b   : > { %v955_v3 = vmax.f32 %v769_v56, 0.0  ;;  %v953_v6 = vmax.f32 %v761_v57, 0.0  ;;  %v2349_v8 = vshll.u32 %v2176_v45, 16  ;;  %v13163_v11 = vpack.c.bf16 %v952_v2, %v952_v2  ;;  %v16402_v14 = vpop.f32.mrb[32].mxu0  ;;  %v2027_v55 = vld [vmem:[#allocation2 + $0x98] sm:$0x1] }
 0x18c   : > { %v2334_v10 = vsel %vm16227_vm3, %v2329_v59, %v2333_v36  ;;  %v2344_v16 = vsel %vm16227_vm3, %v2339_v60, %v2343_v62  ;;  %v13165_v9 = vpack.c.bf16 %v954_v1, %v954_v1  ;;  %v2355_v18 = vshll.u32 %v2177_v4, 16  ;;  %v16404_v20 = vpop.f32.mrb[33].mxu0  ;;  %v2020_v56 = vld [vmem:[#allocation2 + $0x8c] sm:$0x1]  ;;  %v2178_v63 = vld [vmem:[#allocation2 + $0x30] sm:$0xf] }
 0x18d   : > { %v12347_v22 = vcombine.low %v2334_v10, %v2344_v16  ;;  %v13166_v12 = vpack.c.bf16 %v955_v3, %v955_v3  ;;  %v13164_v15 = vpack.c.bf16 %v953_v6, %v953_v6  ;;  %v2351_v17 = vrot.slane %v2349_v8, 5  ;;  %v16407_v26 = vpop.f32.mrb[34].mxu0  ;;  %v2179_v1 = vld [vmem:[#allocation2 + $0x34] sm:$0xf]  ;;  %v2242_v10 = vld [vmem:[#allocation2 + $0x38] sm:$0x1] }
 0x18e   : > { %v2359_v19 = vshrl.u32 %v2177_v4, 16  ;;  %v1488_v21 = vshrl.u32 %v13165_v9, 16  ;;  %v1491_v23 = vshll.u32 %v13165_v9, 16  ;;  %v1471_v24 = vshrl.u32 %v13163_v11, 16  ;;  %v16409_v32 = vpop.f32.mrb[35].mxu0 }
 0x18f   : > { %13932 = vmatprep.mubr.msk.bf16.mxu0 %vm3154_vm4, %v12347_v22  ;;  %v1474_v25 = vshll.u32 %v13163_v11, 16  ;;  %v1496_v27 = vshrl.u32 %v13166_v12, 16  ;;  %v1499_v29 = vshll.u32 %v13166_v12, 16  ;;  %v1479_v30 = vshrl.u32 %v13164_v15, 16 }
 0x190   : > { %v1482_v31 = vshll.u32 %v13164_v15, 16  ;;  %v1490_v34 = vrot.slane %v1488_v21, 7  ;;  %v1473_v36 = vrot.slane %v1471_v24, 7  ;;  %v2352_v37 = vor.u32 %v2351_v17, %v2348_v7 }
 0x191   : > { %v2357_v40 = vrot.slane %v2355_v18, 5  ;;  %v1498_v42 = vrot.slane %v1496_v27, 7  ;;  %v1481_v43 = vrot.slane %v1479_v30, 7  ;;  %v2361_v45 = vrot.slane %v2359_v19, 4  ;;  %v2180_v18 = vld [vmem:[#allocation2 + $0x3c] sm:$0xf] }
 0x192   : > { %v2365_v47 = vshll.u32 %v2241_v13, 16  ;;  %v1493_v48 = vor.u32 %v1491_v23, %v1490_v34  ;;  %v1494_v50 = vrot.slane %v1490_v34, 4  ;;  %v1476_v51 = vor.u32 %v1474_v25, %v1473_v36 }
 0x193   : > { %v1477_v53 = vrot.slane %v1473_v36, 4  ;;  %v1501_v57 = vor.u32 %v1499_v29, %v1498_v42  ;;  %v1503_v59 = vrot.slane %v1498_v42, 4  ;;  %v1484_v60 = vor.u32 %v1482_v31, %v1481_v43  ;;  %v16415_v16 = vpop.f32.mrb[36].mxu0 }
 0x194   : > { %v1486_v62 = vrot.slane %v1481_v43, 4  ;;  %v2024_v2 = vsel %vm16248_vm9, %v1493_v48, %v2023_v35  ;;  %v2017_v3 = vsel %vm16248_vm9, %v1476_v51, %v2016_v41  ;;  %v2353_v6 = vrot.slane %v2352_v37, 4  ;;  %v16425_v11 = vpop.f32.mrb[37].mxu0 }
 0x195   : > { %v2362_v4 = vor.u32 %v2361_v45, %v2357_v40  ;;  %2025 = vst [vmem:[#allocation2 + $0x90] sm:$0xf] %v2024_v2  ;;  %2018 = vst [vmem:[#allocation2 + $0x84] sm:$0xf] %v2017_v3  ;;  %v1502_v7 = vsel %vm16255_vm10, %v1494_v50, %v1501_v57  ;;  %v2028_v8 = vsel %vm16261_vm11, %v1503_v59, %v2027_v55  ;;  %v2367_v15 = vrot.slane %v2365_v47, 5  ;;  %v16431_v19 = vpop.f32.mrb[38].mxu0 }
 0x196   : > { %v1485_v22 = vsel %vm16255_vm10, %v1477_v53, %v1484_v60  ;;  %v2021_v9 = vsel %vm16261_vm11, %v1486_v62, %v2020_v56  ;;  %2026 = vst.msk [vmem:[#allocation2 + $0x94] sm:$0xf] %vm1028_vm0, %v1502_v7  ;;  %2029 = vst [vmem:[#allocation2 + $0x98] sm:$0x1] %v2028_v8  ;;  %v2358_v12 = vsel %vm16227_vm3, %v2353_v6, %v2357_v40  ;;  %v2370_v17 = vshrl.u32 %v2178_v63, 16  ;;  %v16433_v27 = vpop.f32.mrb[39].mxu0 }
 0x197   : > { %2019 = vst.msk [vmem:[#allocation2 + $0x88] sm:$0xf] %vm1028_vm0, %v1485_v22  ;;  %2022 = vst [vmem:[#allocation2 + $0x8c] sm:$0x1] %v2021_v9  ;;  %v2363_v13 = vrot.slane %v2362_v4, 4  ;;  %v2373_v21 = vshll.u32 %v2178_v63, 16  ;;  %v782_v31 = vadd.f32 %v16355_v49, %v16239_v0  ;;  %v774_v34 = vadd.f32 %v16239_v0, %v16357_v54 }
 0x198   : > { %v2379_v23 = vshll.u32 %v2179_v1, 16  ;;  %v2383_v24 = vshrl.u32 %v2179_v1, 16  ;;  %v2389_v25 = vshll.u32 %v2242_v10, 16  ;;  %v2372_v30 = vrot.slane %v2370_v17, 4  ;;  %v2181_v10 = vld [vmem:[#allocation2 + $0x40] sm:$0xf] }
 0x199   : > { %v2368_v29 = vsel %vm16227_vm3, %v2363_v13, %v2367_v15  ;;  %v2375_v36 = vrot.slane %v2373_v21, 5  ;;  %v958_v42 = vmax.f32 %v782_v31, 0.0  ;;  %v956_v43 = vmax.f32 %v774_v34, 0.0  ;;  %v2041_v34 = vld [vmem:[#allocation2 + $0xb0] sm:$0x1] }
 0x19a   : > { %v12348_v35 = vcombine.low %v2358_v12, %v2368_v29  ;;  %v2381_v37 = vrot.slane %v2379_v23, 5  ;;  %v2385_v40 = vrot.slane %v2383_v24, 4  ;;  %v2391_v41 = vrot.slane %v2389_v25, 5  ;;  %v2243_v12 = vld [vmem:[#allocation2 + $0x44] sm:$0x1] }
 0x19b   : > { %v785_v45 = vadd.f32 %v16359_v61, %v16239_v0  ;;  %v2376_v47 = vor.u32 %v2375_v36, %v2372_v30  ;;  %v777_v49 = vadd.f32 %v16239_v0, %v16365_v5  ;;  %v2394_v50 = vshrl.u32 %v2180_v18, 16  ;;  %v2037_v0 = vld [vmem:[#allocation2 + $0xa8] sm:$0xf]  ;;  %v2030_v5 = vld [vmem:[#allocation2 + $0x9c] sm:$0xf]  ;;  %v16450_v7 = vpop.f32.mrb[40].mxu0 }
 0x19c   : > { %13933 = vmatmul.mubr.msk.bf16.gmra.mrb[68].mxu0 %vm3154_vm4, %v12348_v35  ;;  %v2386_v48 = vor.u32 %v2385_v40, %v2381_v37  ;;  %v13169_v51 = vpack.c.bf16 %v958_v42, %v958_v42  ;;  %v13167_v54 = vpack.c.bf16 %v956_v43, %v956_v43  ;;  %v2397_v55 = vshll.u32 %v2180_v18, 16  ;;  %v16452_v15 = vpop.f32.mrb[41].mxu0  ;;  %v2034_v35 = vld [vmem:[#allocation2 + $0xa4] sm:$0x1]  ;;  %v2182_v43 = vld [vmem:[#allocation2 + $0x48] sm:$0xf] }
 0x19d   : > { %v959_v53 = vmax.f32 %v785_v45, 0.0  ;;  %v2377_v56 = vrot.slane %v2376_v47, 4  ;;  %v957_v59 = vmax.f32 %v777_v49, 0.0  ;;  %v2396_v60 = vrot.slane %v2394_v50, 4  ;;  %v16454_v24 = vpop.f32.mrb[42].mxu0 }
 0x19e   : > { %v2387_v57 = vrot.slane %v2386_v48, 4  ;;  %v1522_v62 = vshrl.u32 %v13169_v51, 16  ;;  %v1525_v63 = vshll.u32 %v13169_v51, 16  ;;  %v1505_v1 = vshrl.u32 %v13167_v54, 16  ;;  %v16457_v36 = vpop.f32.mrb[43].mxu0 }
 0x19f   : > { %v1508_v61 = vshll.u32 %v13167_v54, 16  ;;  %v2382_v2 = vsel %vm16227_vm3, %v2377_v56, %v2381_v37  ;;  %v13170_v6 = vpack.c.bf16 %v959_v53, %v959_v53  ;;  %v13168_v4 = vpack.c.bf16 %v957_v59, %v957_v59  ;;  %v2183_v50 = vld [vmem:[#allocation2 + $0x4c] sm:$0xf]  ;;  %v2244_v51 = vld [vmem:[#allocation2 + $0x50] sm:$0x1] }
 0x1a0   : > { %v2392_v3 = vsel %vm16227_vm3, %v2387_v57, %v2391_v41  ;;  %v1524_v22 = vrot.slane %v1522_v62, 7  ;;  %v1507_v9 = vrot.slane %v1505_v1, 7  ;;  %v2399_v13 = vrot.slane %v2397_v55, 5 }
 0x1a1   : > { %v12349_v8 = vcombine.low %v2382_v2, %v2392_v3  ;;  %v1530_v17 = vshrl.u32 %v13170_v6, 16  ;;  %v1533_v18 = vshll.u32 %v13170_v6, 16  ;;  %v1513_v21 = vshrl.u32 %v13168_v4, 16 }
 0x1a2   : > { %v1516_v23 = vshll.u32 %v13168_v4, 16  ;;  %v1527_v25 = vor.u32 %v1525_v63, %v1524_v22  ;;  %v1528_v29 = vrot.slane %v1524_v22, 4  ;;  %v1510_v30 = vor.u32 %v1508_v61, %v1507_v9 }
 0x1a3   : > { %13936 = vmatprep.mubr.msk.bf16.mxu0 %vm3154_vm4, %v12349_v8  ;;  %v1511_v31 = vrot.slane %v1507_v9, 4  ;;  %v1532_v37 = vrot.slane %v1530_v17, 7  ;;  %v1515_v40 = vrot.slane %v1513_v21, 7  ;;  %v2400_v41 = vor.u32 %v2399_v13, %v2396_v60  ;;  %v16463_v54 = vpop.f32.mrb[44].mxu0  ;;  %v16486_v17 = vld [vmem:[%s18612_s2] ss:$0 sm:$0xff] }
 0x1a4   : > { %v2403_v42 = vshll.u32 %v2181_v10, 16  ;;  %v2038_v45 = vsel %vm16248_vm9, %v1527_v25, %v2037_v0  ;;  %v2031_v47 = vsel %vm16248_vm9, %v1510_v30, %v2030_v5  ;;  %v2407_v48 = vshrl.u32 %v2181_v10, 16  ;;  %v16465_v59 = vpop.f32.mrb[45].mxu0  ;;  %v16490_v21 = vld [vmem:[#allocation2 + $0x54] sm:$0xf] }
 0x1a5   : > { %v2413_v49 = vshll.u32 %v2243_v12, 16  ;;  %2039 = vst [vmem:[#allocation2 + $0xa8] sm:$0xf] %v2038_v45  ;;  %2032 = vst [vmem:[#allocation2 + $0x9c] sm:$0xf] %v2031_v47  ;;  %v1535_v53 = vor.u32 %v1533_v18, %v1532_v37  ;;  %v1537_v55 = vrot.slane %v1532_v37, 4  ;;  %v1518_v56 = vor.u32 %v1516_v23, %v1515_v40 }
 0x1a6   : > { %v1520_v57 = vrot.slane %v1515_v40, 4  ;;  %v2401_v60 = vrot.slane %v2400_v41, 4  ;;  %v2405_v62 = vrot.slane %v2403_v42, 5  ;;  %v2409_v63 = vrot.slane %v2407_v48, 4  ;;  %v16467_v61 = vpop.f32.mrb[46].mxu0 }
 0x1a7   : > { %v2415_v1 = vrot.slane %v2413_v49, 5  ;;  %v1536_v2 = vsel %vm16255_vm10, %v1528_v29, %v1535_v53  ;;  %v2042_v3 = vsel %vm16261_vm11, %v1537_v55, %v2041_v34  ;;  %v1519_v0 = vsel %vm16255_vm10, %v1511_v31, %v1518_v56  ;;  %v16477_v6 = vpop.f32.mrb[47].mxu0 }
 0x1a8   : > { %v2035_v5 = vsel %vm16261_vm11, %v1520_v57, %v2034_v35  ;;  %2040 = vst.msk [vmem:[#allocation2 + $0xac] sm:$0xf] %vm1028_vm0, %v1536_v2  ;;  %2043 = vst [vmem:[#allocation2 + $0xb0] sm:$0x1] %v2042_v3  ;;  %v2406_v4 = vsel %vm16227_vm3, %v2401_v60, %v2405_v62  ;;  %v2410_v10 = vor.u32 %v2409_v63, %v2405_v62  ;;  %v2418_v8 = vshrl.u32 %v2182_v43, 16 }
 0x1a9   : > { %2033 = vst.msk [vmem:[#allocation2 + $0xa0] sm:$0xf] %vm1028_vm0, %v1519_v0  ;;  %2036 = vst [vmem:[#allocation2 + $0xa4] sm:$0x1] %v2035_v5  ;;  %v2421_v22 = vshll.u32 %v2182_v43, 16  ;;  %v2427_v9 = vshll.u32 %v2183_v50, 16  ;;  %v798_v18 = vadd.f32 %v16486_v17, %v16369_v33  ;;  %v790_v30 = vadd.f32 %v16486_v17, %v16373_v39 }
 0x1aa   : > { %v2431_v12 = vshrl.u32 %v2183_v50, 16  ;;  %v2437_v13 = vshll.u32 %v2244_v51, 16  ;;  %v2411_v23 = vrot.slane %v2410_v10, 4  ;;  %v2420_v25 = vrot.slane %v2418_v8, 4  ;;  %v2044_v10 = vld [vmem:[#allocation2 + $0xb4] sm:$0xf] }
 0x1ab   : > { %v2423_v29 = vrot.slane %v2421_v22, 5  ;;  %v2429_v31 = vrot.slane %v2427_v9, 5  ;;  %v962_v37 = vmax.f32 %v798_v18, 0.0  ;;  %v960_v42 = vmax.f32 %v790_v30, 0.0  ;;  %v16498_v43 = vpop.f32.mrb[48].mxu0 }
 0x1ac   : > { %v2433_v34 = vrot.slane %v2431_v12, 4  ;;  %v2439_v35 = vrot.slane %v2437_v13, 5  ;;  %v2416_v40 = vsel %vm16227_vm3, %v2411_v23, %v2415_v1  ;;  %v801_v33 = vadd.f32 %v16486_v17, %v16383_v46  ;;  %v16502_v49 = vpop.f32.mrb[49].mxu0  ;;  %v2051_v1 = vld [vmem:[#allocation2 + $0xc0] sm:$0xf] }
 0x1ad   : > { %v2424_v41 = vor.u32 %v2423_v29, %v2420_v25  ;;  %v12350_v45 = vcombine.low %v2406_v4, %v2416_v40  ;;  %v13173_v48 = vpack.c.bf16 %v962_v37, %v962_v37  ;;  %v793_v39 = vadd.f32 %v16486_v17, %v16387_v52  ;;  %v16505_v56 = vpop.f32.mrb[50].mxu0  ;;  %v2185_v25 = vld [vmem:[#allocation2 + $0x58] sm:$0xf] }
 0x1ae   : > { %v2434_v47 = vor.u32 %v2433_v34, %v2429_v31  ;;  %v13171_v51 = vpack.c.bf16 %v960_v42, %v960_v42  ;;  %v963_v53 = vmax.f32 %v801_v33, 0.0  ;;  %v2442_v55 = vshrl.u32 %v16490_v21, 16  ;;  %v16513_v29 = vpop.f32.mrb[51].mxu0  ;;  %v2055_v34 = vld [vmem:[#allocation2 + $0xc8] sm:$0x1] }
 0x1af   : > { %v2425_v50 = vrot.slane %v2424_v41, 4  ;;  %13937 = vmatmul.mubr.msk.bf16.gmra.mrb[72].mxu0 %vm3154_vm4, %v12350_v45  ;;  %v1556_v57 = vshrl.u32 %v13173_v48, 16  ;;  %v1559_v60 = vshll.u32 %v13173_v48, 16  ;;  %v961_v62 = vmax.f32 %v793_v39, 0.0  ;;  %v15228_v9 = vld [vmem:[#allocation2 + $0xa8] sm:$0xff]   ;;  %v15348_v48 = vld [vmem:[#allocation6 + $0x40] sm:$0xff]  }
 0x1b0   : > { %v2435_v46 = vrot.slane %v2434_v47, 4  ;;  %v1539_v52 = vshrl.u32 %v13171_v51, 16  ;;  %v1542_v2 = vshll.u32 %v13171_v51, 16  ;;  %v13174_v3 = vpack.c.bf16 %v963_v53, %v963_v53  ;;  %v15226_v0 = vld [vmem:[#allocation2 + $0x9c] sm:$0xff]  }
 0x1b1   : > { %v2430_v63 = vsel %vm16227_vm3, %v2425_v50, %v2429_v31  ;;  %v1558_v4 = vrot.slane %v1556_v57, 7  ;;  %v13172_v8 = vpack.c.bf16 %v961_v62, %v961_v62  ;;  %v2444_v22 = vrot.slane %v2442_v55, 4  ;;  %14156 = vmatprep.mubr.msk.bf16.mxu1 %vm3154_vm4, %v15226_v0  ;;  %v2048_v33 = vld [vmem:[#allocation2 + $0xbc] sm:$0x1]  ;;  %v2186_v47 = vld [vmem:[#allocation2 + $0x60] sm:$0xf] }
 0x1b2   : > { %v2440_v5 = vsel %vm16227_vm3, %v2435_v46, %v2439_v35  ;;  %v1541_v13 = vrot.slane %v1539_v52, 7  ;;  %v1564_v18 = vshrl.u32 %v13174_v3, 16  ;;  %v1567_v23 = vshll.u32 %v13174_v3, 16  ;;  %14157 = vmatmul.mubr.msk.bf16.vlgmr.msra.gmra.mrb[0].mxu1 %vm3154_vm4, %v15228_v9  ;;  %v2245_v53 = vld [vmem:[#allocation2 + $0x5c] sm:$0x1] }
 0x1b3   : > { %v12351_v12 = vcombine.low %v2430_v63, %v2440_v5  ;;  %v1561_v30 = vor.u32 %v1559_v60, %v1558_v4  ;;  %v1562_v31 = vrot.slane %v1558_v4, 4  ;;  %v1547_v37 = vshrl.u32 %v13172_v8, 16  ;;  %14197 = vmatpush3.bf16.msra.mxu1 %v15348_v48  ;;  %v16518_v39 = vpop.f32.mrb[52].mxu0  ;;  %v2187_v52 = vld [vmem:[#allocation2 + $0x64] sm:$0xf]  ;;  %v15238_v3 = vld [vmem:[#allocation6 + $0x48] sm:$0xff]  }
 0x1b4   : > { %v1550_v40 = vshll.u32 %v13172_v8, 16  ;;  %v1544_v35 = vor.u32 %v1542_v2, %v1541_v13  ;;  %v1545_v41 = vrot.slane %v1541_v13, 4  ;;  %v1566_v42 = vrot.slane %v1564_v18, 7  ;;  %v16522_v57 = vpop.f32.mrb[53].mxu0  ;;  %v2246_v8 = vld [vmem:[#allocation2 + $0x68] sm:$0x1]  ;;  %14198 = vmatprep.subr.bf16.mxu1 %v15238_v3 }
 0x1b5   : > { %13940 = vmatprep.mubr.msk.bf16.mxu0 %vm3154_vm4, %v12351_v12  ;;  %v2445_v45 = vshll.u32 %v16490_v21, 16  ;;  %v2052_v50 = vsel %vm16248_vm9, %v1561_v30, %v2051_v1  ;;  %v1549_v51 = vrot.slane %v1547_v37, 7  ;;  %v2451_v55 = vshll.u32 %v2185_v25, 16  ;;  %v16526_v2 = vpop.f32.mrb[54].mxu0 }
 0x1b6   : > { %v2455_v46 = vshrl.u32 %v2185_v25, 16  ;;  %2053 = vst [vmem:[#allocation2 + $0xc0] sm:$0xf] %v2052_v50  ;;  %v2045_v60 = vsel %vm16248_vm9, %v1544_v35, %v2044_v10  ;;  %v1569_v62 = vor.u32 %v1567_v23, %v1566_v42  ;;  %v1571_v21 = vrot.slane %v1566_v42, 4  ;;  %v16528_v9 = vpop.f32.mrb[55].mxu0 }
 0x1b7   : > { %v2447_v63 = vrot.slane %v2445_v45, 5  ;;  %2046 = vst [vmem:[#allocation2 + $0xb4] sm:$0xf] %v2045_v60  ;;  %v1552_v0 = vor.u32 %v1550_v40, %v1549_v51  ;;  %v1554_v1 = vrot.slane %v1549_v51, 4  ;;  %v2453_v5 = vrot.slane %v2451_v55, 5  ;;  %14199 = vmatpush3.bf16.msra.mxu1 %v15238_v3 }
 0x1b8   : > { %v2457_v4 = vrot.slane %v2455_v46, 4  ;;  %v1570_v12 = vsel %vm16255_vm10, %v1562_v31, %v1569_v62  ;;  %v2056_v10 = vsel %vm16261_vm11, %v1571_v21, %v2055_v34  ;;  %v2461_v18 = vshll.u32 %v2245_v53, 16  ;;  %v2188_v35 = vld [vmem:[#allocation2 + $0x6c] sm:$0xf] }
 0x1b9   : > { %v2448_v13 = vor.u32 %v2447_v63, %v2444_v22  ;;  %2054 = vst.msk [vmem:[#allocation2 + $0xc4] sm:$0xf] %vm1028_vm0, %v1570_v12  ;;  %2057 = vst [vmem:[#allocation2 + $0xc8] sm:$0x1] %v2056_v10  ;;  %v1553_v23 = vsel %vm16255_vm10, %v1545_v41, %v1552_v0  ;;  %v2049_v25 = vsel %vm16261_vm11, %v1554_v1, %v2048_v33  ;;  %v2466_v37 = vshrl.u32 %v2186_v47, 16 }
 0x1ba   : > { %v2458_v30 = vor.u32 %v2457_v4, %v2453_v5  ;;  %2047 = vst.msk [vmem:[#allocation2 + $0xb8] sm:$0xf] %vm1028_vm0, %v1553_v23  ;;  %2050 = vst [vmem:[#allocation2 + $0xbc] sm:$0x1] %v2049_v25  ;;  %v2463_v34 = vrot.slane %v2461_v18, 5  ;;  %v2469_v22 = vshll.u32 %v2186_v47, 16  ;;  %v814_v53 = vadd.f32 %v16486_v17, %v16402_v14 }
 0x1bb   : > { %v2449_v31 = vrot.slane %v2448_v13, 4  ;;  %v2475_v40 = vshll.u32 %v2187_v52, 16  ;;  %v2468_v45 = vrot.slane %v2466_v37, 4  ;;  %v2479_v48 = vshrl.u32 %v2187_v52, 16  ;;  %v16544_v55 = vpop.f32.mrb[56].mxu0 }
 0x1bc   : > { %v2459_v42 = vrot.slane %v2458_v30, 4  ;;  %v2485_v50 = vshll.u32 %v2246_v8, 16  ;;  %v2471_v51 = vrot.slane %v2469_v22, 5  ;;  %v806_v62 = vadd.f32 %v16486_v17, %v16404_v20  ;;  %v16550_v21 = vpop.f32.mrb[57].mxu0 }
 0x1bd   : > { %v2454_v41 = vsel %vm16227_vm3, %v2449_v31, %v2453_v5  ;;  %v2477_v33 = vrot.slane %v2475_v40, 5  ;;  %v2481_v47 = vrot.slane %v2479_v48, 4  ;;  %v966_v3 = vmax.f32 %v814_v53, 0.0  ;;  %v16554_v1 = vpop.f32.mrb[58].mxu0  ;;  %v2189_v40 = vld [vmem:[#allocation2 + $0x70] sm:$0xf] }
 0x1be   : > { %v2464_v46 = vsel %vm16227_vm3, %v2459_v42, %v2463_v34  ;;  %v2487_v60 = vrot.slane %v2485_v50, 5  ;;  %v2472_v52 = vor.u32 %v2471_v51, %v2468_v45  ;;  %v817_v0 = vadd.f32 %v16486_v17, %v16407_v26  ;;  %v16558_v12 = vpop.f32.mrb[59].mxu0  ;;  %v2065_v48 = vld [vmem:[#allocation2 + $0xf0] sm:$0xf] }
 0x1bf   : > { %v12352_v63 = vcombine.low %v2454_v41, %v2464_v46  ;;  %v2482_v14 = vor.u32 %v2481_v47, %v2477_v33  ;;  %v964_v5 = vmax.f32 %v806_v62, 0.0  ;;  %v809_v4 = vadd.f32 %v16486_v17, %v16409_v32  ;;  %v2058_v46 = vld [vmem:[#allocation2 + $0xe4] sm:$0xf] }
 0x1c0   : > { %v2490_v8 = vshrl.u32 %v2188_v35, 16  ;;  %v2473_v20 = vrot.slane %v2472_v52, 4  ;;  %v13177_v10 = vpack.c.bf16 %v966_v3, %v966_v3  ;;  %v967_v13 = vmax.f32 %v817_v0, 0.0  ;;  %v15230_v42 = vld [vmem:[#allocation2 + $0xc0] sm:$0xff]   ;;  %v2069_v52 = vld [vmem:[#allocation2 + $0xf8] sm:$0x1] }
 0x1c1   : > { %13941 = vmatmul.mubr.msk.bf16.gmra.mrb[76].mxu0 %vm3154_vm4, %v12352_v63  ;;  %v2493_v18 = vshll.u32 %v2188_v35, 16  ;;  %v2483_v23 = vrot.slane %v2482_v14, 4  ;;  %v13175_v25 = vpack.c.bf16 %v964_v5, %v964_v5  ;;  %v965_v30 = vmax.f32 %v809_v4, 0.0  ;;  %v15229_v37 = vld [vmem:[#allocation2 + $0xb4] sm:$0xff]  }
 0x1c2   : > { %v2492_v26 = vrot.slane %v2490_v8, 4  ;;  %v2478_v31 = vsel %vm16227_vm3, %v2473_v20, %v2477_v33  ;;  %v1590_v34 = vshrl.u32 %v13177_v10, 16  ;;  %v1593_v22 = vshll.u32 %v13177_v10, 16  ;;  %14160 = vmatprep.mubr.msk.bf16.mxu1 %vm3154_vm4, %v15229_v37  ;;  %v2062_v8 = vld [vmem:[#allocation2 + $0xec] sm:$0x1] }
 0x1c3   : > { %v13178_v32 = vpack.c.bf16 %v967_v13, %v967_v13  ;;  %v2488_v45 = vsel %vm16227_vm3, %v2483_v23, %v2487_v60  ;;  %v1573_v50 = vshrl.u32 %v13175_v25, 16  ;;  %v1576_v41 = vshll.u32 %v13175_v25, 16  ;;  %14161 = vmatmul.mubr.msk.bf16.gmra.mrb[4].mxu1 %vm3154_vm4, %v15230_v42  ;;  %v16567_v33 = vpop.f32.mrb[60].mxu0  ;;  %v2190_v10 = vld [vmem:[#allocation2 + $0x78] sm:$0xf] }
 0x1c4   : > { %v13176_v35 = vpack.c.bf16 %v965_v30, %v965_v30  ;;  %v12353_v51 = vcombine.low %v2478_v31, %v2488_v45  ;;  %v1592_v53 = vrot.slane %v1590_v34, 7  ;;  %v2495_v60 = vrot.slane %v2493_v18, 5  ;;  %v2247_v30 = vld [vmem:[#allocation2 + $0x74] sm:$0x1]  ;;  %v16570_v31 = vpop.f32.mrb[61].mxu0 }
 0x1c5   : > { %v1598_v47 = vshrl.u32 %v13178_v32, 16  ;;  %v1601_v62 = vshll.u32 %v13178_v32, 16  ;;  %v1575_v63 = vrot.slane %v1573_v50, 7  ;;  %v2499_v20 = vshll.u32 %v2189_v40, 16  ;;  %v16574_v45 = vpop.f32.mrb[62].mxu0 }
 0x1c6   : > { %v1581_v3 = vshrl.u32 %v13176_v35, 16  ;;  %v1584_v0 = vshll.u32 %v13176_v35, 16  ;;  %13944 = vmatprep.mubr.msk.bf16.mxu0 %vm3154_vm4, %v12353_v51  ;;  %v1595_v14 = vor.u32 %v1593_v22, %v1592_v53  ;;  %v1596_v5 = vrot.slane %v1592_v53, 4  ;;  %v2191_v51 = vld [vmem:[#allocation2 + $0x7c] sm:$0xf]  ;;  %v16578_v53 = vpop.f32.mrb[63].mxu0 }
 0x1c7   : > { %v1600_v4 = vrot.slane %v1598_v47, 7  ;;  %v1578_v13 = vor.u32 %v1576_v41, %v1575_v63  ;;  %v1579_v23 = vrot.slane %v1575_v63, 4  ;;  %v2496_v37 = vor.u32 %v2495_v60, %v2492_v26  ;;  %v2248_v63 = vld [vmem:[#allocation2 + $0x80] sm:$0x1] }
 0x1c8   : > { %v1583_v25 = vrot.slane %v1581_v3, 7  ;;  %v2066_v34 = vsel %vm16248_vm9, %v1595_v14, %v2065_v48  ;;  %v2501_v42 = vrot.slane %v2499_v20, 5  ;;  %v2503_v47 = vshrl.u32 %v2189_v40, 16 }
 0x1c9   : > { %v1603_v32 = vor.u32 %v1601_v62, %v1600_v4  ;;  %v1605_v18 = vrot.slane %v1600_v4, 4  ;;  %2067 = vst [vmem:[#allocation2 + $0xf0] sm:$0xf] %v2066_v34  ;;  %v2059_v22 = vsel %vm16248_vm9, %v1578_v13, %v2058_v46  ;;  %v2497_v35 = vrot.slane %v2496_v37, 4  ;;  %v2192_v34 = vld [vmem:[#allocation2 + $0x84] sm:$0xf] }
 0x1ca   : > { %v1586_v50 = vor.u32 %v1584_v0, %v1583_v25  ;;  %v1588_v41 = vrot.slane %v1583_v25, 4  ;;  %2060 = vst [vmem:[#allocation2 + $0xe4] sm:$0xf] %v2059_v22  ;;  %v2509_v62 = vshll.u32 %v2247_v30, 16  ;;  %v2514_v60 = vshrl.u32 %v2190_v10, 16 }
 0x1cb   : > { %v1604_v26 = vsel %vm16255_vm10, %v1596_v5, %v1603_v32  ;;  %v2070_v48 = vsel %vm16261_vm11, %v1605_v18, %v2069_v52  ;;  %v2502_v0 = vsel %vm16227_vm3, %v2497_v35, %v2501_v42  ;;  %v2505_v52 = vrot.slane %v2503_v47, 4 }
 0x1cc   : > { %2068 = vst.msk [vmem:[#allocation2 + $0xf4] sm:$0xf] %vm1028_vm0, %v1604_v26  ;;  %2071 = vst [vmem:[#allocation2 + $0xf8] sm:$0x1] %v2070_v48  ;;  %v1587_v46 = vsel %vm16255_vm10, %v1579_v23, %v1586_v50  ;;  %v2063_v3 = vsel %vm16261_vm11, %v1588_v41, %v2062_v8  ;;  %v2511_v40 = vrot.slane %v2509_v62, 5  ;;  %v2517_v14 = vshll.u32 %v2190_v10, 16 }
 0x1cd   : > { %2061 = vst.msk [vmem:[#allocation2 + $0xe8] sm:$0xf] %vm1028_vm0, %v1587_v46  ;;  %2064 = vst [vmem:[#allocation2 + $0xec] sm:$0x1] %v2063_v3  ;;  %v2523_v5 = vshll.u32 %v2191_v51, 16  ;;  %v2516_v4 = vrot.slane %v2514_v60, 4  ;;  %v830_v23 = vadd.f32 %v16486_v17, %v16415_v16  ;;  %v2506_v25 = vor.u32 %v2505_v52, %v2501_v42 }
 0x1ce   : > { %v2527_v20 = vshrl.u32 %v2191_v51, 16  ;;  %v2533_v13 = vshll.u32 %v2248_v63, 16  ;;  %v2519_v30 = vrot.slane %v2517_v14, 5  ;;  %v822_v37 = vadd.f32 %v16486_v17, %v16425_v11 }
 0x1cf   : > { %v2525_v8 = vrot.slane %v2523_v5, 5  ;;  %v970_v22 = vmax.f32 %v830_v23, 0.0  ;;  %v833_v10 = vadd.f32 %v16486_v17, %v16431_v19  ;;  %v2507_v50 = vrot.slane %v2506_v25, 4  ;;  %v2079_v5 = vld [vmem:[#allocation2 + $0x108] sm:$0xf] }
 0x1d0   : > { %v2529_v32 = vrot.slane %v2527_v20, 4  ;;  %v2535_v18 = vrot.slane %v2533_v13, 5  ;;  %v2520_v41 = vor.u32 %v2519_v30, %v2516_v4  ;;  %v968_v35 = vmax.f32 %v822_v37, 0.0  ;;  %v2072_v25 = vld [vmem:[#allocation2 + $0xfc] sm:$0xf] }
 0x1d1   : > { %v825_v51 = vadd.f32 %v16486_v17, %v16433_v27  ;;  %v13181_v42 = vpack.c.bf16 %v970_v22, %v970_v22  ;;  %v971_v26 = vmax.f32 %v833_v10, 0.0  ;;  %v2538_v48 = vshrl.u32 %v2192_v34, 16  ;;  %v2193_v30 = vld [vmem:[#allocation2 + $0x88] sm:$0xf] }
 0x1d2   : > { %v2530_v16 = vor.u32 %v2529_v32, %v2525_v8  ;;  %v2512_v11 = vsel %vm16227_vm3, %v2507_v50, %v2511_v40  ;;  %v2521_v47 = vrot.slane %v2520_v41, 4  ;;  %v13179_v62 = vpack.c.bf16 %v968_v35, %v968_v35 }
 0x1d3   : > { %v969_v63 = vmax.f32 %v825_v51, 0.0  ;;  %v12354_v46 = vcombine.low %v2502_v0, %v2512_v11  ;;  %v1624_v60 = vshrl.u32 %v13181_v42, 16  ;;  %v1627_v19 = vshll.u32 %v13181_v42, 16  ;;  %v15232_v13 = vld [vmem:[#allocation2 + $0xf0] sm:$0xff]  }
 0x1d4   : > { %v2531_v3 = vrot.slane %v2530_v16, 4  ;;  %v15231_v52 = vld [vmem:[#allocation2 + $0xe4] sm:$0xff]   ;;  %v2526_v14 = vsel %vm16227_vm3, %v2521_v47, %v2525_v8  ;;  %v1607_v27 = vshrl.u32 %v13179_v62, 16  ;;  %v1610_v4 = vshll.u32 %v13179_v62, 16  ;;  %v2249_v62 = vld [vmem:[#allocation2 + $0x8c] sm:$0x1] }
 0x1d5   : > { %v13182_v20 = vpack.c.bf16 %v971_v26, %v971_v26  ;;  %13945 = vmatmul.mubr.msk.bf16.gmra.mrb[80].mxu0 %vm3154_vm4, %v12354_v46  ;;  %v1626_v23 = vrot.slane %v1624_v60, 7  ;;  %v13180_v0 = vpack.c.bf16 %v969_v63, %v969_v63  ;;  %v2540_v37 = vrot.slane %v2538_v48, 4  ;;  %14164 = vmatprep.mubr.msk.bf16.mxu1 %vm3154_vm4, %v15231_v52  ;;  %v2083_v26 = vld [vmem:[#allocation2 + $0x110] sm:$0x1]  ;;  %v2076_v52 = vld [vmem:[#allocation2 + $0x104] sm:$0x1] }
 0x1d6   : > { %v2536_v40 = vsel %vm16227_vm3, %v2531_v3, %v2535_v18  ;;  %v1609_v22 = vrot.slane %v1607_v27, 7  ;;  %14165 = vmatmul.mubr.msk.bf16.gmra.mrb[8].mxu1 %vm3154_vm4, %v15232_v13  ;;  %v2541_v11 = vshll.u32 %v2192_v34, 16  ;;  %v2547_v63 = vshll.u32 %v2193_v30, 16  ;;  %v2194_v27 = vld [vmem:[#allocation2 + $0x90] sm:$0xf] }
 0x1d7   : > { %v12355_v32 = vcombine.low %v2526_v14, %v2536_v40  ;;  %v1632_v8 = vshrl.u32 %v13182_v20, 16  ;;  %v1635_v10 = vshll.u32 %v13182_v20, 16  ;;  %v1629_v50 = vor.u32 %v1627_v19, %v1626_v23  ;;  %v2195_v40 = vld [vmem:[#allocation2 + $0x94] sm:$0xf] }
 0x1d8   : > { %v1630_v41 = vrot.slane %v1626_v23, 4  ;;  %v1615_v35 = vshrl.u32 %v13180_v0, 16  ;;  %v1618_v51 = vshll.u32 %v13180_v0, 16  ;;  %v1612_v18 = vor.u32 %v1610_v4, %v1609_v22 }
 0x1d9   : > { %13948 = vmatprep.mubr.msk.bf16.mxu0 %vm3154_vm4, %v12355_v32  ;;  %v1613_v16 = vrot.slane %v1609_v22, 4  ;;  %v1634_v42 = vrot.slane %v1632_v8, 7  ;;  %v2080_v48 = vsel %vm16248_vm9, %v1629_v50, %v2079_v5  ;;  %v2551_v46 = vshrl.u32 %v2193_v30, 16 }
 0x1da   : > { %v1617_v47 = vrot.slane %v1615_v35, 7  ;;  %2081 = vst [vmem:[#allocation2 + $0x108] sm:$0xf] %v2080_v48  ;;  %v2073_v3 = vsel %vm16248_vm9, %v1612_v18, %v2072_v25  ;;  %v2543_v14 = vrot.slane %v2541_v11, 5  ;;  %v2549_v34 = vrot.slane %v2547_v63, 5 }
 0x1db   : > { %v1637_v60 = vor.u32 %v1635_v10, %v1634_v42  ;;  %v1639_v19 = vrot.slane %v1634_v42, 4  ;;  %2074 = vst [vmem:[#allocation2 + $0xfc] sm:$0xf] %v2073_v3  ;;  %v2553_v13 = vrot.slane %v2551_v46, 4  ;;  %v2557_v30 = vshll.u32 %v2249_v62, 16 }
 0x1dc   : > { %v1620_v4 = vor.u32 %v1618_v51, %v1617_v47  ;;  %v1622_v20 = vrot.slane %v1617_v47, 4  ;;  %v2544_v0 = vor.u32 %v2543_v14, %v2540_v37  ;;  %v2250_v25 = vld [vmem:[#allocation2 + $0x98] sm:$0x1]  ;;  %v2562_v10 = vshrl.u32 %v2194_v27, 16  ;;  %v2196_v62 = vld [vmem:[#allocation2 + $0x9c] sm:$0xf] }
 0x1dd   : > { %v1638_v5 = vsel %vm16255_vm10, %v1630_v41, %v1637_v60  ;;  %v2084_v23 = vsel %vm16261_vm11, %v1639_v19, %v2083_v26  ;;  %v2554_v8 = vor.u32 %v2553_v13, %v2549_v34  ;;  %v2559_v41 = vrot.slane %v2557_v30, 5 }
 0x1de   : > { %2082 = vst.msk [vmem:[#allocation2 + $0x10c] sm:$0xf] %vm1028_vm0, %v1638_v5  ;;  %2085 = vst [vmem:[#allocation2 + $0x110] sm:$0x1] %v2084_v23  ;;  %v1621_v32 = vsel %vm16255_vm10, %v1613_v16, %v1620_v4  ;;  %v2077_v22 = vsel %vm16261_vm11, %v1622_v20, %v2076_v52  ;;  %v2545_v50 = vrot.slane %v2544_v0, 4  ;;  %v2565_v35 = vshll.u32 %v2194_v27, 16 }
 0x1df   : > { %2075 = vst.msk [vmem:[#allocation2 + $0x100] sm:$0xf] %vm1028_vm0, %v1621_v32  ;;  %2078 = vst [vmem:[#allocation2 + $0x104] sm:$0x1] %v2077_v22  ;;  %v2571_v37 = vshll.u32 %v2195_v40, 16  ;;  %v2555_v51 = vrot.slane %v2554_v8, 4  ;;  %v846_v47 = vadd.f32 %v16486_v17, %v16450_v7  ;;  %v838_v60 = vadd.f32 %v16486_v17, %v16452_v15 }
 0x1e0   : > { %v2564_v18 = vrot.slane %v2562_v10, 4  ;;  %v2575_v42 = vshrl.u32 %v2195_v40, 16  ;;  %v2581_v26 = vshll.u32 %v2250_v25, 16  ;;  %v2550_v11 = vsel %vm16227_vm3, %v2545_v50, %v2549_v34 }
 0x1e1   : > { %v2567_v16 = vrot.slane %v2565_v35, 5  ;;  %v2573_v48 = vrot.slane %v2571_v37, 5  ;;  %v2560_v63 = vsel %vm16227_vm3, %v2555_v51, %v2559_v41  ;;  %v974_v14 = vmax.f32 %v846_v47, 0.0  ;;  %v2093_v41 = vld [vmem:[#allocation2 + $0x120] sm:$0xf] }
 0x1e2   : > { %v2577_v46 = vrot.slane %v2575_v42, 4  ;;  %v2583_v3 = vrot.slane %v2581_v26, 5  ;;  %v12356_v19 = vcombine.low %v2550_v11, %v2560_v63  ;;  %v849_v27 = vadd.f32 %v16486_v17, %v16454_v24  ;;  %v2086_v11 = vld [vmem:[#allocation2 + $0x114] sm:$0xf] }
 0x1e3   : > { %v2568_v52 = vor.u32 %v2567_v16, %v2564_v18  ;;  %v972_v20 = vmax.f32 %v838_v60, 0.0  ;;  %v841_v7 = vadd.f32 %v16486_v17, %v16457_v36  ;;  %v2586_v34 = vshrl.u32 %v2196_v62, 16  ;;  %v2197_v18 = vld [vmem:[#allocation2 + $0xa0] sm:$0xf] }
 0x1e4   : > { %v2578_v4 = vor.u32 %v2577_v46, %v2573_v48  ;;  %13949 = vmatmul.mubr.msk.bf16.gmra.mrb[84].mxu0 %vm3154_vm4, %v12356_v19  ;;  %v13185_v40 = vpack.c.bf16 %v974_v14, %v974_v14  ;;  %v975_v5 = vmax.f32 %v849_v27, 0.0  ;;  %v2589_v23 = vshll.u32 %v2196_v62, 16  ;;  %v2097_v62 = vld [vmem:[#allocation2 + $0x128] sm:$0x1]  ;;  %v2251_v14 = vld [vmem:[#allocation2 + $0xa4] sm:$0x1] }
 0x1e5   : > { %v2569_v13 = vrot.slane %v2568_v52, 4  ;;  %v13183_v15 = vpack.c.bf16 %v972_v20, %v972_v20  ;;  %v973_v30 = vmax.f32 %v841_v7, 0.0  ;;  %v2588_v25 = vrot.slane %v2586_v34, 4  ;;  %v15234_v50 = vld [vmem:[#allocation2 + $0x108] sm:$0xff]  }
 0x1e6   : > { %v2579_v0 = vrot.slane %v2578_v4, 4  ;;  %v15233_v32 = vld [vmem:[#allocation2 + $0xfc] sm:$0xff]   ;;  %v1658_v22 = vshrl.u32 %v13185_v40, 16  ;;  %v1661_v8 = vshll.u32 %v13185_v40, 16  ;;  %v13186_v10 = vpack.c.bf16 %v975_v5, %v975_v5 }
 0x1e7   : > { %v2574_v24 = vsel %vm16227_vm3, %v2569_v13, %v2573_v48  ;;  %v1641_v35 = vshrl.u32 %v13183_v15, 16  ;;  %v1644_v37 = vshll.u32 %v13183_v15, 16  ;;  %v13184_v51 = vpack.c.bf16 %v973_v30, %v973_v30  ;;  %14168 = vmatprep.mubr.msk.bf16.mxu1 %vm3154_vm4, %v15233_v32  ;;  %v2198_v30 = vld [vmem:[#allocation2 + $0xa8] sm:$0xf] }
 0x1e8   : > { %v2584_v36 = vsel %vm16227_vm3, %v2579_v0, %v2583_v3  ;;  %v1660_v26 = vrot.slane %v1658_v22, 7  ;;  %v1666_v16 = vshrl.u32 %v13186_v10, 16  ;;  %v1669_v47 = vshll.u32 %v13186_v10, 16  ;;  %14169 = vmatmul.mubr.msk.bf16.gmra.mrb[12].mxu1 %vm3154_vm4, %v15234_v50  ;;  %v2090_v0 = vld [vmem:[#allocation2 + $0x11c] sm:$0x1] }
 0x1e9   : > { %v12357_v42 = vcombine.low %v2574_v24, %v2584_v36  ;;  %v1643_v48 = vrot.slane %v1641_v35, 7  ;;  %v1649_v63 = vshrl.u32 %v13184_v51, 16  ;;  %v1652_v46 = vshll.u32 %v13184_v51, 16 }
 0x1ea   : > { %v2591_v60 = vrot.slane %v2589_v23, 5  ;;  %v1663_v3 = vor.u32 %v1661_v8, %v1660_v26  ;;  %v1664_v19 = vrot.slane %v1660_v26, 4  ;;  %v1668_v52 = vrot.slane %v1666_v16, 7  ;;  %v2199_v8 = vld [vmem:[#allocation2 + $0xac] sm:$0xf] }
 0x1eb   : > { %13952 = vmatprep.mubr.msk.bf16.mxu0 %vm3154_vm4, %v12357_v42  ;;  %v2595_v27 = vshll.u32 %v2197_v18, 16  ;;  %v1646_v4 = vor.u32 %v1644_v37, %v1643_v48  ;;  %v1647_v20 = vrot.slane %v1643_v48, 4  ;;  %v1651_v7 = vrot.slane %v1649_v63, 7 }
 0x1ec   : > { %v2592_v34 = vor.u32 %v2591_v60, %v2588_v25  ;;  %v2094_v13 = vsel %vm16248_vm9, %v1663_v3, %v2093_v41  ;;  %v1671_v40 = vor.u32 %v1669_v47, %v1668_v52  ;;  %v1673_v5 = vrot.slane %v1668_v52, 4  ;;  %v2252_v41 = vld [vmem:[#allocation2 + $0xb0] sm:$0x1]  ;;  %v16664_v52 = vld [vmem:[#allocation2 + $0xb4] sm:$0xf] }
 0x1ed   : > { %v2597_v15 = vrot.slane %v2595_v27, 5  ;;  %2095 = vst [vmem:[#allocation2 + $0x120] sm:$0xf] %v2094_v13  ;;  %v2087_v23 = vsel %vm16248_vm9, %v1646_v4, %v2086_v11  ;;  %v1654_v32 = vor.u32 %v1652_v46, %v1651_v7  ;;  %v1656_v24 = vrot.slane %v1651_v7, 4  ;;  %v15248_v7 = vld [vmem:[#allocation6 + $0x50] sm:$0xff]  }
 0x1ee   : > { %v2593_v22 = vrot.slane %v2592_v34, 4  ;;  %2088 = vst [vmem:[#allocation2 + $0x114] sm:$0xf] %v2087_v23  ;;  %v1672_v25 = vsel %vm16255_vm10, %v1664_v19, %v1671_v40  ;;  %v2098_v10 = vsel %vm16261_vm11, %v1673_v5, %v2097_v62  ;;  %v2599_v50 = vshrl.u32 %v2197_v18, 16  ;;  %14264 = vmatprep.subr.bf16.mxu1 %v15248_v7 }
 0x1ef   : > { %v2605_v36 = vshll.u32 %v2251_v14, 16  ;;  %2096 = vst.msk [vmem:[#allocation2 + $0x124] sm:$0xf] %vm1028_vm0, %v1672_v25  ;;  %2099 = vst [vmem:[#allocation2 + $0x128] sm:$0x1] %v2098_v10  ;;  %v1655_v35 = vsel %vm16255_vm10, %v1647_v20, %v1654_v32  ;;  %v2091_v37 = vsel %vm16261_vm11, %v1656_v24, %v2090_v0  ;;  %v2610_v42 = vshrl.u32 %v2198_v30, 16 }
 0x1f0   : > { %v2598_v51 = vsel %vm16227_vm3, %v2593_v22, %v2597_v15  ;;  %2089 = vst.msk [vmem:[#allocation2 + $0x118] sm:$0xf] %vm1028_vm0, %v1655_v35  ;;  %2092 = vst [vmem:[#allocation2 + $0x11c] sm:$0x1] %v2091_v37  ;;  %v2601_v26 = vrot.slane %v2599_v50, 4  ;;  %v2613_v11 = vshll.u32 %v2198_v30, 16  ;;  %v862_v63 = vadd.f32 %v16486_v17, %v16463_v54 }
 0x1f1   : > { %v2607_v18 = vrot.slane %v2605_v36, 5  ;;  %v2619_v16 = vshll.u32 %v2199_v8, 16  ;;  %v2612_v47 = vrot.slane %v2610_v42, 4  ;;  %v2623_v48 = vshrl.u32 %v2199_v8, 16  ;;  %v2107_v42 = vld [vmem:[#allocation2 + $0x138] sm:$0xf] }
 0x1f2   : > { %v2629_v62 = vshll.u32 %v2252_v41, 16  ;;  %v2602_v46 = vor.u32 %v2601_v26, %v2597_v15  ;;  %v2615_v60 = vrot.slane %v2613_v11, 5  ;;  %v854_v19 = vadd.f32 %v16486_v17, %v16465_v59 }
 0x1f3   : > { %v2621_v3 = vrot.slane %v2619_v16, 5  ;;  %v2625_v14 = vrot.slane %v2623_v48, 4  ;;  %v978_v4 = vmax.f32 %v862_v63, 0.0  ;;  %v865_v20 = vadd.f32 %v16486_v17, %v16467_v61  ;;  %v2201_v48 = vld [vmem:[#allocation2 + $0xb8] sm:$0xf] }
 0x1f4   : > { %v2631_v27 = vrot.slane %v2629_v62, 5  ;;  %v2603_v34 = vrot.slane %v2602_v46, 4  ;;  %v2616_v13 = vor.u32 %v2615_v60, %v2612_v47  ;;  %v976_v40 = vmax.f32 %v854_v19, 0.0  ;;  %v15249_v62 = vld [vmem:[#allocation6] sm:$0xff]   ;;  %v2100_v60 = vld [vmem:[#allocation2 + $0x12c] sm:$0xf] }
 0x1f5   : > { %v857_v54 = vadd.f32 %v16486_v17, %v16477_v6  ;;  %v2626_v5 = vor.u32 %v2625_v14, %v2621_v3  ;;  %v13189_v0 = vpack.c.bf16 %v978_v4, %v978_v4  ;;  %v979_v15 = vmax.f32 %v865_v20, 0.0  ;;  %v2111_v20 = vld [vmem:[#allocation2 + $0x140] sm:$0x1]  ;;  %13992 = vmatprep.subr.bf16.mxu0 %v15249_v62 }
 0x1f6   : > { %v2634_v59 = vshrl.u32 %v16664_v52, 16  ;;  %v2608_v30 = vsel %vm16227_vm3, %v2603_v34, %v2607_v18  ;;  %v2617_v23 = vrot.slane %v2616_v13, 4  ;;  %v13187_v32 = vpack.c.bf16 %v976_v40, %v976_v40  ;;  %v15236_v41 = vld [vmem:[#allocation2 + $0x120] sm:$0xff]   ;;  %v2253_v40 = vld [vmem:[#allocation2 + $0xbc] sm:$0x1]  ;;  %13993 = vmatpush3.bf16.msra.mxu0 %v15249_v62 }
 0x1f7   : > { %v977_v24 = vmax.f32 %v857_v54, 0.0  ;;  %v12358_v61 = vcombine.low %v2598_v51, %v2608_v30  ;;  %v2627_v22 = vrot.slane %v2626_v5, 4  ;;  %v1692_v8 = vshrl.u32 %v13189_v0, 16  ;;  %v15235_v10 = vld [vmem:[#allocation2 + $0x114] sm:$0xff]  }
 0x1f8   : > { %v1695_v25 = vshll.u32 %v13189_v0, 16  ;;  %v2622_v6 = vsel %vm16227_vm3, %v2617_v23, %v2621_v3  ;;  %v1675_v17 = vshrl.u32 %v13187_v32, 16  ;;  %v1678_v50 = vshll.u32 %v13187_v32, 16  ;;  %14172 = vmatprep.mubr.msk.bf16.mxu1 %vm3154_vm4, %v15235_v10  ;;  %v2104_v30 = vld [vmem:[#allocation2 + $0x134] sm:$0x1] }
 0x1f9   : > { %v13190_v36 = vpack.c.bf16 %v979_v15, %v979_v15  ;;  %13953 = vmatmul.mubr.msk.bf16.gmra.mrb[88].mxu0 %vm3154_vm4, %v12358_v61  ;;  %v2632_v35 = vsel %vm16227_vm3, %v2627_v22, %v2631_v27  ;;  %v1694_v37 = vrot.slane %v1692_v8, 7  ;;  %v13188_v26 = vpack.c.bf16 %v977_v24, %v977_v24  ;;  %14173 = vmatmul.mubr.msk.bf16.gmra.mrb[16].mxu1 %vm3154_vm4, %v15236_v41  ;;  %v2202_v32 = vld [vmem:[#allocation2 + $0xd8] sm:$0xf]  ;;  %v16698_v41 = vld [vmem:[%s18612_s2] ss:$0 sm:$0xff] }
 0x1fa   : > { %v2636_v51 = vrot.slane %v2634_v59, 4  ;;  %v12359_v18 = vcombine.low %v2622_v6, %v2632_v35  ;;  %v1677_v11 = vrot.slane %v1675_v17, 7  ;;  %v2637_v7 = vshll.u32 %v16664_v52, 16 }
 0x1fb   : > { %v1700_v16 = vshrl.u32 %v13190_v36, 16  ;;  %v1703_v47 = vshll.u32 %v13190_v36, 16  ;;  %v1697_v63 = vor.u32 %v1695_v25, %v1694_v37  ;;  %v1698_v46 = vrot.slane %v1694_v37, 4  ;;  %v15250_v37 = vld [vmem:[#allocation6 + $0x8] sm:$0xff]  }
 0x1fc   : > { %v1683_v3 = vshrl.u32 %v13188_v26, 16  ;;  %v1686_v19 = vshll.u32 %v13188_v26, 16  ;;  %13956 = vmatprep.mubr.msk.bf16.mxu0 %vm3154_vm4, %v12359_v18  ;;  %v1680_v14 = vor.u32 %v1678_v50, %v1677_v11  ;;  %v1681_v27 = vrot.slane %v1677_v11, 4  ;;  %13994 = vmatprep.subr.bf16.mxu0 %v15250_v37 }
 0x1fd   : > { %v1702_v4 = vrot.slane %v1700_v16, 7  ;;  %v2108_v34 = vsel %vm16248_vm9, %v1697_v63, %v2107_v42  ;;  %v2643_v54 = vshll.u32 %v2201_v48, 16  ;;  %v2647_v5 = vshrl.u32 %v2201_v48, 16  ;;  %13995 = vmatpush3.bf16.msra.mxu0 %v15250_v37 }
 0x1fe   : > { %v1685_v13 = vrot.slane %v1683_v3, 7  ;;  %2109 = vst [vmem:[#allocation2 + $0x138] sm:$0xf] %v2108_v34  ;;  %v2101_v0 = vsel %vm16248_vm9, %v1680_v14, %v2100_v60  ;;  %v2639_v23 = vrot.slane %v2637_v7, 5  ;;  %v2653_v6 = vshll.u32 %v2253_v40, 16 }
 0x1ff   : > { %v1705_v15 = vor.u32 %v1703_v47, %v1702_v4  ;;  %v1707_v59 = vrot.slane %v1702_v4, 4  ;;  %2102 = vst [vmem:[#allocation2 + $0x12c] sm:$0xf] %v2101_v0  ;;  %v2645_v61 = vrot.slane %v2643_v54, 5  ;;  %v2649_v22 = vrot.slane %v2647_v5, 4 }
 0x200   : > { %v1688_v52 = vor.u32 %v1686_v19, %v1685_v13  ;;  %v1690_v24 = vrot.slane %v1685_v13, 4  ;;  %v2640_v10 = vor.u32 %v2639_v23, %v2636_v51  ;;  %v878_v35 = vadd.f32 %v16698_v41, %v16498_v43  ;;  %v2121_v40 = vld [vmem:[#allocation2 + $0x150] sm:$0xf] }
 0x201   : > { %v1706_v8 = vsel %vm16255_vm10, %v1698_v46, %v1705_v15  ;;  %v2112_v25 = vsel %vm16261_vm11, %v1707_v59, %v2111_v20  ;;  %v2650_v36 = vor.u32 %v2649_v22, %v2645_v61  ;;  %v2655_v26 = vrot.slane %v2653_v6, 5  ;;  %v2203_v46 = vld [vmem:[#allocation2 + $0xdc] sm:$0xf] }
 0x202   : > { %2110 = vst.msk [vmem:[#allocation2 + $0x13c] sm:$0xf] %vm1028_vm0, %v1706_v8  ;;  %2113 = vst [vmem:[#allocation2 + $0x140] sm:$0x1] %v2112_v25  ;;  %v1689_v17 = vsel %vm16255_vm10, %v1681_v27, %v1688_v52  ;;  %v2105_v50 = vsel %vm16261_vm11, %v1690_v24, %v2104_v30  ;;  %v2641_v42 = vrot.slane %v2640_v10, 4  ;;  %v870_v51 = vadd.f32 %v16698_v41, %v16502_v49 }
 0x203   : > { %2103 = vst.msk [vmem:[#allocation2 + $0x130] sm:$0xf] %vm1028_vm0, %v1689_v17  ;;  %2106 = vst [vmem:[#allocation2 + $0x134] sm:$0x1] %v2105_v50  ;;  %v881_v18 = vadd.f32 %v16698_v41, %v16505_v56  ;;  %v2651_v11 = vrot.slane %v2650_v36, 4  ;;  %v982_v16 = vmax.f32 %v878_v35, 0.0  ;;  %v873_v47 = vadd.f32 %v16698_v41, %v16513_v29 }
 0x204   : > { %v2658_v48 = vshrl.u32 %v2202_v32, 16  ;;  %v2646_v43 = vsel %vm16227_vm3, %v2641_v42, %v2645_v61  ;;  %v980_v62 = vmax.f32 %v870_v51, 0.0  ;;  %v2661_v60 = vshll.u32 %v2202_v32, 16  ;;  %v2114_v30 = vld [vmem:[#allocation2 + $0x144] sm:$0xf] }
 0x205   : > { %v983_v63 = vmax.f32 %v881_v18, 0.0  ;;  %v2656_v49 = vsel %vm16227_vm3, %v2651_v11, %v2655_v26  ;;  %v13193_v3 = vpack.c.bf16 %v982_v16, %v982_v16  ;;  %v981_v56 = vmax.f32 %v873_v47, 0.0  ;;  %v2254_v8 = vld [vmem:[#allocation2 + $0xe0] sm:$0x1]  ;;  %v2125_v36 = vld [vmem:[#allocation2 + $0x158] sm:$0x1] }
 0x206   : > { %v2660_v19 = vrot.slane %v2658_v48, 4  ;;  %v12360_v14 = vcombine.low %v2646_v43, %v2656_v49  ;;  %v13191_v27 = vpack.c.bf16 %v980_v62, %v980_v62  ;;  %v2663_v29 = vrot.slane %v2661_v60, 5  ;;  %v2118_v11 = vld [vmem:[#allocation2 + $0x14c] sm:$0x1]  ;;  %v2204_v16 = vld [vmem:[#allocation2 + $0xe4] sm:$0xf] }
 0x207   : > { %v13194_v4 = vpack.c.bf16 %v983_v63, %v983_v63  ;;  %v1726_v20 = vshrl.u32 %v13193_v3, 16  ;;  %v1729_v7 = vshll.u32 %v13193_v3, 16  ;;  %v13192_v34 = vpack.c.bf16 %v981_v56, %v981_v56  ;;  %v2205_v63 = vld [vmem:[#allocation2 + $0xe8] sm:$0xf]  ;;  %v2255_v56 = vld [vmem:[#allocation2 + $0xec] sm:$0x1] }
 0x208   : > { %v2667_v13 = vshll.u32 %v2203_v46, 16  ;;  %13957 = vmatmul.mubr.msk.bf16.gmra.mrb[92].mxu0 %vm3154_vm4, %v12360_v14  ;;  %v1709_v54 = vshrl.u32 %v13191_v27, 16  ;;  %v1712_v5 = vshll.u32 %v13191_v27, 16  ;;  %v2664_v52 = vor.u32 %v2663_v29, %v2660_v19  ;;  %v2206_v19 = vld [vmem:[#allocation2 + $0xf0] sm:$0xf] }
 0x209   : > { %v1734_v0 = vshrl.u32 %v13194_v4, 16  ;;  %v1737_v15 = vshll.u32 %v13194_v4, 16  ;;  %v1728_v59 = vrot.slane %v1726_v20, 7  ;;  %v1717_v23 = vshrl.u32 %v13192_v34, 16  ;;  %v15239_v6 = vld [vmem:[#allocation2 + $0x138] sm:$0xff]  }
 0x20a   : > { %v1720_v32 = vshll.u32 %v13192_v34, 16  ;;  %v15237_v24 = vld [vmem:[#allocation2 + $0x12c] sm:$0xff]   ;;  %v1711_v61 = vrot.slane %v1709_v54, 7  ;;  %v2669_v25 = vrot.slane %v2667_v13, 5  ;;  %v2671_v10 = vshrl.u32 %v2203_v46, 16 }
 0x20b   : > { %v1736_v22 = vrot.slane %v1734_v0, 7  ;;  %v1731_v17 = vor.u32 %v1729_v7, %v1728_v59  ;;  %v1732_v50 = vrot.slane %v1728_v59, 4  ;;  %v1719_v35 = vrot.slane %v1717_v23, 7  ;;  %14176 = vmatprep.mubr.msk.bf16.mxu1 %vm3154_vm4, %v15237_v24 }
 0x20c   : > { %v2665_v37 = vrot.slane %v2664_v52, 4  ;;  %v1714_v42 = vor.u32 %v1712_v5, %v1711_v61  ;;  %v1715_v26 = vrot.slane %v1711_v61, 4  ;;  %14177 = vmatmul.mubr.msk.bf16.gmra.mrb[20].mxu1 %vm3154_vm4, %v15239_v6  ;;  %v2673_v3 = vrot.slane %v2671_v10, 4  ;;  %v2256_v52 = vld [vmem:[#allocation2 + $0xf8] sm:$0x1] }
 0x20d   : > { %v1739_v51 = vor.u32 %v1737_v15, %v1736_v22  ;;  %v1741_v18 = vrot.slane %v1736_v22, 4  ;;  %v2122_v47 = vsel %vm16248_vm9, %v1731_v17, %v2121_v40  ;;  %v1722_v48 = vor.u32 %v1720_v32, %v1719_v35  ;;  %v2207_v40 = vld [vmem:[#allocation2 + $0xf4] sm:$0xf] }
 0x20e   : > { %v1724_v43 = vrot.slane %v1719_v35, 4  ;;  %v2670_v62 = vsel %vm16227_vm3, %v2665_v37, %v2669_v25  ;;  %2123 = vst [vmem:[#allocation2 + $0x150] sm:$0xf] %v2122_v47  ;;  %v2115_v46 = vsel %vm16248_vm9, %v1714_v42, %v2114_v30  ;;  %v2677_v4 = vshll.u32 %v2254_v8, 16  ;;  %v2208_v42 = vld [vmem:[#allocation2 + $0xfc] sm:$0xf] }
 0x20f   : > { %v1740_v60 = vsel %vm16255_vm10, %v1732_v50, %v1739_v51  ;;  %v2126_v49 = vsel %vm16261_vm11, %v1741_v18, %v2125_v36  ;;  %2116 = vst [vmem:[#allocation2 + $0x144] sm:$0xf] %v2115_v46  ;;  %v1723_v14 = vsel %vm16255_vm10, %v1715_v26, %v1722_v48  ;;  %v2682_v29 = vshrl.u32 %v2204_v16, 16 }
 0x210   : > { %2124 = vst.msk [vmem:[#allocation2 + $0x154] sm:$0xf] %vm1028_vm0, %v1740_v60  ;;  %2127 = vst [vmem:[#allocation2 + $0x158] sm:$0x1] %v2126_v49  ;;  %v2119_v27 = vsel %vm16261_vm11, %v1724_v43, %v2118_v11  ;;  %v2674_v20 = vor.u32 %v2673_v3, %v2669_v25  ;;  %v2685_v7 = vshll.u32 %v2204_v16, 16  ;;  %v2691_v34 = vshll.u32 %v2205_v63, 16 }
 0x211   : > { %2117 = vst.msk [vmem:[#allocation2 + $0x148] sm:$0xf] %vm1028_vm0, %v1723_v14  ;;  %2120 = vst [vmem:[#allocation2 + $0x14c] sm:$0x1] %v2119_v27  ;;  %v2695_v13 = vshrl.u32 %v2205_v63, 16  ;;  %v2679_v54 = vrot.slane %v2677_v4, 5  ;;  %v894_v11 = vadd.f32 %v16698_v41, %v16518_v39  ;;  %v886_v48 = vadd.f32 %v16698_v41, %v16522_v57 }
 0x212   : > { %v2684_v5 = vrot.slane %v2682_v29, 4  ;;  %v2701_v0 = vshll.u32 %v2255_v56, 16  ;;  %v2706_v15 = vshrl.u32 %v2206_v19, 16  ;;  %v2675_v59 = vrot.slane %v2674_v20, 4 }
 0x213   : > { %v2687_v30 = vrot.slane %v2685_v7, 5  ;;  %v2693_v23 = vrot.slane %v2691_v34, 5  ;;  %v2697_v32 = vrot.slane %v2695_v13, 4  ;;  %v2709_v22 = vshll.u32 %v2206_v19, 16 }
 0x214   : > { %v2703_v24 = vrot.slane %v2701_v0, 5  ;;  %v2708_v61 = vrot.slane %v2706_v15, 4  ;;  %v2715_v8 = vshll.u32 %v2207_v40, 16  ;;  %v2680_v25 = vsel %vm16227_vm3, %v2675_v59, %v2679_v54  ;;  %v2209_v0 = vld [vmem:[#allocation2 + $0x100] sm:$0xf] }
 0x215   : > { %v2688_v10 = vor.u32 %v2687_v30, %v2684_v5  ;;  %v2698_v6 = vor.u32 %v2697_v32, %v2693_v23  ;;  %v2719_v17 = vshrl.u32 %v2207_v40, 16  ;;  %v12361_v50 = vcombine.low %v2670_v62, %v2680_v25  ;;  %v2135_v32 = vld [vmem:[#allocation2 + $0x168] sm:$0xf] }
 0x216   : > { %v2711_v36 = vrot.slane %v2709_v22, 5  ;;  %v2717_v35 = vrot.slane %v2715_v8, 5  ;;  %v2725_v37 = vshll.u32 %v2256_v52, 16  ;;  %v897_v43 = vadd.f32 %v16698_v41, %v16526_v2  ;;  %v2128_v8 = vld [vmem:[#allocation2 + $0x15c] sm:$0xf] }
 0x217   : > { %v2689_v26 = vrot.slane %v2688_v10, 4  ;;  %v2699_v51 = vrot.slane %v2698_v6, 4  ;;  %v2721_v18 = vrot.slane %v2719_v17, 4  ;;  %13960 = vmatprep.mubr.msk.bf16.mxu0 %vm3154_vm4, %v12361_v50  ;;  %v986_v49 = vmax.f32 %v894_v11, 0.0  ;;  %v15241_v39 = vld [vmem:[#allocation2 + $0x150] sm:$0xff]  }
 0x218   : > { %v2712_v16 = vor.u32 %v2711_v36, %v2708_v61  ;;  %v2727_v47 = vrot.slane %v2725_v37, 5  ;;  %v15240_v62 = vld [vmem:[#allocation2 + $0x144] sm:$0xff]   ;;  %v984_v19 = vmax.f32 %v886_v48, 0.0  ;;  %v987_v14 = vmax.f32 %v897_v43, 0.0  ;;  %v2139_v36 = vld [vmem:[#allocation2 + $0x170] sm:$0x1] }
 0x219   : > { %v2694_v63 = vsel %vm16227_vm3, %v2689_v26, %v2693_v23  ;;  %v2704_v46 = vsel %vm16227_vm3, %v2699_v51, %v2703_v24  ;;  %v2722_v60 = vor.u32 %v2721_v18, %v2717_v35  ;;  %14180 = vmatprep.mubr.msk.bf16.mxu1 %vm3154_vm4, %v15240_v62  ;;  %v13197_v27 = vpack.c.bf16 %v986_v49, %v986_v49  ;;  %v2132_v11 = vld [vmem:[#allocation2 + $0x164] sm:$0x1] }
 0x21a   : > { %v12362_v3 = vcombine.low %v2694_v63, %v2704_v46  ;;  %v2713_v56 = vrot.slane %v2712_v16, 4  ;;  %v889_v2 = vadd.f32 %v16698_v41, %v16528_v9  ;;  %v2730_v4 = vshrl.u32 %v2208_v42, 16  ;;  %14181 = vmatmul.mubr.msk.bf16.gmra.mrb[24].mxu1 %vm3154_vm4, %v15241_v39  ;;  %v2257_v16 = vld [vmem:[#allocation2 + $0x104] sm:$0x1]  ;;  %v2211_v46 = vld [vmem:[#allocation2 + $0x10c] sm:$0xf] }
 0x21b   : > { %v2723_v57 = vrot.slane %v2722_v60, 4  ;;  %v13195_v20 = vpack.c.bf16 %v984_v19, %v984_v19  ;;  %v13198_v7 = vpack.c.bf16 %v987_v14, %v987_v14  ;;  %v2733_v34 = vshll.u32 %v2208_v42, 16 }
 0x21c   : > { %13961 = vmatmul.mubr.msk.bf16.gmra.mrb[96].mxu0 %vm3154_vm4, %v12362_v3  ;;  %v2718_v29 = vsel %vm16227_vm3, %v2713_v56, %v2717_v35  ;;  %v1760_v40 = vshrl.u32 %v13197_v27, 16  ;;  %v1763_v54 = vshll.u32 %v13197_v27, 16  ;;  %v985_v5 = vmax.f32 %v889_v2, 0.0  ;;  %v2258_v2 = vld [vmem:[#allocation2 + $0x110] sm:$0x1] }
 0x21d   : > { %v2728_v13 = vsel %vm16227_vm3, %v2723_v57, %v2727_v47  ;;  %v1743_v9 = vshrl.u32 %v13195_v20, 16  ;;  %v1746_v59 = vshll.u32 %v13195_v20, 16  ;;  %v1768_v30 = vshrl.u32 %v13198_v7, 16  ;;  %v2210_v47 = vld [vmem:[#allocation2 + $0x108] sm:$0xf] }
 0x21e   : > { %v12363_v15 = vcombine.low %v2718_v29, %v2728_v13  ;;  %v1762_v23 = vrot.slane %v1760_v40, 7  ;;  %v1771_v52 = vshll.u32 %v13198_v7, 16  ;;  %v13196_v24 = vpack.c.bf16 %v985_v5, %v985_v5 }
 0x21f   : > { %v2732_v61 = vrot.slane %v2730_v4, 4  ;;  %v1745_v22 = vrot.slane %v1743_v9, 7  ;;  %v1770_v25 = vrot.slane %v1768_v30, 7  ;;  %v2735_v10 = vrot.slane %v2733_v34, 5 }
 0x220   : > { %13964 = vmatprep.mubr.msk.bf16.mxu0 %vm3154_vm4, %v12363_v15  ;;  %v2739_v6 = vshll.u32 %v2209_v0, 16  ;;  %v1765_v17 = vor.u32 %v1763_v54, %v1762_v23  ;;  %v1766_v50 = vrot.slane %v1762_v23, 4  ;;  %v1751_v35 = vshrl.u32 %v13196_v24, 16 }
 0x221   : > { %v1754_v37 = vshll.u32 %v13196_v24, 16  ;;  %v1748_v42 = vor.u32 %v1746_v59, %v1745_v22  ;;  %v1749_v26 = vrot.slane %v1745_v22, 4  ;;  %v1773_v51 = vor.u32 %v1771_v52, %v1770_v25  ;;  %v16779_v22 = vld [vmem:[#allocation2 + $0x114] sm:$0xf] }
 0x222   : > { %v1775_v18 = vrot.slane %v1770_v25, 4  ;;  %v2136_v48 = vsel %vm16248_vm9, %v1765_v17, %v2135_v32  ;;  %v1753_v43 = vrot.slane %v1751_v35, 7  ;;  %v2736_v62 = vor.u32 %v2735_v10, %v2732_v61 }
 0x223   : > { %v2741_v63 = vrot.slane %v2739_v6, 5  ;;  %2137 = vst [vmem:[#allocation2 + $0x168] sm:$0xf] %v2136_v48  ;;  %v2129_v60 = vsel %vm16248_vm9, %v1748_v42, %v2128_v8  ;;  %v1774_v49 = vsel %vm16255_vm10, %v1766_v50, %v1773_v51  ;;  %v2743_v3 = vshrl.u32 %v2209_v0, 16  ;;  %v2149_v48 = vld [vmem:[#allocation2 + $0x180] sm:$0xf] }
 0x224   : > { %v2140_v39 = vsel %vm16261_vm11, %v1775_v18, %v2139_v36  ;;  %2130 = vst [vmem:[#allocation2 + $0x15c] sm:$0xf] %v2129_v60  ;;  %2138 = vst.msk [vmem:[#allocation2 + $0x16c] sm:$0xf] %vm1028_vm0, %v1774_v49  ;;  %v1756_v56 = vor.u32 %v1754_v37, %v1753_v43  ;;  %v1758_v19 = vrot.slane %v1753_v43, 4  ;;  %v2737_v14 = vrot.slane %v2736_v62, 4 }
 0x225   : > { %2141 = vst [vmem:[#allocation2 + $0x170] sm:$0x1] %v2140_v39  ;;  %v2749_v57 = vshll.u32 %v2257_v16, 16  ;;  %v2745_v27 = vrot.slane %v2743_v3, 4  ;;  %v2754_v4 = vshrl.u32 %v2210_v47, 16  ;;  %v2757_v29 = vshll.u32 %v2210_v47, 16 }
 0x226   : > { %v2763_v20 = vshll.u32 %v2211_v46, 16  ;;  %v1757_v7 = vsel %vm16255_vm10, %v1749_v26, %v1756_v56  ;;  %v2133_v34 = vsel %vm16261_vm11, %v1758_v19, %v2132_v11  ;;  %v2742_v13 = vsel %vm16227_vm3, %v2737_v14, %v2741_v63  ;;  %v2142_v56 = vld [vmem:[#allocation2 + $0x174] sm:$0xf] }
 0x227   : > { %v2751_v40 = vrot.slane %v2749_v57, 5  ;;  %2131 = vst.msk [vmem:[#allocation2 + $0x160] sm:$0xf] %vm1028_vm0, %v1757_v7  ;;  %2134 = vst [vmem:[#allocation2 + $0x164] sm:$0x1] %v2133_v34  ;;  %v2746_v54 = vor.u32 %v2745_v27, %v2741_v63  ;;  %v2756_v5 = vrot.slane %v2754_v4, 4  ;;  %v910_v30 = vadd.f32 %v16698_v41, %v16544_v55 }
 0x228   : > { %v2759_v0 = vrot.slane %v2757_v29, 5  ;;  %v2765_v15 = vrot.slane %v2763_v20, 5  ;;  %v2767_v9 = vshrl.u32 %v2211_v46, 16  ;;  %v2773_v59 = vshll.u32 %v2258_v2, 16  ;;  %v2213_v4 = vld [vmem:[#allocation2 + $0x118] sm:$0xf] }
 0x229   : > { %v902_v23 = vadd.f32 %v16698_v41, %v16550_v21  ;;  %v2747_v32 = vrot.slane %v2746_v54, 4  ;;  %v913_v24 = vadd.f32 %v16698_v41, %v16554_v1  ;;  %v905_v61 = vadd.f32 %v16698_v41, %v16558_v12  ;;  %v2146_v54 = vld [vmem:[#allocation2 + $0x17c] sm:$0x1] }
 0x22a   : > { %v2760_v52 = vor.u32 %v2759_v0, %v2756_v5  ;;  %v2769_v8 = vrot.slane %v2767_v9, 4  ;;  %v2775_v25 = vrot.slane %v2773_v59, 5  ;;  %v990_v10 = vmax.f32 %v910_v30, 0.0  ;;  %v2259_v59 = vld [vmem:[#allocation2 + $0x11c] sm:$0x1] }
 0x22b   : > { %v988_v6 = vmax.f32 %v902_v23, 0.0  ;;  %v2752_v55 = vsel %vm16227_vm3, %v2747_v32, %v2751_v40  ;;  %v991_v50 = vmax.f32 %v913_v24, 0.0  ;;  %v989_v21 = vmax.f32 %v905_v61, 0.0  ;;  %v15243_v14 = vld [vmem:[#allocation2 + $0x168] sm:$0xff]   ;;  %v2214_v24 = vld [vmem:[#allocation2 + $0x120] sm:$0xf] }
 0x22c   : > { %v2761_v17 = vrot.slane %v2760_v52, 4  ;;  %v12364_v36 = vcombine.low %v2742_v13, %v2752_v55  ;;  %v2770_v35 = vor.u32 %v2769_v8, %v2765_v15  ;;  %v13201_v37 = vpack.c.bf16 %v990_v10, %v990_v10  ;;  %v2153_v40 = vld [vmem:[#allocation2 + $0x188] sm:$0x1]  ;;  %v2215_v61 = vld [vmem:[#allocation2 + $0x124] sm:$0xf] }
 0x22d   : > { %v13199_v42 = vpack.c.bf16 %v988_v6, %v988_v6  ;;  %v13202_v12 = vpack.c.bf16 %v991_v50, %v991_v50  ;;  %v13200_v26 = vpack.c.bf16 %v989_v21, %v989_v21  ;;  %v2778_v51 = vshrl.u32 %v16779_v22, 16  ;;  %v2260_v55 = vld [vmem:[#allocation2 + $0x128] sm:$0x1] }
 0x22e   : > { %v2766_v1 = vsel %vm16227_vm3, %v2761_v17, %v2765_v15  ;;  %13965 = vmatmul.mubr.msk.bf16.gmra.mrb[100].mxu0 %vm3154_vm4, %v12364_v36  ;;  %v2771_v18 = vrot.slane %v2770_v35, 4  ;;  %v1794_v11 = vshrl.u32 %v13201_v37, 16  ;;  %v1797_v16 = vshll.u32 %v13201_v37, 16  ;;  %v15242_v60 = vld [vmem:[#allocation2 + $0x15c] sm:$0xff]  }
 0x22f   : > { %v1777_v47 = vshrl.u32 %v13199_v42, 16  ;;  %v1780_v43 = vshll.u32 %v13199_v42, 16  ;;  %v1802_v62 = vshrl.u32 %v13202_v12, 16  ;;  %v1805_v63 = vshll.u32 %v13202_v12, 16  ;;  %14184 = vmatprep.mubr.msk.bf16.mxu1 %vm3154_vm4, %v15242_v60 }
 0x230   : > { %v1785_v46 = vshrl.u32 %v13200_v26, 16  ;;  %v2776_v49 = vsel %vm16227_vm3, %v2771_v18, %v2775_v25  ;;  %v1796_v39 = vrot.slane %v1794_v11, 7  ;;  %v1788_v19 = vshll.u32 %v13200_v26, 16  ;;  %14185 = vmatmul.mubr.msk.bf16.gmra.mrb[28].mxu1 %vm3154_vm4, %v15243_v14 }
 0x231   : > { %v1779_v3 = vrot.slane %v1777_v47, 7  ;;  %v12365_v57 = vcombine.low %v2766_v1, %v2776_v49  ;;  %v1804_v27 = vrot.slane %v1802_v62, 7  ;;  %v2780_v29 = vrot.slane %v2778_v51, 4 }
 0x232   : > { %v1787_v2 = vrot.slane %v1785_v46, 7  ;;  %v1799_v20 = vor.u32 %v1797_v16, %v1796_v39  ;;  %v1800_v7 = vrot.slane %v1796_v39, 4  ;;  %v2781_v32 = vshll.u32 %v16779_v22, 16 }
 0x233   : > { %v1782_v34 = vor.u32 %v1780_v43, %v1779_v3  ;;  %v1783_v13 = vrot.slane %v1779_v3, 4  ;;  %13968 = vmatprep.mubr.msk.bf16.mxu0 %vm3154_vm4, %v12365_v57  ;;  %v1807_v5 = vor.u32 %v1805_v63, %v1804_v27  ;;  %v1809_v0 = vrot.slane %v1804_v27, 4  ;;  %v2216_v3 = vld [vmem:[#allocation2 + $0x12c] sm:$0xf] }
 0x234   : > { %v1790_v15 = vor.u32 %v1788_v19, %v1787_v2  ;;  %v1792_v9 = vrot.slane %v1787_v2, 4  ;;  %v2150_v30 = vsel %vm16248_vm9, %v1799_v20, %v2149_v48  ;;  %v2787_v52 = vshll.u32 %v2213_v4, 16 }
 0x235   : > { %v2143_v23 = vsel %vm16248_vm9, %v1782_v34, %v2142_v56  ;;  %2151 = vst [vmem:[#allocation2 + $0x180] sm:$0xf] %v2150_v30  ;;  %v1808_v8 = vsel %vm16255_vm10, %v1800_v7, %v1807_v5  ;;  %v2154_v25 = vsel %vm16261_vm11, %v1809_v0, %v2153_v40  ;;  %v2783_v22 = vrot.slane %v2781_v32, 5 }
 0x236   : > { %2144 = vst [vmem:[#allocation2 + $0x174] sm:$0xf] %v2143_v23  ;;  %v1791_v10 = vsel %vm16255_vm10, %v1783_v13, %v1790_v15  ;;  %v2147_v6 = vsel %vm16261_vm11, %v1792_v9, %v2146_v54  ;;  %2152 = vst.msk [vmem:[#allocation2 + $0x184] sm:$0xf] %vm1028_vm0, %v1808_v8  ;;  %v2789_v17 = vrot.slane %v2787_v52, 5  ;;  %v2791_v50 = vshrl.u32 %v2213_v4, 16 }
 0x237   : > { %2155 = vst [vmem:[#allocation2 + $0x188] sm:$0x1] %v2154_v25  ;;  %2145 = vst.msk [vmem:[#allocation2 + $0x178] sm:$0xf] %vm1028_vm0, %v1791_v10  ;;  %v2797_v21 = vshll.u32 %v2259_v59, 16  ;;  %v2802_v36 = vshrl.u32 %v2214_v24, 16  ;;  %v2784_v1 = vor.u32 %v2783_v22, %v2780_v29  ;;  %v926_v63 = vadd.f32 %v16698_v41, %v16567_v33 }
 0x238   : > { %2148 = vst [vmem:[#allocation2 + $0x17c] sm:$0x1] %v2147_v6  ;;  %v2805_v35 = vshll.u32 %v2214_v24, 16  ;;  %v2811_v37 = vshll.u32 %v2215_v61, 16  ;;  %v2815_v42 = vshrl.u32 %v2215_v61, 16  ;;  %v2793_v12 = vrot.slane %v2791_v50, 4 }
 0x239   : > { %v2799_v26 = vrot.slane %v2797_v21, 5  ;;  %v2821_v51 = vshll.u32 %v2260_v55, 16  ;;  %v2804_v18 = vrot.slane %v2802_v36, 4  ;;  %v2785_v48 = vrot.slane %v2784_v1, 4  ;;  %v2217_v9 = vld [vmem:[#allocation2 + $0x130] sm:$0xf] }
 0x23a   : > { %v2807_v11 = vrot.slane %v2805_v35, 5  ;;  %v2813_v16 = vrot.slane %v2811_v37, 5  ;;  %v2817_v47 = vrot.slane %v2815_v42, 4  ;;  %v2794_v43 = vor.u32 %v2793_v12, %v2789_v17  ;;  %v2163_v59 = vld [vmem:[#allocation2 + $0x198] sm:$0xf] }
 0x23b   : > { %v2823_v62 = vrot.slane %v2821_v51, 5  ;;  %v918_v49 = vadd.f32 %v16698_v41, %v16570_v31  ;;  %v929_v39 = vadd.f32 %v16698_v41, %v16574_v45  ;;  %v2790_v56 = vsel %vm16227_vm3, %v2785_v48, %v2789_v17  ;;  %v2156_v61 = vld [vmem:[#allocation2 + $0x18c] sm:$0xf]  ;;  %v2167_v55 = vld [vmem:[#allocation2 + $0x1a0] sm:$0x1] }
 0x23c   : > { %v2808_v46 = vor.u32 %v2807_v11, %v2804_v18  ;;  %v2818_v60 = vor.u32 %v2817_v47, %v2813_v16  ;;  %v2795_v19 = vrot.slane %v2794_v43, 4  ;;  %v994_v14 = vmax.f32 %v926_v63, 0.0  ;;  %v2160_v37 = vld [vmem:[#allocation2 + $0x194] sm:$0x1]  ;;  %v2218_v43 = vld [vmem:[#allocation2 + $0x138] sm:$0xf] }
 0x23d   : > { %v921_v57 = vadd.f32 %v16698_v41, %v16578_v53  ;;  %v992_v33 = vmax.f32 %v918_v49, 0.0  ;;  %v995_v4 = vmax.f32 %v929_v39, 0.0  ;;  %v2826_v7 = vshrl.u32 %v2216_v3, 16  ;;  %v15245_v53 = vld [vmem:[#allocation2 + $0x180] sm:$0xff]   ;;  %v2261_v51 = vld [vmem:[#allocation2 + $0x134] sm:$0x1] }
 0x23e   : > { %v2809_v27 = vrot.slane %v2808_v46, 4  ;;  %v2819_v2 = vrot.slane %v2818_v60, 4  ;;  %v2800_v29 = vsel %vm16227_vm3, %v2795_v19, %v2799_v26  ;;  %v13205_v31 = vpack.c.bf16 %v994_v14, %v994_v14  ;;  %v15244_v45 = vld [vmem:[#allocation2 + $0x174] sm:$0xff]   ;;  %v2262_v39 = vld [vmem:[#allocation2 + $0x140] sm:$0x1] }
 0x23f   : > { %v993_v20 = vmax.f32 %v921_v57, 0.0  ;;  %v12366_v34 = vcombine.low %v2790_v56, %v2800_v29  ;;  %v13203_v54 = vpack.c.bf16 %v992_v33, %v992_v33  ;;  %v13206_v15 = vpack.c.bf16 %v995_v4, %v995_v4  ;;  %14188 = vmatprep.mubr.msk.bf16.mxu1 %vm3154_vm4, %v15244_v45  ;;  %v2220_v57 = vld [vmem:[#allocation2 + $0x144] sm:$0xf] }
 0x240   : > { %v2814_v13 = vsel %vm16227_vm3, %v2809_v27, %v2813_v16  ;;  %v2824_v40 = vsel %vm16227_vm3, %v2819_v2, %v2823_v62  ;;  %v1828_v5 = vshrl.u32 %v13205_v31, 16  ;;  %v1831_v0 = vshll.u32 %v13205_v31, 16  ;;  %14189 = vmatmul.mubr.msk.bf16.gmra.mrb[32].mxu1 %vm3154_vm4, %v15245_v53  ;;  %v2219_v62 = vld [vmem:[#allocation2 + $0x13c] sm:$0xf]  ;;  %v2221_v27 = vld [vmem:[#allocation2 + $0x148] sm:$0xf] }
 0x241   : > { %v12367_v41 = vcombine.low %v2814_v13, %v2824_v40  ;;  %13969 = vmatmul.mubr.msk.bf16.gmra.mrb[104].mxu0 %vm3154_vm4, %v12366_v34  ;;  %v1811_v30 = vshrl.u32 %v13203_v54, 16  ;;  %v1814_v23 = vshll.u32 %v13203_v54, 16  ;;  %v13204_v32 = vpack.c.bf16 %v993_v20, %v993_v20  ;;  %v2263_v53 = vld [vmem:[#allocation2 + $0x14c] sm:$0x1] }
 0x242   : > { %v2828_v52 = vrot.slane %v2826_v7, 4  ;;  %v1830_v24 = vrot.slane %v1828_v5, 7  ;;  %v1836_v8 = vshrl.u32 %v13206_v15, 16  ;;  %v1839_v25 = vshll.u32 %v13206_v15, 16 }
 0x243   : > { %13972 = vmatprep.mubr.msk.bf16.mxu0 %vm3154_vm4, %v12367_v41  ;;  %v2829_v10 = vshll.u32 %v2216_v3, 16  ;;  %v1813_v6 = vrot.slane %v1811_v30, 7  ;;  %v1819_v22 = vshrl.u32 %v13204_v32, 16  ;;  %v1822_v17 = vshll.u32 %v13204_v32, 16 }
 0x244   : > { %v2835_v50 = vshll.u32 %v2217_v9, 16  ;;  %v1833_v21 = vor.u32 %v1831_v0, %v1830_v24  ;;  %v1834_v36 = vrot.slane %v1830_v24, 4  ;;  %v1838_v35 = vrot.slane %v1836_v8, 7 }
 0x245   : > { %v2831_v42 = vrot.slane %v2829_v10, 5  ;;  %v1816_v1 = vor.u32 %v1814_v23, %v1813_v6  ;;  %v1817_v12 = vrot.slane %v1813_v6, 4  ;;  %v1821_v26 = vrot.slane %v1819_v22, 7  ;;  %v2223_v10 = vld [vmem:[#allocation2 + $0x154] sm:$0xf] }
 0x246   : > { %v2837_v18 = vrot.slane %v2835_v50, 5  ;;  %v2164_v11 = vsel %vm16248_vm9, %v1833_v21, %v2163_v59  ;;  %v1841_v16 = vor.u32 %v1839_v25, %v1838_v35  ;;  %v1843_v47 = vrot.slane %v1838_v35, 4  ;;  %v2222_v59 = vld [vmem:[#allocation2 + $0x150] sm:$0xf]  ;;  %v2264_v50 = vld [vmem:[#allocation2 + $0x158] sm:$0x1] }
 0x247   : > { %v2832_v48 = vor.u32 %v2831_v42, %v2828_v52  ;;  %2165 = vst [vmem:[#allocation2 + $0x198] sm:$0xf] %v2164_v11  ;;  %v2157_v63 = vsel %vm16248_vm9, %v1816_v1, %v2156_v61  ;;  %v1824_v46 = vor.u32 %v1822_v17, %v1821_v26  ;;  %v1826_v60 = vrot.slane %v1821_v26, 4 }
 0x248   : > { %v2839_v49 = vshrl.u32 %v2217_v9, 16  ;;  %2158 = vst [vmem:[#allocation2 + $0x18c] sm:$0xf] %v2157_v63  ;;  %v1842_v3 = vsel %vm16255_vm10, %v1834_v36, %v1841_v16  ;;  %v2168_v56 = vsel %vm16261_vm11, %v1843_v47, %v2167_v55  ;;  %v2845_v14 = vshll.u32 %v2261_v51, 16  ;;  %v2224_v51 = vld [vmem:[#allocation2 + $0x15c] sm:$0xf] }
 0x249   : > { %v2833_v19 = vrot.slane %v2832_v48, 4  ;;  %2166 = vst.msk [vmem:[#allocation2 + $0x19c] sm:$0xf] %vm1028_vm0, %v1842_v3  ;;  %2169 = vst [vmem:[#allocation2 + $0x1a0] sm:$0x1] %v2168_v56  ;;  %v1825_v28 = vsel %vm16255_vm10, %v1817_v12, %v1824_v46  ;;  %v2161_v2 = vsel %vm16261_vm11, %v1826_v60, %v2160_v37  ;;  %v2850_v4 = vshrl.u32 %v2218_v43, 16 }
 0x24a   : > { %v2841_v33 = vrot.slane %v2839_v49, 4  ;;  %2159 = vst.msk [vmem:[#allocation2 + $0x190] sm:$0xf] %vm1028_vm0, %v1825_v28  ;;  %2162 = vst [vmem:[#allocation2 + $0x194] sm:$0x1] %v2161_v2  ;;  %v2847_v31 = vrot.slane %v2845_v14, 5 }
 0x24b   : > { %v2838_v29 = vsel %vm16227_vm3, %v2833_v19, %v2837_v18  ;;  %v2853_v20 = vshll.u32 %v2218_v43, 16  ;;  %v2859_v7 = vshll.u32 %v2219_v62, 16  ;;  %v2852_v34 = vrot.slane %v2850_v4, 4  ;;  %v2225_v43 = vld [vmem:[#allocation2 + $0x160] sm:$0xf] }
 0x24c   : > { %v2842_v45 = vor.u32 %v2841_v33, %v2837_v18  ;;  %v2863_v13 = vshrl.u32 %v2219_v62, 16  ;;  %v2869_v40 = vshll.u32 %v2262_v39, 16  ;;  %v2874_v44 = vshrl.u32 %v2220_v57, 16  ;;  %v2226_v14 = vld [vmem:[#allocation2 + $0x168] sm:$0xf] }
 0x24d   : > { %v2855_v38 = vrot.slane %v2853_v20, 5  ;;  %v2861_v54 = vrot.slane %v2859_v7, 5  ;;  %v2877_v41 = vshll.u32 %v2220_v57, 16  ;;  %v2883_v9 = vshll.u32 %v2221_v27, 16  ;;  %v2227_v7 = vld [vmem:[#allocation2 + $0x16c] sm:$0xf] }
 0x24e   : > { %v2843_v5 = vrot.slane %v2842_v45, 4  ;;  %v2865_v0 = vrot.slane %v2863_v13, 4  ;;  %v2871_v15 = vrot.slane %v2869_v40, 5  ;;  %v2876_v23 = vrot.slane %v2874_v44, 4  ;;  %v2266_v44 = vld [vmem:[#allocation2 + $0x170] sm:$0x1] }
 0x24f   : > { %v2856_v30 = vor.u32 %v2855_v38, %v2852_v34  ;;  %v2879_v32 = vrot.slane %v2877_v41, 5  ;;  %v2887_v52 = vshrl.u32 %v2221_v27, 16  ;;  %v2885_v8 = vrot.slane %v2883_v9, 5  ;;  %v2265_v27 = vld [vmem:[#allocation2 + $0x164] sm:$0x1] }
 0x250   : > { %v2848_v24 = vsel %vm16227_vm3, %v2843_v5, %v2847_v31  ;;  %v2866_v61 = vor.u32 %v2865_v0, %v2861_v54  ;;  %v2893_v25 = vshll.u32 %v2263_v53, 16  ;;  %v2898_v35 = vshrl.u32 %v2222_v59, 16  ;;  %v15247_v62 = vld [vmem:[#allocation2 + $0x198] sm:$0xff]  }
 0x251   : > { %v12368_v6 = vcombine.low %v2838_v29, %v2848_v24  ;;  %v2857_v55 = vrot.slane %v2856_v30, 4  ;;  %v2880_v22 = vor.u32 %v2879_v32, %v2876_v23  ;;  %v2889_v17 = vrot.slane %v2887_v52, 4  ;;  %v15246_v18 = vld [vmem:[#allocation2 + $0x18c] sm:$0xff]   ;;  %v2229_v24 = vld [vmem:[#allocation2 + $0x178] sm:$0xf] }
 0x252   : > { %v2867_v21 = vrot.slane %v2866_v61, 4  ;;  %v2895_v36 = vrot.slane %v2893_v25, 5  ;;  %v2901_v37 = vshll.u32 %v2222_v59, 16  ;;  %v2907_v26 = vshll.u32 %v2223_v10, 16  ;;  %14192 = vmatprep.mubr.msk.bf16.mxu1 %vm3154_vm4, %v15246_v18  ;;  %v2228_v59 = vld [vmem:[#allocation2 + $0x174] sm:$0xf] }
 0x253   : > { %13973 = vmatmul.mubr.msk.bf16.gmra.mrb[108].mxu0 %vm3154_vm4, %v12368_v6  ;;  %v2862_v42 = vsel %vm16227_vm3, %v2857_v55, %v2861_v54  ;;  %v2881_v1 = vrot.slane %v2880_v22, 4  ;;  %v2890_v12 = vor.u32 %v2889_v17, %v2885_v8  ;;  %v2900_v16 = vrot.slane %v2898_v35, 4  ;;  %14193 = vmatmul.mubr.msk.bf16.gmra.mrb[36].mxu1 %vm3154_vm4, %v15247_v62  ;;  %v2267_v6 = vld [vmem:[#allocation2 + $0x17c] sm:$0x1]  ;;  %v2230_v55 = vld [vmem:[#allocation2 + $0x180] sm:$0xf] }
 0x254   : > { %v2872_v11 = vsel %vm16227_vm3, %v2867_v21, %v2871_v15  ;;  %v2903_v47 = vrot.slane %v2901_v37, 5  ;;  %v2911_v48 = vshrl.u32 %v2223_v10, 16  ;;  %v2909_v49 = vrot.slane %v2907_v26, 5  ;;  %v2231_v62 = vld [vmem:[#allocation2 + $0x184] sm:$0xf] }
 0x255   : > { %v12369_v63 = vcombine.low %v2862_v42, %v2872_v11  ;;  %v2886_v46 = vsel %vm16227_vm3, %v2881_v1, %v2885_v8  ;;  %v2891_v60 = vrot.slane %v2890_v12, 4  ;;  %v2917_v56 = vshll.u32 %v2264_v50, 16 }
 0x256   : > { %v2904_v39 = vor.u32 %v2903_v47, %v2900_v16  ;;  %v2913_v3 = vrot.slane %v2911_v48, 4  ;;  %v2922_v19 = vshrl.u32 %v2224_v51, 16  ;;  %v2925_v28 = vshll.u32 %v2224_v51, 16 }
 0x257   : > { %13976 = vmatprep.mubr.msk.bf16.mxu0 %vm3154_vm4, %v12369_v63  ;;  %v2896_v57 = vsel %vm16227_vm3, %v2891_v60, %v2895_v36  ;;  %v2931_v2 = vshll.u32 %v2225_v43, 16  ;;  %v2935_v33 = vshrl.u32 %v2225_v43, 16  ;;  %v2919_v20 = vrot.slane %v2917_v56, 5  ;;  %v2268_v56 = vld [vmem:[#allocation2 + $0x188] sm:$0x1] }
 0x258   : > { %v12370_v4 = vcombine.low %v2886_v46, %v2896_v57  ;;  %v2905_v29 = vrot.slane %v2904_v39, 4  ;;  %v2914_v31 = vor.u32 %v2913_v3, %v2909_v49  ;;  %v2924_v45 = vrot.slane %v2922_v19, 4  ;;  %v5672_v19 = vld [vmem:[#allocation2 + $0xc] sm:$0xf] }
 0x259   : > { %v2927_v34 = vrot.slane %v2925_v28, 5  ;;  %v2933_v13 = vrot.slane %v2931_v2, 5  ;;  %v2937_v40 = vrot.slane %v2935_v33, 4  ;;  %v2941_v53 = vshll.u32 %v2265_v27, 16 }
 0x25a   : > { %v2910_v38 = vsel %vm16227_vm3, %v2905_v29, %v2909_v49  ;;  %v2915_v54 = vrot.slane %v2914_v31, 4  ;;  %v2946_v41 = vshrl.u32 %v2226_v14, 16  ;;  %v2949_v15 = vshll.u32 %v2226_v14, 16 }
 0x25b   : > { %13977 = vmatmul.mubr.msk.bf16.gmra.mrb[112].mxu0 %vm3154_vm4, %v12370_v4  ;;  %v2928_v5 = vor.u32 %v2927_v34, %v2924_v45  ;;  %v2938_v0 = vor.u32 %v2937_v40, %v2933_v13  ;;  %v2955_v9 = vshll.u32 %v2227_v7, 16  ;;  %v2943_v23 = vrot.slane %v2941_v53, 5  ;;  %v5673_v45 = vld [vmem:[#allocation2 + $0x10] sm:$0xf] }
 0x25c   : > { %v2920_v30 = vsel %vm16227_vm3, %v2915_v54, %v2919_v20  ;;  %v2948_v32 = vrot.slane %v2946_v41, 4  ;;  %v2959_v52 = vshrl.u32 %v2227_v7, 16  ;;  %v2951_v10 = vrot.slane %v2949_v15, 5  ;;  %v5674_v54 = vld [vmem:[#allocation2 + $0x14] sm:$0x1] }
 0x25d   : > { %v12371_v61 = vcombine.low %v2910_v38, %v2920_v30  ;;  %v2929_v8 = vrot.slane %v2928_v5, 4  ;;  %v2939_v25 = vrot.slane %v2938_v0, 4  ;;  %v2957_v22 = vrot.slane %v2955_v9, 5  ;;  %v2232_v15 = vld [vmem:[#allocation2 + $0x18c] sm:$0xf] }
 0x25e   : > { %v2961_v17 = vrot.slane %v2959_v52, 4  ;;  %v2965_v50 = vshll.u32 %v2266_v44, 16  ;;  %v2970_v21 = vshrl.u32 %v2228_v59, 16  ;;  %v2952_v37 = vor.u32 %v2951_v10, %v2948_v32  ;;  %v2233_v32 = vld [vmem:[#allocation2 + $0x190] sm:$0xf] }
 0x25f   : > { %13980 = vmatprep.mubr.msk.bf16.mxu0 %vm3154_vm4, %v12371_v61  ;;  %v2934_v36 = vsel %vm16227_vm3, %v2929_v8, %v2933_v13  ;;  %v2944_v35 = vsel %vm16227_vm3, %v2939_v25, %v2943_v23  ;;  %v2973_v42 = vshll.u32 %v2228_v59, 16  ;;  %v2979_v16 = vshll.u32 %v2229_v24, 16 }
 0x260   : > { %v12372_v1 = vcombine.low %v2934_v36, %v2944_v35  ;;  %v2962_v12 = vor.u32 %v2961_v17, %v2957_v22  ;;  %v2967_v26 = vrot.slane %v2965_v50, 5  ;;  %v2972_v51 = vrot.slane %v2970_v21, 4 }
 0x261   : > { %v2953_v18 = vrot.slane %v2952_v37, 4  ;;  %v2975_v11 = vrot.slane %v2973_v42, 5  ;;  %v2983_v47 = vshrl.u32 %v2229_v24, 16  ;;  %v2989_v43 = vshll.u32 %v2267_v6, 16 }
 0x262   : > { %v2963_v48 = vrot.slane %v2962_v12, 4  ;;  %v2994_v63 = vshrl.u32 %v2230_v55, 16  ;;  %v2997_v46 = vshll.u32 %v2230_v55, 16  ;;  %v2981_v39 = vrot.slane %v2979_v16, 5  ;;  %v2269_v55 = vld [vmem:[#allocation2 + $0x194] sm:$0x1] }
 0x263   : > { %13981 = vmatmul.mubr.msk.bf16.gmra.mrb[116].mxu0 %vm3154_vm4, %v12372_v1  ;;  %v2958_v60 = vsel %vm16227_vm3, %v2953_v18, %v2957_v22  ;;  %v2976_v49 = vor.u32 %v2975_v11, %v2972_v51  ;;  %v2985_v3 = vrot.slane %v2983_v47, 4  ;;  %v2991_v57 = vrot.slane %v2989_v43, 5  ;;  %v5675_v12 = vld [vmem:[#allocation2 + $0x18] sm:$0xf]  ;;  %v5676_v16 = vld [vmem:[#allocation2 + $0x1c] sm:$0xf] }
 0x264   : > { %v2968_v14 = vsel %vm16227_vm3, %v2963_v48, %v2967_v26  ;;  %v2996_v27 = vrot.slane %v2994_v63, 4  ;;  %v2999_v28 = vrot.slane %v2997_v46, 5  ;;  %v3003_v29 = vshll.u32 %v2231_v62, 16 }
 0x265   : > { %v12373_v2 = vcombine.low %v2958_v60, %v2968_v14  ;;  %v2977_v33 = vrot.slane %v2976_v49, 4  ;;  %v2986_v4 = vor.u32 %v2985_v3, %v2981_v39  ;;  %v3007_v20 = vshrl.u32 %v2231_v62, 16  ;;  %v5677_v60 = vld [vmem:[#allocation2 + $0x20] sm:$0x1] }
 0x266   : > { %v3000_v31 = vor.u32 %v2999_v28, %v2996_v27  ;;  %v3013_v7 = vshll.u32 %v2268_v56, 16  ;;  %v5769_v34 = vshrl.u32 %v5672_v19, 16  ;;  %v3005_v38 = vrot.slane %v3003_v29, 5 }
 0x267   : > { %13984 = vmatprep.mubr.msk.bf16.mxu0 %vm3154_vm4, %v12373_v2  ;;  %v2982_v13 = vsel %vm16227_vm3, %v2977_v33, %v2981_v39  ;;  %v2987_v40 = vrot.slane %v2986_v4, 4  ;;  %v5772_v53 = vshll.u32 %v5672_v19, 16  ;;  %v3009_v41 = vrot.slane %v3007_v20, 4  ;;  %v5679_v4 = vld [vmem:[#allocation2 + $0x28] sm:$0xf] }
 0x268   : > { %v3001_v44 = vrot.slane %v3000_v31, 4  ;;  %v3015_v5 = vrot.slane %v3013_v7, 5  ;;  %v5771_v0 = vrot.slane %v5769_v34, 4  ;;  %v5778_v30 = vshll.u32 %v5673_v45, 16 }
 0x269   : > { %v2992_v9 = vsel %vm16227_vm3, %v2987_v40, %v2991_v57  ;;  %v5774_v59 = vrot.slane %v5772_v53, 5  ;;  %v5782_v23 = vshrl.u32 %v5673_v45, 16  ;;  %v3010_v61 = vor.u32 %v3009_v41, %v3005_v38  ;;  %v5678_v57 = vld [vmem:[#allocation2 + $0x24] sm:$0xf] }
 0x26a   : > { %v12374_v52 = vcombine.low %v2982_v13, %v2992_v9  ;;  %v3006_v24 = vsel %vm16227_vm3, %v3001_v44, %v3005_v38  ;;  %v5788_v8 = vshll.u32 %v5674_v54, 16  ;;  %v5780_v10 = vrot.slane %v5778_v30, 5  ;;  %v5680_v13 = vld [vmem:[#allocation2 + $0x2c] sm:$0x1] }
 0x26b   : > { %v5775_v25 = vor.u32 %v5774_v59, %v5771_v0  ;;  %v5784_v6 = vrot.slane %v5782_v23, 4  ;;  %v3018_v22 = vshrl.u32 %v2232_v15, 16  ;;  %v3011_v17 = vrot.slane %v3010_v61, 4  ;;  %v5681_v59 = vld [vmem:[#allocation2 + $0x30] sm:$0xf] }
 0x26c   : > { %13985 = vmatmul.mubr.msk.bf16.gmra.mrb[120].mxu0 %vm3154_vm4, %v12374_v52  ;;  %v5790_v50 = vrot.slane %v5788_v8, 5  ;;  %v3021_v21 = vshll.u32 %v2232_v15, 16  ;;  %v3027_v36 = vshll.u32 %v2233_v32, 16  ;;  %v3031_v1 = vshrl.u32 %v2233_v32, 16 }
 0x26d   : > { %v5776_v35 = vrot.slane %v5775_v25, 4  ;;  %v5785_v37 = vor.u32 %v5784_v6, %v5780_v10  ;;  %v3020_v42 = vrot.slane %v3018_v22, 4  ;;  %v3016_v26 = vsel %vm16227_vm3, %v3011_v17, %v3015_v5  ;;  %v15350_v25 = vld [vmem:[#allocation2] sm:$0xf]  ;;  %v15353_v22 = vld [vmem:[#allocation2 + $0x10] sm:$0xf] }
 0x26e   : > { %v3023_v51 = vrot.slane %v3021_v21, 5  ;;  %v3029_v18 = vrot.slane %v3027_v36, 5  ;;  %v3037_v11 = vshll.u32 %v2269_v55, 16  ;;  %v12375_v47 = vcombine.low %v3006_v24, %v3016_v26  ;;  %v5682_v24 = vld [vmem:[#allocation2 + $0x34] sm:$0xf] }
 0x26f   : > { %v5781_v48 = vsel %vm16227_vm3, %v5776_v35, %v5780_v10  ;;  %v5786_v43 = vrot.slane %v5785_v37, 4  ;;  %v3033_v62 = vrot.slane %v3031_v1, 4  ;;  %v5793_v49 = vshrl.u32 %v5675_v12, 16  ;;  %v15351_v10 = vld [vmem:[#allocation2 + $0x4] sm:$0xf] }
 0x270   : > { %v3024_v63 = vor.u32 %v3023_v51, %v3020_v42  ;;  %v3039_v46 = vrot.slane %v3037_v11, 5  ;;  %v5796_v39 = vshll.u32 %v5675_v12, 16  ;;  %13988 = vmatprep.mubr.msk.bf16.mxu0 %vm3154_vm4, %v12375_v47  ;;  %v5802_v19 = vshll.u32 %v5676_v16, 16  ;;  %v15352_v55 = vld [vmem:[#allocation2 + $0xc] sm:$0xf] }
 0x271   : > { %v5791_v3 = vsel %vm16227_vm3, %v5786_v43, %v5790_v50  ;;  %v3034_v56 = vor.u32 %v3033_v62, %v3029_v18  ;;  %v5806_v14 = vshrl.u32 %v5676_v16, 16  ;;  %v5795_v2 = vrot.slane %v5793_v49, 4  ;;  %v5683_v50 = vld [vmem:[#allocation2 + $0x38] sm:$0x1]  ;;  %v5684_v51 = vld [vmem:[#allocation2 + $0x3c] sm:$0xf] }
 0x272   : > { %v12641_v27 = vcombine.low %v5781_v48, %v5791_v3  ;;  %v3025_v28 = vrot.slane %v3024_v63, 4  ;;  %v5798_v33 = vrot.slane %v5796_v39, 5  ;;  %v5804_v31 = vrot.slane %v5802_v19, 5  ;;  %v5685_v43 = vld [vmem:[#allocation2 + $0x40] sm:$0xf] }
 0x273   : > { %v3035_v29 = vrot.slane %v3034_v56, 4  ;;  %v5808_v20 = vrot.slane %v5806_v14, 4  ;;  %v5812_v7 = vshll.u32 %v5677_v60, 16  ;;  %v5817_v40 = vshrl.u32 %v5678_v57, 16  ;;  %v15354_v60 = vld [vmem:[#allocation2 + $0x18] sm:$0xf] }
 0x274   : > { %14200 = vmatprep.mubr.msk.bf16.mxu1 %vm3154_vm4, %v12641_v27  ;;  %v3030_v45 = vsel %vm16227_vm3, %v3025_v28, %v3029_v18  ;;  %v5799_v34 = vor.u32 %v5798_v33, %v5795_v2  ;;  %v5820_v38 = vshll.u32 %v5678_v57, 16  ;;  %v5826_v41 = vshll.u32 %v5679_v4, 16  ;;  %v15251_v18 = vld [vmem:[#allocation6 + $0x58] sm:$0xff]   ;;  %v15355_v49 = vld [vmem:[#allocation2 + $0x1c] sm:$0xf]  ;;  %v15356_v56 = vld [vmem:[#allocation6 + $0x50] sm:$0xff]  }
 0x275   : > { %v3040_v54 = vsel %vm16227_vm3, %v3035_v29, %v3039_v46  ;;  %v5809_v53 = vor.u32 %v5808_v20, %v5804_v31  ;;  %v5814_v44 = vrot.slane %v5812_v7, 5  ;;  %v5819_v15 = vrot.slane %v5817_v40, 4  ;;  %v5686_v3 = vld [vmem:[#allocation2 + $0x44] sm:$0x1] }
 0x276   : > { %v12376_v5 = vcombine.low %v3030_v45, %v3040_v54  ;;  %v5800_v0 = vrot.slane %v5799_v34, 4  ;;  %v5822_v9 = vrot.slane %v5820_v38, 5  ;;  %v5828_v23 = vrot.slane %v5826_v41, 5  ;;  %v5687_v45 = vld [vmem:[#allocation2 + $0x48] sm:$0xf] }
 0x277   : > { %v5810_v30 = vrot.slane %v5809_v53, 4  ;;  %v5830_v32 = vshrl.u32 %v5679_v4, 16  ;;  %v5836_v52 = vshll.u32 %v5680_v13, 16  ;;  %v12411_v6 = vcombine.low %v15350_v25, %v15351_v10  ;;  %v5688_v54 = vld [vmem:[#allocation2 + $0x4c] sm:$0xf] }
 0x278   : > { %13989 = vmatmul.mubr.msk.bf16.gmra.mrb[124].mxu0 %vm3154_vm4, %v12376_v5  ;;  %v5805_v61 = vsel %vm16227_vm3, %v5800_v0, %v5804_v31  ;;  %v5823_v8 = vor.u32 %v5822_v9, %v5819_v15  ;;  %v12412_v17 = vcombine.low %v15352_v55, %v15353_v22  ;;  %v5841_v37 = vshrl.u32 %v5681_v59, 16  ;;  %v15357_v5 = vld [vmem:[#allocation2 + $0x24] sm:$0xf]  ;;  %v15358_v0 = vld [vmem:[#allocation2 + $0x28] sm:$0xf] }
 0x279   : > { %v5815_v21 = vsel %vm16227_vm3, %v5810_v30, %v5814_v44  ;;  %v5832_v36 = vrot.slane %v5830_v32, 4  ;;  %v5838_v35 = vrot.slane %v5836_v52, 5  ;;  %13996 = vmatprep.mubr.msk.bf16.mxu0 %vm3154_vm4, %v12411_v6  ;;  %v5844_v12 = vshll.u32 %v5681_v59, 16  ;;  %v5689_v30 = vld [vmem:[#allocation2 + $0x50] sm:$0x1] }
 0x27a   : > { %v12642_v42 = vcombine.low %v5805_v61, %v5815_v21  ;;  %v5824_v1 = vrot.slane %v5823_v8, 4  ;;  %v5850_v26 = vshll.u32 %v5682_v24, 16  ;;  %v5843_v16 = vrot.slane %v5841_v37, 4  ;;  %v5690_v25 = vld [vmem:[#allocation2 + $0x54] sm:$0xf] }
 0x27b   : > { %v5833_v11 = vor.u32 %v5832_v36, %v5828_v23  ;;  %v5854_v47 = vshrl.u32 %v5682_v24, 16  ;;  %v5860_v48 = vshll.u32 %v5683_v50, 16  ;;  %v5846_v63 = vrot.slane %v5844_v12, 5  ;;  %v15260_v37 = vld [vmem:[#allocation6 + $0x60] sm:$0xff]  }
 0x27c   : > { %14201 = vmatmul.mubr.msk.bf16.vlgmr.msra.gmra.mrb[40].mxu1 %vm3154_vm4, %v12642_v42  ;;  %v5829_v62 = vsel %vm16227_vm3, %v5824_v1, %v5828_v23  ;;  %v5852_v46 = vrot.slane %v5850_v26, 5  ;;  %v12413_v39 = vcombine.low %v15354_v60, %v15355_v49  ;;  %v5865_v27 = vshrl.u32 %v5684_v51, 16  ;;  %v15262_v42 = vld [vmem:[#allocation6 + $0x20] sm:$0xff]  }
 0x27d   : > { %14265 = vmatpush3.bf16.msra.mxu1 %v15356_v56  ;;  %v5834_v19 = vrot.slane %v5833_v11, 4  ;;  %v5856_v14 = vrot.slane %v5854_v47, 4  ;;  %v5862_v57 = vrot.slane %v5860_v48, 5  ;;  %v5847_v28 = vor.u32 %v5846_v63, %v5843_v16  ;;  %v15359_v26 = vld [vmem:[#allocation2 + $0x30] sm:$0xf]  ;;  %14060 = vmatprep.subr.bf16.mxu0 %v15262_v42 }
 0x27e   : > { %v5868_v2 = vshll.u32 %v5684_v51, 16  ;;  %v5874_v33 = vshll.u32 %v5685_v43, 16  ;;  %v5878_v4 = vshrl.u32 %v5685_v43, 16  ;;  %14266 = vmatprep.subr.bf16.mxu1 %v15251_v18  ;;  %v5867_v20 = vrot.slane %v5865_v27, 4  ;;  %v15360_v51 = vld [vmem:[#allocation2 + $0x34] sm:$0xf] }
 0x27f   : > { %v5839_v29 = vsel %vm16227_vm3, %v5834_v19, %v5838_v35  ;;  %v5857_v31 = vor.u32 %v5856_v14, %v5852_v46  ;;  %v5884_v7 = vshll.u32 %v5686_v3, 16  ;;  %v5848_v13 = vrot.slane %v5847_v28, 4  ;;  %v5692_v11 = vld [vmem:[#allocation2 + $0x5c] sm:$0x1]  ;;  %v5693_v63 = vld [vmem:[#allocation2 + $0x60] sm:$0xf] }
 0x280   : > { %v12643_v34 = vcombine.low %v5829_v62, %v5839_v29  ;;  %13997 = vmatmul.mubr.msk.bf16.vlgmr.msra.gmra.mrb[64].mxu0 %vm3154_vm4, %v12412_v17  ;;  %v5870_v40 = vrot.slane %v5868_v2, 5  ;;  %v5876_v38 = vrot.slane %v5874_v33, 5  ;;  %v5880_v44 = vrot.slane %v5878_v4, 4  ;;  %v5691_v17 = vld [vmem:[#allocation2 + $0x58] sm:$0xf] }
 0x281   : > { %v5858_v53 = vrot.slane %v5857_v31, 4  ;;  %14000 = vmatprep.mubr.msk.bf16.mxu0 %vm3154_vm4, %v12413_v39  ;;  %v5886_v41 = vrot.slane %v5884_v7, 5  ;;  %v12414_v15 = vcombine.low %v15357_v5, %v15358_v0  ;;  %14267 = vmatpush3.bf16.msra.mxu1 %v15251_v18  ;;  %v5853_v9 = vsel %vm16227_vm3, %v5848_v13, %v5852_v46  ;;  %v15361_v2 = vld [vmem:[#allocation2 + $0x3c] sm:$0xf]  ;;  %v15362_v33 = vld [vmem:[#allocation2 + $0x40] sm:$0xf] }
 0x282   : > { %14204 = vmatprep.mubr.msk.bf16.mxu1 %vm3154_vm4, %v12643_v34  ;;  %v5871_v59 = vor.u32 %v5870_v40, %v5867_v20  ;;  %v5889_v23 = vshrl.u32 %v5687_v45, 16  ;;  %v5892_v32 = vshll.u32 %v5687_v45, 16  ;;  %v5881_v24 = vor.u32 %v5880_v44, %v5876_v38  ;;  %14332 = vmatprep.subr.bf16.mxu1 %v15260_v37  ;;  %v5695_v29 = vld [vmem:[#allocation2 + $0x68] sm:$0x1]  ;;  %v5696_v13 = vld [vmem:[#allocation2 + $0x6c] sm:$0xf] }
 0x283   : > { %v5863_v52 = vsel %vm16227_vm3, %v5858_v53, %v5862_v57  ;;  %v5898_v61 = vshll.u32 %v5688_v54, 16  ;;  %v5902_v8 = vshrl.u32 %v5688_v54, 16  ;;  %v5908_v35 = vshll.u32 %v5689_v30, 16  ;;  %v5694_v57 = vld [vmem:[#allocation2 + $0x64] sm:$0xf]  ;;  %14061 = vmatpush3.bf16.msra.mxu0 %v15262_v42 }
 0x284   : > { %v12644_v10 = vcombine.low %v5853_v9, %v5863_v52  ;;  %v5872_v6 = vrot.slane %v5871_v59, 4  ;;  %v5891_v55 = vrot.slane %v5889_v23, 4  ;;  %v5894_v22 = vrot.slane %v5892_v32, 5  ;;  %v15263_v9 = vld [vmem:[#allocation6 + $0x28] sm:$0xff]   ;;  %v15363_v23 = vld [vmem:[#allocation2 + $0x48] sm:$0xf] }
 0x285   : > { %v5882_v50 = vrot.slane %v5881_v24, 4  ;;  %v5900_v21 = vrot.slane %v5898_v61, 5  ;;  %v5904_v36 = vrot.slane %v5902_v8, 4  ;;  %v12415_v18 = vcombine.low %v15359_v26, %v15360_v51  ;;  %v15364_v32 = vld [vmem:[#allocation2 + $0x4c] sm:$0xf]  ;;  %14062 = vmatprep.subr.bf16.mxu0 %v15263_v9 }
 0x286   : > { %14205 = vmatmul.mubr.msk.bf16.gmra.mrb[44].mxu1 %vm3154_vm4, %v12644_v10  ;;  %v5877_v1 = vsel %vm16227_vm3, %v5872_v6, %v5876_v38  ;;  %v5895_v12 = vor.u32 %v5894_v22, %v5891_v55  ;;  %v5913_v16 = vshrl.u32 %v5690_v25, 16  ;;  %v5910_v43 = vrot.slane %v5908_v35, 5  ;;  %v5698_v24 = vld [vmem:[#allocation2 + $0x74] sm:$0x1]  ;;  %v5699_v42 = vld [vmem:[#allocation2 + $0x78] sm:$0xf] }
 0x287   : > { %v5887_v47 = vsel %vm16227_vm3, %v5882_v50, %v5886_v41  ;;  %v5905_v48 = vor.u32 %v5904_v36, %v5900_v21  ;;  %v5916_v62 = vshll.u32 %v5690_v25, 16  ;;  %v5922_v39 = vshll.u32 %v5691_v17, 16  ;;  %14063 = vmatpush3.bf16.msra.mxu0 %v15263_v9  ;;  %v5705_v9 = vld [vmem:[#allocation2 + $0x90] sm:$0xf] }
 0x288   : > { %v12645_v46 = vcombine.low %v5877_v1, %v5887_v47  ;;  %14001 = vmatmul.mubr.msk.bf16.gmra.mrb[68].mxu0 %vm3154_vm4, %v12414_v15  ;;  %v5896_v60 = vrot.slane %v5895_v12, 4  ;;  %v5915_v49 = vrot.slane %v5913_v16, 4  ;;  %v5926_v19 = vshrl.u32 %v5691_v17, 16  ;;  %v5697_v15 = vld [vmem:[#allocation2 + $0x70] sm:$0xf] }
 0x289   : > { %v5906_v3 = vrot.slane %v5905_v48, 4  ;;  %14004 = vmatprep.mubr.msk.bf16.mxu0 %vm3154_vm4, %v12415_v18  ;;  %v5918_v56 = vrot.slane %v5916_v62, 5  ;;  %v5932_v14 = vshll.u32 %v5692_v11, 16  ;;  %v5924_v28 = vrot.slane %v5922_v39, 5  ;;  %v5700_v18 = vld [vmem:[#allocation2 + $0x7c] sm:$0xf] }
 0x28a   : > { %14208 = vmatprep.mubr.msk.bf16.mxu1 %vm3154_vm4, %v12645_v46  ;;  %v5901_v27 = vsel %vm16227_vm3, %v5896_v60, %v5900_v21  ;;  %v12416_v4 = vcombine.low %v15361_v2, %v15362_v33  ;;  %v5937_v31 = vshrl.u32 %v5693_v63, 16  ;;  %v5928_v45 = vrot.slane %v5926_v19, 4  ;;  %v15365_v11 = vld [vmem:[#allocation6 + $0x30] sm:$0xff]   ;;  %v15367_v62 = vld [vmem:[#allocation2 + $0x58] sm:$0xf] }
 0x28b   : > { %v5911_v20 = vsel %vm16227_vm3, %v5906_v3, %v5910_v43  ;;  %v5919_v7 = vor.u32 %v5918_v56, %v5915_v49  ;;  %v5934_v34 = vrot.slane %v5932_v14, 5  ;;  %v5940_v54 = vshll.u32 %v5693_v63, 16  ;;  %14128 = vmatprep.subr.bf16.mxu0 %v15365_v11  ;;  %v15366_v43 = vld [vmem:[#allocation2 + $0x54] sm:$0xf]  ;;  %v5701_v49 = vld [vmem:[#allocation2 + $0x80] sm:$0x1] }
 0x28c   : > { %v12646_v40 = vcombine.low %v5901_v27, %v5911_v20  ;;  %v5939_v38 = vrot.slane %v5937_v31, 4  ;;  %v5946_v53 = vshll.u32 %v5694_v57, 16  ;;  %v5929_v41 = vor.u32 %v5928_v45, %v5924_v28  ;;  %v5702_v27 = vld [vmem:[#allocation2 + $0x84] sm:$0xf]  ;;  %v5703_v45 = vld [vmem:[#allocation2 + $0x88] sm:$0xf] }
 0x28d   : > { %v5920_v44 = vrot.slane %v5919_v7, 4  ;;  %v5950_v5 = vshrl.u32 %v5694_v57, 16  ;;  %v5956_v0 = vshll.u32 %v5695_v29, 16  ;;  %v5942_v59 = vrot.slane %v5940_v54, 5 }
 0x28e   : > { %14209 = vmatmul.mubr.msk.bf16.gmra.mrb[48].mxu1 %vm3154_vm4, %v12646_v40  ;;  %v5948_v30 = vrot.slane %v5946_v53, 5  ;;  %v12417_v52 = vcombine.low %v15363_v23, %v15364_v32  ;;  %v5961_v61 = vshrl.u32 %v5696_v13, 16  ;;  %v5930_v25 = vrot.slane %v5929_v41, 4  ;;  %v15368_v40 = vld [vmem:[#allocation2 + $0x60] sm:$0xf] }
 0x28f   : > { %v5925_v8 = vsel %vm16227_vm3, %v5920_v44, %v5924_v28  ;;  %v5952_v10 = vrot.slane %v5950_v5, 4  ;;  %v5958_v6 = vrot.slane %v5956_v0, 5  ;;  %v5943_v55 = vor.u32 %v5942_v59, %v5939_v38  ;;  %v15369_v38 = vld [vmem:[#allocation2 + $0x64] sm:$0xf]  ;;  %v5704_v53 = vld [vmem:[#allocation2 + $0x8c] sm:$0x1] }
 0x290   : > { %14005 = vmatmul.mubr.msk.bf16.gmra.mrb[72].mxu0 %vm3154_vm4, %v12416_v4  ;;  %v5963_v22 = vrot.slane %v5961_v61, 4  ;;  %v5964_v17 = vshll.u32 %v5696_v13, 16  ;;  %v5970_v50 = vshll.u32 %v5697_v15, 16  ;;  %v5935_v21 = vsel %vm16227_vm3, %v5930_v25, %v5934_v34  ;;  %v5706_v25 = vld [vmem:[#allocation2 + $0x94] sm:$0xf] }
 0x291   : > { %v5953_v36 = vor.u32 %v5952_v10, %v5948_v30  ;;  %14008 = vmatprep.mubr.msk.bf16.mxu0 %vm3154_vm4, %v12417_v52  ;;  %v5974_v35 = vshrl.u32 %v5697_v15, 16  ;;  %v5980_v37 = vshll.u32 %v5698_v24, 16  ;;  %v12647_v1 = vcombine.low %v5925_v8, %v5935_v21 }
 0x292   : > { %v5944_v12 = vrot.slane %v5943_v55, 4  ;;  %v5966_v26 = vrot.slane %v5964_v17, 5  ;;  %v5972_v51 = vrot.slane %v5970_v50, 5  ;;  %v12418_v63 = vcombine.low %v15366_v43, %v15367_v62  ;;  %v15370_v55 = vld [vmem:[#allocation2 + $0x6c] sm:$0xf] }
 0x293   : > { %v5954_v16 = vrot.slane %v5953_v36, 4  ;;  %v5976_v47 = vrot.slane %v5974_v35, 4  ;;  %v5982_v48 = vrot.slane %v5980_v37, 5  ;;  %14212 = vmatprep.mubr.msk.bf16.mxu1 %vm3154_vm4, %v12647_v1  ;;  %v5985_v39 = vshrl.u32 %v5699_v42, 16  ;;  %v5707_v50 = vld [vmem:[#allocation2 + $0x98] sm:$0x1] }
 0x294   : > { %v5949_v46 = vsel %vm16227_vm3, %v5944_v12, %v5948_v30  ;;  %v5967_v60 = vor.u32 %v5966_v26, %v5963_v22  ;;  %v5988_v3 = vshll.u32 %v5699_v42, 16  ;;  %v5994_v14 = vshll.u32 %v5700_v18, 16  ;;  %v15371_v22 = vld [vmem:[#allocation2 + $0x70] sm:$0xf]  ;;  %v5708_v1 = vld [vmem:[#allocation2 + $0x9c] sm:$0xf] }
 0x295   : > { %v5959_v56 = vsel %vm16227_vm3, %v5954_v16, %v5958_v6  ;;  %v5977_v19 = vor.u32 %v5976_v47, %v5972_v51  ;;  %v5998_v57 = vshrl.u32 %v5700_v18, 16  ;;  %v5987_v33 = vrot.slane %v5985_v39, 4  ;;  %v5709_v43 = vld [vmem:[#allocation2 + $0xa0] sm:$0xf]  ;;  %v5710_v39 = vld [vmem:[#allocation2 + $0xa4] sm:$0x1] }
 0x296   : > { %v12648_v28 = vcombine.low %v5949_v46, %v5959_v56  ;;  %v5968_v2 = vrot.slane %v5967_v60, 4  ;;  %v5990_v4 = vrot.slane %v5988_v3, 5  ;;  %v5996_v31 = vrot.slane %v5994_v14, 5  ;;  %v15372_v46 = vld [vmem:[#allocation2 + $0x78] sm:$0xf] }
 0x297   : > { %v5978_v29 = vrot.slane %v5977_v19, 4  ;;  %v6000_v20 = vrot.slane %v5998_v57, 4  ;;  %v6004_v7 = vshll.u32 %v5701_v49, 16  ;;  %v12419_v54 = vcombine.low %v15368_v40, %v15369_v38  ;;  %v15373_v60 = vld [vmem:[#allocation2 + $0x7c] sm:$0xf] }
 0x298   : > { %14213 = vmatmul.mubr.msk.bf16.gmra.mrb[52].mxu1 %vm3154_vm4, %v12648_v28  ;;  %v5973_v34 = vsel %vm16227_vm3, %v5968_v2, %v5972_v51  ;;  %14009 = vmatmul.mubr.msk.bf16.gmra.mrb[76].mxu0 %vm3154_vm4, %v12418_v63  ;;  %v5991_v13 = vor.u32 %v5990_v4, %v5987_v33  ;;  %v6009_v44 = vshrl.u32 %v5702_v27, 16  ;;  %v6012_v15 = vshll.u32 %v5702_v27, 16  ;;  %v5712_v38 = vld [vmem:[#allocation2 + $0xac] sm:$0xf] }
 0x299   : > { %v5983_v41 = vsel %vm16227_vm3, %v5978_v29, %v5982_v48  ;;  %v6001_v5 = vor.u32 %v6000_v20, %v5996_v31  ;;  %v6006_v0 = vrot.slane %v6004_v7, 5  ;;  %14012 = vmatprep.mubr.msk.bf16.mxu0 %vm3154_vm4, %v12419_v54  ;;  %v6018_v32 = vshll.u32 %v5703_v45, 16  ;;  %v5711_v7 = vld [vmem:[#allocation2 + $0xa8] sm:$0xf] }
 0x29a   : > { %v12649_v59 = vcombine.low %v5973_v34, %v5983_v41  ;;  %v5992_v30 = vrot.slane %v5991_v13, 4  ;;  %v6011_v23 = vrot.slane %v6009_v44, 4  ;;  %v6014_v24 = vrot.slane %v6012_v15, 5  ;;  %v15374_v41 = vld [vmem:[#allocation2 + $0x84] sm:$0xf] }
 0x29b   : > { %v6002_v52 = vrot.slane %v6001_v5, 4  ;;  %v6022_v61 = vshrl.u32 %v5703_v45, 16  ;;  %v6028_v8 = vshll.u32 %v5704_v53, 16  ;;  %v6020_v6 = vrot.slane %v6018_v32, 5  ;;  %v15375_v5 = vld [vmem:[#allocation2 + $0x88] sm:$0xf] }
 0x29c   : > { %14216 = vmatprep.mubr.msk.bf16.mxu1 %vm3154_vm4, %v12649_v59  ;;  %v5997_v10 = vsel %vm16227_vm3, %v5992_v30, %v5996_v31  ;;  %v12420_v17 = vcombine.low %v15370_v55, %v15371_v22  ;;  %v6033_v21 = vshrl.u32 %v5705_v9, 16  ;;  %v6015_v35 = vor.u32 %v6014_v24, %v6011_v23  ;;  %v5713_v59 = vld [vmem:[#allocation2 + $0xb0] sm:$0x1] }
 0x29d   : > { %v6007_v36 = vsel %vm16227_vm3, %v6002_v52, %v6006_v0  ;;  %v6024_v37 = vrot.slane %v6022_v61, 4  ;;  %v6030_v42 = vrot.slane %v6028_v8, 5  ;;  %v6036_v51 = vshll.u32 %v5705_v9, 16  ;;  %v5714_v8 = vld [vmem:[#allocation2 + $0xb4] sm:$0xf] }
 0x29e   : > { %v12650_v12 = vcombine.low %v5997_v10, %v6007_v36  ;;  %v6035_v26 = vrot.slane %v6033_v21, 4  ;;  %v6042_v18 = vshll.u32 %v5706_v25, 16  ;;  %v6016_v11 = vrot.slane %v6015_v35, 4  ;;  %v5715_v36 = vld [vmem:[#allocation2 + $0xb8] sm:$0xf] }
 0x29f   : > { %v6025_v16 = vor.u32 %v6024_v37, %v6020_v6  ;;  %v6046_v47 = vshrl.u32 %v5706_v25, 16  ;;  %v6052_v48 = vshll.u32 %v5707_v50, 16  ;;  %v6038_v62 = vrot.slane %v6036_v51, 5 }
 0x2a0   : > { %14217 = vmatmul.mubr.msk.bf16.gmra.mrb[56].mxu1 %vm3154_vm4, %v12650_v12  ;;  %14013 = vmatmul.mubr.msk.bf16.gmra.mrb[80].mxu0 %vm3154_vm4, %v12420_v17  ;;  %v6044_v63 = vrot.slane %v6042_v18, 5  ;;  %v12421_v49 = vcombine.low %v15372_v46, %v15373_v60  ;;  %v6057_v3 = vshrl.u32 %v5708_v1, 16  ;;  %v6021_v56 = vsel %vm16227_vm3, %v6016_v11, %v6020_v6 }
 0x2a1   : > { %v6026_v19 = vrot.slane %v6025_v16, 4  ;;  %v6048_v14 = vrot.slane %v6046_v47, 4  ;;  %v6054_v57 = vrot.slane %v6052_v48, 5  ;;  %v6039_v27 = vor.u32 %v6038_v62, %v6035_v26  ;;  %v5716_v26 = vld [vmem:[#allocation2 + $0xbc] sm:$0x1] }
 0x2a2   : > { %14016 = vmatprep.mubr.msk.bf16.mxu0 %vm3154_vm4, %v12421_v49  ;;  %v6059_v28 = vrot.slane %v6057_v3, 4  ;;  %v6060_v2 = vshll.u32 %v5708_v1, 16  ;;  %v6066_v33 = vshll.u32 %v5709_v43, 16  ;;  %v6070_v31 = vshrl.u32 %v5709_v43, 16  ;;  %v15377_v1 = vld [vmem:[#allocation2 + $0x94] sm:$0xf] }
 0x2a3   : > { %v6031_v4 = vsel %vm16227_vm3, %v6026_v19, %v6030_v42  ;;  %v6049_v29 = vor.u32 %v6048_v14, %v6044_v63  ;;  %v6076_v20 = vshll.u32 %v5710_v39, 16  ;;  %v6040_v34 = vrot.slane %v6039_v27, 4  ;;  %v15376_v42 = vld [vmem:[#allocation2 + $0x90] sm:$0xf]  ;;  %v5717_v48 = vld [vmem:[#allocation2 + $0xc0] sm:$0xf] }
 0x2a4   : > { %v12651_v45 = vcombine.low %v6021_v56, %v6031_v4  ;;  %v6062_v13 = vrot.slane %v6060_v2, 5  ;;  %v6068_v40 = vrot.slane %v6066_v33, 5  ;;  %v6072_v53 = vrot.slane %v6070_v31, 4  ;;  %v5718_v56 = vld [vmem:[#allocation2 + $0xc4] sm:$0xf] }
 0x2a5   : > { %v6050_v54 = vrot.slane %v6049_v29, 4  ;;  %v6078_v44 = vrot.slane %v6076_v20, 5  ;;  %v12422_v0 = vcombine.low %v15374_v41, %v15375_v5  ;;  %v6045_v15 = vsel %vm16227_vm3, %v6040_v34, %v6044_v63  ;;  %v15379_v27 = vld [vmem:[#allocation2 + $0xa0] sm:$0xf]  ;;  %v5719_v2 = vld [vmem:[#allocation2 + $0xc8] sm:$0x1] }
 0x2a6   : > { %14220 = vmatprep.mubr.msk.bf16.mxu1 %vm3154_vm4, %v12651_v45  ;;  %v6063_v9 = vor.u32 %v6062_v13, %v6059_v28  ;;  %v6081_v30 = vshrl.u32 %v5711_v7, 16  ;;  %v6084_v23 = vshll.u32 %v5711_v7, 16  ;;  %v6073_v52 = vor.u32 %v6072_v53, %v6068_v40  ;;  %v5720_v7 = vld [vmem:[#allocation2 + $0xe4] sm:$0xf]  ;;  %v5721_v41 = vld [vmem:[#allocation2 + $0xe8] sm:$0xf] }
 0x2a7   : > { %v6055_v32 = vsel %vm16227_vm3, %v6050_v54, %v6054_v57  ;;  %v6090_v24 = vshll.u32 %v5712_v38, 16  ;;  %v6094_v61 = vshrl.u32 %v5712_v38, 16  ;;  %v6100_v21 = vshll.u32 %v5713_v59, 16  ;;  %v15378_v57 = vld [vmem:[#allocation2 + $0x9c] sm:$0xf] }
 0x2a8   : > { %v12652_v25 = vcombine.low %v6045_v15, %v6055_v32  ;;  %v6064_v10 = vrot.slane %v6063_v9, 4  ;;  %14017 = vmatmul.mubr.msk.bf16.gmra.mrb[84].mxu0 %vm3154_vm4, %v12422_v0  ;;  %v6083_v6 = vrot.slane %v6081_v30, 4  ;;  %v6086_v55 = vrot.slane %v6084_v23, 5  ;;  %v15380_v15 = vld [vmem:[#allocation2 + $0xa8] sm:$0xf] }
 0x2a9   : > { %v6074_v22 = vrot.slane %v6073_v52, 4  ;;  %v6092_v17 = vrot.slane %v6090_v24, 5  ;;  %v6096_v50 = vrot.slane %v6094_v61, 4  ;;  %v12423_v12 = vcombine.low %v15376_v42, %v15377_v1  ;;  %v15381_v9 = vld [vmem:[#allocation2 + $0xac] sm:$0xf] }
 0x2aa   : > { %14221 = vmatmul.mubr.msk.bf16.gmra.mrb[60].mxu1 %vm3154_vm4, %v12652_v25  ;;  %v6069_v35 = vsel %vm16227_vm3, %v6064_v10, %v6068_v40  ;;  %v6087_v37 = vor.u32 %v6086_v55, %v6083_v6  ;;  %v6105_v51 = vshrl.u32 %v5714_v8, 16  ;;  %v6102_v16 = vrot.slane %v6100_v21, 5  ;;  %v5722_v30 = vld [vmem:[#allocation2 + $0xec] sm:$0x1]  ;;  %v5723_v21 = vld [vmem:[#allocation2 + $0xf0] sm:$0xf] }
 0x2ab   : > { %v6079_v18 = vsel %vm16227_vm3, %v6074_v22, %v6078_v44  ;;  %v6097_v11 = vor.u32 %v6096_v50, %v6092_v17  ;;  %v6108_v47 = vshll.u32 %v5714_v8, 16  ;;  %14020 = vmatprep.mubr.msk.bf16.mxu0 %vm3154_vm4, %v12423_v12  ;;  %v6114_v46 = vshll.u32 %v5715_v36, 16  ;;  %v5724_v1 = vld [vmem:[#allocation2 + $0xf4] sm:$0xf] }
 0x2ac   : > { %v12653_v43 = vcombine.low %v6069_v35, %v6079_v18  ;;  %v6088_v62 = vrot.slane %v6087_v37, 4  ;;  %v6107_v63 = vrot.slane %v6105_v51, 4  ;;  %v6118_v39 = vshrl.u32 %v5715_v36, 16  ;;  %v15382_v18 = vld [vmem:[#allocation2 + $0xb4] sm:$0xf] }
 0x2ad   : > { %v6098_v60 = vrot.slane %v6097_v11, 4  ;;  %v6110_v49 = vrot.slane %v6108_v47, 5  ;;  %v6124_v3 = vshll.u32 %v5716_v26, 16  ;;  %v6116_v14 = vrot.slane %v6114_v46, 5  ;;  %v15383_v11 = vld [vmem:[#allocation2 + $0xb8] sm:$0xf] }
 0x2ae   : > { %14224 = vmatprep.mubr.msk.bf16.mxu1 %vm3154_vm4, %v12653_v43  ;;  %v6093_v19 = vsel %vm16227_vm3, %v6088_v62, %v6092_v17  ;;  %v12424_v28 = vcombine.low %v15378_v57, %v15379_v27  ;;  %v6129_v33 = vshrl.u32 %v5717_v48, 16  ;;  %v6120_v31 = vrot.slane %v6118_v39, 4  ;;  %v5725_v43 = vld [vmem:[#allocation2 + $0xf8] sm:$0x1]  ;;  %v5727_v27 = vld [vmem:[#allocation2 + $0x100] sm:$0xf] }
 0x2af   : > { %v6103_v4 = vsel %vm16227_vm3, %v6098_v60, %v6102_v16  ;;  %v6111_v29 = vor.u32 %v6110_v49, %v6107_v63  ;;  %v6126_v20 = vrot.slane %v6124_v3, 5  ;;  %v6132_v13 = vshll.u32 %v5717_v48, 16  ;;  %v5726_v3 = vld [vmem:[#allocation2 + $0xfc] sm:$0xf] }
 0x2b0   : > { %v12654_v45 = vcombine.low %v6093_v19, %v6103_v4  ;;  %14021 = vmatmul.mubr.msk.bf16.gmra.mrb[88].mxu0 %vm3154_vm4, %v12424_v28  ;;  %v6131_v34 = vrot.slane %v6129_v33, 4  ;;  %v6138_v40 = vshll.u32 %v5718_v56, 16  ;;  %v6121_v54 = vor.u32 %v6120_v31, %v6116_v14 }
 0x2b1   : > { %v6112_v38 = vrot.slane %v6111_v29, 4  ;;  %v6142_v53 = vshrl.u32 %v5718_v56, 16  ;;  %v6148_v44 = vshll.u32 %v5719_v2, 16  ;;  %v6134_v5 = vrot.slane %v6132_v13, 5 }
 0x2b2   : > { %14225 = vmatmul.mubr.msk.bf16.gmra.mrb[0].mxu1 %vm3154_vm4, %v12654_v45  ;;  %v6140_v0 = vrot.slane %v6138_v40, 5  ;;  %v12425_v59 = vcombine.low %v15380_v15, %v15381_v9  ;;  %v6153_v23 = vshrl.u32 %v5720_v7, 16  ;;  %v6122_v52 = vrot.slane %v6121_v54, 4 }
 0x2b3   : > { %v6117_v32 = vsel %vm16227_vm3, %v6112_v38, %v6116_v14  ;;  %v6144_v24 = vrot.slane %v6142_v53, 4  ;;  %v6150_v61 = vrot.slane %v6148_v44, 5  ;;  %v6135_v8 = vor.u32 %v6134_v5, %v6131_v34  ;;  %v5729_v5 = vld [vmem:[#allocation2 + $0x108] sm:$0xf] }
 0x2b4   : > { %14024 = vmatprep.mubr.msk.bf16.mxu0 %vm3154_vm4, %v12425_v59  ;;  %v6155_v25 = vrot.slane %v6153_v23, 4  ;;  %v6156_v10 = vshll.u32 %v5720_v7, 16  ;;  %v6162_v6 = vshll.u32 %v5721_v41, 16  ;;  %v6127_v55 = vsel %vm16227_vm3, %v6122_v52, %v6126_v20  ;;  %v5728_v20 = vld [vmem:[#allocation2 + $0x104] sm:$0x1] }
 0x2b5   : > { %v6145_v22 = vor.u32 %v6144_v24, %v6140_v0  ;;  %v6166_v17 = vshrl.u32 %v5721_v41, 16  ;;  %v6172_v50 = vshll.u32 %v5722_v30, 16  ;;  %v12655_v36 = vcombine.low %v6117_v32, %v6127_v55  ;;  %v5730_v30 = vld [vmem:[#allocation2 + $0x10c] sm:$0xf]  ;;  %v15384_v52 = vld [vmem:[#allocation2 + $0xd8] sm:$0xf] }
 0x2b6   : > { %v6136_v35 = vrot.slane %v6135_v8, 4  ;;  %v6158_v37 = vrot.slane %v6156_v10, 5  ;;  %v6164_v42 = vrot.slane %v6162_v6, 5  ;;  %v12426_v16 = vcombine.low %v15382_v18, %v15383_v11  ;;  %v15385_v24 = vld [vmem:[#allocation2 + $0xdc] sm:$0xf] }
 0x2b7   : > { %v6146_v12 = vrot.slane %v6145_v22, 4  ;;  %v6168_v26 = vrot.slane %v6166_v17, 4  ;;  %v6174_v51 = vrot.slane %v6172_v50, 5  ;;  %14228 = vmatprep.mubr.msk.bf16.mxu1 %vm3154_vm4, %v12655_v36  ;;  %v6177_v62 = vshrl.u32 %v5723_v21, 16  ;;  %v15386_v8 = vld [vmem:[#allocation2 + $0xe4] sm:$0xf] }
 0x2b8   : > { %v6141_v47 = vsel %vm16227_vm3, %v6136_v35, %v6140_v0  ;;  %v6159_v48 = vor.u32 %v6158_v37, %v6155_v25  ;;  %v6180_v63 = vshll.u32 %v5723_v21, 16  ;;  %14025 = vmatmul.mubr.msk.bf16.gmra.mrb[92].mxu0 %vm3154_vm4, %v12426_v16  ;;  %v6186_v49 = vshll.u32 %v5724_v1, 16  ;;  %v15387_v25 = vld [vmem:[#allocation2 + $0xe8] sm:$0xf]  ;;  %v5731_v6 = vld [vmem:[#allocation2 + $0x110] sm:$0x1] }
 0x2b9   : > { %v6151_v46 = vsel %vm16227_vm3, %v6146_v12, %v6150_v61  ;;  %v6169_v60 = vor.u32 %v6168_v26, %v6164_v42  ;;  %v6190_v39 = vshrl.u32 %v5724_v1, 16  ;;  %v6179_v14 = vrot.slane %v6177_v62, 4  ;;  %v5733_v18 = vld [vmem:[#allocation2 + $0x118] sm:$0xf] }
 0x2ba   : > { %v12656_v56 = vcombine.low %v6141_v47, %v6151_v46  ;;  %v6160_v19 = vrot.slane %v6159_v48, 4  ;;  %v6182_v57 = vrot.slane %v6180_v63, 5  ;;  %v6188_v2 = vrot.slane %v6186_v49, 5  ;;  %v15388_v48 = vld [vmem:[#allocation2 + $0xf0] sm:$0xf] }
 0x2bb   : > { %v6170_v28 = vrot.slane %v6169_v60, 4  ;;  %v6192_v33 = vrot.slane %v6190_v39, 4  ;;  %v6196_v4 = vshll.u32 %v5725_v43, 16  ;;  %v6201_v7 = vshrl.u32 %v5726_v3, 16  ;;  %v15389_v43 = vld [vmem:[#allocation2 + $0xf4] sm:$0xf] }
 0x2bc   : > { %14229 = vmatmul.mubr.msk.bf16.gmra.mrb[4].mxu1 %vm3154_vm4, %v12656_v56  ;;  %v6165_v29 = vsel %vm16227_vm3, %v6160_v19, %v6164_v42  ;;  %v6183_v31 = vor.u32 %v6182_v57, %v6179_v14  ;;  %v6204_v45 = vshll.u32 %v5726_v3, 16  ;;  %v6210_v38 = vshll.u32 %v5727_v27, 16  ;;  %v5732_v42 = vld [vmem:[#allocation2 + $0x114] sm:$0xf]  ;;  %v5734_v63 = vld [vmem:[#allocation2 + $0x11c] sm:$0x1] }
 0x2bd   : > { %v6175_v34 = vsel %vm16227_vm3, %v6170_v28, %v6174_v51  ;;  %v6193_v13 = vor.u32 %v6192_v33, %v6188_v2  ;;  %v6198_v40 = vrot.slane %v6196_v4, 5  ;;  %v6203_v44 = vrot.slane %v6201_v7, 4  ;;  %v5735_v33 = vld [vmem:[#allocation2 + $0x120] sm:$0xf]  ;;  %v5736_v7 = vld [vmem:[#allocation2 + $0x124] sm:$0xf] }
 0x2be   : > { %v12657_v54 = vcombine.low %v6165_v29, %v6175_v34  ;;  %v6184_v53 = vrot.slane %v6183_v31, 4  ;;  %v6206_v41 = vrot.slane %v6204_v45, 5  ;;  %v6212_v15 = vrot.slane %v6210_v38, 5  ;;  %v15391_v38 = vld [vmem:[#allocation2 + $0x100] sm:$0xf] }
 0x2bf   : > { %v6194_v0 = vrot.slane %v6193_v13, 4  ;;  %v6214_v9 = vshrl.u32 %v5727_v27, 16  ;;  %v6220_v59 = vshll.u32 %v5728_v20, 16  ;;  %v12427_v61 = vcombine.low %v15384_v52, %v15385_v24 }
 0x2c0   : > { %14232 = vmatprep.mubr.msk.bf16.mxu1 %vm3154_vm4, %v12657_v54  ;;  %v6189_v23 = vsel %vm16227_vm3, %v6184_v53, %v6188_v2  ;;  %v6207_v32 = vor.u32 %v6206_v41, %v6203_v44  ;;  %v12428_v10 = vcombine.low %v15386_v8, %v15387_v25  ;;  %v6225_v50 = vshrl.u32 %v5729_v5, 16  ;;  %v5737_v41 = vld [vmem:[#allocation2 + $0x128] sm:$0x1] }
 0x2c1   : > { %v6199_v55 = vsel %vm16227_vm3, %v6194_v0, %v6198_v40  ;;  %v6216_v22 = vrot.slane %v6214_v9, 4  ;;  %v6222_v17 = vrot.slane %v6220_v59, 5  ;;  %14028 = vmatprep.mubr.msk.bf16.mxu0 %vm3154_vm4, %v12427_v61  ;;  %v6228_v35 = vshll.u32 %v5729_v5, 16  ;;  %v15390_v40 = vld [vmem:[#allocation2 + $0xfc] sm:$0xf] }
 0x2c2   : > { %v12658_v21 = vcombine.low %v6189_v23, %v6199_v55  ;;  %v6208_v36 = vrot.slane %v6207_v32, 4  ;;  %v6234_v37 = vshll.u32 %v5730_v30, 16  ;;  %14029 = vmatmul.mubr.msk.bf16.gmra.mrb[96].mxu0 %vm3154_vm4, %v12428_v10  ;;  %v6227_v12 = vrot.slane %v6225_v50, 4  ;;  %v5738_v23 = vld [vmem:[#allocation2 + $0x12c] sm:$0xf] }
 0x2c3   : > { %v6217_v1 = vor.u32 %v6216_v22, %v6212_v15  ;;  %v6238_v26 = vshrl.u32 %v5730_v30, 16  ;;  %v6244_v51 = vshll.u32 %v5731_v6, 16  ;;  %v6230_v16 = vrot.slane %v6228_v35, 5  ;;  %v5739_v55 = vld [vmem:[#allocation2 + $0x130] sm:$0xf] }
 0x2c4   : > { %14233 = vmatmul.mubr.msk.bf16.gmra.mrb[8].mxu1 %vm3154_vm4, %v12658_v21  ;;  %v6213_v11 = vsel %vm16227_vm3, %v6208_v36, %v6212_v15  ;;  %v6236_v47 = vrot.slane %v6234_v37, 5  ;;  %v12429_v62 = vcombine.low %v15388_v48, %v15389_v43  ;;  %v6249_v39 = vshrl.u32 %v5732_v42, 16  ;;  %v15392_v50 = vld [vmem:[#allocation2 + $0x108] sm:$0xf]  ;;  %v15393_v21 = vld [vmem:[#allocation2 + $0x10c] sm:$0xf] }
 0x2c5   : > { %v6218_v46 = vrot.slane %v6217_v1, 4  ;;  %v6240_v60 = vrot.slane %v6238_v26, 4  ;;  %v6246_v49 = vrot.slane %v6244_v51, 5  ;;  %v6231_v3 = vor.u32 %v6230_v16, %v6227_v12  ;;  %v5740_v35 = vld [vmem:[#allocation2 + $0x134] sm:$0x1] }
 0x2c6   : > { %14032 = vmatprep.mubr.msk.bf16.mxu0 %vm3154_vm4, %v12429_v62  ;;  %v6252_v56 = vshll.u32 %v5732_v42, 16  ;;  %v6258_v19 = vshll.u32 %v5733_v18, 16  ;;  %v6262_v14 = vshrl.u32 %v5733_v18, 16  ;;  %v6251_v28 = vrot.slane %v6249_v39, 4  ;;  %v5741_v51 = vld [vmem:[#allocation2 + $0x138] sm:$0xf] }
 0x2c7   : > { %v6223_v57 = vsel %vm16227_vm3, %v6218_v46, %v6222_v17  ;;  %v6241_v27 = vor.u32 %v6240_v60, %v6236_v47  ;;  %v6268_v2 = vshll.u32 %v5734_v63, 16  ;;  %v6232_v29 = vrot.slane %v6231_v3, 4  ;;  %v5742_v46 = vld [vmem:[#allocation2 + $0x13c] sm:$0xf]  ;;  %v15394_v39 = vld [vmem:[#allocation2 + $0x114] sm:$0xf] }
 0x2c8   : > { %v12659_v4 = vcombine.low %v6213_v11, %v6223_v57  ;;  %v6254_v31 = vrot.slane %v6252_v56, 5  ;;  %v6260_v20 = vrot.slane %v6258_v19, 5  ;;  %v6264_v34 = vrot.slane %v6262_v14, 4  ;;  %v15395_v3 = vld [vmem:[#allocation2 + $0x118] sm:$0xf] }
 0x2c9   : > { %v6242_v45 = vrot.slane %v6241_v27, 4  ;;  %v6270_v13 = vrot.slane %v6268_v2, 5  ;;  %v12430_v54 = vcombine.low %v15390_v40, %v15391_v38  ;;  %v6237_v53 = vsel %vm16227_vm3, %v6232_v29, %v6236_v47  ;;  %v5743_v19 = vld [vmem:[#allocation2 + $0x140] sm:$0x1]  ;;  %v5745_v40 = vld [vmem:[#allocation2 + $0x148] sm:$0xf] }
 0x2ca   : > { %14236 = vmatprep.mubr.msk.bf16.mxu1 %vm3154_vm4, %v12659_v4  ;;  %v6255_v44 = vor.u32 %v6254_v31, %v6251_v28  ;;  %v6273_v5 = vshrl.u32 %v5735_v33, 16  ;;  %v6276_v0 = vshll.u32 %v5735_v33, 16  ;;  %v6265_v9 = vor.u32 %v6264_v34, %v6260_v20  ;;  %v5744_v33 = vld [vmem:[#allocation2 + $0x144] sm:$0xf] }
 0x2cb   : > { %v6247_v15 = vsel %vm16227_vm3, %v6242_v45, %v6246_v49  ;;  %14033 = vmatmul.mubr.msk.bf16.gmra.mrb[100].mxu0 %vm3154_vm4, %v12430_v54  ;;  %v6282_v59 = vshll.u32 %v5736_v7, 16  ;;  %v6286_v30 = vshrl.u32 %v5736_v7, 16  ;;  %v6292_v6 = vshll.u32 %v5737_v41, 16 }
 0x2cc   : > { %v12660_v32 = vcombine.low %v6237_v53, %v6247_v15  ;;  %v6256_v52 = vrot.slane %v6255_v44, 4  ;;  %v6275_v24 = vrot.slane %v6273_v5, 4  ;;  %v6278_v61 = vrot.slane %v6276_v0, 5  ;;  %v15396_v53 = vld [vmem:[#allocation2 + $0x120] sm:$0xf] }
 0x2cd   : > { %v6266_v8 = vrot.slane %v6265_v9, 4  ;;  %v6284_v25 = vrot.slane %v6282_v59, 5  ;;  %v6288_v10 = vrot.slane %v6286_v30, 4  ;;  %v12431_v36 = vcombine.low %v15392_v50, %v15393_v21  ;;  %v15397_v44 = vld [vmem:[#allocation2 + $0x124] sm:$0xf] }
 0x2ce   : > { %14237 = vmatmul.mubr.msk.bf16.gmra.mrb[12].mxu1 %vm3154_vm4, %v12660_v32  ;;  %v6261_v22 = vsel %vm16227_vm3, %v6256_v52, %v6260_v20  ;;  %v6279_v17 = vor.u32 %v6278_v61, %v6275_v24  ;;  %v6297_v37 = vshrl.u32 %v5738_v23, 16  ;;  %v6294_v12 = vrot.slane %v6292_v6, 5  ;;  %v5746_v5 = vld [vmem:[#allocation2 + $0x14c] sm:$0x1]  ;;  %v5747_v6 = vld [vmem:[#allocation2 + $0x150] sm:$0xf] }
 0x2cf   : > { %v6271_v42 = vsel %vm16227_vm3, %v6266_v8, %v6270_v13  ;;  %v6289_v1 = vor.u32 %v6288_v10, %v6284_v25  ;;  %v6300_v26 = vshll.u32 %v5738_v23, 16  ;;  %14036 = vmatprep.mubr.msk.bf16.mxu0 %vm3154_vm4, %v12431_v36  ;;  %v6306_v47 = vshll.u32 %v5739_v55, 16  ;;  %v5748_v21 = vld [vmem:[#allocation2 + $0x154] sm:$0xf] }
 0x2d0   : > { %v12661_v18 = vcombine.low %v6261_v22, %v6271_v42  ;;  %v6280_v11 = vrot.slane %v6279_v17, 4  ;;  %v6299_v16 = vrot.slane %v6297_v37, 4  ;;  %v6310_v62 = vshrl.u32 %v5739_v55, 16  ;;  %v15398_v42 = vld [vmem:[#allocation2 + $0x12c] sm:$0xf] }
 0x2d1   : > { %v6290_v48 = vrot.slane %v6289_v1, 4  ;;  %v6302_v43 = vrot.slane %v6300_v26, 5  ;;  %v6316_v63 = vshll.u32 %v5740_v35, 16  ;;  %v6308_v49 = vrot.slane %v6306_v47, 5  ;;  %v15399_v1 = vld [vmem:[#allocation2 + $0x130] sm:$0xf] }
 0x2d2   : > { %14240 = vmatprep.mubr.msk.bf16.mxu1 %vm3154_vm4, %v12661_v18  ;;  %v6285_v60 = vsel %vm16227_vm3, %v6280_v11, %v6284_v25  ;;  %v12432_v56 = vcombine.low %v15394_v39, %v15395_v3  ;;  %v6321_v14 = vshrl.u32 %v5741_v51, 16  ;;  %v6312_v28 = vrot.slane %v6310_v62, 4  ;;  %v5749_v18 = vld [vmem:[#allocation2 + $0x158] sm:$0x1] }
 0x2d3   : > { %v6295_v57 = vsel %vm16227_vm3, %v6290_v48, %v6294_v12  ;;  %v6303_v27 = vor.u32 %v6302_v43, %v6299_v16  ;;  %v6318_v2 = vrot.slane %v6316_v63, 5  ;;  %v6324_v31 = vshll.u32 %v5741_v51, 16  ;;  %v5750_v63 = vld [vmem:[#allocation2 + $0x15c] sm:$0xf] }
 0x2d4   : > { %v12662_v4 = vcombine.low %v6285_v60, %v6295_v57  ;;  %14037 = vmatmul.mubr.msk.bf16.gmra.mrb[104].mxu0 %vm3154_vm4, %v12432_v56  ;;  %v6323_v29 = vrot.slane %v6321_v14, 4  ;;  %v6330_v20 = vshll.u32 %v5742_v46, 16  ;;  %v6313_v45 = vor.u32 %v6312_v28, %v6308_v49  ;;  %v5751_v57 = vld [vmem:[#allocation2 + $0x160] sm:$0xf] }
 0x2d5   : > { %v6304_v7 = vrot.slane %v6303_v27, 4  ;;  %v6334_v34 = vshrl.u32 %v5742_v46, 16  ;;  %v6340_v13 = vshll.u32 %v5743_v19, 16  ;;  %v6326_v38 = vrot.slane %v6324_v31, 5 }
 0x2d6   : > { %14241 = vmatmul.mubr.msk.bf16.gmra.mrb[16].mxu1 %vm3154_vm4, %v12662_v4  ;;  %v6332_v54 = vrot.slane %v6330_v20, 5  ;;  %v12433_v41 = vcombine.low %v15396_v53, %v15397_v44  ;;  %v6345_v0 = vshrl.u32 %v5744_v33, 16  ;;  %v6314_v9 = vrot.slane %v6313_v45, 4 }
 0x2d7   : > { %v6309_v15 = vsel %vm16227_vm3, %v6304_v7, %v6308_v49  ;;  %v6336_v59 = vrot.slane %v6334_v34, 4  ;;  %v6342_v30 = vrot.slane %v6340_v13, 5  ;;  %v6327_v23 = vor.u32 %v6326_v38, %v6323_v29  ;;  %v5752_v29 = vld [vmem:[#allocation2 + $0x164] sm:$0x1]  ;;  %v5753_v13 = vld [vmem:[#allocation2 + $0x168] sm:$0xf] }
 0x2d8   : > { %14040 = vmatprep.mubr.msk.bf16.mxu0 %vm3154_vm4, %v12433_v41  ;;  %v6347_v32 = vrot.slane %v6345_v0, 4  ;;  %v6348_v52 = vshll.u32 %v5744_v33, 16  ;;  %v6354_v24 = vshll.u32 %v5745_v40, 16  ;;  %v6319_v61 = vsel %vm16227_vm3, %v6314_v9, %v6318_v2  ;;  %v15400_v2 = vld [vmem:[#allocation2 + $0x138] sm:$0xf] }
 0x2d9   : > { %v6337_v8 = vor.u32 %v6336_v59, %v6332_v54  ;;  %v6358_v25 = vshrl.u32 %v5745_v40, 16  ;;  %v6364_v10 = vshll.u32 %v5746_v5, 16  ;;  %v12663_v55 = vcombine.low %v6309_v15, %v6319_v61  ;;  %v15401_v33 = vld [vmem:[#allocation2 + $0x13c] sm:$0xf]  ;;  %v5754_v15 = vld [vmem:[#allocation2 + $0x16c] sm:$0xf] }
 0x2da   : > { %v6328_v22 = vrot.slane %v6327_v23, 4  ;;  %v6350_v17 = vrot.slane %v6348_v52, 5  ;;  %v6356_v50 = vrot.slane %v6354_v24, 5  ;;  %v12434_v12 = vcombine.low %v15398_v42, %v15399_v1  ;;  %v15403_v23 = vld [vmem:[#allocation2 + $0x148] sm:$0xf] }
 0x2db   : > { %v6338_v36 = vrot.slane %v6337_v8, 4  ;;  %v6360_v35 = vrot.slane %v6358_v25, 4  ;;  %v6366_v37 = vrot.slane %v6364_v10, 5  ;;  %14244 = vmatprep.mubr.msk.bf16.mxu1 %vm3154_vm4, %v12663_v55  ;;  %v6369_v11 = vshrl.u32 %v5747_v6, 16  ;;  %v5755_v52 = vld [vmem:[#allocation2 + $0x170] sm:$0x1] }
 0x2dc   : > { %v6333_v26 = vsel %vm16227_vm3, %v6328_v22, %v6332_v54  ;;  %v6351_v51 = vor.u32 %v6350_v17, %v6347_v32  ;;  %v6372_v16 = vshll.u32 %v5747_v6, 16  ;;  %14041 = vmatmul.mubr.msk.bf16.gmra.mrb[108].mxu0 %vm3154_vm4, %v12434_v12  ;;  %v6378_v43 = vshll.u32 %v5748_v21, 16  ;;  %v5756_v6 = vld [vmem:[#allocation2 + $0x174] sm:$0xf]  ;;  %v5757_v42 = vld [vmem:[#allocation2 + $0x178] sm:$0xf] }
 0x2dd   : > { %v6343_v47 = vsel %vm16227_vm3, %v6338_v36, %v6342_v30  ;;  %v6361_v48 = vor.u32 %v6360_v35, %v6356_v50  ;;  %v6382_v62 = vshrl.u32 %v5748_v21, 16  ;;  %v6371_v49 = vrot.slane %v6369_v11, 4  ;;  %v15402_v30 = vld [vmem:[#allocation2 + $0x144] sm:$0xf]  ;;  %v5758_v11 = vld [vmem:[#allocation2 + $0x17c] sm:$0x1] }
 0x2de   : > { %v12664_v46 = vcombine.low %v6333_v26, %v6343_v47  ;;  %v6352_v60 = vrot.slane %v6351_v51, 4  ;;  %v6374_v39 = vrot.slane %v6372_v16, 5  ;;  %v6380_v56 = vrot.slane %v6378_v43, 5  ;;  %v15404_v26 = vld [vmem:[#allocation2 + $0x150] sm:$0xf] }
 0x2df   : > { %v6362_v3 = vrot.slane %v6361_v48, 4  ;;  %v6384_v19 = vrot.slane %v6382_v62, 4  ;;  %v6388_v14 = vshll.u32 %v5749_v18, 16  ;;  %v12435_v4 = vcombine.low %v15400_v2, %v15401_v33  ;;  %v15405_v51 = vld [vmem:[#allocation2 + $0x154] sm:$0xf] }
 0x2e0   : > { %14245 = vmatmul.mubr.msk.bf16.gmra.mrb[20].mxu1 %vm3154_vm4, %v12664_v46  ;;  %v6357_v27 = vsel %vm16227_vm3, %v6352_v60, %v6356_v50  ;;  %v6375_v28 = vor.u32 %v6374_v39, %v6371_v49  ;;  %v6393_v31 = vshrl.u32 %v5750_v63, 16  ;;  %v6396_v34 = vshll.u32 %v5750_v63, 16  ;;  %v5760_v33 = vld [vmem:[#allocation2 + $0x184] sm:$0xf] }
 0x2e1   : > { %v6367_v20 = vsel %vm16227_vm3, %v6362_v3, %v6366_v37  ;;  %v6385_v7 = vor.u32 %v6384_v19, %v6380_v56  ;;  %v6390_v45 = vrot.slane %v6388_v14, 5  ;;  %14044 = vmatprep.mubr.msk.bf16.mxu0 %vm3154_vm4, %v12435_v4  ;;  %v6402_v53 = vshll.u32 %v5751_v57, 16  ;;  %v5759_v14 = vld [vmem:[#allocation2 + $0x180] sm:$0xf] }
 0x2e2   : > { %v12665_v40 = vcombine.low %v6357_v27, %v6367_v20  ;;  %v6376_v38 = vrot.slane %v6375_v28, 4  ;;  %v6395_v54 = vrot.slane %v6393_v31, 4  ;;  %v6398_v41 = vrot.slane %v6396_v34, 5  ;;  %v15406_v20 = vld [vmem:[#allocation2 + $0x15c] sm:$0xf] }
 0x2e3   : > { %v6386_v44 = vrot.slane %v6385_v7, 4  ;;  %v6406_v5 = vshrl.u32 %v5751_v57, 16  ;;  %v6412_v0 = vshll.u32 %v5752_v29, 16  ;;  %v6404_v59 = vrot.slane %v6402_v53, 5  ;;  %v15407_v7 = vld [vmem:[#allocation2 + $0x160] sm:$0xf] }
 0x2e4   : > { %14248 = vmatprep.mubr.msk.bf16.mxu1 %vm3154_vm4, %v12665_v40  ;;  %v6381_v9 = vsel %vm16227_vm3, %v6376_v38, %v6380_v56  ;;  %v12436_v32 = vcombine.low %v15402_v30, %v15403_v23  ;;  %v6417_v24 = vshrl.u32 %v5753_v13, 16  ;;  %v6399_v8 = vor.u32 %v6398_v41, %v6395_v54  ;;  %v5761_v40 = vld [vmem:[#allocation2 + $0x188] sm:$0x1] }
 0x2e5   : > { %v6391_v61 = vsel %vm16227_vm3, %v6386_v44, %v6390_v45  ;;  %v6408_v25 = vrot.slane %v6406_v5, 4  ;;  %v6414_v10 = vrot.slane %v6412_v0, 5  ;;  %v6420_v17 = vshll.u32 %v5753_v13, 16  ;;  %v5762_v0 = vld [vmem:[#allocation2 + $0x18c] sm:$0xf] }
 0x2e6   : > { %v12666_v55 = vcombine.low %v6381_v9, %v6391_v61  ;;  %14045 = vmatmul.mubr.msk.bf16.gmra.mrb[112].mxu0 %vm3154_vm4, %v12436_v32  ;;  %v6419_v22 = vrot.slane %v6417_v24, 4  ;;  %v6426_v50 = vshll.u32 %v5754_v15, 16  ;;  %v6400_v21 = vrot.slane %v6399_v8, 4  ;;  %v5763_v61 = vld [vmem:[#allocation2 + $0x190] sm:$0xf] }
 0x2e7   : > { %v6409_v36 = vor.u32 %v6408_v25, %v6404_v59  ;;  %v6430_v35 = vshrl.u32 %v5754_v15, 16  ;;  %v6436_v37 = vshll.u32 %v5755_v52, 16  ;;  %v6422_v1 = vrot.slane %v6420_v17, 5  ;;  %v15408_v25 = vld [vmem:[#allocation2 + $0x168] sm:$0xf] }
 0x2e8   : > { %14249 = vmatmul.mubr.msk.bf16.gmra.mrb[24].mxu1 %vm3154_vm4, %v12666_v55  ;;  %v6428_v12 = vrot.slane %v6426_v50, 5  ;;  %v12437_v18 = vcombine.low %v15404_v26, %v15405_v51  ;;  %v6441_v16 = vshrl.u32 %v5756_v6, 16  ;;  %v6405_v47 = vsel %vm16227_vm3, %v6400_v21, %v6404_v59  ;;  %v5764_v21 = vld [vmem:[#allocation2 + $0x194] sm:$0x1] }
 0x2e9   : > { %v6410_v48 = vrot.slane %v6409_v36, 4  ;;  %v6432_v43 = vrot.slane %v6430_v35, 4  ;;  %v6438_v62 = vrot.slane %v6436_v37, 5  ;;  %v6423_v63 = vor.u32 %v6422_v1, %v6419_v22  ;;  %v5765_v35 = vld [vmem:[#allocation2 + $0x198] sm:$0xf] }
 0x2ea   : > { %14048 = vmatprep.mubr.msk.bf16.mxu0 %vm3154_vm4, %v12437_v18  ;;  %v6443_v46 = vrot.slane %v6441_v16, 4  ;;  %v6444_v60 = vshll.u32 %v5756_v6, 16  ;;  %v6450_v49 = vshll.u32 %v5757_v42, 16  ;;  %v6454_v56 = vshrl.u32 %v5757_v42, 16  ;;  %v5766_v16 = vld [vmem:[#allocation2 + $0x19c] sm:$0xf] }
 0x2eb   : > { %v6415_v39 = vsel %vm16227_vm3, %v6410_v48, %v6414_v10  ;;  %v6433_v3 = vor.u32 %v6432_v43, %v6428_v12  ;;  %v6460_v19 = vshll.u32 %v5758_v11, 16  ;;  %v6424_v27 = vrot.slane %v6423_v63, 4  ;;  %v15409_v10 = vld [vmem:[#allocation2 + $0x16c] sm:$0xf]  ;;  %v15410_v43 = vld [vmem:[#allocation2 + $0x174] sm:$0xf] }
 0x2ec   : > { %v12667_v57 = vcombine.low %v6405_v47, %v6415_v39  ;;  %v6446_v28 = vrot.slane %v6444_v60, 5  ;;  %v6452_v2 = vrot.slane %v6450_v49, 5  ;;  %v6456_v29 = vrot.slane %v6454_v56, 4 }
 0x2ed   : > { %v6434_v4 = vrot.slane %v6433_v3, 4  ;;  %v6462_v31 = vrot.slane %v6460_v19, 5  ;;  %v12438_v45 = vcombine.low %v15406_v20, %v15407_v7  ;;  %v6429_v34 = vsel %vm16227_vm3, %v6424_v27, %v6428_v12  ;;  %v5767_v19 = vld [vmem:[#allocation2 + $0x1a0] sm:$0x1]  ;;  %v15413_v7 = vld [vmem:[#allocation2 + $0x184] sm:$0xf] }
 0x2ee   : > { %14252 = vmatprep.mubr.msk.bf16.mxu1 %vm3154_vm4, %v12667_v57  ;;  %v6447_v13 = vor.u32 %v6446_v28, %v6443_v46  ;;  %v6465_v38 = vshrl.u32 %v5759_v14, 16  ;;  %v6468_v54 = vshll.u32 %v5759_v14, 16  ;;  %v6457_v44 = vor.u32 %v6456_v29, %v6452_v2  ;;  %v15412_v20 = vld [vmem:[#allocation2 + $0x180] sm:$0xf] }
 0x2ef   : > { %v6439_v53 = vsel %vm16227_vm3, %v6434_v4, %v6438_v62  ;;  %14049 = vmatmul.mubr.msk.bf16.gmra.mrb[116].mxu0 %vm3154_vm4, %v12438_v45  ;;  %v6474_v41 = vshll.u32 %v5760_v33, 16  ;;  %v6478_v5 = vshrl.u32 %v5760_v33, 16  ;;  %v6484_v24 = vshll.u32 %v5761_v40, 16  ;;  %v15411_v62 = vld [vmem:[#allocation2 + $0x178] sm:$0xf] }
 0x2f0   : > { %v12668_v15 = vcombine.low %v6429_v34, %v6439_v53  ;;  %v6448_v9 = vrot.slane %v6447_v13, 4  ;;  %v6467_v59 = vrot.slane %v6465_v38, 4  ;;  %v6470_v30 = vrot.slane %v6468_v54, 5  ;;  %v7098_v54 = vld [vmem:[#allocation2 + $0xc] sm:$0xe] }
 0x2f1   : > { %v6458_v23 = vrot.slane %v6457_v44, 4  ;;  %v6476_v32 = vrot.slane %v6474_v41, 5  ;;  %v6480_v52 = vrot.slane %v6478_v5, 4  ;;  %v12439_v6 = vcombine.low %v15408_v25, %v15409_v10  ;;  %v15414_v53 = vld [vmem:[#allocation2 + $0x10] sm:$0xf] }
 0x2f2   : > { %14253 = vmatmul.mubr.msk.bf16.gmra.mrb[28].mxu1 %vm3154_vm4, %v12668_v15  ;;  %v6471_v8 = vor.u32 %v6470_v30, %v6467_v59  ;;  %v6489_v55 = vshrl.u32 %v5762_v0, 16  ;;  %v6453_v22 = vsel %vm16227_vm3, %v6448_v9, %v6452_v2  ;;  %v6492_v36 = vshll.u32 %v5762_v0, 16  ;;  %v15415_v15 = vld [vmem:[#allocation2 + $0x14] sm:$0x1] }
 0x2f3   : > { %v6463_v17 = vsel %vm16227_vm3, %v6458_v23, %v6462_v31  ;;  %v6481_v50 = vor.u32 %v6480_v52, %v6476_v32  ;;  %14052 = vmatprep.mubr.msk.bf16.mxu0 %vm3154_vm4, %v12439_v6  ;;  %v6498_v12 = vshll.u32 %v5763_v61, 16  ;;  %v6486_v51 = vrot.slane %v6484_v24, 5  ;;  %v15416_v52 = vld [vmem:[#allocation2 + $0x18c] sm:$0xf]  ;;  %v15417_v24 = vld [vmem:[#allocation2 + $0x190] sm:$0xf] }
 0x2f4   : > { %v12669_v37 = vcombine.low %v6453_v22, %v6463_v17  ;;  %v6472_v42 = vrot.slane %v6471_v8, 4  ;;  %v6491_v1 = vrot.slane %v6489_v55, 4  ;;  %v6494_v18 = vrot.slane %v6492_v36, 5  ;;  %v15418_v6 = vld [vmem:[#allocation2 + $0x1c] sm:$0xf] }
 0x2f5   : > { %v6482_v26 = vrot.slane %v6481_v50, 4  ;;  %v6502_v11 = vshrl.u32 %v5763_v61, 16  ;;  %v6500_v47 = vrot.slane %v6498_v12, 5  ;;  %v6508_v48 = vshll.u32 %v5764_v21, 16  ;;  %v15419_v17 = vld [vmem:[#allocation2 + $0x28] sm:$0xf] }
 0x2f6   : > { %14256 = vmatprep.mubr.msk.bf16.mxu1 %vm3154_vm4, %v12669_v37  ;;  %v12440_v63 = vcombine.low %v15410_v43, %v15411_v62  ;;  %v6513_v46 = vshrl.u32 %v5765_v35, 16  ;;  %v6477_v60 = vsel %vm16227_vm3, %v6472_v42, %v6476_v32  ;;  %v6495_v39 = vor.u32 %v6494_v18, %v6491_v1  ;;  %v4097_v21 = vld [vmem:[#allocation2] sm:$0xe]  ;;  %v7099_v42 = vld [vmem:[#allocation2 + $0x18] sm:$0xe] }
 0x2f7   : > { %v6487_v49 = vsel %vm16227_vm3, %v6482_v26, %v6486_v51  ;;  %v6504_v3 = vrot.slane %v6502_v11, 4  ;;  %v6516_v57 = vshll.u32 %v5765_v35, 16  ;;  %v6522_v27 = vshll.u32 %v5766_v16, 16  ;;  %v7100_v26 = vld [vmem:[#allocation2 + $0x24] sm:$0xe] }
 0x2f8   : > { %v12670_v56 = vcombine.low %v6477_v60, %v6487_v49  ;;  %14053 = vmatmul.mubr.msk.bf16.gmra.mrb[120].mxu0 %vm3154_vm4, %v12440_v63  ;;  %v6515_v14 = vrot.slane %v6513_v46, 4  ;;  %v6496_v28 = vrot.slane %v6495_v39, 4  ;;  %v6526_v33 = vshrl.u32 %v5766_v16, 16  ;;  %v15420_v11 = vld [vmem:[#allocation2 + $0x4] sm:$0xf] }
 0x2f9   : > { %v6505_v2 = vor.u32 %v6504_v3, %v6500_v47  ;;  %v6510_v4 = vrot.slane %v6508_v48, 5  ;;  %v6518_v29 = vrot.slane %v6516_v57, 5  ;;  %v6524_v31 = vrot.slane %v6522_v27, 5  ;;  %v4098_v43 = vld [vmem:[#allocation2 + $0xc] sm:$0xe] }
 0x2fa   : > { %14257 = vmatmul.mubr.msk.bf16.gmra.mrb[32].mxu1 %vm3154_vm4, %v12670_v56  ;;  %v12441_v45 = vcombine.low %v15412_v20, %v15413_v7  ;;  %v6528_v13 = vrot.slane %v6526_v33, 4  ;;  %v6532_v40 = vshll.u32 %v5767_v19, 16  ;;  %v7228_v44 = vrot.slane %v15414_v53, 5  ;;  %v15422_v63 = vld [vmem:[#allocation2 + $0x20] sm:$0x1] }
 0x2fb   : > { %v6506_v34 = vrot.slane %v6505_v2, 4  ;;  %v6519_v38 = vor.u32 %v6518_v29, %v6515_v14  ;;  %v6501_v41 = vsel %vm16227_vm3, %v6496_v28, %v6500_v47  ;;  %v7231_v9 = vrot.slane %v15415_v15, 5  ;;  %v15421_v47 = vld [vmem:[#allocation2 + $0x8] sm:$0x1]  ;;  %v15423_v49 = vld [vmem:[#allocation2 + $0x10] sm:$0xf] }
 0x2fc   : > { %14056 = vmatprep.mubr.msk.bf16.mxu0 %vm3154_vm4, %v12441_v45  ;;  %v6529_v0 = vor.u32 %v6528_v13, %v6524_v31  ;;  %v7230_v32 = vrot.slane %v7228_v44, 4  ;;  %v12442_v61 = vcombine.low %v15416_v52, %v15417_v24  ;;  %v6534_v25 = vrot.slane %v6532_v40, 5  ;;  %v15424_v56 = vld [vmem:[#allocation2 + $0x2c] sm:$0x1]  ;;  %v15425_v2 = vld [vmem:[#allocation2 + $0x14] sm:$0x1] }
 0x2fd   : > { %v6511_v5 = vsel %vm16227_vm3, %v6506_v34, %v6510_v4  ;;  %v6520_v30 = vrot.slane %v6519_v38, 4  ;;  %v12707_v10 = vrot.slane %v7098_v54, 9  ;;  %v7235_v55 = vrot.slane %v15418_v6, 5  ;;  %v15426_v4 = vld [vmem:[#allocation2 + $0x34] sm:$0xf] }
 0x2fe   : > { %v12671_v59 = vcombine.low %v6501_v41, %v6511_v5  ;;  %v6530_v8 = vrot.slane %v6529_v0, 4  ;;  %v7232_v22 = vsel %vm17073_vm14, %v7230_v32, %v7231_v9  ;;  %v7242_v50 = vrot.slane %v15419_v17, 5  ;;  %v15427_v34 = vld [vmem:[#allocation2 + $0x1c] sm:$0xf]  ;;  %v7101_v41 = vld [vmem:[#allocation2 + $0x30] sm:$0xe] }
 0x2ff   : > { %v6525_v36 = vsel %vm16227_vm3, %v6520_v30, %v6524_v31  ;;  %v7229_v37 = vsel %vm17073_vm14, %v12707_v10, %v7228_v44  ;;  %v7237_v51 = vrot.slane %v7235_v55, 4  ;;  %v12477_v18 = vrot.slane %v4097_v21, 9  ;;  %v4099_v31 = vld [vmem:[#allocation2 + $0x18] sm:$0xe]  ;;  %v15428_v15 = vld [vmem:[#allocation2 + $0x20] sm:$0x1] }
 0x300   : > { %14260 = vmatprep.mubr.msk.bf16.mxu1 %vm3154_vm4, %v12671_v59  ;;  %14057 = vmatmul.mubr.msk.bf16.gmra.mrb[124].mxu0 %vm3154_vm4, %v12442_v61  ;;  %v6535_v35 = vsel %vm16227_vm3, %v6530_v8, %v6534_v25  ;;  %v12739_v12 = vcombine.low %v7229_v37, %v7232_v22  ;;  %v4198_v16 = vrot.slane %v15420_v11, 5  ;;  %v4201_v48 = vrot.slane %v15421_v47, 5  ;;  %v15429_v52 = vld [vmem:[#allocation2 + $0x40] sm:$0xf]  ;;  %v4100_v61 = vld [vmem:[#allocation2 + $0x24] sm:$0xe] }
 0x301   : > { %v12672_v1 = vcombine.low %v6525_v36, %v6535_v35  ;;  %v12708_v62 = vrot.slane %v7099_v42, 9  ;;  %v7238_v46 = vrot.slane %v15422_v63, 5  ;;  %v7244_v60 = vrot.slane %v7242_v50, 4  ;;  %v15264_v8 = vld [vmem:[#allocation6 + $0x68] sm:$0xff]   ;;  %v15432_v37 = vld [vmem:[#allocation6 + $0x30] sm:$0xff]   ;;  %v15433_v42 = vld [vmem:[#allocation6 + $0x60] sm:$0xff]  }
 0x302   : > { %v4205_v39 = vrot.slane %v15423_v49, 5  ;;  %v12709_v3 = vrot.slane %v7100_v26, 9  ;;  %v7245_v19 = vrot.slane %v15424_v56, 5  ;;  %v4199_v14 = vsel %vm17073_vm14, %v12477_v18, %v4198_v16  ;;  %v15431_v17 = vld [vmem:[#allocation2 + $0x38] sm:$0x1] }
 0x303   : > { %14261 = vmatmul.mubr.msk.bf16.gmra.mrb[36].mxu1 %vm3154_vm4, %v12672_v1  ;;  %v4200_v57 = vrot.slane %v4198_v16, 4  ;;  %v12478_v27 = vrot.slane %v4098_v43, 9  ;;  %v4208_v33 = vrot.slane %v15425_v2, 5  ;;  %v7249_v29 = vrot.slane %v15426_v4, 5  ;;  %v7102_v36 = vld [vmem:[#allocation2 + $0x3c] sm:$0xe] }
 0x304   : > { %14268 = vmatprep.mubr.msk.bf16.mxu1 %vm3154_vm4, %v12739_v12  ;;  %v4207_v28 = vrot.slane %v4205_v39, 4  ;;  %v7236_v20 = vsel %vm17073_vm14, %v12708_v62, %v7235_v55  ;;  %v7239_v7 = vsel %vm17073_vm14, %v7237_v51, %v7238_v46  ;;  %v4212_v13 = vrot.slane %v15427_v34, 5  ;;  %v15430_v55 = vld [vmem:[#allocation2 + $0x28] sm:$0xf]  ;;  %v15434_v51 = vld [vmem:[#allocation2 + $0x2c] sm:$0x1] }
 0x305   : > { %v4202_v45 = vsel %vm17073_vm14, %v4200_v57, %v4201_v48  ;;  %v7246_v40 = vsel %vm17073_vm14, %v7244_v60, %v7245_v19  ;;  %v4206_v54 = vsel %vm17073_vm14, %v12478_v27, %v4205_v39  ;;  %v12479_v5 = vrot.slane %v4099_v31, 9  ;;  %v4101_v11 = vld [vmem:[#allocation2 + $0x30] sm:$0xe]  ;;  %v15435_v47 = vld [vmem:[#allocation2 + $0x44] sm:$0x1]  ;;  %v15438_v19 = vld [vmem:[#allocation6 + $0x38] sm:$0xff]  }
 0x306   : > { %v12509_v38 = vcombine.low %v4199_v14, %v4202_v45  ;;  %v4209_v53 = vsel %vm17073_vm14, %v4207_v28, %v4208_v33  ;;  %v4214_v0 = vrot.slane %v4212_v13, 4  ;;  %v4215_v9 = vrot.slane %v15428_v15, 5  ;;  %v15436_v43 = vld [vmem:[#allocation2 + $0x4c] sm:$0xf]  ;;  %v15437_v63 = vld [vmem:[#allocation2 + $0x34] sm:$0xf] }
 0x307   : > { %v12510_v44 = vcombine.low %v4206_v54, %v4209_v53  ;;  %v12740_v59 = vcombine.low %v7236_v20, %v7239_v7  ;;  %v7243_v30 = vsel %vm17073_vm14, %v12709_v3, %v7242_v50  ;;  %v7251_v32 = vrot.slane %v7249_v29, 4  ;;  %v15266_v60 = vld [vmem:[#allocation6 + $0x70] sm:$0xff]   ;;  %v7103_v57 = vld [vmem:[#allocation2 + $0x48] sm:$0xe]  ;;  %v15439_v2 = vld [vmem:[#allocation2 + $0x38] sm:$0x1] }
 0x308   : > { %14064 = vmatprep.mubr.msk.bf16.mxu0 %vm3154_vm4, %v12509_v38  ;;  %v7256_v24 = vrot.slane %v15429_v52, 5  ;;  %v12741_v25 = vcombine.low %v7243_v30, %v7246_v40  ;;  %v4213_v10 = vsel %vm17073_vm14, %v12479_v5, %v4212_v13  ;;  %v4216_v6 = vsel %vm17073_vm14, %v4214_v0, %v4215_v9  ;;  %v15440_v20 = vld [vmem:[#allocation2 + $0x58] sm:$0xf]  ;;  %v15441_v40 = vld [vmem:[#allocation2 + $0x40] sm:$0xf] }
 0x309   : > { %14065 = vmatmul.mubr.msk.bf16.vlgmr.msra.gmra.mrb[64].mxu0 %vm3154_vm4, %v12510_v44  ;;  %v4219_v22 = vrot.slane %v15430_v55, 5  ;;  %v7252_v50 = vrot.slane %v15431_v17, 5  ;;  %v12511_v21 = vcombine.low %v4213_v10, %v4216_v6  ;;  %v12710_v1 = vrot.slane %v7101_v41, 9  ;;  %v15442_v44 = vld [vmem:[#allocation2 + $0x50] sm:$0x1] }
 0x30a   : > { %v7258_v35 = vrot.slane %v7256_v24, 4  ;;  %14129 = vmatpush3.bf16.msra.mxu0 %v15432_v37  ;;  %v12480_v12 = vrot.slane %v4100_v61, 9  ;;  %v4222_v18 = vrot.slane %v15434_v51, 5  ;;  %v7259_v48 = vrot.slane %v15435_v47, 5  ;;  %v4102_v0 = vld [vmem:[#allocation2 + $0x3c] sm:$0xe] }
 0x30b   : > { %14269 = vmatmul.mubr.msk.bf16.vlgmr.msra.gmra.mrb[40].mxu1 %vm3154_vm4, %v12740_v59  ;;  %v4221_v26 = vrot.slane %v4219_v22, 4  ;;  %v7253_v16 = vsel %vm17073_vm14, %v7251_v32, %v7252_v50  ;;  %14068 = vmatprep.mubr.msk.bf16.mxu0 %vm3154_vm4, %v12511_v21  ;;  %v7263_v62 = vrot.slane %v15436_v43, 5  ;;  %v4226_v46 = vrot.slane %v15437_v63, 5  ;;  %v4103_v15 = vld [vmem:[#allocation2 + $0x48] sm:$0xe] }
 0x30c   : > { %14333 = vmatpush3.bf16.msra.mxu1 %v15433_v42  ;;  %14272 = vmatprep.mubr.msk.bf16.mxu1 %vm3154_vm4, %v12741_v25  ;;  %v7250_v49 = vsel %vm17073_vm14, %v12710_v1, %v7249_v29  ;;  %v12711_v39 = vrot.slane %v7102_v36, 9  ;;  %v4220_v3 = vsel %vm17073_vm14, %v12480_v12, %v4219_v22  ;;  %v7260_v14 = vsel %vm17073_vm14, %v7258_v35, %v7259_v48  ;;  %v7104_v9 = vld [vmem:[#allocation2 + $0x54] sm:$0xe]  ;;  %v15443_v32 = vld [vmem:[#allocation2 + $0x44] sm:$0x1] }
 0x30d   : > { %14334 = vmatprep.subr.bf16.mxu1 %v15264_v8  ;;  %v4223_v56 = vsel %vm17073_vm14, %v4221_v26, %v4222_v18  ;;  %14130 = vmatprep.subr.bf16.mxu0 %v15438_v19  ;;  %v12481_v27 = vrot.slane %v4101_v11, 9  ;;  %v4228_v28 = vrot.slane %v4226_v46, 4  ;;  %v4229_v33 = vrot.slane %v15439_v2, 5  ;;  %v15445_v25 = vld [vmem:[#allocation2 + $0x4c] sm:$0xf] }
 0x30e   : > { %14131 = vmatpush3.bf16.msra.mxu0 %v15438_v19  ;;  %v12742_v4 = vcombine.low %v7250_v49, %v7253_v16  ;;  %v7257_v29 = vsel %vm17073_vm14, %v12711_v39, %v7256_v24  ;;  %v12512_v31 = vcombine.low %v4220_v3, %v4223_v56  ;;  %v7270_v7 = vrot.slane %v15440_v20, 5  ;;  %v15444_v24 = vld [vmem:[#allocation2 + $0x64] sm:$0xf]  ;;  %v15446_v55 = vld [vmem:[#allocation2 + $0x5c] sm:$0x1] }
 0x30f   : > { %v7265_v45 = vrot.slane %v7263_v62, 4  ;;  %v4227_v34 = vsel %vm17073_vm14, %v12481_v27, %v4226_v46  ;;  %v4230_v13 = vsel %vm17073_vm14, %v4228_v28, %v4229_v33  ;;  %v4233_v38 = vrot.slane %v15441_v40, 5  ;;  %v15447_v37 = vld [vmem:[#allocation2 + $0x50] sm:$0x1]  ;;  %v15449_v48 = vld [vmem:[#allocation2 + $0x58] sm:$0xf] }
 0x310   : > { %14335 = vmatpush3.bf16.msra.mxu1 %v15264_v8  ;;  %v12743_v54 = vcombine.low %v7257_v29, %v7260_v14  ;;  %v12712_v53 = vrot.slane %v7103_v57, 9  ;;  %v7266_v41 = vrot.slane %v15442_v44, 5  ;;  %v12513_v5 = vcombine.low %v4227_v34, %v4230_v13  ;;  %v15448_v51 = vld [vmem:[#allocation2 + $0x70] sm:$0xf]  ;;  %v7105_v46 = vld [vmem:[#allocation2 + $0x60] sm:$0xe] }
 0x311   : > { %14400 = vmatprep.subr.bf16.mxu1 %v15266_v60  ;;  %14069 = vmatmul.mubr.msk.bf16.gmra.mrb[68].mxu0 %vm3154_vm4, %v12512_v31  ;;  %v7272_v59 = vrot.slane %v7270_v7, 4  ;;  %v4235_v30 = vrot.slane %v4233_v38, 4  ;;  %v4236_v52 = vrot.slane %v15443_v32, 5  ;;  %v7277_v61 = vrot.slane %v15444_v24, 5  ;;  %v4104_v49 = vld [vmem:[#allocation2 + $0x54] sm:$0xe] }
 0x312   : > { %v7264_v8 = vsel %vm17073_vm14, %v12712_v53, %v7263_v62  ;;  %14072 = vmatprep.mubr.msk.bf16.mxu0 %vm3154_vm4, %v12513_v5  ;;  %v4240_v10 = vrot.slane %v15445_v25, 5  ;;  %v7267_v6 = vsel %vm17073_vm14, %v7265_v45, %v7266_v41  ;;  %v7273_v22 = vrot.slane %v15446_v55, 5  ;;  %v15450_v3 = vld [vmem:[#allocation2 + $0x68] sm:$0x1]  ;;  %v4105_v14 = vld [vmem:[#allocation2 + $0x60] sm:$0xe] }
 0x313   : > { %14273 = vmatmul.mubr.msk.bf16.gmra.mrb[44].mxu1 %vm3154_vm4, %v12742_v4  ;;  %v12482_v17 = vrot.slane %v4102_v0, 9  ;;  %v4237_v50 = vsel %vm17073_vm14, %v4235_v30, %v4236_v52  ;;  %v12713_v21 = vrot.slane %v7104_v9, 9  ;;  %v12483_v36 = vrot.slane %v4103_v15, 9  ;;  %v7106_v57 = vld [vmem:[#allocation2 + $0x6c] sm:$0xe] }
 0x314   : > { %14276 = vmatprep.mubr.msk.bf16.mxu1 %vm3154_vm4, %v12743_v54  ;;  %v4242_v35 = vrot.slane %v4240_v10, 4  ;;  %v4243_v42 = vrot.slane %v15447_v37, 5  ;;  %v7274_v1 = vsel %vm17073_vm14, %v7272_v59, %v7273_v22  ;;  %v7279_v26 = vrot.slane %v7277_v61, 4  ;;  %v15451_v28 = vld [vmem:[#allocation2 + $0x5c] sm:$0x1] }
 0x315   : > { %v4234_v12 = vsel %vm17073_vm14, %v12482_v17, %v4233_v38  ;;  %v7284_v18 = vrot.slane %v15448_v51, 5  ;;  %v4241_v16 = vsel %vm17073_vm14, %v12483_v36, %v4240_v10  ;;  %v4247_v43 = vrot.slane %v15449_v48, 5  ;;  %v15452_v33 = vld [vmem:[#allocation2 + $0x64] sm:$0xf]  ;;  %v15453_v20 = vld [vmem:[#allocation2 + $0x74] sm:$0x1] }
 0x316   : > { %v12514_v11 = vcombine.low %v4234_v12, %v4237_v50  ;;  %v4244_v47 = vsel %vm17073_vm14, %v4242_v35, %v4243_v42  ;;  %v12744_v62 = vcombine.low %v7264_v8, %v7267_v6  ;;  %v7271_v63 = vsel %vm17073_vm14, %v12713_v21, %v7270_v7  ;;  %v15454_v13 = vld [vmem:[#allocation2 + $0x7c] sm:$0xf]  ;;  %v15455_v54 = vld [vmem:[#allocation2 + $0x68] sm:$0x1]  ;;  %v7107_v9 = vld [vmem:[#allocation2 + $0x78] sm:$0xe] }
 0x317   : > { %v12515_v60 = vcombine.low %v4241_v16, %v4244_v47  ;;  %v12745_v39 = vcombine.low %v7271_v63, %v7274_v1  ;;  %v7280_v56 = vrot.slane %v15450_v3, 5  ;;  %v4249_v19 = vrot.slane %v4247_v43, 4  ;;  %v15456_v30 = vld [vmem:[#allocation2 + $0x88] sm:$0xf]  ;;  %v15457_v52 = vld [vmem:[#allocation2 + $0x70] sm:$0xf] }
 0x318   : > { %v7286_v27 = vrot.slane %v7284_v18, 4  ;;  %v4250_v2 = vrot.slane %v15451_v28, 5  ;;  %v4254_v4 = vrot.slane %v15452_v33, 5  ;;  %v12714_v29 = vrot.slane %v7105_v46, 9  ;;  %v4106_v21 = vld [vmem:[#allocation2 + $0x6c] sm:$0xe] }
 0x319   : > { %14073 = vmatmul.mubr.msk.bf16.gmra.mrb[72].mxu0 %vm3154_vm4, %v12514_v11  ;;  %v7281_v31 = vsel %vm17073_vm14, %v7279_v26, %v7280_v56  ;;  %v7287_v7 = vrot.slane %v15453_v20, 5  ;;  %v12484_v45 = vrot.slane %v4104_v49, 9  ;;  %v7291_v40 = vrot.slane %v15454_v13, 5  ;;  %v15458_v36 = vld [vmem:[#allocation2 + $0x7c] sm:$0xf] }
 0x31a   : > { %14076 = vmatprep.mubr.msk.bf16.mxu0 %vm3154_vm4, %v12515_v60  ;;  %v4251_v34 = vsel %vm17073_vm14, %v4249_v19, %v4250_v2  ;;  %v4256_v38 = vrot.slane %v4254_v4, 4  ;;  %v4257_v53 = vrot.slane %v15455_v54, 5  ;;  %v7278_v44 = vsel %vm17073_vm14, %v12714_v29, %v7277_v61  ;;  %v15459_v37 = vld [vmem:[#allocation2 + $0x80] sm:$0x1]  ;;  %v15460_v12 = vld [vmem:[#allocation2 + $0x74] sm:$0x1] }
 0x31b   : > { %14277 = vmatmul.mubr.msk.bf16.gmra.mrb[48].mxu1 %vm3154_vm4, %v12744_v62  ;;  %v12715_v41 = vrot.slane %v7106_v57, 9  ;;  %v4248_v5 = vsel %vm17073_vm14, %v12484_v45, %v4247_v43  ;;  %v12485_v0 = vrot.slane %v4105_v14, 9  ;;  %v7288_v15 = vsel %vm17073_vm14, %v7286_v27, %v7287_v7  ;;  %v4107_v51 = vld [vmem:[#allocation2 + $0x78] sm:$0xe]  ;;  %v7108_v11 = vld [vmem:[#allocation2 + $0x84] sm:$0xe] }
 0x31c   : > { %14280 = vmatprep.mubr.msk.bf16.mxu1 %vm3154_vm4, %v12745_v39  ;;  %v4258_v59 = vsel %vm17073_vm14, %v4256_v38, %v4257_v53  ;;  %v7298_v32 = vrot.slane %v15456_v30, 5  ;;  %v4261_v24 = vrot.slane %v15457_v52, 5  ;;  %v12746_v8 = vcombine.low %v7278_v44, %v7281_v31  ;;  %v15461_v47 = vld [vmem:[#allocation2 + $0x80] sm:$0x1]  ;;  %v15462_v62 = vld [vmem:[#allocation2 + $0x8c] sm:$0x1] }
 0x31d   : > { %v12516_v25 = vcombine.low %v4248_v5, %v4251_v34  ;;  %v4255_v61 = vsel %vm17073_vm14, %v12485_v0, %v4254_v4  ;;  %v7285_v10 = vsel %vm17073_vm14, %v12715_v41, %v7284_v18  ;;  %v7293_v6 = vrot.slane %v7291_v40, 4  ;;  %v15463_v49 = vld [vmem:[#allocation2 + $0x94] sm:$0xf]  ;;  %v15464_v19 = vld [vmem:[#allocation2 + $0x88] sm:$0xf] }
 0x31e   : > { %v12517_v55 = vcombine.low %v4255_v61, %v4258_v59  ;;  %v4263_v22 = vrot.slane %v4261_v24, 4  ;;  %v12747_v17 = vcombine.low %v7285_v10, %v7288_v15  ;;  %v12716_v50 = vrot.slane %v7107_v9, 9  ;;  %v15465_v2 = vld [vmem:[#allocation2 + $0xa0] sm:$0xf]  ;;  %v7109_v7 = vld [vmem:[#allocation2 + $0x90] sm:$0xe] }
 0x31f   : > { %v4268_v35 = vrot.slane %v15458_v36, 5  ;;  %v7294_v42 = vrot.slane %v15459_v37, 5  ;;  %v7300_v1 = vrot.slane %v7298_v32, 4  ;;  %v4264_v26 = vrot.slane %v15460_v12, 5  ;;  %v15466_v13 = vld [vmem:[#allocation2 + $0x94] sm:$0xf] }
 0x320   : > { %v7292_v18 = vsel %vm17073_vm14, %v12716_v50, %v7291_v40  ;;  %v4271_v48 = vrot.slane %v15461_v47, 5  ;;  %v7301_v63 = vrot.slane %v15462_v62, 5  ;;  %v12486_v46 = vrot.slane %v4106_v21, 9  ;;  %v4108_v53 = vld [vmem:[#allocation2 + $0x84] sm:$0xe] }
 0x321   : > { %14077 = vmatmul.mubr.msk.bf16.gmra.mrb[76].mxu0 %vm3154_vm4, %v12516_v25  ;;  %v4270_v16 = vrot.slane %v4268_v35, 4  ;;  %v7295_v43 = vsel %vm17073_vm14, %v7293_v6, %v7294_v42  ;;  %v4265_v60 = vsel %vm17073_vm14, %v4263_v22, %v4264_v26  ;;  %v7305_v39 = vrot.slane %v15463_v49, 5  ;;  %v15467_v41 = vld [vmem:[#allocation2 + $0x8c] sm:$0x1]  ;;  %v4109_v0 = vld [vmem:[#allocation2 + $0x90] sm:$0xe] }
 0x322   : > { %14080 = vmatprep.mubr.msk.bf16.mxu0 %vm3154_vm4, %v12517_v55  ;;  %v12487_v3 = vrot.slane %v4107_v51, 9  ;;  %v4275_v14 = vrot.slane %v15464_v19, 5  ;;  %v12717_v57 = vrot.slane %v7108_v11, 9  ;;  %v7302_v27 = vsel %vm17073_vm14, %v7300_v1, %v7301_v63  ;;  %v15468_v59 = vld [vmem:[#allocation2 + $0x98] sm:$0x1] }
 0x323   : > { %14281 = vmatmul.mubr.msk.bf16.gmra.mrb[52].mxu1 %vm3154_vm4, %v12746_v8  ;;  %v4272_v56 = vsel %vm17073_vm14, %v4270_v16, %v4271_v48  ;;  %v4262_v28 = vsel %vm17073_vm14, %v12486_v46, %v4261_v24  ;;  %v7312_v33 = vrot.slane %v15465_v2, 5  ;;  %v12748_v4 = vcombine.low %v7292_v18, %v7295_v43  ;;  %v15469_v52 = vld [vmem:[#allocation2 + $0xac] sm:$0xf]  ;;  %v15470_v8 = vld [vmem:[#allocation2 + $0x98] sm:$0x1] }
 0x324   : > { %14284 = vmatprep.mubr.msk.bf16.mxu1 %vm3154_vm4, %v12747_v17  ;;  %v12518_v29 = vcombine.low %v4262_v28, %v4265_v60  ;;  %v4269_v31 = vsel %vm17073_vm14, %v12487_v3, %v4268_v35  ;;  %v7299_v20 = vsel %vm17073_vm14, %v12717_v57, %v7298_v32  ;;  %v4277_v34 = vrot.slane %v4275_v14, 4  ;;  %v7110_v32 = vld [vmem:[#allocation2 + $0x9c] sm:$0xe]  ;;  %v15471_v61 = vld [vmem:[#allocation2 + $0xa4] sm:$0x1] }
 0x325   : > { %v12519_v45 = vcombine.low %v4269_v31, %v4272_v56  ;;  %v4282_v40 = vrot.slane %v15466_v13, 5  ;;  %v12749_v38 = vcombine.low %v7299_v20, %v7302_v27  ;;  %v7307_v54 = vrot.slane %v7305_v39, 4  ;;  %v15472_v22 = vld [vmem:[#allocation2 + $0xa0] sm:$0xf]  ;;  %v15473_v12 = vld [vmem:[#allocation2 + $0xb8] sm:$0xf] }
 0x326   : > { %v7314_v44 = vrot.slane %v7312_v33, 4  ;;  %v4278_v5 = vrot.slane %v15467_v41, 5  ;;  %v12718_v9 = vrot.slane %v7109_v7, 9  ;;  %v7308_v30 = vrot.slane %v15468_v59, 5  ;;  %v15474_v16 = vld [vmem:[#allocation2 + $0xac] sm:$0xf] }
 0x327   : > { %v4284_v15 = vrot.slane %v4282_v40, 4  ;;  %v7319_v24 = vrot.slane %v15469_v52, 5  ;;  %v4285_v25 = vrot.slane %v15470_v8, 5  ;;  %v7315_v10 = vrot.slane %v15471_v61, 5  ;;  %v7111_v62 = vld [vmem:[#allocation2 + $0xa8] sm:$0xe] }
 0x328   : > { %v12488_v6 = vrot.slane %v4108_v53, 9  ;;  %v4279_v55 = vsel %vm17073_vm14, %v4277_v34, %v4278_v5  ;;  %v4289_v17 = vrot.slane %v15472_v22, 5  ;;  %v7306_v50 = vsel %vm17073_vm14, %v12718_v9, %v7305_v39  ;;  %v15475_v49 = vld [vmem:[#allocation2 + $0xb0] sm:$0x1]  ;;  %v4110_v3 = vld [vmem:[#allocation2 + $0x9c] sm:$0xe] }
 0x329   : > { %14081 = vmatmul.mubr.msk.bf16.gmra.mrb[80].mxu0 %vm3154_vm4, %v12518_v29  ;;  %v7309_v21 = vsel %vm17073_vm14, %v7307_v54, %v7308_v30  ;;  %v12489_v36 = vrot.slane %v4109_v0, 9  ;;  %v4286_v35 = vsel %vm17073_vm14, %v4284_v15, %v4285_v25  ;;  %v12719_v37 = vrot.slane %v7110_v32, 9  ;;  %v4111_v27 = vld [vmem:[#allocation2 + $0xa8] sm:$0xe]  ;;  %v15478_v31 = vld [vmem:[#allocation2 + $0xb0] sm:$0x1] }
 0x32a   : > { %14084 = vmatprep.mubr.msk.bf16.mxu0 %vm3154_vm4, %v12519_v45  ;;  %v7316_v42 = vsel %vm17073_vm14, %v7314_v44, %v7315_v10  ;;  %v4276_v1 = vsel %vm17073_vm14, %v12488_v6, %v4275_v14  ;;  %v7326_v26 = vrot.slane %v15473_v12, 5  ;;  %v7321_v18 = vrot.slane %v7319_v24, 4  ;;  %v15476_v14 = vld [vmem:[#allocation2 + $0xa4] sm:$0x1]  ;;  %v15479_v7 = vld [vmem:[#allocation2 + $0xbc] sm:$0x1] }
 0x32b   : > { %14285 = vmatmul.mubr.msk.bf16.gmra.mrb[56].mxu1 %vm3154_vm4, %v12748_v4  ;;  %v12520_v51 = vcombine.low %v4276_v1, %v4279_v55  ;;  %v4283_v11 = vsel %vm17073_vm14, %v12489_v36, %v4282_v40  ;;  %v4296_v47 = vrot.slane %v15474_v16, 5  ;;  %v12750_v48 = vcombine.low %v7306_v50, %v7309_v21  ;;  %v17216_v4 = vld [vmem:[#allocation2 + $0xc4] sm:$0xf]  ;;  %v15480_v40 = vld [vmem:[#allocation2 + $0xb8] sm:$0xf] }
 0x32c   : > { %14288 = vmatprep.mubr.msk.bf16.mxu1 %vm3154_vm4, %v12749_v38  ;;  %v7313_v43 = vsel %vm17073_vm14, %v12719_v37, %v7312_v33  ;;  %v12521_v63 = vcombine.low %v4283_v11, %v4286_v35  ;;  %v4291_v46 = vrot.slane %v4289_v17, 4  ;;  %v7322_v39 = vrot.slane %v15475_v49, 5  ;;  %v7112_v33 = vld [vmem:[#allocation2 + $0xb4] sm:$0xe]  ;;  %v15481_v15 = vld [vmem:[#allocation2 + $0xe8] sm:$0xf] }
 0x32d   : > { %v12751_v60 = vcombine.low %v7313_v43, %v7316_v42  ;;  %v4298_v56 = vrot.slane %v4296_v47, 4  ;;  %v7328_v19 = vrot.slane %v7326_v26, 4  ;;  %v4292_v57 = vrot.slane %v15476_v14, 5  ;;  %v4113_v59 = vld [vmem:[#allocation2 + $0xd8] sm:$0xe] }
 0x32e   : > { %v12720_v28 = vrot.slane %v7111_v62, 9  ;;  %v7323_v2 = vsel %vm17073_vm14, %v7321_v18, %v7322_v39  ;;  %v7333_v29 = vrot.slane %v17216_v4, 5  ;;  %v4299_v20 = vrot.slane %v15478_v31, 5  ;;  %v7113_v25 = vld [vmem:[#allocation2 + $0xc0] sm:$0xe] }
 0x32f   : > { %v7329_v45 = vrot.slane %v15479_v7, 5  ;;  %v12490_v34 = vrot.slane %v4110_v3, 9  ;;  %v4293_v13 = vsel %vm17073_vm14, %v4291_v46, %v4292_v57  ;;  %v4303_v38 = vrot.slane %v15480_v40, 5  ;;  %v15482_v61 = vld [vmem:[#allocation2 + $0xc8] sm:$0x1] }
 0x330   : > { %v7320_v54 = vsel %vm17073_vm14, %v12720_v28, %v7319_v24  ;;  %v12491_v53 = vrot.slane %v4111_v27, 9  ;;  %v4300_v44 = vsel %vm17073_vm14, %v4298_v56, %v4299_v20  ;;  %v12721_v41 = vrot.slane %v7112_v33, 9  ;;  %v15483_v21 = vld [vmem:[#allocation2 + $0xdc] sm:$0xf]  ;;  %v15484_v35 = vld [vmem:[#allocation2 + $0xe0] sm:$0x1] }
 0x331   : > { %14085 = vmatmul.mubr.msk.bf16.gmra.mrb[84].mxu0 %vm3154_vm4, %v12520_v51  ;;  %v7330_v5 = vsel %vm17073_vm14, %v7328_v19, %v7329_v45  ;;  %v4290_v0 = vsel %vm17073_vm14, %v12490_v34, %v4289_v17  ;;  %v7340_v9 = vrot.slane %v15481_v15, 5  ;;  %v12752_v30 = vcombine.low %v7320_v54, %v7323_v2  ;;  %v4112_v17 = vld [vmem:[#allocation2 + $0xb4] sm:$0xe]  ;;  %v7114_v42 = vld [vmem:[#allocation2 + $0xe4] sm:$0xe] }
 0x332   : > { %14088 = vmatprep.mubr.msk.bf16.mxu0 %vm3154_vm4, %v12521_v63  ;;  %v12522_v32 = vcombine.low %v4290_v0, %v4293_v13  ;;  %v7335_v52 = vrot.slane %v7333_v29, 4  ;;  %v4297_v24 = vsel %vm17073_vm14, %v12491_v53, %v4296_v47  ;;  %v7327_v8 = vsel %vm17073_vm14, %v12721_v41, %v7326_v26  ;;  %v15485_v12 = vld [vmem:[#allocation2 + $0xbc] sm:$0x1]  ;;  %v15486_v47 = vld [vmem:[#allocation2 + $0xec] sm:$0x1] }
 0x333   : > { %14289 = vmatmul.mubr.msk.bf16.gmra.mrb[60].mxu1 %vm3154_vm4, %v12750_v48  ;;  %v7336_v10 = vrot.slane %v15482_v61, 5  ;;  %v12523_v6 = vcombine.low %v4297_v24, %v4300_v44  ;;  %v4305_v55 = vrot.slane %v4303_v38, 4  ;;  %v12753_v22 = vcombine.low %v7327_v8, %v7330_v5  ;;  %v15487_v63 = vld [vmem:[#allocation2 + $0xe8] sm:$0xf]  ;;  %v15488_v49 = vld [vmem:[#allocation2 + $0xf4] sm:$0xf] }
 0x334   : > { %14292 = vmatprep.mubr.msk.bf16.mxu1 %vm3154_vm4, %v12751_v60  ;;  %v12493_v50 = vrot.slane %v4113_v59, 9  ;;  %v4310_v36 = vrot.slane %v15483_v21, 5  ;;  %v4313_v37 = vrot.slane %v15484_v35, 5  ;;  %v7342_v1 = vrot.slane %v7340_v9, 4  ;;  %v15489_v56 = vld [vmem:[#allocation2 + $0xf4] sm:$0xf] }
 0x335   : > { %v4306_v26 = vrot.slane %v15485_v12, 5  ;;  %v12722_v51 = vrot.slane %v7113_v25, 9  ;;  %v7337_v18 = vsel %vm17073_vm14, %v7335_v52, %v7336_v10  ;;  %v7343_v48 = vrot.slane %v15486_v47, 5  ;;  %v15490_v27 = vld [vmem:[#allocation2 + $0x100] sm:$0xf] }
 0x336   : > { %v4311_v11 = vsel %vm17073_vm14, %v12493_v50, %v4310_v36  ;;  %v4312_v16 = vrot.slane %v4310_v36, 4  ;;  %v12492_v43 = vrot.slane %v4112_v17, 9  ;;  %v4317_v46 = vrot.slane %v15487_v63, 5  ;;  %v7115_v45 = vld [vmem:[#allocation2 + $0xf0] sm:$0xe] }
 0x337   : > { %v4307_v62 = vsel %vm17073_vm14, %v4305_v55, %v4306_v26  ;;  %v12723_v60 = vrot.slane %v7114_v42, 9  ;;  %v7347_v39 = vrot.slane %v15488_v49, 5  ;;  %v4324_v19 = vrot.slane %v15489_v56, 5  ;;  %v15491_v4 = vld [vmem:[#allocation2 + $0xec] sm:$0x1] }
 0x338   : > { %v4314_v3 = vsel %vm17073_vm14, %v4312_v16, %v4313_v37  ;;  %v7344_v14 = vsel %vm17073_vm14, %v7342_v1, %v7343_v48  ;;  %v4304_v57 = vsel %vm17073_vm14, %v12492_v43, %v4303_v38  ;;  %v7354_v28 = vrot.slane %v15490_v27, 5  ;;  %v4114_v38 = vld [vmem:[#allocation2 + $0xe4] sm:$0xe]  ;;  %v4115_v44 = vld [vmem:[#allocation2 + $0xf0] sm:$0xe] }
 0x339   : > { %14089 = vmatmul.mubr.msk.bf16.gmra.mrb[88].mxu0 %vm3154_vm4, %v12522_v32  ;;  %v12525_v2 = vcombine.low %v4311_v11, %v4314_v3  ;;  %v7334_v33 = vsel %vm17073_vm14, %v12722_v51, %v7333_v29  ;;  %v12524_v31 = vcombine.low %v4304_v57, %v4307_v62  ;;  %v7341_v7 = vsel %vm17073_vm14, %v12723_v60, %v7340_v9  ;;  %v15492_v5 = vld [vmem:[#allocation2 + $0xf8] sm:$0x1]  ;;  %v7116_v15 = vld [vmem:[#allocation2 + $0xfc] sm:$0xe]  ;;  %v17261_v9 = vld [vmem:[#allocation2 + $0x10c] sm:$0xf] }
 0x33a   : > { %14092 = vmatprep.mubr.msk.bf16.mxu0 %vm3154_vm4, %v12523_v6  ;;  %v12754_v20 = vcombine.low %v7334_v33, %v7337_v18  ;;  %v4319_v34 = vrot.slane %v4317_v46, 4  ;;  %v12755_v13 = vcombine.low %v7341_v7, %v7344_v14  ;;  %v7349_v40 = vrot.slane %v7347_v39, 4  ;;  %v15495_v52 = vld [vmem:[#allocation2 + $0x104] sm:$0x1]  ;;  %v15496_v61 = vld [vmem:[#allocation2 + $0x100] sm:$0xf] }
 0x33b   : > { %14293 = vmatmul.mubr.msk.bf16.gmra.mrb[0].mxu1 %vm3154_vm4, %v12752_v30  ;;  %v4326_v54 = vrot.slane %v4324_v19, 4  ;;  %v7356_v53 = vrot.slane %v7354_v28, 4  ;;  %v4320_v29 = vrot.slane %v15491_v4, 5  ;;  %v12724_v41 = vrot.slane %v7115_v45, 9  ;;  %v15494_v30 = vld [vmem:[#allocation2 + $0xf8] sm:$0x1] }
 0x33c   : > { %14296 = vmatprep.mubr.msk.bf16.mxu1 %vm3154_vm4, %v12753_v22  ;;  %v7350_v0 = vrot.slane %v15492_v5, 5  ;;  %v7361_v59 = vrot.slane %v17261_v9, 5  ;;  %v4327_v32 = vrot.slane %v15494_v30, 5  ;;  %v7357_v24 = vrot.slane %v15495_v52, 5  ;;  %v15497_v17 = vld [vmem:[#allocation2 + $0x10c] sm:$0xf] }
 0x33d   : > { %v12494_v8 = vrot.slane %v4114_v38, 9  ;;  %v4321_v25 = vsel %vm17073_vm14, %v4319_v34, %v4320_v29  ;;  %v4331_v10 = vrot.slane %v15496_v61, 5  ;;  %v12495_v55 = vrot.slane %v4115_v44, 9  ;;  %v15498_v37 = vld [vmem:[#allocation2 + $0x118] sm:$0xf] }
 0x33e   : > { %v7351_v6 = vsel %vm17073_vm14, %v7349_v40, %v7350_v0  ;;  %v4328_v22 = vsel %vm17073_vm14, %v4326_v54, %v4327_v32  ;;  %v4338_v50 = vrot.slane %v15497_v17, 5  ;;  %v12725_v21 = vrot.slane %v7116_v15, 9  ;;  %v7117_v16 = vld [vmem:[#allocation2 + $0x108] sm:$0xe]  ;;  %v15499_v62 = vld [vmem:[#allocation2 + $0x110] sm:$0x1] }
 0x33f   : > { %v7358_v36 = vsel %vm17073_vm14, %v7356_v53, %v7357_v24  ;;  %v4318_v35 = vsel %vm17073_vm14, %v12494_v8, %v4317_v46  ;;  %v7368_v42 = vrot.slane %v15498_v37, 5  ;;  %v7348_v1 = vsel %vm17073_vm14, %v12724_v41, %v7347_v39  ;;  %v4116_v46 = vld [vmem:[#allocation2 + $0xfc] sm:$0xe]  ;;  %v15500_v39 = vld [vmem:[#allocation2 + $0x104] sm:$0x1] }
 0x340   : > { %v12526_v12 = vcombine.low %v4318_v35, %v4321_v25  ;;  %v7363_v26 = vrot.slane %v7361_v59, 4  ;;  %v4325_v51 = vsel %vm17073_vm14, %v12495_v55, %v4324_v19  ;;  %v12756_v18 = vcombine.low %v7348_v1, %v7351_v6  ;;  %v4117_v56 = vld [vmem:[#allocation2 + $0x108] sm:$0xe]  ;;  %v7118_v57 = vld [vmem:[#allocation2 + $0x114] sm:$0xe] }
 0x341   : > { %14093 = vmatmul.mubr.msk.bf16.gmra.mrb[92].mxu0 %vm3154_vm4, %v12524_v31  ;;  %v7355_v11 = vsel %vm17073_vm14, %v12725_v21, %v7354_v28  ;;  %v12527_v47 = vcombine.low %v4325_v51, %v4328_v22  ;;  %v4333_v48 = vrot.slane %v4331_v10, 4  ;;  %v7364_v63 = vrot.slane %v15499_v62, 5  ;;  %v15501_v27 = vld [vmem:[#allocation2 + $0x110] sm:$0x1]  ;;  %v15503_v7 = vld [vmem:[#allocation2 + $0x118] sm:$0xf] }
 0x342   : > { %14096 = vmatprep.mubr.msk.bf16.mxu0 %vm3154_vm4, %v12525_v2  ;;  %v12757_v43 = vcombine.low %v7355_v11, %v7358_v36  ;;  %v4340_v60 = vrot.slane %v4338_v50, 4  ;;  %v7370_v49 = vrot.slane %v7368_v42, 4  ;;  %v4334_v3 = vrot.slane %v15500_v39, 5  ;;  %v15502_v2 = vld [vmem:[#allocation2 + $0x11c] sm:$0x1] }
 0x343   : > { %14297 = vmatmul.mubr.msk.bf16.gmra.mrb[4].mxu1 %vm3154_vm4, %v12754_v20  ;;  %v12726_v19 = vrot.slane %v7117_v16, 9  ;;  %v7365_v14 = vsel %vm17073_vm14, %v7363_v26, %v7364_v63  ;;  %v4341_v28 = vrot.slane %v15501_v27, 5  ;;  %v7371_v33 = vrot.slane %v15502_v2, 5  ;;  %v15504_v34 = vld [vmem:[#allocation2 + $0x124] sm:$0xf] }
 0x344   : > { %14300 = vmatprep.mubr.msk.bf16.mxu1 %vm3154_vm4, %v12755_v13  ;;  %v12496_v31 = vrot.slane %v4116_v46, 9  ;;  %v4335_v20 = vsel %vm17073_vm14, %v4333_v48, %v4334_v3  ;;  %v4345_v45 = vrot.slane %v15503_v7, 5  ;;  %v7375_v13 = vrot.slane %v15504_v34, 5  ;;  %v15505_v54 = vld [vmem:[#allocation2 + $0x124] sm:$0xf] }
 0x345   : > { %v12497_v40 = vrot.slane %v4117_v56, 9  ;;  %v4342_v38 = vsel %vm17073_vm14, %v4340_v60, %v4341_v28  ;;  %v4352_v53 = vrot.slane %v15505_v54, 5  ;;  %v12727_v4 = vrot.slane %v7118_v57, 9  ;;  %v15506_v41 = vld [vmem:[#allocation2 + $0x130] sm:$0xf] }
 0x346   : > { %v7372_v29 = vsel %vm17073_vm14, %v7370_v49, %v7371_v33  ;;  %v4332_v44 = vsel %vm17073_vm14, %v12496_v31, %v4331_v10  ;;  %v7382_v5 = vrot.slane %v15506_v41, 5  ;;  %v7362_v0 = vsel %vm17073_vm14, %v12726_v19, %v7361_v59  ;;  %v7119_v24 = vld [vmem:[#allocation2 + $0x120] sm:$0xe]  ;;  %v4118_v6 = vld [vmem:[#allocation2 + $0x114] sm:$0xe] }
 0x347   : > { %v12528_v15 = vcombine.low %v4332_v44, %v4335_v20  ;;  %v4339_v30 = vsel %vm17073_vm14, %v12497_v40, %v4338_v50  ;;  %v12758_v32 = vcombine.low %v7362_v0, %v7365_v14  ;;  %v7369_v52 = vsel %vm17073_vm14, %v12727_v4, %v7368_v42  ;;  %v15507_v55 = vld [vmem:[#allocation2 + $0x11c] sm:$0x1]  ;;  %v4119_v17 = vld [vmem:[#allocation2 + $0x120] sm:$0xe]  ;;  %v15508_v21 = vld [vmem:[#allocation2 + $0x128] sm:$0x1] }
 0x348   : > { %v12529_v8 = vcombine.low %v4339_v30, %v4342_v38  ;;  %v4347_v25 = vrot.slane %v4345_v45, 4  ;;  %v12759_v61 = vcombine.low %v7369_v52, %v7372_v29  ;;  %v7377_v10 = vrot.slane %v7375_v13, 4  ;;  %v7120_v35 = vld [vmem:[#allocation2 + $0x12c] sm:$0xe]  ;;  %v17308_v37 = vld [vmem:[#allocation2 + $0x13c] sm:$0xf] }
 0x349   : > { %14097 = vmatmul.mubr.msk.bf16.gmra.mrb[96].mxu0 %vm3154_vm4, %v12526_v12  ;;  %v4354_v9 = vrot.slane %v4352_v53, 4  ;;  %v7384_v59 = vrot.slane %v7382_v5, 4  ;;  %v4348_v22 = vrot.slane %v15507_v55, 5  ;;  %v12728_v50 = vrot.slane %v7119_v24, 9  ;;  %v15510_v1 = vld [vmem:[#allocation2 + $0x128] sm:$0x1] }
 0x34a   : > { %14100 = vmatprep.mubr.msk.bf16.mxu0 %vm3154_vm4, %v12527_v47  ;;  %v7378_v36 = vrot.slane %v15508_v21, 5  ;;  %v7389_v42 = vrot.slane %v17308_v37, 5  ;;  %v4355_v12 = vrot.slane %v15510_v1, 5  ;;  %v15511_v26 = vld [vmem:[#allocation2 + $0x134] sm:$0x1]  ;;  %v12729_v60 = vrot.slane %v7120_v35, 9 }
 0x34b   : > { %14301 = vmatmul.mubr.msk.bf16.gmra.mrb[8].mxu1 %vm3154_vm4, %v12756_v18  ;;  %v7385_v51 = vrot.slane %v15511_v26, 5  ;;  %v12498_v18 = vrot.slane %v4118_v6, 9  ;;  %v4349_v11 = vsel %vm17073_vm14, %v4347_v25, %v4348_v22  ;;  %v15512_v16 = vld [vmem:[#allocation2 + $0x130] sm:$0xf]  ;;  %v15513_v63 = vld [vmem:[#allocation2 + $0x13c] sm:$0xf]  ;;  %v7376_v19 = vsel %vm17073_vm14, %v12728_v50, %v7375_v13 }
 0x34c   : > { %14304 = vmatprep.mubr.msk.bf16.mxu1 %vm3154_vm4, %v12757_v43  ;;  %v4359_v47 = vrot.slane %v15512_v16, 5  ;;  %v7379_v48 = vsel %vm17073_vm14, %v7377_v10, %v7378_v36  ;;  %v12499_v43 = vrot.slane %v4119_v17, 9  ;;  %v4356_v62 = vsel %vm17073_vm14, %v4354_v9, %v4355_v12  ;;  %v15514_v3 = vld [vmem:[#allocation2 + $0x148] sm:$0xf]  ;;  %v7121_v33 = vld [vmem:[#allocation2 + $0x138] sm:$0xe] }
 0x34d   : > { %v4366_v46 = vrot.slane %v15513_v63, 5  ;;  %v7386_v49 = vsel %vm17073_vm14, %v7384_v59, %v7385_v51  ;;  %v4346_v39 = vsel %vm17073_vm14, %v12498_v18, %v4345_v45  ;;  %v7396_v56 = vrot.slane %v15514_v3, 5  ;;  %v15515_v45 = vld [vmem:[#allocation2 + $0x140] sm:$0x1]  ;;  %v4120_v13 = vld [vmem:[#allocation2 + $0x12c] sm:$0xe] }
 0x34e   : > { %v12530_v14 = vcombine.low %v4346_v39, %v4349_v11  ;;  %v7391_v57 = vrot.slane %v7389_v42, 4  ;;  %v4353_v27 = vsel %vm17073_vm14, %v12499_v43, %v4352_v53  ;;  %v12760_v28 = vcombine.low %v7376_v19, %v7379_v48  ;;  %v15516_v54 = vld [vmem:[#allocation2 + $0x134] sm:$0x1]  ;;  %v4121_v4 = vld [vmem:[#allocation2 + $0x138] sm:$0xe] }
 0x34f   : > { %v7383_v2 = vsel %vm17073_vm14, %v12729_v60, %v7382_v5  ;;  %v12531_v31 = vcombine.low %v4353_v27, %v4356_v62  ;;  %v4361_v20 = vrot.slane %v4359_v47, 4  ;;  %v7392_v34 = vrot.slane %v15515_v45, 5  ;;  %v7122_v41 = vld [vmem:[#allocation2 + $0x144] sm:$0xe]  ;;  %v15517_v5 = vld [vmem:[#allocation2 + $0x140] sm:$0x1] }
 0x350   : > { %v12761_v7 = vcombine.low %v7383_v2, %v7386_v49  ;;  %v4368_v40 = vrot.slane %v4366_v46, 4  ;;  %v7398_v38 = vrot.slane %v7396_v56, 4  ;;  %v4362_v53 = vrot.slane %v15516_v54, 5  ;;  %v15519_v24 = vld [vmem:[#allocation2 + $0x148] sm:$0xf] }
 0x351   : > { %14101 = vmatmul.mubr.msk.bf16.gmra.mrb[100].mxu0 %vm3154_vm4, %v12528_v15  ;;  %v12730_v29 = vrot.slane %v7121_v33, 9  ;;  %v7393_v44 = vsel %vm17073_vm14, %v7391_v57, %v7392_v34  ;;  %v4369_v0 = vrot.slane %v15517_v5, 5  ;;  %v15518_v15 = vld [vmem:[#allocation2 + $0x14c] sm:$0x1]  ;;  %v15520_v25 = vld [vmem:[#allocation2 + $0x154] sm:$0xf] }
 0x352   : > { %14104 = vmatprep.mubr.msk.bf16.mxu0 %vm3154_vm4, %v12529_v8  ;;  %v7399_v30 = vrot.slane %v15518_v15, 5  ;;  %v4363_v52 = vsel %vm17073_vm14, %v4361_v20, %v4362_v53  ;;  %v4373_v8 = vrot.slane %v15519_v24, 5  ;;  %v12501_v10 = vrot.slane %v4121_v4, 9  ;;  %v15521_v9 = vld [vmem:[#allocation2 + $0x154] sm:$0xf] }
 0x353   : > { %14305 = vmatmul.mubr.msk.bf16.gmra.mrb[12].mxu1 %vm3154_vm4, %v12758_v32  ;;  %v12500_v32 = vrot.slane %v4120_v13, 9  ;;  %v4370_v6 = vsel %vm17073_vm14, %v4368_v40, %v4369_v0  ;;  %v4380_v59 = vrot.slane %v15521_v9, 5  ;;  %v12731_v55 = vrot.slane %v7122_v41, 9  ;;  %v15522_v50 = vld [vmem:[#allocation2 + $0x160] sm:$0xf] }
 0x354   : > { %14308 = vmatprep.mubr.msk.bf16.mxu1 %vm3154_vm4, %v12759_v61  ;;  %v7403_v61 = vrot.slane %v15520_v25, 5  ;;  %v7400_v22 = vsel %vm17073_vm14, %v7398_v38, %v7399_v30  ;;  %v7410_v21 = vrot.slane %v15522_v50, 5  ;;  %v7390_v36 = vsel %vm17073_vm14, %v12730_v29, %v7389_v42  ;;  %v7123_v51 = vld [vmem:[#allocation2 + $0x150] sm:$0xe]  ;;  %v4122_v48 = vld [vmem:[#allocation2 + $0x144] sm:$0xe] }
 0x355   : > { %v4360_v17 = vsel %vm17073_vm14, %v12500_v32, %v4359_v47  ;;  %v4367_v1 = vsel %vm17073_vm14, %v12501_v10, %v4366_v46  ;;  %v12762_v12 = vcombine.low %v7390_v36, %v7393_v44  ;;  %v7397_v26 = vsel %vm17073_vm14, %v12731_v55, %v7396_v56  ;;  %v15523_v43 = vld [vmem:[#allocation2 + $0x14c] sm:$0x1]  ;;  %v4123_v63 = vld [vmem:[#allocation2 + $0x150] sm:$0xe]  ;;  %v15524_v60 = vld [vmem:[#allocation2 + $0x158] sm:$0x1] }
 0x356   : > { %v12532_v35 = vcombine.low %v4360_v17, %v4363_v52  ;;  %v12533_v18 = vcombine.low %v4367_v1, %v4370_v6  ;;  %v4375_v11 = vrot.slane %v4373_v8, 4  ;;  %v12763_v16 = vcombine.low %v7397_v26, %v7400_v22  ;;  %v7124_v39 = vld [vmem:[#allocation2 + $0x15c] sm:$0xe]  ;;  %v17355_v3 = vld [vmem:[#allocation2 + $0x16c] sm:$0xf] }
 0x357   : > { %v7405_v47 = vrot.slane %v7403_v61, 4  ;;  %v4382_v37 = vrot.slane %v4380_v59, 4  ;;  %v7412_v42 = vrot.slane %v7410_v21, 4  ;;  %v4376_v62 = vrot.slane %v15523_v43, 5  ;;  %v15526_v19 = vld [vmem:[#allocation2 + $0x158] sm:$0x1] }
 0x358   : > { %v12732_v46 = vrot.slane %v7123_v51, 9  ;;  %v7406_v49 = vrot.slane %v15524_v60, 5  ;;  %v7417_v56 = vrot.slane %v17355_v3, 5  ;;  %v15527_v57 = vld [vmem:[#allocation2 + $0x164] sm:$0x1]  ;;  %v12733_v40 = vrot.slane %v7124_v39, 9 }
 0x359   : > { %14105 = vmatmul.mubr.msk.bf16.gmra.mrb[104].mxu0 %vm3154_vm4, %v12530_v14  ;;  %v4383_v14 = vrot.slane %v15526_v19, 5  ;;  %v7413_v27 = vrot.slane %v15527_v57, 5  ;;  %v4377_v2 = vsel %vm17073_vm14, %v4375_v11, %v4376_v62  ;;  %v15528_v33 = vld [vmem:[#allocation2 + $0x160] sm:$0xf]  ;;  %v15529_v34 = vld [vmem:[#allocation2 + $0x16c] sm:$0xf] }
 0x35a   : > { %14108 = vmatprep.mubr.msk.bf16.mxu0 %vm3154_vm4, %v12531_v31  ;;  %v4387_v31 = vrot.slane %v15528_v33, 5  ;;  %v7407_v20 = vsel %vm17073_vm14, %v7405_v47, %v7406_v49  ;;  %v4394_v13 = vrot.slane %v15529_v34, 5  ;;  %v15530_v53 = vld [vmem:[#allocation2 + $0x178] sm:$0xf]  ;;  %v7404_v29 = vsel %vm17073_vm14, %v12732_v46, %v7403_v61  ;;  %v7125_v30 = vld [vmem:[#allocation2 + $0x168] sm:$0xe] }
 0x35b   : > { %14309 = vmatmul.mubr.msk.bf16.gmra.mrb[16].mxu1 %vm3154_vm4, %v12760_v28  ;;  %v12502_v28 = vrot.slane %v4122_v48, 9  ;;  %v4384_v45 = vsel %vm17073_vm14, %v4382_v37, %v4383_v14  ;;  %v7414_v38 = vsel %vm17073_vm14, %v7412_v42, %v7413_v27  ;;  %v7424_v4 = vrot.slane %v15530_v53, 5  ;;  %v4124_v61 = vld [vmem:[#allocation2 + $0x15c] sm:$0xe]  ;;  %v15532_v9 = vld [vmem:[#allocation2 + $0x164] sm:$0x1] }
 0x35c   : > { %14312 = vmatprep.mubr.msk.bf16.mxu1 %vm3154_vm4, %v12761_v7  ;;  %v12503_v7 = vrot.slane %v4123_v63, 9  ;;  %v7419_v41 = vrot.slane %v7417_v56, 4  ;;  %v12764_v0 = vcombine.low %v7404_v29, %v7407_v20  ;;  %v7411_v15 = vsel %vm17073_vm14, %v12733_v40, %v7410_v21  ;;  %v4125_v55 = vld [vmem:[#allocation2 + $0x168] sm:$0xe]  ;;  %v7126_v50 = vld [vmem:[#allocation2 + $0x174] sm:$0xe] }
 0x35d   : > { %v4374_v54 = vsel %vm17073_vm14, %v12502_v28, %v4373_v8  ;;  %v4389_v52 = vrot.slane %v4387_v31, 4  ;;  %v12765_v24 = vcombine.low %v7411_v15, %v7414_v38  ;;  %v15531_v8 = vld [vmem:[#allocation2 + $0x170] sm:$0x1]  ;;  %v4396_v10 = vrot.slane %v4394_v13, 4  ;;  %v15535_v51 = vld [vmem:[#allocation2 + $0x178] sm:$0xf] }
 0x35e   : > { %v12534_v44 = vcombine.low %v4374_v54, %v4377_v2  ;;  %v4381_v5 = vsel %vm17073_vm14, %v12503_v7, %v4380_v59  ;;  %v7420_v25 = vrot.slane %v15531_v8, 5  ;;  %v7426_v6 = vrot.slane %v7424_v4, 4  ;;  %v15533_v21 = vld [vmem:[#allocation2 + $0x170] sm:$0x1]  ;;  %v15536_v11 = vld [vmem:[#allocation2 + $0x184] sm:$0xf] }
 0x35f   : > { %v12535_v32 = vcombine.low %v4381_v5, %v4384_v45  ;;  %v4390_v59 = vrot.slane %v15532_v9, 5  ;;  %v12734_v22 = vrot.slane %v7125_v30, 9  ;;  %v4397_v36 = vrot.slane %v15533_v21, 5  ;;  %v15537_v37 = vld [vmem:[#allocation2 + $0x184] sm:$0xf] }
 0x360   : > { %v7421_v17 = vsel %vm17073_vm14, %v7419_v41, %v7420_v25  ;;  %v12505_v47 = vrot.slane %v4125_v55, 9  ;;  %v4408_v42 = vrot.slane %v15537_v37, 5  ;;  %v12735_v43 = vrot.slane %v7126_v50, 9  ;;  %v15538_v46 = vld [vmem:[#allocation2 + $0x190] sm:$0xf] }
 0x361   : > { %14109 = vmatmul.mubr.msk.bf16.gmra.mrb[108].mxu0 %vm3154_vm4, %v12532_v35  ;;  %v15534_v35 = vld [vmem:[#allocation2 + $0x17c] sm:$0x1]  ;;  %v4391_v26 = vsel %vm17073_vm14, %v4389_v52, %v4390_v59  ;;  %v4398_v48 = vsel %vm17073_vm14, %v4396_v10, %v4397_v36  ;;  %v7438_v60 = vrot.slane %v15538_v46, 5  ;;  %v7418_v49 = vsel %vm17073_vm14, %v12734_v22, %v7417_v56  ;;  %v7127_v27 = vld [vmem:[#allocation2 + $0x180] sm:$0xe] }
 0x362   : > { %14112 = vmatprep.mubr.msk.bf16.mxu0 %vm3154_vm4, %v12533_v18  ;;  %v7427_v1 = vrot.slane %v15534_v35, 5  ;;  %v4401_v18 = vrot.slane %v15535_v51, 5  ;;  %v4395_v19 = vsel %vm17073_vm14, %v12505_v47, %v4394_v13  ;;  %v12766_v14 = vcombine.low %v7418_v49, %v7421_v17  ;;  %v4126_v20 = vld [vmem:[#allocation2 + $0x174] sm:$0xe]  ;;  %v15539_v7 = vld [vmem:[#allocation2 + $0x17c] sm:$0x1] }
 0x363   : > { %14313 = vmatmul.mubr.msk.bf16.gmra.mrb[20].mxu1 %vm3154_vm4, %v12762_v12  ;;  %v12504_v12 = vrot.slane %v4124_v61, 9  ;;  %v7425_v57 = vsel %vm17073_vm14, %v12735_v43, %v7424_v4  ;;  %v12537_v28 = vcombine.low %v4395_v19, %v4398_v48  ;;  %v4410_v3 = vrot.slane %v4408_v42, 4  ;;  %v4127_v34 = vld [vmem:[#allocation2 + $0x180] sm:$0xe]  ;;  %v15540_v40 = vld [vmem:[#allocation2 + $0x188] sm:$0x1] }
 0x364   : > { %14316 = vmatprep.mubr.msk.bf16.mxu1 %vm3154_vm4, %v12763_v16  ;;  %v7431_v16 = vrot.slane %v15536_v11, 5  ;;  %v7428_v62 = vsel %vm17073_vm14, %v7426_v6, %v7427_v1  ;;  %v4403_v2 = vrot.slane %v4401_v18, 4  ;;  %v7440_v56 = vrot.slane %v7438_v60, 4  ;;  %v7128_v54 = vld [vmem:[#allocation2 + $0x18c] sm:$0xe]  ;;  %v15265_v46 = vld [vmem:[#allocation2 + $0x18] sm:$0xff]  }
 0x365   : > { %v4388_v63 = vsel %vm17073_vm14, %v12504_v12, %v4387_v31  ;;  %v12767_v33 = vcombine.low %v7425_v57, %v7428_v62  ;;  %v4404_v45 = vrot.slane %v15539_v7, 5  ;;  %v12736_v13 = vrot.slane %v7127_v27, 9  ;;  %v15541_v53 = vld [vmem:[#allocation2 + $0x188] sm:$0x1]  ;;  %v15542_v29 = vld [vmem:[#allocation2 + $0x194] sm:$0x1] }
 0x366   : > { %v12536_v39 = vcombine.low %v4388_v63, %v4391_v26  ;;  %v7433_v31 = vrot.slane %v7431_v16, 4  ;;  %v7434_v38 = vrot.slane %v15540_v40, 5  ;;  %v4411_v4 = vrot.slane %v15541_v53, 5  ;;  %v4128_v35 = vld [vmem:[#allocation2 + $0x18c] sm:$0xe]  ;;  %v15267_v49 = vld [vmem:[#allocation2 + $0x24] sm:$0xff]  }
 0x367   : > { %v12506_v41 = vrot.slane %v4126_v20, 9  ;;  %v4405_v5 = vsel %vm17073_vm14, %v4403_v2, %v4404_v45  ;;  %v12737_v25 = vrot.slane %v7128_v54, 9  ;;  %v7432_v6 = vsel %vm17073_vm14, %v12736_v13, %v7431_v16  ;;  %v7129_v1 = vld [vmem:[#allocation2 + $0x198] sm:$0xe]  ;;  %v15545_v12 = vld [vmem:[#allocation2 + $0x194] sm:$0x1] }
 0x368   : > { %v7435_v30 = vsel %vm17073_vm14, %v7433_v31, %v7434_v38  ;;  %v4412_v8 = vsel %vm17073_vm14, %v4410_v3, %v4411_v4  ;;  %v4418_v26 = vrot.slane %v15545_v12, 5  ;;  %v15546_v51 = vld [vmem:[#allocation2 + $0x1a0] sm:$0x1]  ;;  %v12508_v11 = vrot.slane %v4128_v35, 9  ;;  %v15268_v63 = vld [vmem:[#allocation2 + $0xc] sm:$0xff]   ;;  %v15275_v3 = vld [vmem:[#allocation2 + $0x54] sm:$0xff]  }
 0x369   : > { %14113 = vmatmul.mubr.msk.bf16.gmra.mrb[112].mxu0 %vm3154_vm4, %v12534_v44  ;;  %v7441_v44 = vrot.slane %v15542_v29, 5  ;;  %v4402_v10 = vsel %vm17073_vm14, %v12506_v41, %v4401_v18  ;;  %v12768_v55 = vcombine.low %v7432_v6, %v7435_v30  ;;  %v7439_v22 = vsel %vm17073_vm14, %v12737_v25, %v7438_v60  ;;  %v15270_v60 = vld [vmem:[#allocation2 + $0x18] sm:$0xff]   ;;  %v15295_v19 = vld [vmem:[#allocation6 + $0x78] sm:$0xff]   ;;  %v15547_v57 = vld [vmem:[#allocation6 + $0x70] sm:$0xff]  }
 0x36a   : > { %14116 = vmatprep.mubr.msk.bf16.mxu0 %vm3154_vm4, %v12535_v32  ;;  %v15544_v32 = vld [vmem:[#allocation2 + $0x19c] sm:$0xf]  ;;  %v12538_v9 = vcombine.low %v4402_v10, %v4405_v5  ;;  %v7448_v18 = vrot.slane %v15546_v51, 5  ;;  %v12738_v47 = vrot.slane %v7129_v1, 9  ;;  %v17438_v27 = vld [vmem:[#allocation6 + $0x80] sm:$0xff]   ;;  %v15273_v31 = vld [vmem:[#allocation2 + $0x48] sm:$0xff]  }
 0x36b   : > { %14317 = vmatmul.mubr.msk.bf16.gmra.mrb[24].mxu1 %vm3154_vm4, %v12764_v0  ;;  %v15543_v0 = vld [vmem:[#allocation2 + $0x190] sm:$0xf]  ;;  %v7445_v52 = vrot.slane %v15544_v32, 5  ;;  %v7442_v61 = vsel %vm17073_vm14, %v7440_v56, %v7441_v44  ;;  %v15271_v2 = vld [vmem:[#allocation2 + $0x3c] sm:$0xff]   ;;  %v15278_v20 = vld [vmem:[#allocation2 + $0x48] sm:$0xff]  }
 0x36c   : > { %14320 = vmatprep.mubr.msk.bf16.mxu1 %vm3154_vm4, %v12765_v24  ;;  %v4415_v15 = vrot.slane %v15543_v0, 5  ;;  %v12507_v24 = vrot.slane %v4127_v34, 9  ;;  %v12769_v21 = vcombine.low %v7439_v22, %v7442_v61  ;;  %v15280_v56 = vld [vmem:[#allocation2 + $0x54] sm:$0xff]   ;;  %v15277_v7 = vld [vmem:[#allocation2 + $0x60] sm:$0xff]   ;;  %v15279_v34 = vld [vmem:[#allocation2 + $0x6c] sm:$0xff]  }
 0x36d   : > { %v7447_v36 = vrot.slane %v7445_v52, 4  ;;  %v15282_v45 = vld [vmem:[#allocation2 + $0x60] sm:$0xff]   ;;  %v15284_v13 = vld [vmem:[#allocation2 + $0x6c] sm:$0xff]   ;;  %v15281_v40 = vld [vmem:[#allocation2 + $0x78] sm:$0xff]  }
 0x36e   : > { %v4409_v59 = vsel %vm17073_vm14, %v12507_v24, %v4408_v42  ;;  %v4417_v50 = vrot.slane %v4415_v15, 4  ;;  %v4416_v37 = vsel %vm17073_vm14, %v12508_v11, %v4415_v15  ;;  %v7446_v42 = vsel %vm17073_vm14, %v12738_v47, %v7445_v52  ;;  %v15286_v38 = vld [vmem:[#allocation2 + $0x78] sm:$0xff]   ;;  %v15283_v54 = vld [vmem:[#allocation2 + $0x84] sm:$0xff]   ;;  %v15285_v4 = vld [vmem:[#allocation2 + $0x90] sm:$0xff]  }
 0x36f   : > { %v12539_v17 = vcombine.low %v4409_v59, %v4412_v8  ;;  %v7449_v48 = vsel %vm17073_vm14, %v7447_v36, %v7448_v18  ;;  %v15288_v53 = vld [vmem:[#allocation2 + $0x84] sm:$0xff]   ;;  %v15290_v29 = vld [vmem:[#allocation2 + $0x90] sm:$0xff]   ;;  %v15287_v44 = vld [vmem:[#allocation2 + $0x9c] sm:$0xff]  }
 0x370   : > { %v4419_v16 = vsel %vm17073_vm14, %v4417_v50, %v4418_v26  ;;  %v12770_v62 = vcombine.low %v7446_v42, %v7449_v48  ;;  %v15289_v41 = vld [vmem:[#allocation2 + $0xa8] sm:$0xff]   ;;  %v15291_v5 = vld [vmem:[#allocation2 + $0xb4] sm:$0xff]   ;;  %v15292_v0 = vld [vmem:[#allocation2 + $0xc0] sm:$0xff]  }
 0x371   : > { %14117 = vmatmul.mubr.msk.bf16.gmra.mrb[116].mxu0 %vm3154_vm4, %v12536_v39  ;;  %v12540_v43 = vcombine.low %v4416_v37, %v4419_v16  ;;  %v15272_v39 = vld [vmem:[#allocation2 + $0x24] sm:$0xff]   ;;  %v15293_v15 = vld [vmem:[#allocation2 + $0xcc] sm:$0xff]   ;;  %v15296_v32 = vld [vmem:[#allocation2 + $0xfc] sm:$0xff]  }
 0x372   : > { %14120 = vmatprep.mubr.msk.bf16.mxu0 %vm3154_vm4, %v12537_v28  ;;  %v15274_v28 = vld [vmem:[#allocation2 + $0x30] sm:$0xff]   ;;  %v15297_v52 = vld [vmem:[#allocation2 + $0x108] sm:$0xff]   ;;  %v15299_v8 = vld [vmem:[#allocation2 + $0x120] sm:$0xff]  }
 0x373   : > { %14321 = vmatmul.mubr.msk.bf16.gmra.mrb[28].mxu1 %vm3154_vm4, %v12766_v14  ;;  %v15269_v14 = vld [vmem:[#allocation2 + $0x30] sm:$0xff]   ;;  %v15301_v61 = vld [vmem:[#allocation2 + $0x138] sm:$0xff]   ;;  %v15302_v22 = vld [vmem:[#allocation2 + $0x144] sm:$0xff]  }
 0x374   : > { %14324 = vmatprep.mubr.msk.bf16.mxu1 %vm3154_vm4, %v12767_v33  ;;  %v15276_v33 = vld [vmem:[#allocation2 + $0x3c] sm:$0xff]   ;;  %v15294_v30 = vld [vmem:[#allocation2 + $0xf0] sm:$0xff]   ;;  %v8703_v6 = vld [vmem:[#allocation2 + $0x18] sm:$0xf] }
 0x375   : > { %v15298_v24 = vld [vmem:[#allocation2 + $0x114] sm:$0xff]   ;;  %v15300_v25 = vld [vmem:[#allocation2 + $0x12c] sm:$0xff]   ;;  %v8704_v10 = vld [vmem:[#allocation2 + $0x1c] sm:$0xf]  ;;  %v8800_v50 = vshrl.u32 %v8703_v6, 16 }
 0x376   : > { %v8813_v59 = vshrl.u32 %v8704_v10, 16  ;;  %v8706_v36 = vld [vmem:[#allocation2 + $0x24] sm:$0xf]  ;;  %v8709_v51 = vld [vmem:[#allocation2 + $0x30] sm:$0xf] }
 0x377   : > { %v8824_v18 = vshrl.u32 %v8706_v36, 16  ;;  %v8827_v11 = vshll.u32 %v8706_v36, 16  ;;  %v8802_v16 = vrot.slane %v8800_v50, 4  ;;  %v8705_v48 = vld [vmem:[#allocation2 + $0x20] sm:$0x1] }
 0x378   : > { %v8815_v26 = vrot.slane %v8813_v59, 4 }
 0x379   : > { %14121 = vmatmul.mubr.msk.bf16.gmra.mrb[120].mxu0 %vm3154_vm4, %v12538_v9  ;;  %v8809_v9 = vshll.u32 %v8704_v10, 16 }
 0x37a   : > { %14124 = vmatprep.mubr.msk.bf16.mxu0 %vm3154_vm4, %v12539_v17  ;;  %v15303_v17 = vld [vmem:[#allocation2 + $0x150] sm:$0xff]  }
 0x37b   : > { %14325 = vmatmul.mubr.msk.bf16.gmra.mrb[32].mxu1 %vm3154_vm4, %v12768_v55  ;;  %v8707_v55 = vld [vmem:[#allocation2 + $0x28] sm:$0xf]  ;;  %v8811_v12 = vrot.slane %v8809_v9, 5  ;;  %v8719_v9 = vld [vmem:[#allocation2 + $0x58] sm:$0xf] }
 0x37c   : > { %14328 = vmatprep.mubr.msk.bf16.mxu1 %vm3154_vm4, %v12769_v21  ;;  %v8803_v21 = vshll.u32 %v8703_v6, 16  ;;  %v8833_v35 = vshll.u32 %v8707_v55, 16  ;;  %v8837_v1 = vshrl.u32 %v8707_v55, 16  ;;  %v8716_v6 = vld [vmem:[#allocation2 + $0x4c] sm:$0xf] }
 0x37d   : > { %v8714_v55 = vld [vmem:[#allocation2 + $0x44] sm:$0x1] }
 0x37e   : > { %v8805_v47 = vrot.slane %v8803_v21, 5  ;;  %v17472_v37 = vrot.slane %v8833_v35, 5  ;;  %v8839_v42 = vrot.slane %v8837_v1, 4 }
 0x381   : > { %14125 = vmatmul.mubr.msk.bf16.gmra.mrb[124].mxu0 %vm3154_vm4, %v12540_v43  ;;  %v8848_v43 = vshrl.u32 %v8709_v51, 16 }
 0x382   : > { %14132 = vmatprep.mubr.msk.bf16.mxu0 %vm3154_vm4, %v15268_v63  ;;  %v8816_v63 = vor.u32 %v8815_v26, %v8811_v12  ;;  %v8909_v26 = vshrl.u32 %v8716_v6, 16 }
 0x383   : > { %14329 = vmatmul.mubr.msk.bf16.gmra.mrb[36].mxu1 %vm3154_vm4, %v12770_v62  ;;  %v8851_v62 = vshll.u32 %v8709_v51, 16  ;;  %v8718_v51 = vld [vmem:[#allocation2 + $0x54] sm:$0xf] }
 0x384   : > { %14336 = vmatprep.mubr.msk.bf16.mxu1 %vm3154_vm4, %v15265_v46  ;;  %v15304_v46 = vld [vmem:[#allocation2 + $0x15c] sm:$0xff]  }
 0x389   : > { %14133 = vmatmul.mubr.msk.bf16.vlgmr.msra.gmra.mrb[64].mxu0 %vm3154_vm4, %v15270_v60  ;;  %v8826_v60 = vrot.slane %v8824_v18, 4  ;;  %v8929_v18 = vshll.u32 %v8719_v9, 16 }
 0x38a   : > { %14136 = vmatprep.mubr.msk.bf16.mxu0 %vm3154_vm4, %v15272_v39  ;;  %v8710_v39 = vld [vmem:[#allocation2 + $0x34] sm:$0xf] }
 0x38b   : > { %14337 = vmatmul.mubr.msk.bf16.vlgmr.msra.gmra.mrb[40].mxu1 %vm3154_vm4, %v15267_v49  ;;  %v8829_v49 = vrot.slane %v8827_v11, 5  ;;  %v8933_v11 = vshrl.u32 %v8719_v9, 16 }
 0x38c   : > { %14401 = vmatpush3.bf16.msra.mxu1 %v15547_v57  ;;  %14340 = vmatprep.mubr.msk.bf16.mxu1 %vm3154_vm4, %v15269_v14  ;;  %v8806_v14 = vor.u32 %v8805_v47, %v8802_v16  ;;  %v8819_v57 = vshll.u32 %v8705_v48, 16 }
 0x38d   : > { %14402 = vmatprep.subr.bf16.mxu1 %v15295_v19 }
 0x390   : > { %14403 = vmatpush3.bf16.msra.mxu1 %v15295_v19  ;;  %v15305_v19 = vld [vmem:[#allocation2 + $0x168] sm:$0xff]  }
 0x391   : > { %14468 = vmatprep.subr.bf16.mxu1 %v17438_v27  ;;  %14137 = vmatmul.mubr.msk.bf16.gmra.mrb[68].mxu0 %vm3154_vm4, %v15274_v28  ;;  %v8708_v28 = vld [vmem:[#allocation2 + $0x2c] sm:$0x1] }
 0x392   : > { %14140 = vmatprep.mubr.msk.bf16.mxu0 %vm3154_vm4, %v15276_v33  ;;  %v8850_v33 = vrot.slane %v8848_v43, 4  ;;  %v8721_v43 = vld [vmem:[#allocation2 + $0x60] sm:$0xf] }
 0x393   : > { %14341 = vmatmul.mubr.msk.bf16.gmra.mrb[44].mxu1 %vm3154_vm4, %v15271_v2  ;;  %v8840_v2 = vor.u32 %v8839_v42, %v17472_v37  ;;  %v8891_v42 = vshll.u32 %v8714_v55, 16 }
 0x394   : > { %14344 = vmatprep.mubr.msk.bf16.mxu1 %vm3154_vm4, %v15273_v31  ;;  %v8853_v31 = vrot.slane %v8851_v62, 5 }
 0x399   : > { %14141 = vmatmul.mubr.msk.bf16.gmra.mrb[72].mxu0 %vm3154_vm4, %v15278_v20  ;;  %v8817_v20 = vrot.slane %v8816_v63, 4 }
 0x39a   : > { %14144 = vmatprep.mubr.msk.bf16.mxu0 %vm3154_vm4, %v15280_v56  ;;  %v8861_v56 = vshrl.u32 %v8710_v39, 16 }
 0x39b   : > { %14345 = vmatmul.mubr.msk.bf16.gmra.mrb[48].mxu1 %vm3154_vm4, %v15275_v3  ;;  %v8857_v3 = vshll.u32 %v8710_v39, 16  ;;  %v15309_v39 = vld [vmem:[#allocation2 + $0x198] sm:$0xff]  }
 0x39c   : > { %14348 = vmatprep.mubr.msk.bf16.mxu1 %vm3154_vm4, %v15277_v7  ;;  %v8830_v7 = vor.u32 %v8829_v49, %v8826_v60  ;;  %v8722_v60 = vld [vmem:[#allocation2 + $0x64] sm:$0xf]  ;;  %v15308_v49 = vld [vmem:[#allocation2 + $0x18c] sm:$0xff]  }
 0x3a1   : > { %14145 = vmatmul.mubr.msk.bf16.gmra.mrb[76].mxu0 %vm3154_vm4, %v15282_v45  ;;  %v8843_v45 = vshll.u32 %v8708_v28, 16  ;;  %v8923_v28 = vshll.u32 %v8718_v51, 16 }
 0x3a2   : > { %14148 = vmatprep.mubr.msk.bf16.mxu0 %vm3154_vm4, %v15284_v13  ;;  %v8821_v13 = vrot.slane %v8819_v57, 5  ;;  %v8920_v57 = vshrl.u32 %v8718_v51, 16 }
 0x3a3   : > { %14349 = vmatmul.mubr.msk.bf16.gmra.mrb[52].mxu1 %vm3154_vm4, %v15279_v34  ;;  %v8807_v34 = vrot.slane %v8806_v14, 4 }
 0x3a4   : > { %14352 = vmatprep.mubr.msk.bf16.mxu1 %vm3154_vm4, %v15281_v40  ;;  %v8711_v40 = vld [vmem:[#allocation2 + $0x38] sm:$0x1] }
 0x3a9   : > { %14149 = vmatmul.mubr.msk.bf16.gmra.mrb[80].mxu0 %vm3154_vm4, %v15286_v38  ;;  %v8841_v38 = vrot.slane %v8840_v2, 4  ;;  %v8717_v2 = vld [vmem:[#allocation2 + $0x50] sm:$0x1] }
 0x3aa   : > { %14152 = vmatprep.mubr.msk.bf16.mxu0 %vm3154_vm4, %v15288_v53  ;;  %v8822_v53 = vsel %vm16227_vm3, %v8817_v20, %v8821_v13  ;;  %v17505_v20 = vrot.slane %v8929_v18, 5  ;;  %v8724_v13 = vld [vmem:[#allocation2 + $0x6c] sm:$0xf] }
 0x3ab   : > { %14353 = vmatmul.mubr.msk.bf16.gmra.mrb[56].mxu1 %vm3154_vm4, %v15283_v54  ;;  %v8854_v54 = vor.u32 %v8853_v31, %v8850_v33  ;;  %v8911_v31 = vrot.slane %v8909_v26, 4  ;;  %v8723_v26 = vld [vmem:[#allocation2 + $0x68] sm:$0x1] }
 0x3ac   : > { %14356 = vmatprep.mubr.msk.bf16.mxu1 %vm3154_vm4, %v15285_v4  ;;  %v17479_v4 = vrot.slane %v8857_v3, 5  ;;  %v8935_v3 = vrot.slane %v8933_v11, 4 }
 0x3b1   : > { %14153 = vmatmul.mubr.msk.bf16.gmra.mrb[84].mxu0 %vm3154_vm4, %v15290_v29  ;;  %v8863_v29 = vrot.slane %v8861_v56, 4  ;;  %v8944_v56 = vshrl.u32 %v8721_v43, 16 }
 0x3b3   : > { %14357 = vmatmul.mubr.msk.bf16.gmra.mrb[60].mxu1 %vm3154_vm4, %v15287_v44  ;;  %v8712_v44 = vld [vmem:[#allocation2 + $0x3c] sm:$0xf]  ;;  %v8864_v59 = vor.u32 %v8863_v29, %v17479_v4 }
 0x3b4   : > { %14360 = vmatprep.mubr.msk.bf16.mxu1 %vm3154_vm4, %v15289_v41  ;;  %v15306_v41 = vld [vmem:[#allocation2 + $0x174] sm:$0xff]   ;;  %v8872_v10 = vshrl.u32 %v8712_v44, 16 }
 0x3b5   : > { %v8865_v62 = vrot.slane %v8864_v59, 4 }
 0x3b6   : > { %v8874_v48 = vrot.slane %v8872_v10, 4 }
 0x3bb   : > { %14361 = vmatmul.mubr.msk.bf16.gmra.mrb[0].mxu1 %vm3154_vm4, %v15291_v5  ;;  %v8831_v5 = vrot.slane %v8830_v7, 4  ;;  %v8947_v7 = vshll.u32 %v8721_v43, 16 }
 0x3bc   : > { %14364 = vmatprep.mubr.msk.bf16.mxu1 %vm3154_vm4, %v15292_v0  ;;  %v8845_v0 = vrot.slane %v8843_v45, 5  ;;  %v8953_v45 = vshll.u32 %v8722_v60, 16 }
 0x3bd   : > { %v8836_v21 = vsel %vm16227_vm3, %v8831_v5, %v17472_v37  ;;  %v8925_v5 = vrot.slane %v8923_v28, 5 }
 0x3be   : > { %v17516_v10 = vrot.slane %v8953_v45, 5 }
 0x3c3   : > { %14365 = vmatmul.mubr.msk.bf16.gmra.mrb[4].mxu1 %vm3154_vm4, %v15293_v15  ;;  %v8867_v15 = vshll.u32 %v8711_v40, 16 }
 0x3c4   : > { %14368 = vmatprep.mubr.msk.bf16.mxu1 %vm3154_vm4, %v15294_v30  ;;  %v8713_v30 = vld [vmem:[#allocation2 + $0x40] sm:$0xf] }
 0x3c5   : > { %v8885_v50 = vshrl.u32 %v8713_v30, 16  ;;  %v8869_v36 = vrot.slane %v8867_v15, 5 }
 0x3c7   : > { %v8870_v40 = vsel %vm16227_vm3, %v8865_v62, %v8869_v36 }
 0x3cb   : > { %14369 = vmatmul.mubr.msk.bf16.gmra.mrb[8].mxu1 %vm3154_vm4, %v15296_v32  ;;  %v15307_v32 = vld [vmem:[#allocation2 + $0x180] sm:$0xff]  }
 0x3cc   : > { %14372 = vmatprep.mubr.msk.bf16.mxu1 %vm3154_vm4, %v15297_v52  ;;  %v8812_v52 = vsel %vm16227_vm3, %v8807_v34, %v8811_v12  ;;  %v8905_v12 = vshll.u32 %v8716_v6, 16  ;;  %v8957_v34 = vshrl.u32 %v8722_v60, 16 }
 0x3ce   : > { %v17503_v33 = vrot.slane %v8905_v12, 5  ;;  %v8959_v6 = vrot.slane %v8957_v34, 4 }
 0x3d0   : > { %v8912_v15 = vor.u32 %v8911_v31, %v17503_v33 }
 0x3d3   : > { %14373 = vmatmul.mubr.msk.bf16.gmra.mrb[12].mxu1 %vm3154_vm4, %v15298_v24  ;;  %v8715_v24 = vld [vmem:[#allocation2 + $0x48] sm:$0xf] }
 0x3d4   : > { %14376 = vmatprep.mubr.msk.bf16.mxu1 %vm3154_vm4, %v15299_v8  ;;  %v17484_v8 = vcombine.low %v8812_v52, %v8822_v53  ;;  %v8896_v35 = vshrl.u32 %v8715_v24, 16  ;;  %v8899_v1 = vshll.u32 %v8715_v24, 16  ;;  %v17512_v53 = vrot.slane %v8891_v42, 5  ;;  %v15310_v24 = vld [vmem:[#allocation2 + $0x1a4] sm:$0xff]  }
 0x3d5   : > { %v8971_v52 = vshll.u32 %v8724_v13, 16 }
 0x3d6   : > { %v8901_v14 = vrot.slane %v8899_v1, 5  ;;  %v8913_v1 = vrot.slane %v8912_v15, 4 }
 0x3d7   : > { %v8973_v18 = vrot.slane %v8971_v52, 5 }
 0x3db   : > { %14377 = vmatmul.mubr.msk.bf16.gmra.mrb[16].mxu1 %vm3154_vm4, %v15300_v25  ;;  %v8846_v25 = vsel %vm16227_vm3, %v8841_v38, %v8845_v0  ;;  %v8725_v0 = vld [vmem:[#allocation2 + $0x70] sm:$0xf] }
 0x3dc   : > { %14380 = vmatprep.mubr.msk.bf16.mxu1 %vm3154_vm4, %v15301_v61  ;;  %v17488_v61 = vrot.slane %v8854_v54, 4  ;;  %v17495_v16 = vcombine.low %v8836_v21, %v8846_v25  ;;  %v8946_v25 = vrot.slane %v8944_v56, 4  ;;  %v8977_v55 = vshll.u32 %v8725_v0, 16 }
 0x3de   : > { %v8860_v47 = vsel %vm16227_vm3, %v17488_v61, %v17479_v4  ;;  %v8720_v4 = vld [vmem:[#allocation2 + $0x5c] sm:$0x1]  ;;  %v8949_v61 = vrot.slane %v8947_v7, 5 }
 0x3df   : > { %v12873_v9 = vcombine.low %v8860_v47, %v8870_v40  ;;  %v8939_v59 = vshll.u32 %v8720_v4, 16  ;;  %v8729_v40 = vld [vmem:[#allocation2 + $0x80] sm:$0x1] }
 0x3e0   : > { %v8950_v11 = vor.u32 %v8949_v61, %v8946_v25  ;;  %v8733_v25 = vld [vmem:[#allocation2 + $0x90] sm:$0xf]  ;;  %v8734_v61 = vld [vmem:[#allocation2 + $0x94] sm:$0xf] }
 0x3e1   : > { %v8941_v62 = vrot.slane %v8939_v59, 5 }
 0x3e3   : > { %14381 = vmatmul.mubr.msk.bf16.gmra.mrb[20].mxu1 %vm3154_vm4, %v15302_v22  ;;  %v8875_v22 = vshll.u32 %v8712_v44, 16  ;;  %v8915_v44 = vshll.u32 %v8717_v2, 16 }
 0x3e4   : > { %14384 = vmatprep.mubr.msk.bf16.mxu1 %vm3154_vm4, %v15303_v17  ;;  %v8881_v17 = vshll.u32 %v8713_v30, 16  ;;  %v8936_v30 = vor.u32 %v8935_v3, %v17505_v20  ;;  %v8951_v3 = vrot.slane %v8950_v11, 4 }
 0x3e5   : > { %v8877_v37 = vrot.slane %v8875_v22, 5  ;;  %v8981_v22 = vshrl.u32 %v8725_v0, 16  ;;  %v8917_v43 = vrot.slane %v8915_v44, 5  ;;  %v15312_v44 = vld [vmem:[#allocation6 + $0x88] sm:$0xff]  }
 0x3e6   : > { %v17501_v63 = vrot.slane %v8881_v17, 5  ;;  %v8727_v17 = vld [vmem:[#allocation2 + $0x78] sm:$0xf]  ;;  %v8937_v12 = vrot.slane %v8936_v30, 4  ;;  %v8731_v30 = vld [vmem:[#allocation2 + $0x88] sm:$0xf] }
 0x3e7   : > { %v8878_v38 = vor.u32 %v8877_v37, %v8874_v48  ;;  %v8960_v48 = vor.u32 %v8959_v6, %v17516_v10  ;;  %v8992_v42 = vshrl.u32 %v8727_v17, 16  ;;  %v8995_v47 = vshll.u32 %v8727_v17, 16  ;;  %v8737_v17 = vld [vmem:[#allocation2 + $0xa0] sm:$0xf] }
 0x3e8   : > { %v17522_v37 = vrot.slane %v8977_v55, 5  ;;  %v8918_v28 = vsel %vm16227_vm3, %v8913_v1, %v8917_v43  ;;  %v8942_v2 = vsel %vm16227_vm3, %v8937_v12, %v8941_v62 }
 0x3e9   : > { %v8961_v56 = vrot.slane %v8960_v48, 4  ;;  %v8994_v7 = vrot.slane %v8992_v42, 4  ;;  %v8997_v45 = vrot.slane %v8995_v47, 5  ;;  %v9049_v42 = vshll.u32 %v8734_v61, 16 }
 0x3ea   : > { %v9053_v47 = vshrl.u32 %v8734_v61, 16 }
 0x3eb   : > { %14385 = vmatmul.mubr.msk.bf16.gmra.mrb[24].mxu1 %vm3154_vm4, %v15304_v46  ;;  %v8887_v46 = vrot.slane %v8885_v50, 4  ;;  %v8879_v50 = vrot.slane %v8878_v38, 4  ;;  %v8998_v52 = vor.u32 %v8997_v45, %v8994_v7 }
 0x3ec   : > { %14388 = vmatprep.mubr.msk.bf16.mxu1 %vm3154_vm4, %v15305_v19  ;;  %v8898_v19 = vrot.slane %v8896_v35, 4 }
 0x3ed   : > { %v8888_v54 = vor.u32 %v8887_v46, %v17501_v63  ;;  %v8983_v46 = vrot.slane %v8981_v22, 4  ;;  %v8884_v60 = vsel %vm16227_vm3, %v8879_v50, %v17501_v63  ;;  %v8730_v63 = vld [vmem:[#allocation2 + $0x84] sm:$0xf]  ;;  %v8732_v22 = vld [vmem:[#allocation2 + $0x8c] sm:$0x1]  ;;  %v17565_v11 = vrot.slane %v8998_v52, 4 }
 0x3ee   : > { %v8902_v29 = vor.u32 %v8901_v14, %v8898_v19  ;;  %v8963_v19 = vshll.u32 %v8723_v26, 16  ;;  %v8726_v14 = vld [vmem:[#allocation2 + $0x74] sm:$0x1]  ;;  %v9016_v4 = vshrl.u32 %v8730_v63, 16  ;;  %v9043_v26 = vshll.u32 %v8733_v25, 16 }
 0x3ef   : > { %v8889_v21 = vrot.slane %v8888_v54, 4  ;;  %v8984_v34 = vor.u32 %v8983_v46, %v17522_v37  ;;  %v8743_v52 = vld [vmem:[#allocation2 + $0xb8] sm:$0xf] }
 0x3f0   : > { %v8903_v36 = vrot.slane %v8902_v29, 4  ;;  %v9019_v29 = vshll.u32 %v8730_v63, 16 }
 0x3f1   : > { %v8985_v6 = vrot.slane %v8984_v34, 4 }
 0x3f3   : > { %14389 = vmatmul.mubr.msk.bf16.gmra.mrb[28].mxu1 %vm3154_vm4, %v15306_v41  ;;  %v8922_v41 = vrot.slane %v8920_v57, 4  ;;  %v8728_v57 = vld [vmem:[#allocation2 + $0x7c] sm:$0xf] }
 0x3f4   : > { %14392 = vmatprep.mubr.msk.bf16.mxu1 %vm3154_vm4, %v15307_v32  ;;  %v8968_v32 = vshrl.u32 %v8724_v13, 16  ;;  %v8987_v13 = vshll.u32 %v8726_v14, 16  ;;  %v9001_v38 = vshll.u32 %v8728_v57, 16  ;;  %v9005_v54 = vshrl.u32 %v8728_v57, 16 }
 0x3f5   : > { %v8926_v35 = vor.u32 %v8925_v5, %v8922_v41  ;;  %v9035_v57 = vshll.u32 %v8732_v22, 16 }
 0x3f6   : > { %v8970_v51 = vrot.slane %v8968_v32, 4  ;;  %v8956_v32 = vsel %vm16227_vm3, %v8951_v3, %v17516_v10  ;;  %v8989_v59 = vrot.slane %v8987_v13, 5  ;;  %v17552_v55 = vrot.slane %v9001_v38, 5 }
 0x3f7   : > { %v9018_v10 = vrot.slane %v9016_v4, 4  ;;  %v17577_v3 = vrot.slane %v9049_v42, 5 }
 0x3f8   : > { %v8974_v31 = vor.u32 %v8973_v18, %v8970_v51  ;;  %v8736_v51 = vld [vmem:[#allocation2 + $0x9c] sm:$0xf]  ;;  %v8990_v62 = vsel %vm16227_vm3, %v8985_v6, %v8989_v59  ;;  %v8738_v6 = vld [vmem:[#allocation2 + $0xa4] sm:$0x1] }
 0x3f9   : > { %v9067_v63 = vshll.u32 %v8736_v51, 16 }
 0x3fa   : > { %v8975_v15 = vrot.slane %v8974_v31, 4  ;;  %v9064_v31 = vshrl.u32 %v8736_v51, 16  ;;  %v9125_v51 = vshrl.u32 %v8743_v52, 16 }
 0x3fb   : > { %14393 = vmatmul.mubr.msk.bf16.gmra.mrb[32].mxu1 %vm3154_vm4, %v15308_v49  ;;  %v8894_v49 = vsel %vm16227_vm3, %v8889_v21, %v17512_v53  ;;  %v8965_v53 = vrot.slane %v8963_v19, 5  ;;  %v9021_v21 = vrot.slane %v9019_v29, 5 }
 0x3fc   : > { %14396 = vmatprep.mubr.msk.bf16.mxu1 %vm3154_vm4, %v15309_v39  ;;  %v8927_v39 = vrot.slane %v8926_v35, 4  ;;  %v12874_v41 = vcombine.low %v8884_v60, %v8894_v49  ;;  %v9029_v35 = vshrl.u32 %v8731_v30, 16  ;;  %v9073_v60 = vshll.u32 %v8737_v17, 16  ;;  %v8740_v49 = vld [vmem:[#allocation2 + $0xac] sm:$0xf] }
 0x3fd   : > { %v9097_v7 = vshll.u32 %v8740_v49, 16  ;;  %v9101_v45 = vshrl.u32 %v8740_v49, 16 }
 0x3fe   : > { %v9031_v14 = vrot.slane %v9029_v35, 4  ;;  %v17580_v34 = vrot.slane %v9073_v60, 5  ;;  %v8741_v35 = vld [vmem:[#allocation2 + $0xb0] sm:$0x1] }
 0x3ff   : > { %v17600_v59 = vrot.slane %v9097_v7, 5  ;;  %v9127_v7 = vrot.slane %v9125_v51, 4 }
 0x403   : > { %14397 = vmatmul.mubr.msk.bf16.gmra.mrb[36].mxu1 %vm3154_vm4, %v15310_v24  ;;  %v9011_v24 = vshll.u32 %v8729_v40, 16 }
 0x404   : > { %14404 = vmatprep.mubr.msk.bf16.mxu1 %vm3154_vm4, %v17484_v8  ;;  %v8908_v8 = vsel %vm16227_vm3, %v8903_v36, %v17503_v33  ;;  %v8932_v33 = vsel %vm16227_vm3, %v8927_v39, %v17505_v20  ;;  %v8966_v20 = vsel %vm16227_vm3, %v8961_v56, %v8965_v53  ;;  %v9025_v36 = vshll.u32 %v8731_v30, 16 }
 0x405   : > { %v12875_v5 = vcombine.low %v8908_v8, %v8918_v28  ;;  %v17541_v0 = vcombine.low %v8932_v33, %v8942_v2  ;;  %v17558_v12 = vcombine.low %v8956_v32, %v8966_v20  ;;  %v17567_v48 = vrot.slane %v9011_v24, 5  ;;  %v8739_v8 = vld [vmem:[#allocation2 + $0xa8] sm:$0xf] }
 0x406   : > { %v9022_v39 = vor.u32 %v9021_v21, %v9018_v10  ;;  %v17574_v19 = vrot.slane %v9025_v36, 5  ;;  %v9045_v2 = vrot.slane %v9043_v26, 5  ;;  %v9055_v56 = vrot.slane %v9053_v47, 4 }
 0x407   : > { %v9088_v40 = vshrl.u32 %v8739_v8, 16  ;;  %v9091_v38 = vshll.u32 %v8739_v8, 16  ;;  %v9004_v53 = vsel %vm16227_vm3, %v17565_v11, %v17552_v55  ;;  %v9066_v32 = vrot.slane %v9064_v31, 4 }
 0x408   : > { %v9032_v29 = vor.u32 %v9031_v14, %v17574_v19  ;;  %v9069_v20 = vrot.slane %v9067_v63, 5  ;;  %v9056_v61 = vor.u32 %v9055_v56, %v17577_v3  ;;  %v9121_v26 = vshll.u32 %v8743_v52, 16  ;;  %v8745_v14 = vld [vmem:[#allocation2 + $0xc0] sm:$0xf] }
 0x409   : > { %v9090_v21 = vrot.slane %v9088_v40, 4  ;;  %v9093_v36 = vrot.slane %v9091_v38, 5  ;;  %v8744_v38 = vld [vmem:[#allocation2 + $0xbc] sm:$0x1] }
 0x40a   : > { %v9033_v42 = vrot.slane %v9032_v29, 4  ;;  %v9057_v49 = vrot.slane %v9056_v61, 4  ;;  %v17619_v56 = vrot.slane %v9121_v26, 5  ;;  %v17652_v26 = vld [vmem:[#allocation2 + $0x188] sm:$0x1] }
 0x40b   : > { %14405 = vmatmul.mubr.msk.bf16.vlgmr.msra.gmra.mrb[40].mxu1 %vm3154_vm4, %v17495_v16  ;;  %v9007_v16 = vrot.slane %v9005_v54, 4 }
 0x40c   : > { %14469 = vmatpush3.bf16.msra.mxu1 %v17438_v27  ;;  %14408 = vmatprep.mubr.msk.bf16.mxu1 %vm3154_vm4, %v12873_v9  ;;  %v17554_v50 = vpop.f32.mrb[88].mxu0  ;;  %v8980_v27 = vsel %vm16227_vm3, %v8975_v15, %v17522_v37  ;;  %v9040_v9 = vshrl.u32 %v8733_v25, 16  ;;  %v9077_v37 = vshrl.u32 %v8737_v17, 16  ;;  %v17595_v15 = vrot.slane %v9035_v57, 5 }
 0x40d   : > { %18644 = vst [vmem:[#allocation12_spill] sm:$0xff] %v17554_v50  ;;  %14470 = vmatprep.subr.bf16.mxu1 %v15312_v44  ;;  %v17556_v1 = vpop.f32.mrb[89].mxu0  ;;  %v9008_v46 = vor.u32 %v9007_v16, %v17552_v55  ;;  %v17584_v33 = vcombine.low %v8980_v27, %v8990_v62  ;;  %v9023_v25 = vrot.slane %v9022_v39, 4  ;;  %v9103_v16 = vrot.slane %v9101_v45, 4 }
 0x40e   : > { %18645 = vst [vmem:[#allocation13_spill] sm:$0xff] %v17556_v1  ;;  %v17563_v18 = vpop.f32.mrb[90].mxu0  ;;  %v9042_v28 = vrot.slane %v9040_v9, 4  ;;  %v9079_v13 = vrot.slane %v9077_v37, 4  ;;  %v9070_v62 = vor.u32 %v9069_v20, %v9066_v32  ;;  %v9038_v45 = vsel %vm16227_vm3, %v9033_v42, %v17595_v15  ;;  %v17660_v42 = vld [vmem:[#allocation2 + $0xf4] sm:$0xf] }
 0x40f   : > { %18646 = vst [vmem:[#allocation14_spill] sm:$0xff] %v17563_v18  ;;  %v17569_v43 = vpop.f32.mrb[91].mxu0  ;;  %v17590_v4 = vrot.slane %v9008_v46, 4  ;;  %v9083_v46 = vshll.u32 %v8738_v6, 16  ;;  %v9028_v37 = vsel %vm16227_vm3, %v9023_v25, %v17574_v19  ;;  %v9104_v39 = vor.u32 %v9103_v16, %v17600_v59 }
 0x410   : > { %18647 = vst [vmem:[#allocation15_spill] sm:$0xff] %v17569_v43  ;;  %14471 = vmatpush3.bf16.msra.mxu1 %v15312_v44  ;;  %v8735_v44 = vld [vmem:[#allocation2 + $0x98] sm:$0x1]  ;;  %v9046_v30 = vor.u32 %v9045_v2, %v9042_v28  ;;  %v9080_v10 = vor.u32 %v9079_v13, %v17580_v34  ;;  %v9094_v28 = vor.u32 %v9093_v36, %v9090_v21  ;;  %v8746_v2 = vld [vmem:[#allocation2 + $0xc4] sm:$0xf]  ;;  %v9071_v13 = vrot.slane %v9070_v62, 4 }
 0x411   : > { %v9059_v17 = vshll.u32 %v8735_v44, 16  ;;  %v9014_v60 = vsel %vm16227_vm3, %v17590_v4, %v17567_v48  ;;  %v9085_v40 = vrot.slane %v9083_v46, 5  ;;  %v9105_v44 = vrot.slane %v9104_v39, 4 }
 0x412   : > { %v9047_v47 = vrot.slane %v9046_v30, 4  ;;  %v9081_v8 = vrot.slane %v9080_v10, 4  ;;  %v9139_v30 = vshll.u32 %v8745_v14, 16  ;;  %v9095_v20 = vrot.slane %v9094_v28, 4  ;;  %v17682_v28 = vld [vmem:[#allocation2 + $0x19c] sm:$0xf] }
 0x413   : > { %14409 = vmatmul.mubr.msk.bf16.gmra.mrb[44].mxu1 %vm3154_vm4, %v12874_v41  ;;  %v8742_v41 = vld [vmem:[#allocation2 + $0xb4] sm:$0xf]  ;;  %v9061_v57 = vrot.slane %v9059_v17, 5  ;;  %v9145_v52 = vshll.u32 %v8746_v2, 16  ;;  %v9149_v25 = vshrl.u32 %v8746_v2, 16  ;;  %v9128_v6 = vor.u32 %v9127_v7, %v17619_v56 }
 0x414   : > { %14412 = vmatprep.mubr.msk.bf16.mxu1 %vm3154_vm4, %v12875_v5  ;;  %v17582_v54 = vpop.f32.mrb[92].mxu0  ;;  %v9112_v27 = vshrl.u32 %v8742_v41, 16  ;;  %v9115_v9 = vshll.u32 %v8742_v41, 16  ;;  %v9136_v41 = vshrl.u32 %v8745_v14, 16  ;;  %v9086_v15 = vsel %vm16227_vm3, %v9081_v8, %v9085_v40  ;;  %v17638_v17 = vld [vmem:[#allocation2 + $0x184] sm:$0xf] }
 0x415   : > { %18648 = vst [vmem:[#allocation16_spill] sm:$0xff] %v17582_v54  ;;  %v17593_v5 = vpop.f32.mrb[93].mxu0  ;;  %v9062_v29 = vsel %vm16227_vm3, %v9057_v49, %v9061_v57  ;;  %v9131_v16 = vshll.u32 %v8744_v38, 16  ;;  %v12879_v10 = vcombine.low %v9004_v53, %v9014_v60  ;;  %v12880_v21 = vcombine.low %v9028_v37, %v9038_v45  ;;  %v17670_v60 = vld [vmem:[#allocation2 + $0x194] sm:$0x1] }
 0x416   : > { %18649 = vst [vmem:[#allocation17_spill] sm:$0xff] %v17593_v5  ;;  %v17597_v24 = vpop.f32.mrb[94].mxu0  ;;  %v9114_v63 = vrot.slane %v9112_v27, 4  ;;  %v9117_v48 = vrot.slane %v9115_v9, 5  ;;  %v17648_v27 = vld [vmem:[#allocation2 + $0xc8] sm:$0x1]  ;;  %v9100_v62 = vsel %vm16227_vm3, %v9095_v20, %v17600_v59 }
 0x417   : > { %18650 = vst [vmem:[#allocation18_spill] sm:$0xff] %v17597_v24  ;;  %v17602_v22 = vpop.f32.mrb[95].mxu0  ;;  %v17650_v9 = vld [vmem:[#allocation2 + $0xf0] sm:$0xf]  ;;  %v9138_v11 = vrot.slane %v9136_v41, 4  ;;  %v9141_v53 = vrot.slane %v9139_v30, 5 }
 0x418   : > { %18651 = vst [vmem:[#allocation19_spill] sm:$0xff] %v17602_v22  ;;  %v9118_v61 = vor.u32 %v9117_v48, %v9114_v63  ;;  %v17668_v46 = vrot.slane %v9145_v52, 5  ;;  %v10455_v37 = vrot.slane %v17638_v17, 5  ;;  %v17677_v14 = vrot.slane %v9128_v6, 4  ;;  %v10158_v7 = vld [vmem:[#allocation2 + $0x18c] sm:$0xe] }
 0x419   : > { %v17679_v57 = vrot.slane %v9131_v16, 5  ;;  %v10458_v48 = vrot.slane %v17652_v26, 5  ;;  %v9184_v40 = vshrl.u32 %v17650_v9, 16  ;;  %v9187_v38 = vshll.u32 %v17650_v9, 16  ;;  %v8749_v30 = vld [vmem:[#allocation2 + $0xd0] sm:$0xf] }
 0x41a   : > { %v17675_v39 = vrot.slane %v9118_v61, 4  ;;  %v10457_v63 = vrot.slane %v10455_v37, 4  ;;  %v17698_v20 = vld [vmem:[#allocation2 + $0x1a0] sm:$0x1]  ;;  %v12966_v61 = vrot.slane %v10158_v7, 9  ;;  %v10465_v16 = vrot.slane %v17670_v60, 5 }
 0x41b   : > { %14413 = vmatmul.mubr.msk.bf16.gmra.mrb[48].mxu1 %vm3154_vm4, %v17541_v0  ;;  %v9107_v0 = vshll.u32 %v8741_v35, 16  ;;  %v9076_v35 = vsel %vm16227_vm3, %v9071_v13, %v17580_v34  ;;  %v10157_v34 = vld [vmem:[#allocation2 + $0x180] sm:$0xe]  ;;  %v8748_v13 = vld [vmem:[#allocation2 + $0xcc] sm:$0xf] }
 0x41c   : > { %14416 = vmatprep.mubr.msk.bf16.mxu1 %vm3154_vm4, %v17558_v12  ;;  %v17617_v31 = vpop.f32.mrb[96].mxu0  ;;  %v9052_v12 = vsel %vm16227_vm3, %v9047_v47, %v17577_v3  ;;  %v17656_v51 = vcombine.low %v9076_v35, %v9086_v15  ;;  %v17662_v47 = vld [vmem:[#allocation2 + $0x190] sm:$0xf]  ;;  %v12965_v2 = vrot.slane %v10157_v34, 9  ;;  %v9193_v15 = vshll.u32 %v17660_v42, 16 }
 0x41d   : > { %18652 = vst [vmem:[#allocation20_spill] sm:$0xff] %v17617_v31  ;;  %v17621_v19 = vpop.f32.mrb[97].mxu0  ;;  %v9109_v3 = vrot.slane %v9107_v0, 5  ;;  %v12881_v36 = vcombine.low %v9052_v12, %v9062_v29  ;;  %v9142_v12 = vor.u32 %v9141_v53, %v9138_v11  ;;  %v10462_v29 = vrot.slane %v17662_v47, 5 }
 0x41e   : > { %18653 = vst [vmem:[#allocation21_spill] sm:$0xff] %v17621_v19  ;;  %v17629_v4 = vpop.f32.mrb[98].mxu0  ;;  %v17702_v52 = vsel %vm17073_vm14, %v12965_v2, %v10455_v37  ;;  %v9160_v35 = vshrl.u32 %v8748_v13, 16  ;;  %v9163_v9 = vshll.u32 %v8748_v13, 16  ;;  %v10469_v11 = vrot.slane %v17682_v28, 5 }
 0x41f   : > { %18654 = vst [vmem:[#allocation22_spill] sm:$0xff] %v17629_v4  ;;  %v17633_v32 = vpop.f32.mrb[99].mxu0  ;;  %v9110_v55 = vsel %vm16227_vm3, %v9105_v44, %v9109_v3  ;;  %v10464_v6 = vrot.slane %v10462_v29, 4  ;;  %v9169_v53 = vshll.u32 %v8749_v30, 16  ;;  %v9173_v34 = vshrl.u32 %v8749_v30, 16 }
 0x420   : > { %18655 = vst [vmem:[#allocation23_spill] sm:$0xff] %v17633_v32  ;;  %v17686_v0 = vcombine.low %v9100_v62, %v9110_v55  ;;  %v9197_v55 = vshrl.u32 %v17660_v42, 16  ;;  %v17716_v62 = vsel %vm17073_vm14, %v12966_v61, %v10462_v29  ;;  %v8753_v37 = vld [vmem:[#allocation2 + $0xf8] sm:$0x1]  ;;  %v9124_v7 = vsel %vm16227_vm3, %v17675_v39, %v17619_v56  ;;  %v8754_v30 = vld [vmem:[#allocation2 + $0xfc] sm:$0xf] }
 0x421   : > { %v9143_v13 = vrot.slane %v9142_v12, 4  ;;  %v9186_v29 = vrot.slane %v9184_v40, 4  ;;  %v17748_v3 = vrot.slane %v9193_v15, 5  ;;  %v8755_v12 = vld [vmem:[#allocation2 + $0x100] sm:$0xf]  ;;  %v9165_v8 = vrot.slane %v9163_v9, 5 }
 0x422   : > { %v9208_v15 = vshrl.u32 %v8754_v30, 16 }
 0x423   : > { %14417 = vmatmul.mubr.msk.bf16.gmra.mrb[52].mxu1 %vm3154_vm4, %v17584_v33  ;;  %v9151_v33 = vrot.slane %v9149_v25, 4  ;;  %v17706_v25 = vsel %vm17073_vm14, %v10457_v63, %v10458_v48  ;;  %v10471_v63 = vrot.slane %v10469_v11, 4 }
 0x424   : > { %14420 = vmatprep.mubr.msk.bf16.mxu1 %vm3154_vm4, %v12879_v10  ;;  %v17673_v49 = vpop.f32.mrb[100].mxu0  ;;  %v10159_v10 = vld [vmem:[#allocation2 + $0x198] sm:$0xe] }
 0x425   : > { %18656 = vst [vmem:[#allocation24_spill] sm:$0xff] %v17673_v49  ;;  %v17684_v59 = vpop.f32.mrb[101].mxu0  ;;  %v9152_v41 = vor.u32 %v9151_v33, %v17668_v46  ;;  %v17720_v33 = vsel %vm17073_vm14, %v10464_v6, %v10465_v16  ;;  %v12967_v2 = vrot.slane %v10159_v10, 9  ;;  %v9189_v16 = vrot.slane %v9187_v38, 5  ;;  %v8758_v10 = vld [vmem:[#allocation2 + $0x10c] sm:$0xf] }
 0x426   : > { %18657 = vst [vmem:[#allocation25_spill] sm:$0xff] %v17684_v59  ;;  %v17689_v45 = vpop.f32.mrb[102].mxu0  ;;  %v9245_v59 = vshrl.u32 %v8758_v10, 16 }
 0x427   : > { %18658 = vst [vmem:[#allocation26_spill] sm:$0xff] %v17689_v45  ;;  %v17694_v44 = vpop.f32.mrb[103].mxu0  ;;  %v9153_v6 = vrot.slane %v9152_v41, 4  ;;  %v17740_v42 = vsel %vm17073_vm14, %v12967_v2, %v10469_v11  ;;  %v9162_v41 = vrot.slane %v9160_v35, 4  ;;  %v17754_v11 = vrot.slane %v9169_v53, 5 }
 0x428   : > { %18659 = vst [vmem:[#allocation27_spill] sm:$0xff] %v17694_v44  ;;  %v9175_v2 = vrot.slane %v9173_v34, 4  ;;  %v8757_v44 = vld [vmem:[#allocation2 + $0x108] sm:$0xf]  ;;  %v9241_v45 = vshll.u32 %v8758_v10, 16  ;;  %v9148_v35 = vsel %vm16227_vm3, %v9143_v13, %v17668_v46  ;;  %v9210_v46 = vrot.slane %v9208_v15, 4 }
 0x429   : > { %v9166_v34 = vor.u32 %v9165_v8, %v9162_v41  ;;  %v8761_v10 = vld [vmem:[#allocation2 + $0x118] sm:$0xf]  ;;  %v9247_v41 = vrot.slane %v9245_v59, 4 }
 0x42a   : > { %v17777_v8 = vrot.slane %v9241_v45, 5  ;;  %v9269_v40 = vshrl.u32 %v8761_v10, 16  ;;  %v17786_v45 = vld [vmem:[#allocation2 + $0x110] sm:$0x1] }
 0x42b   : > { %14421 = vmatmul.mubr.msk.bf16.gmra.mrb[56].mxu1 %vm3154_vm4, %v12880_v21  ;;  %v10472_v21 = vrot.slane %v17698_v20, 5 }
 0x42c   : > { %14424 = vmatprep.mubr.msk.bf16.mxu1 %vm3154_vm4, %v12881_v36  ;;  %v17726_v48 = vpop.f32.mrb[104].mxu0  ;;  %v9134_v36 = vsel %vm16227_vm3, %v17677_v14, %v17679_v57  ;;  %v9199_v14 = vrot.slane %v9197_v55, 4  ;;  %v9203_v57 = vshll.u32 %v8753_v37, 16  ;;  %v9217_v55 = vshll.u32 %v8755_v12, 16 }
 0x42d   : > { %18660 = vst [vmem:[#allocation28_spill] sm:$0xff] %v17726_v48  ;;  %v17736_v61 = vpop.f32.mrb[105].mxu0  ;;  %v17744_v56 = vsel %vm17073_vm14, %v10471_v63, %v10472_v21  ;;  %v18664_v63 = vshll.u32 %v17648_v27, 16  ;;  %v9211_v48 = vshll.u32 %v8754_v30, 16  ;;  %v9221_v37 = vshrl.u32 %v8755_v12, 16 }
 0x42e   : > { %18661 = vst [vmem:[#allocation29_spill] sm:$0xff] %v17736_v61  ;;  %v17746_v39 = vpop.f32.mrb[106].mxu0  ;;  %v12884_v61 = vcombine.low %v9124_v7, %v9134_v36  ;;  %v9190_v27 = vor.u32 %v9189_v16, %v9186_v29  ;;  %v9200_v53 = vor.u32 %v9199_v14, %v17748_v3  ;;  %v9176_v7 = vor.u32 %v9175_v2, %v17754_v11  ;;  %v8760_v29 = vld [vmem:[#allocation2 + $0x114] sm:$0xf] }
 0x42f   : > { %18662 = vst [vmem:[#allocation30_spill] sm:$0xff] %v17746_v39  ;;  %v17752_v38 = vpop.f32.mrb[107].mxu0  ;;  %v9157_v21 = vrot.slane %v18664_v63, 5  ;;  %v8750_v39 = vld [vmem:[#allocation2 + $0xd4] sm:$0x1]  ;;  %v17769_v30 = vrot.slane %v9203_v57, 5 }
 0x430   : > { %18663 = vst [vmem:[#allocation31_spill] sm:$0xff] %v17752_v38  ;;  %v9179_v36 = vshll.u32 %v8750_v39, 16  ;;  %v9213_v13 = vrot.slane %v9211_v48, 5  ;;  %v9232_v63 = vshrl.u32 %v8757_v44, 16  ;;  %v17775_v14 = vrot.slane %v9217_v55, 5 }
 0x431   : > { %v9158_v9 = vsel %vm16227_vm3, %v9153_v6, %v9157_v21  ;;  %v9235_v6 = vshll.u32 %v8757_v44, 16  ;;  %v9191_v57 = vrot.slane %v9190_v27, 4  ;;  %v9201_v2 = vrot.slane %v9200_v53, 4 }
 0x432   : > { %v9265_v21 = vshll.u32 %v8761_v10, 16  ;;  %v9167_v48 = vrot.slane %v9166_v34, 4  ;;  %v9177_v44 = vrot.slane %v9176_v7, 4  ;;  %v9181_v38 = vrot.slane %v9179_v36, 5 }
 0x433   : > { %14425 = vmatmul.mubr.msk.bf16.gmra.mrb[60].mxu1 %vm3154_vm4, %v17656_v51  ;;  %v8756_v51 = vld [vmem:[#allocation2 + $0x104] sm:$0x1]  ;;  %v9214_v49 = vor.u32 %v9213_v13, %v9210_v46  ;;  %v9234_v55 = vrot.slane %v9232_v63, 4  ;;  %v9237_v32 = vrot.slane %v9235_v6, 5  ;;  %v9248_v27 = vor.u32 %v9247_v41, %v17777_v8  ;;  %v8766_v13 = vld [vmem:[#allocation2 + $0x12c] sm:$0xf] }
 0x434   : > { %14428 = vmatprep.mubr.msk.bf16.mxu1 %vm3154_vm4, %v17686_v0  ;;  %v17771_v12 = vpop.f32.mrb[108].mxu0  ;;  %v9223_v0 = vrot.slane %v9221_v37, 4  ;;  %v17783_v37 = vld [vmem:[#allocation2 + $0x124] sm:$0xf]  ;;  %v9256_v53 = vshrl.u32 %v8760_v29, 16  ;;  %v9259_v10 = vshll.u32 %v8760_v29, 16  ;;  %v9172_v36 = vsel %vm16227_vm3, %v9167_v48, %v17754_v11 }
 0x435   : > { %18665 = vst [vmem:[#allocation32_spill] sm:$0xff] %v17771_v12  ;;  %v17773_v16 = vpop.f32.mrb[109].mxu0  ;;  %v12885_v12 = vcombine.low %v9148_v35, %v9158_v9  ;;  %v9196_v35 = vsel %vm16227_vm3, %v9191_v57, %v17748_v3  ;;  %v9206_v9 = vsel %vm16227_vm3, %v9201_v2, %v17769_v30  ;;  %v17796_v34 = vrot.slane %v9265_v21, 5  ;;  %v17809_v29 = vld [vmem:[#allocation2 + $0x130] sm:$0xf] }
 0x436   : > { %18666 = vst [vmem:[#allocation33_spill] sm:$0xff] %v17773_v16  ;;  %v17779_v39 = vpop.f32.mrb[110].mxu0  ;;  %v9227_v16 = vshll.u32 %v8756_v51, 16  ;;  %v9224_v59 = vor.u32 %v9223_v0, %v17775_v14  ;;  %v9271_v7 = vrot.slane %v9269_v40, 4  ;;  %v8763_v51 = vld [vmem:[#allocation2 + $0x120] sm:$0xf]  ;;  %v9238_v40 = vor.u32 %v9237_v32, %v9234_v55 }
 0x437   : > { %18667 = vst [vmem:[#allocation34_spill] sm:$0xff] %v17779_v39  ;;  %v17781_v15 = vpop.f32.mrb[111].mxu0  ;;  %v9289_v46 = vshll.u32 %v17783_v37, 16  ;;  %v9293_v3 = vshrl.u32 %v17783_v37, 16  ;;  %v9215_v30 = vrot.slane %v9214_v49, 4  ;;  %v9249_v41 = vrot.slane %v9248_v27, 4 }
 0x438   : > { %18668 = vst [vmem:[#allocation35_spill] sm:$0xff] %v17781_v15  ;;  %v9229_v6 = vrot.slane %v9227_v16, 5  ;;  %v9225_v11 = vrot.slane %v9224_v59, 4  ;;  %v9261_v57 = vrot.slane %v9259_v10, 5  ;;  %v17815_v48 = vld [vmem:[#allocation2 + $0x11c] sm:$0x1]  ;;  %v12887_v59 = vcombine.low %v9196_v35, %v9206_v9 }
 0x439   : > { %v9280_v49 = vshrl.u32 %v8763_v51, 16  ;;  %v9283_v16 = vshll.u32 %v8763_v51, 16  ;;  %v17820_v55 = vrot.slane %v9289_v46, 5  ;;  %v9304_v15 = vshrl.u32 %v8766_v13, 16  ;;  %v17830_v46 = vld [vmem:[#allocation2 + $0x13c] sm:$0xf] }
 0x43a   : > { %v9317_v10 = vshrl.u32 %v17809_v29, 16  ;;  %v9275_v51 = vshll.u32 %v17815_v48, 16  ;;  %v8775_v39 = vld [vmem:[#allocation2 + $0x150] sm:$0xf] }
 0x43b   : > { %14429 = vmatmul.mubr.msk.bf16.gmra.mrb[0].mxu1 %vm3154_vm4, %v12884_v61  ;;  %v9182_v61 = vsel %vm16227_vm3, %v9177_v44, %v9181_v38  ;;  %v9258_v38 = vrot.slane %v9256_v53, 4  ;;  %v9272_v44 = vor.u32 %v9271_v7, %v17796_v34  ;;  %v9313_v53 = vshll.u32 %v17809_v29, 16 }
 0x43c   : > { %14432 = vmatprep.mubr.msk.bf16.mxu1 %vm3154_vm4, %v12885_v12  ;;  %v17806_v63 = vpop.f32.mrb[112].mxu0  ;;  %v9251_v12 = vshll.u32 %v17786_v45, 16  ;;  %v12886_v2 = vcombine.low %v9172_v36, %v9182_v61  ;;  %v9220_v36 = vsel %vm16227_vm3, %v9215_v30, %v17775_v14  ;;  %v9230_v7 = vsel %vm16227_vm3, %v9225_v11, %v9229_v6  ;;  %v8769_v11 = vld [vmem:[#allocation2 + $0x138] sm:$0xf] }
 0x43d   : > { %18669 = vst [vmem:[#allocation36_spill] sm:$0xff] %v17806_v63  ;;  %v17811_v0 = vpop.f32.mrb[113].mxu0  ;;  %v9295_v63 = vrot.slane %v9293_v3, 4  ;;  %v9239_v61 = vrot.slane %v9238_v40, 4  ;;  %v9262_v9 = vor.u32 %v9261_v57, %v9258_v38  ;;  %v17835_v3 = vld [vmem:[#allocation2 + $0x128] sm:$0x1]  ;;  %v12888_v57 = vcombine.low %v9220_v36, %v9230_v7 }
 0x43e   : > { %18670 = vst [vmem:[#allocation37_spill] sm:$0xff] %v17811_v0  ;;  %v17813_v21 = vpop.f32.mrb[114].mxu0  ;;  %v9307_v0 = vshll.u32 %v8766_v13, 16  ;;  %v9253_v27 = vrot.slane %v9251_v12, 5  ;;  %v9282_v13 = vrot.slane %v9280_v49, 4  ;;  %v9285_v12 = vrot.slane %v9283_v16, 5 }
 0x43f   : > { %18671 = vst [vmem:[#allocation38_spill] sm:$0xff] %v17813_v21  ;;  %v17818_v32 = vpop.f32.mrb[115].mxu0  ;;  %v9273_v14 = vrot.slane %v9272_v44, 4  ;;  %v9296_v30 = vor.u32 %v9295_v63, %v17820_v55  ;;  %v9306_v6 = vrot.slane %v9304_v15, 4  ;;  %v17841_v21 = vrot.slane %v9313_v53, 5 }
 0x440   : > { %18672 = vst [vmem:[#allocation39_spill] sm:$0xff] %v17818_v32  ;;  %v9254_v35 = vsel %vm16227_vm3, %v9249_v41, %v9253_v27  ;;  %v9309_v40 = vrot.slane %v9307_v0, 5  ;;  %v9337_v41 = vshll.u32 %v17830_v46, 16  ;;  %v9341_v38 = vshrl.u32 %v17830_v46, 16  ;;  %v8772_v15 = vld [vmem:[#allocation2 + $0x144] sm:$0xf] }
 0x441   : > { %v9244_v49 = vsel %vm16227_vm3, %v9239_v61, %v17777_v8  ;;  %v9277_v63 = vrot.slane %v9275_v51, 5  ;;  %v9286_v27 = vor.u32 %v9285_v12, %v9282_v13  ;;  %v9299_v53 = vshll.u32 %v17835_v3, 16  ;;  %v17859_v7 = vld [vmem:[#allocation2 + $0x134] sm:$0x1] }
 0x442   : > { %v12889_v0 = vcombine.low %v9244_v49, %v9254_v35  ;;  %v9310_v8 = vor.u32 %v9309_v40, %v9306_v6  ;;  %v9328_v61 = vshrl.u32 %v8769_v11, 16  ;;  %v9331_v51 = vshll.u32 %v8769_v11, 16 }
 0x443   : > { %14433 = vmatmul.mubr.msk.bf16.gmra.mrb[4].mxu1 %vm3154_vm4, %v12886_v2  ;;  %v9319_v2 = vrot.slane %v9317_v10, 4  ;;  %v17853_v10 = vld [vmem:[#allocation2 + $0x148] sm:$0xf]  ;;  %v9278_v36 = vsel %vm16227_vm3, %v9273_v14, %v9277_v63  ;;  %v17862_v49 = vrot.slane %v9337_v41, 5  ;;  %v9352_v13 = vshrl.u32 %v8772_v15, 16 }
 0x444   : > { %14436 = vmatprep.mubr.msk.bf16.mxu1 %vm3154_vm4, %v12887_v59  ;;  %v17839_v32 = vpop.f32.mrb[116].mxu0  ;;  %v9263_v59 = vrot.slane %v9262_v9, 4  ;;  %v9343_v9 = vrot.slane %v9341_v38, 4  ;;  %v9355_v12 = vshll.u32 %v8772_v15, 16  ;;  %v9287_v14 = vrot.slane %v9286_v27, 4 }
 0x445   : > { %18673 = vst [vmem:[#allocation40_spill] sm:$0xff] %v17839_v32  ;;  %v17848_v44 = vpop.f32.mrb[117].mxu0  ;;  %v9320_v35 = vor.u32 %v9319_v2, %v17841_v21  ;;  %v9301_v63 = vrot.slane %v9299_v53, 5  ;;  %v9323_v6 = vshll.u32 %v17859_v7, 16  ;;  %v9311_v40 = vrot.slane %v9310_v8, 4 }
 0x446   : > { %18674 = vst [vmem:[#allocation41_spill] sm:$0xff] %v17848_v44  ;;  %v17850_v16 = vpop.f32.mrb[118].mxu0  ;;  %v9297_v44 = vrot.slane %v9296_v30, 4  ;;  %v9268_v30 = vsel %vm16227_vm3, %v9263_v59, %v17796_v34  ;;  %v9330_v11 = vrot.slane %v9328_v61, 4  ;;  %v9333_v2 = vrot.slane %v9331_v51, 5 }
 0x447   : > { %18675 = vst [vmem:[#allocation42_spill] sm:$0xff] %v17850_v16  ;;  %v17855_v32 = vpop.f32.mrb[119].mxu0  ;;  %v9361_v16 = vshll.u32 %v17853_v10, 16  ;;  %v17872_v41 = vld [vmem:[#allocation2 + $0x154] sm:$0xf]  ;;  %v12890_v38 = vcombine.low %v9268_v30, %v9278_v36  ;;  %v9321_v27 = vrot.slane %v9320_v35, 4  ;;  %v9292_v36 = vsel %vm16227_vm3, %v9287_v14, %v17820_v55 }
 0x448   : > { %18676 = vst [vmem:[#allocation43_spill] sm:$0xff] %v17855_v32  ;;  %v9365_v32 = vshrl.u32 %v17853_v10, 16  ;;  %v9302_v15 = vsel %vm16227_vm3, %v9297_v44, %v9301_v63  ;;  %v17878_v53 = vld [vmem:[#allocation2 + $0x140] sm:$0x1]  ;;  %v9354_v34 = vrot.slane %v9352_v13, 4  ;;  %v9357_v59 = vrot.slane %v9355_v12, 5 }
 0x449   : > { %v17883_v8 = vrot.slane %v9361_v16, 5  ;;  %v9325_v51 = vrot.slane %v9323_v6, 5  ;;  %v9385_v35 = vshll.u32 %v17872_v41, 16  ;;  %v9389_v63 = vshrl.u32 %v17872_v41, 16  ;;  %v8778_v55 = vld [vmem:[#allocation2 + $0x15c] sm:$0xf] }
 0x44a   : > { %v9367_v61 = vrot.slane %v9365_v32, 4  ;;  %v12891_v30 = vcombine.low %v9292_v36, %v9302_v15  ;;  %v9316_v32 = vsel %vm16227_vm3, %v9311_v40, %v17841_v21  ;;  %v9334_v16 = vor.u32 %v9333_v2, %v9330_v11  ;;  %v17902_v6 = vld [vmem:[#allocation2 + $0x14c] sm:$0x1] }
 0x44b   : > { %14437 = vmatmul.mubr.msk.bf16.gmra.mrb[8].mxu1 %vm3154_vm4, %v12888_v57  ;;  %v9347_v13 = vshll.u32 %v17878_v53, 16  ;;  %v9326_v12 = vsel %vm16227_vm3, %v9321_v27, %v9325_v51  ;;  %v9358_v19 = vor.u32 %v9357_v59, %v9354_v34  ;;  %v17907_v21 = vld [vmem:[#allocation2 + $0x16c] sm:$0xf]  ;;  %v17910_v40 = vrot.slane %v9385_v35, 5 }
 0x44c   : > { %14440 = vmatprep.mubr.msk.bf16.mxu1 %vm3154_vm4, %v12889_v0  ;;  %v17876_v57 = vpop.f32.mrb[120].mxu0  ;;  %v9344_v0 = vor.u32 %v9343_v9, %v17862_v49  ;;  %v17892_v9 = vld [vmem:[#allocation2 + $0x160] sm:$0xf]  ;;  %v9368_v15 = vor.u32 %v9367_v61, %v17883_v8  ;;  %v9391_v11 = vrot.slane %v9389_v63, 4  ;;  %v9400_v2 = vshrl.u32 %v8778_v55, 16 }
 0x44d   : > { %18677 = vst [vmem:[#allocation44_spill] sm:$0xff] %v17876_v57  ;;  %v17881_v4 = vpop.f32.mrb[121].mxu0  ;;  %v9379_v57 = vshll.u32 %v8775_v39, 16  ;;  %v9409_v36 = vshll.u32 %v17892_v9, 16  ;;  %v9403_v27 = vshll.u32 %v8778_v55, 16  ;;  %v9349_v34 = vrot.slane %v9347_v13, 5 }
 0x44e   : > { %18678 = vst [vmem:[#allocation45_spill] sm:$0xff] %v17881_v4  ;;  %v17888_v44 = vpop.f32.mrb[122].mxu0  ;;  %v9345_v14 = vrot.slane %v9344_v0, 4  ;;  %v12892_v0 = vcombine.low %v9316_v32, %v9326_v12  ;;  %v9371_v59 = vshll.u32 %v17902_v6, 16  ;;  %v8781_v61 = vld [vmem:[#allocation2 + $0x168] sm:$0xf] }
 0x44f   : > { %18679 = vst [vmem:[#allocation46_spill] sm:$0xff] %v17888_v44  ;;  %v17894_v4 = vpop.f32.mrb[123].mxu0  ;;  %v9376_v44 = vshrl.u32 %v8775_v39, 16  ;;  %v9335_v39 = vrot.slane %v9334_v16, 4  ;;  %v9381_v22 = vrot.slane %v9379_v57, 5  ;;  %v9433_v24 = vshll.u32 %v17907_v21, 16 }
 0x450   : > { %18680 = vst [vmem:[#allocation47_spill] sm:$0xff] %v17894_v4  ;;  %v9413_v4 = vshrl.u32 %v17892_v9, 16  ;;  %v9350_v35 = vsel %vm16227_vm3, %v9345_v14, %v9349_v34  ;;  %v17922_v32 = vld [vmem:[#allocation2 + $0x158] sm:$0x1]  ;;  %v17924_v16 = vrot.slane %v9409_v36, 5  ;;  %v9359_v12 = vrot.slane %v9358_v19, 4 }
 0x451   : > { %v9378_v31 = vrot.slane %v9376_v44, 4  ;;  %v9392_v57 = vor.u32 %v9391_v11, %v17910_v40  ;;  %v17929_v44 = vld [vmem:[#allocation2 + $0x164] sm:$0x1]  ;;  %v9405_v5 = vrot.slane %v9403_v27, 5  ;;  %v9340_v14 = vsel %vm16227_vm3, %v9335_v39, %v17862_v49  ;;  %v8784_v11 = vld [vmem:[#allocation2 + $0x174] sm:$0xf] }
 0x452   : > { %v9415_v13 = vrot.slane %v9413_v4, 4  ;;  %v9427_v36 = vshll.u32 %v8781_v61, 16  ;;  %v9395_v4 = vshll.u32 %v17922_v32, 16  ;;  %v12893_v43 = vcombine.low %v9340_v14, %v9350_v35 }
 0x453   : > { %14441 = vmatmul.mubr.msk.bf16.gmra.mrb[12].mxu1 %vm3154_vm4, %v12890_v38  ;;  %v9437_v38 = vshrl.u32 %v17907_v21, 16  ;;  %v9382_v54 = vor.u32 %v9381_v22, %v9378_v31  ;;  %v9419_v49 = vshll.u32 %v17929_v44, 16  ;;  %v9364_v22 = vsel %vm16227_vm3, %v9359_v12, %v17883_v8  ;;  %v8787_v8 = vld [vmem:[#allocation2 + $0x180] sm:$0xf] }
 0x454   : > { %14444 = vmatprep.mubr.msk.bf16.mxu1 %vm3154_vm4, %v12891_v30  ;;  %v17914_v51 = vpop.f32.mrb[124].mxu0  ;;  %v9369_v30 = vrot.slane %v9368_v15, 4  ;;  %v9373_v15 = vrot.slane %v9371_v59, 5  ;;  %v9416_v27 = vor.u32 %v9415_v13, %v17924_v16  ;;  %v9393_v31 = vrot.slane %v9392_v57, 4  ;;  %v17950_v59 = vld [vmem:[#allocation2 + $0x170] sm:$0x1] }
 0x455   : > { %18681 = vst [vmem:[#allocation48_spill] sm:$0xff] %v17914_v51  ;;  %v17920_v63 = vpop.f32.mrb[125].mxu0  ;;  %v9402_v51 = vrot.slane %v9400_v2, 4  ;;  %v9439_v19 = vrot.slane %v9437_v38, 4  ;;  %v9429_v38 = vrot.slane %v9427_v36, 5  ;;  %v9448_v35 = vshrl.u32 %v8784_v11, 16 }
 0x456   : > { %18682 = vst [vmem:[#allocation49_spill] sm:$0xff] %v17920_v63  ;;  %v17926_v55 = vpop.f32.mrb[126].mxu0  ;;  %v9424_v63 = vshrl.u32 %v8781_v61, 16  ;;  %v9374_v2 = vsel %vm16227_vm3, %v9369_v30, %v9373_v15  ;;  %v9451_v30 = vshll.u32 %v8784_v11, 16  ;;  %v9383_v14 = vrot.slane %v9382_v54, 4 }
 0x457   : > { %18683 = vst [vmem:[#allocation50_spill] sm:$0xff] %v17926_v55  ;;  %v17934_v34 = vpop.f32.mrb[127].mxu0  ;;  %v17937_v55 = vrot.slane %v9433_v24, 5  ;;  %v9406_v39 = vor.u32 %v9405_v5, %v9402_v51  ;;  %v17947_v24 = vld [vmem:[#allocation2 + $0x178] sm:$0xf]  ;;  %v12894_v13 = vcombine.low %v9364_v22, %v9374_v2  ;;  %v9397_v15 = vrot.slane %v9395_v4, 5 }
 0x458   : > { %18684 = vst [vmem:[#allocation51_spill] sm:$0xff] %v17934_v34  ;;  %v9426_v61 = vrot.slane %v9424_v63, 4  ;;  %v9417_v5 = vrot.slane %v9416_v27, 4  ;;  %v9421_v51 = vrot.slane %v9419_v49, 5  ;;  %v9461_v57 = vshrl.u32 %v17947_v24, 16 }
 0x459   : > { %v9440_v34 = vor.u32 %v9439_v19, %v17937_v55  ;;  %v9398_v63 = vsel %vm16227_vm3, %v9393_v31, %v9397_v15  ;;  %v9443_v54 = vshll.u32 %v17950_v59, 16  ;;  %v9481_v4 = vshll.u32 %v17638_v17, 16  ;;  %v17971_v31 = vld [vmem:[#allocation2 + $0x17c] sm:$0x1] }
 0x45a   : > { %v9485_v19 = vshrl.u32 %v17638_v17, 16  ;;  %v9407_v2 = vrot.slane %v9406_v39, 4  ;;  %v9430_v27 = vor.u32 %v9429_v38, %v9426_v61  ;;  %v9450_v49 = vrot.slane %v9448_v35, 4  ;;  %v8790_v35 = vld [vmem:[#allocation2 + $0x18c] sm:$0xf] }
 0x45b   : > { %14445 = vmatmul.mubr.msk.bf16.gmra.mrb[16].mxu1 %vm3154_vm4, %v12892_v0  ;;  %v9453_v22 = vrot.slane %v9451_v30, 5  ;;  %v9388_v18 = vsel %vm16227_vm3, %v9383_v14, %v17910_v40  ;;  %v9441_v1 = vrot.slane %v9440_v34, 4  ;;  %v9472_v15 = vshrl.u32 %v8787_v8, 16 }
 0x45c   : > { %14448 = vmatprep.mubr.msk.bf16.mxu1 %vm3154_vm4, %v12893_v43  ;;  %v17952_v0 = vpop.f32.mrb[64].mxu0  ;;  %v9457_v43 = vshll.u32 %v17947_v24, 16  ;;  %v9475_v50 = vshll.u32 %v8787_v8, 16  ;;  %v9445_v39 = vrot.slane %v9443_v54, 5  ;;  %v17978_v61 = vrot.slane %v9481_v4, 5 }
 0x45d   : > { %v17955_v12 = vpop.f32.mrb[65].mxu0  ;;  %v9487_v38 = vrot.slane %v9485_v19, 4  ;;  %v9412_v40 = vsel %vm16227_vm3, %v9407_v2, %v17924_v16  ;;  %v9454_v34 = vor.u32 %v9453_v22, %v9450_v49  ;;  %v9467_v30 = vshll.u32 %v17971_v31, 16  ;;  %v8793_v54 = vld [vmem:[#allocation2 + $0x198] sm:$0xf] }
 0x45e   : > { %18685 = vst [vmem:[#allocation52_spill] sm:$0xff] %v17955_v12  ;;  %v17961_v36 = vpop.f32.mrb[66].mxu0  ;;  %v9422_v12 = vsel %vm16227_vm3, %v9417_v5, %v9421_v51  ;;  %v17975_v17 = vrot.slane %v9457_v43, 5  ;;  %v9446_v8 = vsel %vm16227_vm3, %v9441_v1, %v9445_v39  ;;  %v9474_v5 = vrot.slane %v9472_v15, 4 }
 0x45f   : > { %18686 = vst [vmem:[#allocation53_spill] sm:$0xff] %v17961_v36  ;;  %v17966_v11 = vpop.f32.mrb[67].mxu0  ;;  %v12895_v36 = vcombine.low %v9388_v18, %v9398_v63  ;;  %v9431_v18 = vrot.slane %v9430_v27, 4  ;;  %v12896_v14 = vcombine.low %v9412_v40, %v9422_v12  ;;  %v9477_v51 = vrot.slane %v9475_v50, 5 }
 0x460   : > { %18687 = vst [vmem:[#allocation54_spill] sm:$0xff] %v17966_v11  ;;  %v9463_v11 = vrot.slane %v9461_v57, 4  ;;  %v9496_v63 = vshrl.u32 %v8790_v35, 16  ;;  %v9509_v16 = vshrl.u32 %v17662_v47, 16  ;;  %v9488_v12 = vor.u32 %v9487_v38, %v17978_v61  ;;  %v8796_v38 = vld [vmem:[#allocation2 + $0x1a4] sm:$0xf] }
 0x461   : > { %v9499_v19 = vshll.u32 %v8790_v35, 16  ;;  %v9529_v1 = vshll.u32 %v17682_v28, 16  ;;  %v9533_v2 = vshrl.u32 %v17682_v28, 16  ;;  %v9436_v50 = vsel %vm16227_vm3, %v9431_v18, %v17937_v55  ;;  %v18005_v35 = vld [vmem:[#allocation2 + $0x1a8] sm:$0xf] }
 0x462   : > { %v9464_v57 = vor.u32 %v9463_v11, %v17975_v17  ;;  %v9455_v27 = vrot.slane %v9454_v34, 4  ;;  %v9469_v49 = vrot.slane %v9467_v30, 5  ;;  %v12897_v22 = vcombine.low %v9436_v50, %v9446_v8 }
 0x463   : > { %14449 = vmatmul.mubr.msk.bf16.gmra.mrb[20].mxu1 %vm3154_vm4, %v12894_v13  ;;  %v9478_v15 = vor.u32 %v9477_v51, %v9474_v5  ;;  %v9520_v39 = vshrl.u32 %v8793_v54, 16  ;;  %v9523_v40 = vshll.u32 %v8793_v54, 16  ;;  %v9489_v55 = vrot.slane %v9488_v12, 4 }
 0x464   : > { %14452 = vmatprep.mubr.msk.bf16.mxu1 %vm3154_vm4, %v12895_v36  ;;  %v17987_v13 = vpop.f32.mrb[68].mxu0  ;;  %v9505_v36 = vshll.u32 %v17662_v47, 16  ;;  %v9491_v47 = vshll.u32 %v17652_v26, 16  ;;  %v9501_v18 = vrot.slane %v9499_v19, 5  ;;  %v9535_v34 = vrot.slane %v9533_v2, 4 }
 0x465   : > { %18688 = vst [vmem:[#allocation55_spill] sm:$0xff] %v17987_v13  ;;  %v17989_v43 = vpop.f32.mrb[69].mxu0  ;;  %v9511_v13 = vrot.slane %v9509_v16, 4  ;;  %v9544_v26 = vshrl.u32 %v8796_v38, 16  ;;  %v9547_v30 = vshll.u32 %v8796_v38, 16  ;;  %v9553_v8 = vshll.u32 %v18005_v35, 16 }
 0x466   : > { %18689 = vst [vmem:[#allocation56_spill] sm:$0xff] %v17989_v43  ;;  %v17994_v4 = vpop.f32.mrb[70].mxu0  ;;  %v9498_v43 = vrot.slane %v9496_v63, 4  ;;  %v9507_v28 = vrot.slane %v9505_v36, 5  ;;  %v9557_v5 = vshrl.u32 %v18005_v35, 16  ;;  %v9479_v51 = vrot.slane %v9478_v15, 4 }
 0x467   : > { %18690 = vst [vmem:[#allocation57_spill] sm:$0xff] %v17994_v4  ;;  %v18002_v11 = vpop.f32.mrb[71].mxu0  ;;  %v9465_v4 = vrot.slane %v9464_v57, 4  ;;  %v9493_v54 = vrot.slane %v9491_v47, 5  ;;  %v9522_v63 = vrot.slane %v9520_v39, 4  ;;  %v9525_v36 = vrot.slane %v9523_v40, 5 }
 0x468   : > { %18691 = vst [vmem:[#allocation58_spill] sm:$0xff] %v18002_v11  ;;  %v9531_v11 = vrot.slane %v9529_v1, 5  ;;  %v9512_v19 = vor.u32 %v9511_v13, %v9507_v28  ;;  %v9502_v50 = vor.u32 %v9501_v18, %v9498_v43  ;;  %v9515_v47 = vshll.u32 %v17670_v60, 16 }
 0x469   : > { %v9470_v16 = vsel %vm16227_vm3, %v9465_v4, %v9469_v49  ;;  %v9494_v1 = vsel %vm16227_vm3, %v9489_v55, %v9493_v54  ;;  %v9546_v39 = vrot.slane %v9544_v26, 4  ;;  %v9549_v40 = vrot.slane %v9547_v30, 5  ;;  %v18031_v55 = vld [vmem:[#allocation2 + $0x1ac] sm:$0x1] }
 0x46a   : > { %v9484_v13 = vsel %vm16227_vm3, %v9479_v51, %v17978_v61  ;;  %v9526_v4 = vor.u32 %v9525_v36, %v9522_v63  ;;  %v9539_v49 = vshll.u32 %v17698_v20, 16  ;;  %v9513_v18 = vrot.slane %v9512_v19, 4 }
 0x46b   : > { %14453 = vmatmul.mubr.msk.bf16.gmra.mrb[24].mxu1 %vm3154_vm4, %v12896_v14  ;;  %v9460_v14 = vsel %vm16227_vm3, %v9455_v27, %v17975_v17  ;;  %v9555_v17 = vrot.slane %v9553_v8, 5  ;;  %v9559_v27 = vrot.slane %v9557_v5, 4  ;;  %v12899_v43 = vcombine.low %v9484_v13, %v9494_v1 }
 0x46c   : > { %14456 = vmatprep.mubr.msk.bf16.mxu1 %vm3154_vm4, %v12897_v22  ;;  %v18011_v57 = vpop.f32.mrb[72].mxu0  ;;  %v9536_v22 = vor.u32 %v9535_v34, %v9531_v11  ;;  %v12898_v38 = vcombine.low %v9460_v14, %v9470_v16  ;;  %v9517_v60 = vrot.slane %v9515_v47, 5  ;;  %v9503_v26 = vrot.slane %v9502_v50, 4  ;;  %v15548_v16 = vld [vmem:[#allocation2 + $0x1c] sm:$0xf] }
 0x46d   : > { %v18018_v12 = vpop.f32.mrb[73].mxu0  ;;  %v9550_v30 = vor.u32 %v9549_v40, %v9546_v39  ;;  %v9560_v8 = vor.u32 %v9559_v27, %v9555_v17  ;;  %v9563_v5 = vshll.u32 %v18031_v55, 16  ;;  %v9527_v54 = vrot.slane %v9526_v4, 4 }
 0x46e   : > { %v18022_v2 = vpop.f32.mrb[74].mxu0  ;;  %v9537_v34 = vrot.slane %v9536_v22, 4  ;;  %v9541_v61 = vrot.slane %v9539_v49, 5  ;;  %v9518_v20 = vsel %vm16227_vm3, %v9513_v18, %v9517_v60  ;;  %v10259_v19 = vrot.slane %v15548_v16, 5  ;;  %v10129_v49 = vld [vmem:[#allocation2 + $0x18] sm:$0xe] }
 0x46f   : > { %v18025_v15 = vpop.f32.mrb[75].mxu0  ;;  %v9508_v1 = vsel %vm16227_vm3, %v9503_v26, %v9507_v28  ;;  %v9551_v47 = vrot.slane %v9550_v30, 4  ;;  %v9561_v22 = vrot.slane %v9560_v8, 4  ;;  %v9565_v39 = vrot.slane %v9563_v5, 5 }
 0x470   : > { %v9542_v36 = vsel %vm16227_vm3, %v9537_v34, %v9541_v61  ;;  %v12900_v40 = vcombine.low %v9508_v1, %v9518_v20  ;;  %v9532_v27 = vsel %vm16227_vm3, %v9527_v54, %v9531_v11  ;;  %v10261_v13 = vrot.slane %v10259_v19, 4  ;;  %v15550_v11 = vld [vmem:[#allocation2 + $0x28] sm:$0xf]  ;;  %v10130_v1 = vld [vmem:[#allocation2 + $0x24] sm:$0xe] }
 0x471   : > { %v9556_v4 = vsel %vm16227_vm3, %v9551_v47, %v9555_v17  ;;  %v9566_v28 = vsel %vm16227_vm3, %v9561_v22, %v9565_v39  ;;  %v10266_v26 = vrot.slane %v15550_v11, 5  ;;  %v12937_v8 = vrot.slane %v10129_v49, 9  ;;  %v15551_v17 = vld [vmem:[#allocation2 + $0x34] sm:$0xf]  ;;  %v15313_v22 = vld [vmem:[%s18615_s5] sm:$0xff]   ;;  %v15314_v39 = vld [vmem:[%s18615_s5 + $0x8] sm:$0xff]  }
 0x472   : > { %v12902_v30 = vcombine.low %v9556_v4, %v9566_v28  ;;  %v10273_v61 = vrot.slane %v15551_v17, 5  ;;  %14536 = vmatprep.subr.bf16.mxu0 %v15313_v22  ;;  %v12938_v28 = vrot.slane %v10130_v1, 9  ;;  %v15555_v17 = vld [vmem:[#allocation2 + $0x4c] sm:$0xf] }
 0x473   : > { %14457 = vmatmul.mubr.msk.bf16.gmra.mrb[28].mxu1 %vm3154_vm4, %v12898_v38  ;;  %v12901_v38 = vcombine.low %v9532_v27, %v9542_v36  ;;  %v10260_v20 = vsel %vm17073_vm14, %v12937_v8, %v10259_v19  ;;  %v10268_v16 = vrot.slane %v10266_v26, 4  ;;  %v15553_v19 = vld [vmem:[#allocation2 + $0x38] sm:$0x1]  ;;  %14537 = vmatpush3.bf16.msra.mxu0 %v15313_v22 }
 0x474   : > { %14460 = vmatprep.mubr.msk.bf16.mxu1 %vm3154_vm4, %v12899_v43  ;;  %v18036_v51 = vpop.f32.mrb[76].mxu0  ;;  %v15549_v43 = vld [vmem:[#allocation2 + $0x20] sm:$0x1]  ;;  %v10275_v47 = vrot.slane %v10273_v61, 4  ;;  %14538 = vmatprep.subr.bf16.mxu0 %v15314_v39 }
 0x475   : > { %v18040_v63 = vpop.f32.mrb[77].mxu0  ;;  %v10262_v18 = vrot.slane %v15549_v43, 5 }
 0x476   : > { %v18044_v14 = vpop.f32.mrb[78].mxu0 }
 0x477   : > { %v18048_v50 = vpop.f32.mrb[79].mxu0  ;;  %v10263_v5 = vsel %vm17073_vm14, %v10261_v13, %v10262_v18  ;;  %v10276_v13 = vrot.slane %v15553_v19, 5  ;;  %v15554_v18 = vld [vmem:[#allocation2 + $0x40] sm:$0xf]  ;;  %14539 = vmatpush3.bf16.msra.mxu0 %v15314_v39  ;;  %v15556_v19 = vld [vmem:[#allocation2 + $0x44] sm:$0x1] }
 0x478   : > { %v12969_v36 = vcombine.low %v10260_v20, %v10263_v5  ;;  %v10280_v11 = vrot.slane %v15554_v18, 5  ;;  %v10287_v20 = vrot.slane %v15555_v17, 5  ;;  %v10133_v18 = vld [vmem:[#allocation2 + $0x48] sm:$0xe]  ;;  %v15557_v17 = vld [vmem:[#allocation2 + $0x50] sm:$0x1] }
 0x479   : > { %v10277_v8 = vsel %vm17073_vm14, %v10275_v47, %v10276_v13  ;;  %v10132_v47 = vld [vmem:[#allocation2 + $0x3c] sm:$0xe]  ;;  %v10283_v13 = vrot.slane %v15556_v19, 5 }
 0x47a   : > { %v10282_v22 = vrot.slane %v10280_v11, 4 }
 0x47b   : > { %14461 = vmatmul.mubr.msk.bf16.gmra.mrb[32].mxu1 %vm3154_vm4, %v12900_v40  ;;  %v15552_v40 = vld [vmem:[#allocation2 + $0x2c] sm:$0x1] }
 0x47c   : > { %14464 = vmatprep.mubr.msk.bf16.mxu1 %vm3154_vm4, %v12901_v38  ;;  %v18058_v60 = vpop.f32.mrb[80].mxu0  ;;  %v10269_v27 = vrot.slane %v15552_v40, 5  ;;  %v10131_v38 = vld [vmem:[#allocation2 + $0x30] sm:$0xe] }
 0x47d   : > { %v18060_v34 = vpop.f32.mrb[81].mxu0 }
 0x47e   : > { %v18064_v54 = vpop.f32.mrb[82].mxu0  ;;  %v10270_v49 = vsel %vm17073_vm14, %v10268_v16, %v10269_v27 }
 0x47f   : > { %v18066_v58 = vpop.f32.mrb[83].mxu0 }
 0x483   : > { %14465 = vmatmul.mubr.msk.bf16.gmra.mrb[36].mxu1 %vm3154_vm4, %v12902_v30  ;;  %v12939_v30 = vrot.slane %v10131_v38, 9  ;;  %v10289_v38 = vrot.slane %v10287_v20, 4 }
 0x484   : > { %14472 = vmatprep.mubr.msk.bf16.mxu1 %vm3154_vm4, %v12969_v36  ;;  %v18078_v4 = vpop.f32.mrb[84].mxu0  ;;  %v10267_v36 = vsel %vm17073_vm14, %v12938_v28, %v10266_v26  ;;  %v10290_v26 = vrot.slane %v15557_v17, 5  ;;  %v12940_v28 = vrot.slane %v10132_v47, 9 }
 0x485   : > { %v18082_v43 = vpop.f32.mrb[85].mxu0  ;;  %v12970_v16 = vcombine.low %v10267_v36, %v10270_v49  ;;  %v10274_v40 = vsel %vm17073_vm14, %v12939_v30, %v10273_v61  ;;  %v10284_v49 = vsel %vm17073_vm14, %v10282_v22, %v10283_v13  ;;  %v15558_v36 = vld [vmem:[#allocation2 + $0x58] sm:$0xf]  ;;  %v12941_v30 = vrot.slane %v10133_v18, 9  ;;  %v10134_v22 = vld [vmem:[#allocation2 + $0x54] sm:$0xe] }
 0x486   : > { %18692 = vst [vmem:[#allocation59_spill] sm:$0xff] %v18082_v43  ;;  %v18086_v5 = vpop.f32.mrb[86].mxu0  ;;  %v12971_v27 = vcombine.low %v10274_v40, %v10277_v8  ;;  %v10294_v61 = vrot.slane %v15558_v36, 5  ;;  %v10291_v39 = vsel %vm17073_vm14, %v10289_v38, %v10290_v26  ;;  %v15559_v8 = vld [vmem:[#allocation2 + $0x64] sm:$0xf]  ;;  %v10281_v40 = vsel %vm17073_vm14, %v12940_v28, %v10280_v11 }
 0x487   : > { %18693 = vst [vmem:[#allocation60_spill] sm:$0xff] %v18086_v5  ;;  %v18090_v1 = vpop.f32.mrb[87].mxu0  ;;  %v10288_v19 = vsel %vm17073_vm14, %v12941_v30, %v10287_v20  ;;  %v15560_v18 = vld [vmem:[#allocation2 + $0x5c] sm:$0x1]  ;;  %v10135_v38 = vld [vmem:[#allocation2 + $0x60] sm:$0xe] }
 0x488   : > { %18694 = vst [vmem:[#allocation61_spill] sm:$0xff] %v18090_v1  ;;  %v12973_v17 = vcombine.low %v10288_v19, %v10291_v39  ;;  %v10296_v47 = vrot.slane %v10294_v61, 4  ;;  %v10297_v36 = vrot.slane %v15560_v18, 5  ;;  %v15561_v26 = vld [vmem:[#allocation2 + $0x68] sm:$0x1]  ;;  %v12942_v1 = vrot.slane %v10134_v22, 9 }
 0x489   : > { %v15562_v28 = vld [vmem:[#allocation2 + $0x70] sm:$0xf]  ;;  %v12943_v20 = vrot.slane %v10135_v38, 9  ;;  %v15563_v39 = vld [vmem:[#allocation2 + $0x7c] sm:$0xf] }
 0x48a   : > { %v10298_v11 = vsel %vm17073_vm14, %v10296_v47, %v10297_v36  ;;  %v10136_v47 = vld [vmem:[#allocation2 + $0x6c] sm:$0xe]  ;;  %v15564_v38 = vld [vmem:[#allocation2 + $0x74] sm:$0x1] }
 0x48b   : > { %14473 = vmatmul.mubr.msk.bf16.vlgmr.msra.gmra.mrb[40].mxu1 %vm3154_vm4, %v12970_v16  ;;  %v10301_v16 = vrot.slane %v15559_v8, 5  ;;  %v10304_v8 = vrot.slane %v15561_v26, 5  ;;  %v10311_v26 = vrot.slane %v15564_v38, 5 }
 0x48c   : > { %14476 = vmatprep.mubr.msk.bf16.mxu1 %vm3154_vm4, %v12971_v27  ;;  %v12972_v27 = vcombine.low %v10281_v40, %v10284_v49  ;;  %v10308_v49 = vrot.slane %v15562_v28, 5  ;;  %v10315_v40 = vrot.slane %v15563_v39, 5  ;;  %v12944_v39 = vrot.slane %v10136_v47, 9 }
 0x48d   : > { %v10303_v13 = vrot.slane %v10301_v16, 4 }
 0x48e   : > { %v10310_v22 = vrot.slane %v10308_v49, 4  ;;  %v10317_v36 = vrot.slane %v10315_v40, 4 }
 0x48f   : > { %v10305_v30 = vsel %vm17073_vm14, %v10303_v13, %v10304_v8  ;;  %v10137_v13 = vld [vmem:[#allocation2 + $0x78] sm:$0xe]  ;;  %v15565_v8 = vld [vmem:[#allocation2 + $0x80] sm:$0x1] }
 0x490   : > { %v10318_v28 = vrot.slane %v15565_v8, 5 }
 0x493   : > { %14477 = vmatmul.mubr.msk.bf16.gmra.mrb[44].mxu1 %vm3154_vm4, %v12972_v27  ;;  %v10295_v27 = vsel %vm17073_vm14, %v12942_v1, %v10294_v61  ;;  %v10312_v1 = vsel %vm17073_vm14, %v10310_v22, %v10311_v26  ;;  %v15566_v61 = vld [vmem:[#allocation2 + $0x88] sm:$0xf]  ;;  %v10138_v22 = vld [vmem:[#allocation2 + $0x84] sm:$0xe] }
 0x494   : > { %14480 = vmatprep.mubr.msk.bf16.mxu1 %vm3154_vm4, %v12973_v17  ;;  %v12974_v19 = vcombine.low %v10295_v27, %v10298_v11  ;;  %v10302_v17 = vsel %vm17073_vm14, %v12943_v20, %v10301_v16  ;;  %v10322_v11 = vrot.slane %v15566_v61, 5  ;;  %v12945_v16 = vrot.slane %v10137_v13, 9  ;;  %v15568_v13 = vld [vmem:[#allocation2 + $0x8c] sm:$0x1] }
 0x495   : > { %v12975_v18 = vcombine.low %v10302_v17, %v10305_v30  ;;  %v10319_v20 = vsel %vm17073_vm14, %v10317_v36, %v10318_v28  ;;  %v15567_v30 = vld [vmem:[#allocation2 + $0x94] sm:$0xf]  ;;  %v10325_v8 = vrot.slane %v15568_v13, 5  ;;  %v10139_v36 = vld [vmem:[#allocation2 + $0x90] sm:$0xe] }
 0x496   : > { %v10329_v27 = vrot.slane %v15567_v30, 5  ;;  %v10324_v47 = vrot.slane %v10322_v11, 4  ;;  %v15569_v28 = vld [vmem:[#allocation2 + $0x98] sm:$0x1]  ;;  %v12946_v30 = vrot.slane %v10138_v22, 9 }
 0x497   : > { %v10332_v61 = vrot.slane %v15569_v28, 5 }
 0x498   : > { %v10331_v26 = vrot.slane %v10329_v27, 4 }
 0x49b   : > { %14481 = vmatmul.mubr.msk.bf16.gmra.mrb[48].mxu1 %vm3154_vm4, %v12974_v19  ;;  %v10309_v19 = vsel %vm17073_vm14, %v12944_v39, %v10308_v49  ;;  %v10326_v49 = vsel %vm17073_vm14, %v10324_v47, %v10325_v8  ;;  %v15570_v39 = vld [vmem:[#allocation2 + $0xa0] sm:$0xf]  ;;  %v10140_v47 = vld [vmem:[#allocation2 + $0x9c] sm:$0xe] }
 0x49c   : > { %14484 = vmatprep.mubr.msk.bf16.mxu1 %vm3154_vm4, %v12975_v18  ;;  %v12976_v17 = vcombine.low %v10309_v19, %v10312_v1  ;;  %v10316_v18 = vsel %vm17073_vm14, %v12945_v16, %v10315_v40  ;;  %v10336_v1 = vrot.slane %v15570_v39, 5  ;;  %v12947_v40 = vrot.slane %v10139_v36, 9  ;;  %v15572_v36 = vld [vmem:[#allocation2 + $0xa4] sm:$0x1] }
 0x49d   : > { %v12977_v38 = vcombine.low %v10316_v18, %v10319_v20  ;;  %v10333_v16 = vsel %vm17073_vm14, %v10331_v26, %v10332_v61  ;;  %v15571_v20 = vld [vmem:[#allocation2 + $0xac] sm:$0xf]  ;;  %v10339_v28 = vrot.slane %v15572_v36, 5  ;;  %v10141_v26 = vld [vmem:[#allocation2 + $0xa8] sm:$0xe] }
 0x49e   : > { %v10343_v19 = vrot.slane %v15571_v20, 5  ;;  %v10338_v22 = vrot.slane %v10336_v1, 4  ;;  %v15573_v61 = vld [vmem:[#allocation2 + $0xb0] sm:$0x1]  ;;  %v12948_v20 = vrot.slane %v10140_v47, 9 }
 0x49f   : > { %v10346_v39 = vrot.slane %v15573_v61, 5 }
 0x4a0   : > { %v10345_v8 = vrot.slane %v10343_v19, 4 }
 0x4a3   : > { %14485 = vmatmul.mubr.msk.bf16.gmra.mrb[52].mxu1 %vm3154_vm4, %v12976_v17  ;;  %v10323_v17 = vsel %vm17073_vm14, %v12946_v30, %v10322_v11  ;;  %v10340_v11 = vsel %vm17073_vm14, %v10338_v22, %v10339_v28  ;;  %v15574_v30 = vld [vmem:[#allocation2 + $0xb8] sm:$0xf]  ;;  %v10142_v22 = vld [vmem:[#allocation2 + $0xb4] sm:$0xe] }
 0x4a4   : > { %14488 = vmatprep.mubr.msk.bf16.mxu1 %vm3154_vm4, %v12977_v38  ;;  %v12978_v18 = vcombine.low %v10323_v17, %v10326_v49  ;;  %v10330_v38 = vsel %vm17073_vm14, %v12947_v40, %v10329_v27  ;;  %v10350_v49 = vrot.slane %v15574_v30, 5  ;;  %v12949_v27 = vrot.slane %v10141_v26, 9  ;;  %v15576_v26 = vld [vmem:[#allocation2 + $0xbc] sm:$0x1] }
 0x4a5   : > { %v12979_v13 = vcombine.low %v10330_v38, %v10333_v16  ;;  %v10347_v40 = vsel %vm17073_vm14, %v10345_v8, %v10346_v39  ;;  %v15575_v16 = vld [vmem:[#allocation2 + $0xc4] sm:$0xf]  ;;  %v10353_v61 = vrot.slane %v15576_v26, 5  ;;  %v10143_v8 = vld [vmem:[#allocation2 + $0xc0] sm:$0xe] }
 0x4a6   : > { %v10357_v17 = vrot.slane %v15575_v16, 5  ;;  %v10352_v47 = vrot.slane %v10350_v49, 4  ;;  %v15577_v39 = vld [vmem:[#allocation2 + $0xd0] sm:$0xf]  ;;  %v15578_v16 = vld [vmem:[#allocation2 + $0xc8] sm:$0x1] }
 0x4a7   : > { %v10364_v30 = vrot.slane %v15577_v39, 5  ;;  %v10360_v5 = vrot.slane %v15578_v16, 5  ;;  %v15580_v26 = vld [vmem:[#allocation2 + $0xd4] sm:$0x1] }
 0x4a8   : > { %v10359_v28 = vrot.slane %v10357_v17, 4  ;;  %v10367_v39 = vrot.slane %v15580_v26, 5  ;;  %v15584_v26 = vld [vmem:[#allocation2 + $0x104] sm:$0x1] }
 0x4ab   : > { %14489 = vmatmul.mubr.msk.bf16.gmra.mrb[56].mxu1 %vm3154_vm4, %v12978_v18  ;;  %v10337_v18 = vsel %vm17073_vm14, %v12948_v20, %v10336_v1  ;;  %v10144_v1 = vld [vmem:[#allocation2 + $0xcc] sm:$0xe]  ;;  %v12950_v20 = vrot.slane %v10142_v22, 9 }
 0x4ac   : > { %14492 = vmatprep.mubr.msk.bf16.mxu1 %vm3154_vm4, %v12979_v13  ;;  %v12980_v38 = vcombine.low %v10337_v18, %v10340_v11  ;;  %v10344_v13 = vsel %vm17073_vm14, %v12949_v27, %v10343_v19  ;;  %v10354_v19 = vsel %vm17073_vm14, %v10352_v47, %v10353_v61  ;;  %v12951_v11 = vrot.slane %v10143_v8, 9  ;;  %v15581_v61 = vld [vmem:[#allocation2 + $0xf8] sm:$0x1] }
 0x4ad   : > { %v12981_v36 = vcombine.low %v10344_v13, %v10347_v40  ;;  %v10361_v27 = vsel %vm17073_vm14, %v10359_v28, %v10360_v5  ;;  %v15579_v40 = vld [vmem:[#allocation2 + $0xf4] sm:$0xf]  ;;  %v12952_v13 = vrot.slane %v10144_v1, 9  ;;  %v10145_v28 = vld [vmem:[#allocation2 + $0xf0] sm:$0xe]  ;;  %v10374_v8 = vrot.slane %v15581_v61, 5 }
 0x4ae   : > { %v10371_v18 = vrot.slane %v15579_v40, 5  ;;  %v10358_v22 = vsel %vm17073_vm14, %v12951_v11, %v10357_v17  ;;  %v15582_v1 = vld [vmem:[#allocation2 + $0x100] sm:$0xf]  ;;  %v12953_v40 = vrot.slane %v10145_v28, 9 }
 0x4af   : > { %v12983_v16 = vcombine.low %v10358_v22, %v10361_v27  ;;  %v10365_v5 = vsel %vm17073_vm14, %v12952_v13, %v10364_v30  ;;  %v10146_v13 = vld [vmem:[#allocation2 + $0xfc] sm:$0xe]  ;;  %v10147_v22 = vld [vmem:[#allocation2 + $0x108] sm:$0xe] }
 0x4b0   : > { %v10373_v47 = vrot.slane %v10371_v18, 4  ;;  %v10372_v27 = vsel %vm17073_vm14, %v12953_v40, %v10371_v18  ;;  %v12955_v18 = vrot.slane %v10147_v22, 9 }
 0x4b2   : > { %v10375_v17 = vsel %vm17073_vm14, %v10373_v47, %v10374_v8  ;;  %v10399_v8 = vrot.slane %v17783_v37, 5  ;;  %v10402_v37 = vrot.slane %v17835_v3, 5 }
 0x4b3   : > { %14493 = vmatmul.mubr.msk.bf16.gmra.mrb[60].mxu1 %vm3154_vm4, %v12980_v38  ;;  %v10351_v38 = vsel %vm17073_vm14, %v12950_v20, %v10350_v49  ;;  %v10378_v20 = vrot.slane %v15582_v1, 5 }
 0x4b4   : > { %14496 = vmatprep.mubr.msk.bf16.mxu1 %vm3154_vm4, %v12981_v36  ;;  %v10366_v36 = vrot.slane %v10364_v30, 4  ;;  %v12982_v43 = vcombine.low %v10351_v38, %v10354_v19  ;;  %v12985_v38 = vcombine.low %v10372_v27, %v10375_v17  ;;  %v10401_v27 = vrot.slane %v10399_v8, 4 }
 0x4b5   : > { %v10380_v30 = vrot.slane %v10378_v20, 4 }
 0x4b6   : > { %v10368_v49 = vsel %vm17073_vm14, %v10366_v36, %v10367_v39  ;;  %v10381_v39 = vrot.slane %v15584_v26, 5  ;;  %v10403_v26 = vsel %vm17073_vm14, %v10401_v27, %v10402_v37  ;;  %v10152_v27 = vld [vmem:[#allocation2 + $0x144] sm:$0xe] }
 0x4b7   : > { %v12984_v19 = vcombine.low %v10365_v5, %v10368_v49  ;;  %v12954_v5 = vrot.slane %v10146_v13, 9  ;;  %v15585_v49 = vld [vmem:[#allocation2 + $0x118] sm:$0xf]  ;;  %v12960_v37 = vrot.slane %v10152_v27, 9 }
 0x4b8   : > { %v10382_v47 = vsel %vm17073_vm14, %v10380_v30, %v10381_v39  ;;  %v10392_v28 = vrot.slane %v15585_v49, 5  ;;  %v10149_v30 = vld [vmem:[#allocation2 + $0x120] sm:$0xe]  ;;  %v10413_v39 = vrot.slane %v17830_v46, 5  ;;  %v10416_v46 = vrot.slane %v17878_v53, 5 }
 0x4b9   : > { %v10379_v1 = vsel %vm17073_vm14, %v12954_v5, %v10378_v20 }
 0x4ba   : > { %v10394_v17 = vrot.slane %v10392_v28, 4  ;;  %v10415_v49 = vrot.slane %v10413_v39, 4 }
 0x4bb   : > { %14497 = vmatmul.mubr.msk.bf16.gmra.mrb[0].mxu1 %vm3154_vm4, %v12982_v43  ;;  %v15583_v43 = vld [vmem:[#allocation2 + $0x10c] sm:$0xf] }
 0x4bc   : > { %14500 = vmatprep.mubr.msk.bf16.mxu1 %vm3154_vm4, %v12983_v16  ;;  %v10385_v11 = vrot.slane %v15583_v43, 5  ;;  %v10388_v16 = vrot.slane %v17786_v45, 5  ;;  %v10148_v43 = vld [vmem:[#allocation2 + $0x114] sm:$0xe] }
 0x4bd   : > { %v12956_v13 = vrot.slane %v10148_v43, 9 }
 0x4be   : > { %v10387_v36 = vrot.slane %v10385_v11, 4  ;;  %v10386_v40 = vsel %vm17073_vm14, %v12955_v18, %v10385_v11  ;;  %v12957_v11 = vrot.slane %v10149_v30, 9  ;;  %v10151_v18 = vld [vmem:[#allocation2 + $0x138] sm:$0xe]  ;;  %v10153_v30 = vld [vmem:[#allocation2 + $0x150] sm:$0xe] }
 0x4bf   : > { %v10393_v22 = vsel %vm17073_vm14, %v12956_v13, %v10392_v28 }
 0x4c0   : > { %v10389_v61 = vsel %vm17073_vm14, %v10387_v36, %v10388_v16  ;;  %v10406_v36 = vrot.slane %v17809_v29, 5  ;;  %v10409_v29 = vrot.slane %v17859_v7, 5 }
 0x4c1   : > { %v12987_v45 = vcombine.low %v10386_v40, %v10389_v61  ;;  %v10427_v40 = vrot.slane %v17872_v41, 5  ;;  %v10430_v41 = vrot.slane %v17922_v32, 5 }
 0x4c2   : > { %v10408_v5 = vrot.slane %v10406_v36, 4 }
 0x4c3   : > { %14501 = vmatmul.mubr.msk.bf16.gmra.mrb[4].mxu1 %vm3154_vm4, %v12984_v19  ;;  %v12986_v19 = vcombine.low %v10379_v1, %v10382_v47  ;;  %v10150_v47 = vld [vmem:[#allocation2 + $0x12c] sm:$0xe]  ;;  %v10420_v1 = vrot.slane %v17853_v10, 5  ;;  %v10423_v10 = vrot.slane %v17902_v6, 5 }
 0x4c4   : > { %14504 = vmatprep.mubr.msk.bf16.mxu1 %vm3154_vm4, %v12985_v38  ;;  %v10395_v38 = vrot.slane %v17815_v48, 5  ;;  %v10400_v48 = vsel %vm17073_vm14, %v12957_v11, %v10399_v8  ;;  %v12958_v61 = vrot.slane %v10150_v47, 9  ;;  %v10410_v28 = vsel %vm17073_vm14, %v10408_v5, %v10409_v29  ;;  %v10155_v5 = vld [vmem:[#allocation2 + $0x168] sm:$0xe] }
 0x4c5   : > { %v12989_v3 = vcombine.low %v10400_v48, %v10403_v26  ;;  %v12959_v8 = vrot.slane %v10151_v18, 9  ;;  %v10422_v43 = vrot.slane %v10420_v1, 4  ;;  %v10441_v26 = vrot.slane %v17907_v21, 5  ;;  %v10154_v48 = vld [vmem:[#allocation2 + $0x15c] sm:$0xe] }
 0x4c6   : > { %v10396_v20 = vsel %vm17073_vm14, %v10394_v17, %v10395_v38  ;;  %v10429_v38 = vrot.slane %v10427_v40, 4  ;;  %v10444_v21 = vrot.slane %v17950_v59, 5  ;;  %v12962_v47 = vrot.slane %v10154_v48, 9  ;;  %v10156_v59 = vld [vmem:[#allocation2 + $0x174] sm:$0xe] }
 0x4c7   : > { %v12988_v16 = vcombine.low %v10393_v22, %v10396_v20  ;;  %v10414_v7 = vsel %vm17073_vm14, %v12959_v8, %v10413_v39  ;;  %v10424_v13 = vsel %vm17073_vm14, %v10422_v43, %v10423_v10  ;;  %v10434_v20 = vrot.slane %v17892_v9, 5  ;;  %v10160_v43 = vld [vmem:[#allocation2 + $0x1a4] sm:$0xe] }
 0x4c8   : > { %v10431_v11 = vsel %vm17073_vm14, %v10429_v38, %v10430_v41  ;;  %v10421_v39 = vsel %vm17073_vm14, %v12960_v37, %v10420_v1  ;;  %v10437_v9 = vrot.slane %v17929_v44, 5  ;;  %v10448_v29 = vrot.slane %v17947_v24, 5 }
 0x4c9   : > { %v12992_v22 = vcombine.low %v10421_v39, %v10424_v13  ;;  %v12963_v18 = vrot.slane %v10155_v5, 9  ;;  %v10451_v24 = vrot.slane %v17971_v31, 5  ;;  %v12968_v27 = vrot.slane %v10160_v43, 9  ;;  %v18701_v5 = vld [vmem:[#allocation55_spill] sm:$0xff] }
 0x4ca   : > { %v10450_v8 = vrot.slane %v10448_v29, 4  ;;  %v10479_v38 = vrot.slane %v18031_v55, 5  ;;  %v18696_v10 = vcombine.low %v17716_v62, %v17720_v33  ;;  %v18261_v62 = vld [vmem:[%s18614_s4] ss:$0 sm:$0xff] }
 0x4cb   : > { %14505 = vmatmul.mubr.msk.bf16.gmra.mrb[8].mxu1 %vm3154_vm4, %v12986_v19  ;;  %v10417_v19 = vsel %vm17073_vm14, %v10415_v49, %v10416_v46  ;;  %v10442_v44 = vsel %vm17073_vm14, %v12963_v18, %v10441_v26 }
 0x4cc   : > { %14508 = vmatprep.mubr.msk.bf16.mxu1 %vm3154_vm4, %v12987_v45  ;;  %v10407_v45 = vsel %vm17073_vm14, %v12958_v61, %v10406_v36  ;;  %v12991_v53 = vcombine.low %v10414_v7, %v10417_v19  ;;  %v12961_v36 = vrot.slane %v10153_v30, 9  ;;  %v10435_v61 = vsel %vm17073_vm14, %v12962_v47, %v10434_v20 }
 0x4cd   : > { %v12990_v17 = vcombine.low %v10407_v45, %v10410_v28  ;;  %v12964_v19 = vrot.slane %v10156_v59, 9  ;;  %v18695_v7 = vcombine.low %v17702_v52, %v17706_v25  ;;  %v18697_v30 = vcombine.low %v17740_v42, %v17744_v56  ;;  %v18698_v56 = vld [vmem:[#allocation52_spill] sm:$0xff]  ;;  %v18704_v59 = vld [vmem:[#allocation58_spill] sm:$0xff] }
 0x4ce   : > { %v10428_v6 = vsel %vm17073_vm14, %v12961_v36, %v10427_v40  ;;  %v10452_v40 = vsel %vm17073_vm14, %v10450_v8, %v10451_v24 }
 0x4cf   : > { %v12993_v32 = vcombine.low %v10428_v6, %v10431_v11  ;;  %v10449_v45 = vsel %vm17073_vm14, %v12964_v19, %v10448_v29  ;;  %v18702_v29 = vld [vmem:[#allocation56_spill] sm:$0xff] }
 0x4d3   : > { %14509 = vmatmul.mubr.msk.bf16.gmra.mrb[12].mxu1 %vm3154_vm4, %v12988_v16  ;;  %v10436_v16 = vrot.slane %v10434_v20, 4  ;;  %v18699_v20 = vld [vmem:[#allocation53_spill] sm:$0xff] }
 0x4d4   : > { %14512 = vmatprep.mubr.msk.bf16.mxu1 %vm3154_vm4, %v12989_v3  ;;  %v10443_v3 = vrot.slane %v10441_v26, 4  ;;  %v18700_v26 = vld [vmem:[#allocation54_spill] sm:$0xff] }
 0x4d5   : > { %v10438_v49 = vsel %vm17073_vm14, %v10436_v16, %v10437_v9 }
 0x4d6   : > { %v10445_v46 = vsel %vm17073_vm14, %v10443_v3, %v10444_v21  ;;  %v12994_v28 = vcombine.low %v10435_v61, %v10438_v49 }
 0x4d7   : > { %v12995_v1 = vcombine.low %v10442_v44, %v10445_v46 }
 0x4db   : > { %14513 = vmatmul.mubr.msk.bf16.gmra.mrb[16].mxu1 %vm3154_vm4, %v12990_v17  ;;  %v12996_v17 = vcombine.low %v10449_v45, %v10452_v40 }
 0x4dc   : > { %14516 = vmatprep.mubr.msk.bf16.mxu1 %vm3154_vm4, %v12991_v53  ;;  %v10476_v53 = vrot.slane %v18005_v35, 5 }
 0x4de   : > { %v10478_v31 = vrot.slane %v10476_v53, 4  ;;  %v10477_v52 = vsel %vm17073_vm14, %v12968_v27, %v10476_v53 }
 0x4e0   : > { %v10480_v25 = vsel %vm17073_vm14, %v10478_v31, %v10479_v38 }
 0x4e1   : > { %v13000_v35 = vcombine.low %v10477_v52, %v10480_v25 }
 0x4e3   : > { %14517 = vmatmul.mubr.msk.bf16.gmra.mrb[20].mxu1 %vm3154_vm4, %v12992_v22 }
 0x4e4   : > { %14520 = vmatprep.mubr.msk.bf16.mxu1 %vm3154_vm4, %v12993_v32 }
 0x4eb   : > { %14521 = vmatmul.mubr.msk.bf16.gmra.mrb[24].mxu1 %vm3154_vm4, %v12994_v28  ;;  %v18703_v28 = vld [vmem:[#allocation57_spill] sm:$0xff] }
 0x4ec   : > { %14524 = vmatprep.mubr.msk.bf16.mxu1 %vm3154_vm4, %v12995_v1 }
 0x4f3   : > { %14525 = vmatmul.mubr.msk.bf16.gmra.mrb[28].mxu1 %vm3154_vm4, %v12996_v17 }
 0x4f4   : > { %14528 = vmatprep.mubr.msk.bf16.mxu1 %vm3154_vm4, %v18695_v7 }
 0x4fb   : > { %14529 = vmatmul.mubr.msk.bf16.gmra.mrb[32].mxu1 %vm3154_vm4, %v18696_v10 }
 0x4fc   : > { %14532 = vmatprep.mubr.msk.bf16.mxu1 %vm3154_vm4, %v18697_v30 }
 0x503   : > { %14533 = vmatmul.mubr.msk.bf16.gmra.mrb[36].mxu1 %vm3154_vm4, %v13000_v35 }
 0x55e   : > { %v14474_v55 = vpop.f32.mrb[40].mxu1 }
 0x55f   : > { %v14608_v33 = vadd.f32 %v14474_v55, %v17952_v0  ;;  %v10724_v42 = vpop.f32.mrb[41].mxu1 }
 0x560   : > { %v14609_v41 = vadd.f32 %v10724_v42, %v18698_v56  ;;  %v14475_v37 = vpop.f32.mrb[42].mxu1 }
 0x561   : > { %v11052_v13 = vadd.f32 %v14608_v33, %v18261_v62  ;;  %v14610_v23 = vadd.f32 %v14475_v37, %v18699_v20  ;;  %v10727_v36 = vpop.f32.mrb[43].mxu1 }
 0x562   : > { %v11050_v11 = vadd.f32 %v14609_v41, %v18261_v62  ;;  %v14611_v39 = vadd.f32 %v10727_v36, %v18700_v26 }
 0x563   : > { %v11053_v22 = vadd.f32 %v14610_v23, %v18261_v62  ;;  %v11116_v32 = vmax.f32 %v11052_v13, 0.0 }
 0x564   : > { %v11051_v6 = vadd.f32 %v14611_v39, %v18261_v62  ;;  %v11114_v0 = vmax.f32 %v11050_v11, 0.0 }
 0x565   : > { %v11117_v16 = vmax.f32 %v11053_v22, 0.0 }
 0x566   : > { %v11115_v48 = vmax.f32 %v11051_v6, 0.0  ;;  %v14478_v3 = vpop.f32.mrb[44].mxu1 }
 0x567   : > { %v11179_v9 = vpack.c.bf16 %v11117_v16, %v11116_v32  ;;  %v14612_v21 = vadd.f32 %v14478_v3, %v18701_v5  ;;  %v10740_v47 = vpop.f32.mrb[45].mxu1 }
 0x568   : > { %v11178_v49 = vpack.c.bf16 %v11115_v48, %v11114_v0  ;;  %v14613_v18 = vadd.f32 %v10740_v47, %v18702_v29  ;;  %v14479_v46 = vpop.f32.mrb[46].mxu1 }
 0x569   : > { %v11056_v61 = vadd.f32 %v14612_v21, %v18261_v62  ;;  %v14614_v44 = vadd.f32 %v14479_v46, %v18703_v28  ;;  %v10743_v1 = vpop.f32.mrb[47].mxu1 }
 0x56a   : > { %v11054_v8 = vadd.f32 %v14613_v18, %v18261_v62  ;;  %v14615_v24 = vadd.f32 %v10743_v1, %v18704_v59  ;;  %14540 = vmatprep.mubr.msk.bf16.mxu0 %vm3154_vm4, %v11178_v49 }
 0x56b   : > { %v11057_v19 = vadd.f32 %v14614_v44, %v18261_v62  ;;  %14541 = vmatmul.mubr.msk.bf16.vlgmr.msra.gmra.mrb[128].mxu0 %vm3154_vm4, %v11179_v9  ;;  %v11120_v45 = vmax.f32 %v11056_v61, 0.0 }
 0x56c   : > { %v11055_v40 = vadd.f32 %v14615_v24, %v18261_v62  ;;  %v11118_v7 = vmax.f32 %v11054_v8, 0.0 }
 0x56d   : > { %v11121_v17 = vmax.f32 %v11057_v19, 0.0 }
 0x56e   : > { %v11119_v53 = vmax.f32 %v11055_v40, 0.0  ;;  %v14482_v43 = vpop.f32.mrb[48].mxu1 }
 0x56f   : > { %v11181_v27 = vpack.c.bf16 %v11121_v17, %v11120_v45  ;;  %v14616_v31 = vadd.f32 %v14482_v43, %v18011_v57  ;;  %v10756_v38 = vpop.f32.mrb[49].mxu1 }
 0x570   : > { %v11180_v10 = vpack.c.bf16 %v11119_v53, %v11118_v7  ;;  %v14617_v30 = vadd.f32 %v10756_v38, %v18018_v12  ;;  %v14483_v52 = vpop.f32.mrb[50].mxu1  ;;  %v18705_v7 = vld [vmem:[#allocation59_spill] sm:$0xff] }
 0x571   : > { %v11060_v25 = vadd.f32 %v14616_v31, %v18261_v62  ;;  %v14618_v35 = vadd.f32 %v14483_v52, %v18022_v2  ;;  %v10759_v55 = vpop.f32.mrb[51].mxu1 }
 0x572   : > { %v11058_v33 = vadd.f32 %v14617_v30, %v18261_v62  ;;  %v14619_v42 = vadd.f32 %v10759_v55, %v18025_v15  ;;  %14544 = vmatprep.mubr.msk.bf16.mxu0 %vm3154_vm4, %v11180_v10  ;;  %v18707_v30 = vld [vmem:[#allocation61_spill] sm:$0xff] }
 0x573   : > { %v11061_v56 = vadd.f32 %v14618_v35, %v18261_v62  ;;  %14545 = vmatmul.mubr.msk.bf16.gmra.mrb[132].mxu0 %vm3154_vm4, %v11181_v27  ;;  %v11124_v41 = vmax.f32 %v11060_v25, 0.0  ;;  %v18706_v27 = vld [vmem:[#allocation60_spill] sm:$0xff] }
 0x574   : > { %v11059_v57 = vadd.f32 %v14619_v42, %v18261_v62  ;;  %v11122_v37 = vmax.f32 %v11058_v33, 0.0 }
 0x575   : > { %v11125_v12 = vmax.f32 %v11061_v56, 0.0 }
 0x576   : > { %v11123_v13 = vmax.f32 %v11059_v57, 0.0  ;;  %v14486_v20 = vpop.f32.mrb[52].mxu1 }
 0x577   : > { %v11183_v23 = vpack.c.bf16 %v11125_v12, %v11124_v41  ;;  %v14620_v2 = vadd.f32 %v14486_v20, %v18036_v51  ;;  %v10772_v36 = vpop.f32.mrb[53].mxu1  ;;  %v18708_v41 = vld [vmem:[#allocation12_spill] sm:$0xff]  ;;  %v18709_v20 = vld [vmem:[#allocation13_spill] sm:$0xff] }
 0x578   : > { %v11182_v11 = vpack.c.bf16 %v11123_v13, %v11122_v37  ;;  %v14621_v15 = vadd.f32 %v10772_v36, %v18040_v63  ;;  %v14487_v26 = vpop.f32.mrb[54].mxu1 }
 0x579   : > { %v11064_v39 = vadd.f32 %v14620_v2, %v18261_v62  ;;  %v14622_v22 = vadd.f32 %v14487_v26, %v18044_v14  ;;  %v10775_v6 = vpop.f32.mrb[55].mxu1 }
 0x57a   : > { %v11062_v32 = vadd.f32 %v14621_v15, %v18261_v62  ;;  %v14623_v16 = vadd.f32 %v10775_v6, %v18048_v50  ;;  %14548 = vmatprep.mubr.msk.bf16.mxu0 %vm3154_vm4, %v11182_v11  ;;  %v18710_v11 = vld [vmem:[#allocation14_spill] sm:$0xff] }
 0x57b   : > { %v11065_v0 = vadd.f32 %v14622_v22, %v18261_v62  ;;  %14549 = vmatmul.mubr.msk.bf16.gmra.mrb[136].mxu0 %vm3154_vm4, %v11183_v23  ;;  %v11128_v48 = vmax.f32 %v11064_v39, 0.0  ;;  %v18711_v22 = vld [vmem:[#allocation15_spill] sm:$0xff] }
 0x57c   : > { %v11063_v51 = vadd.f32 %v14623_v16, %v18261_v62  ;;  %v11126_v3 = vmax.f32 %v11062_v32, 0.0 }
 0x57d   : > { %v11129_v63 = vmax.f32 %v11065_v0, 0.0 }
 0x57e   : > { %v11127_v9 = vmax.f32 %v11063_v51, 0.0  ;;  %v14490_v5 = vpop.f32.mrb[56].mxu1 }
 0x57f   : > { %v11185_v21 = vpack.c.bf16 %v11129_v63, %v11128_v48  ;;  %v14624_v14 = vadd.f32 %v14490_v5, %v18058_v60  ;;  %v10788_v47 = vpop.f32.mrb[57].mxu1  ;;  %v18712_v5 = vld [vmem:[#allocation16_spill] sm:$0xff] }
 0x580   : > { %v11184_v49 = vpack.c.bf16 %v11127_v9, %v11126_v3  ;;  %v14625_v50 = vadd.f32 %v10788_v47, %v18060_v34  ;;  %v14491_v29 = vpop.f32.mrb[58].mxu1 }
 0x581   : > { %v11068_v18 = vadd.f32 %v14624_v14, %v18261_v62  ;;  %v14626_v46 = vadd.f32 %v14491_v29, %v18064_v54  ;;  %v10791_v61 = vpop.f32.mrb[59].mxu1 }
 0x582   : > { %v11066_v28 = vadd.f32 %v14625_v50, %v18261_v62  ;;  %v14627_v44 = vadd.f32 %v10791_v61, %v18066_v58  ;;  %14552 = vmatprep.mubr.msk.bf16.mxu0 %vm3154_vm4, %v11184_v49  ;;  %v18713_v49 = vld [vmem:[#allocation17_spill] sm:$0xff] }
 0x583   : > { %v11069_v1 = vadd.f32 %v14626_v46, %v18261_v62  ;;  %14553 = vmatmul.mubr.msk.bf16.gmra.mrb[140].mxu0 %vm3154_vm4, %v11185_v21  ;;  %v11132_v8 = vmax.f32 %v11068_v18, 0.0  ;;  %v18714_v46 = vld [vmem:[#allocation18_spill] sm:$0xff] }
 0x584   : > { %v11067_v60 = vadd.f32 %v14627_v44, %v18261_v62  ;;  %v11130_v59 = vmax.f32 %v11066_v28, 0.0 }
 0x585   : > { %v11133_v34 = vmax.f32 %v11069_v1, 0.0  ;;  %v18715_v1 = vld [vmem:[#allocation19_spill] sm:$0xff] }
 0x586   : > { %v11131_v24 = vmax.f32 %v11067_v60, 0.0  ;;  %v14494_v19 = vpop.f32.mrb[60].mxu1 }
 0x587   : > { %v11187_v40 = vpack.c.bf16 %v11133_v34, %v11132_v8  ;;  %v14628_v54 = vadd.f32 %v14494_v19, %v18078_v4  ;;  %v10804_v45 = vpop.f32.mrb[61].mxu1 }
 0x588   : > { %v11186_v17 = vpack.c.bf16 %v11131_v24, %v11130_v59  ;;  %v14629_v58 = vadd.f32 %v10804_v45, %v18705_v7  ;;  %v14495_v53 = vpop.f32.mrb[62].mxu1 }
 0x589   : > { %v11072_v43 = vadd.f32 %v14628_v54, %v18261_v62  ;;  %v14630_v31 = vadd.f32 %v14495_v53, %v18706_v27  ;;  %v10807_v38 = vpop.f32.mrb[63].mxu1 }
 0x58a   : > { %v11070_v10 = vadd.f32 %v14629_v58, %v18261_v62  ;;  %v14631_v52 = vadd.f32 %v10807_v38, %v18707_v30  ;;  %14556 = vmatprep.mubr.msk.bf16.mxu0 %vm3154_vm4, %v11186_v17  ;;  %v18716_v17 = vld [vmem:[#allocation20_spill] sm:$0xff] }
 0x58b   : > { %v11073_v25 = vadd.f32 %v14630_v31, %v18261_v62  ;;  %14557 = vmatmul.mubr.msk.bf16.gmra.mrb[144].mxu0 %vm3154_vm4, %v11187_v40  ;;  %v11136_v35 = vmax.f32 %v11072_v43, 0.0  ;;  %v18717_v43 = vld [vmem:[#allocation21_spill] sm:$0xff] }
 0x58c   : > { %v11071_v4 = vadd.f32 %v14631_v52, %v18261_v62  ;;  %v11134_v33 = vmax.f32 %v11070_v10, 0.0  ;;  %v18718_v10 = vld [vmem:[#allocation22_spill] sm:$0xff] }
 0x58d   : > { %v11137_v55 = vmax.f32 %v11073_v25, 0.0 }
 0x58e   : > { %v11135_v42 = vmax.f32 %v11071_v4, 0.0  ;;  %v14498_v56 = vpop.f32.mrb[0].mxu1  ;;  %v18719_v4 = vld [vmem:[#allocation23_spill] sm:$0xff] }
 0x58f   : > { %v11189_v57 = vpack.c.bf16 %v11137_v55, %v11136_v35  ;;  %v14632_v12 = vadd.f32 %v14498_v56, %v18708_v41  ;;  %v10820_v37 = vpop.f32.mrb[1].mxu1 }
 0x590   : > { %v11188_v13 = vpack.c.bf16 %v11135_v42, %v11134_v33  ;;  %v14633_v23 = vadd.f32 %v10820_v37, %v18709_v20  ;;  %v14499_v2 = vpop.f32.mrb[2].mxu1 }
 0x591   : > { %v11076_v36 = vadd.f32 %v14632_v12, %v18261_v62  ;;  %v14634_v15 = vadd.f32 %v14499_v2, %v18710_v11  ;;  %v10823_v26 = vpop.f32.mrb[3].mxu1 }
 0x592   : > { %v11074_v39 = vadd.f32 %v14633_v23, %v18261_v62  ;;  %v14635_v6 = vadd.f32 %v10823_v26, %v18711_v22  ;;  %14560 = vmatprep.mubr.msk.bf16.mxu0 %vm3154_vm4, %v11188_v13  ;;  %v18720_v13 = vld [vmem:[#allocation24_spill] sm:$0xff] }
 0x593   : > { %v11077_v32 = vadd.f32 %v14634_v15, %v18261_v62  ;;  %14561 = vmatmul.mubr.msk.bf16.gmra.mrb[148].mxu0 %vm3154_vm4, %v11189_v57  ;;  %v11140_v0 = vmax.f32 %v11076_v36, 0.0  ;;  %v18721_v36 = vld [vmem:[#allocation25_spill] sm:$0xff] }
 0x594   : > { %v11075_v16 = vadd.f32 %v14635_v6, %v18261_v62  ;;  %v11138_v48 = vmax.f32 %v11074_v39, 0.0  ;;  %v18722_v39 = vld [vmem:[#allocation26_spill] sm:$0xff] }
 0x595   : > { %v11141_v51 = vmax.f32 %v11077_v32, 0.0 }
 0x596   : > { %v11139_v63 = vmax.f32 %v11075_v16, 0.0  ;;  %v14502_v3 = vpop.f32.mrb[4].mxu1  ;;  %v18723_v16 = vld [vmem:[#allocation27_spill] sm:$0xff] }
 0x597   : > { %v11191_v9 = vpack.c.bf16 %v11141_v51, %v11140_v0  ;;  %v14636_v21 = vadd.f32 %v14502_v3, %v18712_v5  ;;  %v10836_v14 = vpop.f32.mrb[5].mxu1 }
 0x598   : > { %v11190_v47 = vpack.c.bf16 %v11139_v63, %v11138_v48  ;;  %v14637_v50 = vadd.f32 %v10836_v14, %v18713_v49  ;;  %v14503_v29 = vpop.f32.mrb[6].mxu1 }
 0x599   : > { %v11080_v18 = vadd.f32 %v14636_v21, %v18261_v62  ;;  %v14638_v61 = vadd.f32 %v14503_v29, %v18714_v46  ;;  %v10839_v28 = vpop.f32.mrb[7].mxu1 }
 0x59a   : > { %v11078_v44 = vadd.f32 %v14637_v50, %v18261_v62  ;;  %v14639_v60 = vadd.f32 %v10839_v28, %v18715_v1  ;;  %14564 = vmatprep.mubr.msk.bf16.mxu0 %vm3154_vm4, %v11190_v47  ;;  %v18724_v47 = vld [vmem:[#allocation28_spill] sm:$0xff] }
 0x59b   : > { %v11081_v8 = vadd.f32 %v14638_v61, %v18261_v62  ;;  %14565 = vmatmul.mubr.msk.bf16.gmra.mrb[152].mxu0 %vm3154_vm4, %v11191_v9  ;;  %v11144_v59 = vmax.f32 %v11080_v18, 0.0  ;;  %v18725_v18 = vld [vmem:[#allocation29_spill] sm:$0xff] }
 0x59c   : > { %v11079_v34 = vadd.f32 %v14639_v60, %v18261_v62  ;;  %v11142_v19 = vmax.f32 %v11078_v44, 0.0  ;;  %v18726_v44 = vld [vmem:[#allocation30_spill] sm:$0xff] }
 0x59d   : > { %v11145_v24 = vmax.f32 %v11081_v8, 0.0 }
 0x59e   : > { %v11143_v40 = vmax.f32 %v11079_v34, 0.0  ;;  %v14506_v54 = vpop.f32.mrb[8].mxu1  ;;  %v18727_v34 = vld [vmem:[#allocation31_spill] sm:$0xff] }
 0x59f   : > { %v11193_v45 = vpack.c.bf16 %v11145_v24, %v11144_v59  ;;  %v14640_v7 = vadd.f32 %v14506_v54, %v18716_v17  ;;  %v10852_v58 = vpop.f32.mrb[9].mxu1 }
 0x5a0   : > { %v11192_v53 = vpack.c.bf16 %v11143_v40, %v11142_v19  ;;  %v14641_v27 = vadd.f32 %v10852_v58, %v18717_v43  ;;  %v14507_v31 = vpop.f32.mrb[10].mxu1 }
 0x5a1   : > { %v11084_v38 = vadd.f32 %v14640_v7, %v18261_v62  ;;  %v14642_v30 = vadd.f32 %v14507_v31, %v18718_v10  ;;  %v10855_v52 = vpop.f32.mrb[11].mxu1 }
 0x5a2   : > { %v11082_v25 = vadd.f32 %v14641_v27, %v18261_v62  ;;  %v14643_v35 = vadd.f32 %v10855_v52, %v18719_v4  ;;  %14568 = vmatprep.mubr.msk.bf16.mxu0 %vm3154_vm4, %v11192_v53  ;;  %v18728_v53 = vld [vmem:[#allocation32_spill] sm:$0xff] }
 0x5a3   : > { %v11085_v55 = vadd.f32 %v14642_v30, %v18261_v62  ;;  %14569 = vmatmul.mubr.msk.bf16.gmra.mrb[156].mxu0 %vm3154_vm4, %v11193_v45  ;;  %v11148_v42 = vmax.f32 %v11084_v38, 0.0  ;;  %v18729_v38 = vld [vmem:[#allocation33_spill] sm:$0xff] }
 0x5a4   : > { %v11083_v33 = vadd.f32 %v14643_v35, %v18261_v62  ;;  %v11146_v57 = vmax.f32 %v11082_v25, 0.0  ;;  %v18730_v25 = vld [vmem:[#allocation34_spill] sm:$0xff] }
 0x5a5   : > { %v11149_v56 = vmax.f32 %v11085_v55, 0.0 }
 0x5a6   : > { %v11147_v41 = vmax.f32 %v11083_v33, 0.0  ;;  %v14510_v12 = vpop.f32.mrb[12].mxu1  ;;  %v18731_v33 = vld [vmem:[#allocation35_spill] sm:$0xff] }
 0x5a7   : > { %v11195_v37 = vpack.c.bf16 %v11149_v56, %v11148_v42  ;;  %v14644_v20 = vadd.f32 %v14510_v12, %v18720_v13  ;;  %v10868_v23 = vpop.f32.mrb[13].mxu1 }
 0x5a8   : > { %v11194_v2 = vpack.c.bf16 %v11147_v41, %v11146_v57  ;;  %v14645_v11 = vadd.f32 %v10868_v23, %v18721_v36  ;;  %v14511_v15 = vpop.f32.mrb[14].mxu1 }
 0x5a9   : > { %v11088_v26 = vadd.f32 %v14644_v20, %v18261_v62  ;;  %v14646_v22 = vadd.f32 %v14511_v15, %v18722_v39  ;;  %v10871_v6 = vpop.f32.mrb[15].mxu1 }
 0x5aa   : > { %v11086_v32 = vadd.f32 %v14645_v11, %v18261_v62  ;;  %v14647_v0 = vadd.f32 %v10871_v6, %v18723_v16  ;;  %14572 = vmatprep.mubr.msk.bf16.mxu0 %vm3154_vm4, %v11194_v2  ;;  %v18732_v2 = vld [vmem:[#allocation36_spill] sm:$0xff] }
 0x5ab   : > { %v11089_v51 = vadd.f32 %v14646_v22, %v18261_v62  ;;  %14573 = vmatmul.mubr.msk.bf16.gmra.mrb[160].mxu0 %vm3154_vm4, %v11195_v37  ;;  %v11152_v63 = vmax.f32 %v11088_v26, 0.0  ;;  %v18733_v26 = vld [vmem:[#allocation37_spill] sm:$0xff] }
 0x5ac   : > { %v11087_v48 = vadd.f32 %v14647_v0, %v18261_v62  ;;  %v11150_v9 = vmax.f32 %v11086_v32, 0.0  ;;  %v18734_v32 = vld [vmem:[#allocation38_spill] sm:$0xff] }
 0x5ad   : > { %v11153_v3 = vmax.f32 %v11089_v51, 0.0 }
 0x5ae   : > { %v11151_v5 = vmax.f32 %v11087_v48, 0.0  ;;  %v14514_v21 = vpop.f32.mrb[16].mxu1  ;;  %v18735_v48 = vld [vmem:[#allocation39_spill] sm:$0xff] }
 0x5af   : > { %v11197_v14 = vpack.c.bf16 %v11153_v3, %v11152_v63  ;;  %v14648_v49 = vadd.f32 %v14514_v21, %v18724_v47  ;;  %v10884_v50 = vpop.f32.mrb[17].mxu1 }
 0x5b0   : > { %v11196_v29 = vpack.c.bf16 %v11151_v5, %v11150_v9  ;;  %v14649_v46 = vadd.f32 %v10884_v50, %v18725_v18  ;;  %v14515_v61 = vpop.f32.mrb[18].mxu1 }
 0x5b1   : > { %v11092_v28 = vadd.f32 %v14648_v49, %v18261_v62  ;;  %v14650_v1 = vadd.f32 %v14515_v61, %v18726_v44  ;;  %v10887_v60 = vpop.f32.mrb[19].mxu1 }
 0x5b2   : > { %v11090_v8 = vadd.f32 %v14649_v46, %v18261_v62  ;;  %v14651_v59 = vadd.f32 %v10887_v60, %v18727_v34  ;;  %14576 = vmatprep.mubr.msk.bf16.mxu0 %vm3154_vm4, %v11196_v29  ;;  %v18736_v29 = vld [vmem:[#allocation40_spill] sm:$0xff] }
 0x5b3   : > { %v11093_v24 = vadd.f32 %v14650_v1, %v18261_v62  ;;  %14577 = vmatmul.mubr.msk.bf16.gmra.mrb[164].mxu0 %vm3154_vm4, %v11197_v14  ;;  %v11156_v40 = vmax.f32 %v11092_v28, 0.0  ;;  %v18737_v28 = vld [vmem:[#allocation41_spill] sm:$0xff] }
 0x5b4   : > { %v11091_v19 = vadd.f32 %v14651_v59, %v18261_v62  ;;  %v11154_v45 = vmax.f32 %v11090_v8, 0.0  ;;  %v18738_v8 = vld [vmem:[#allocation42_spill] sm:$0xff] }
 0x5b5   : > { %v11157_v54 = vmax.f32 %v11093_v24, 0.0 }
 0x5b6   : > { %v11155_v17 = vmax.f32 %v11091_v19, 0.0  ;;  %v14518_v7 = vpop.f32.mrb[20].mxu1  ;;  %v18739_v19 = vld [vmem:[#allocation43_spill] sm:$0xff] }
 0x5b7   : > { %v11199_v58 = vpack.c.bf16 %v11157_v54, %v11156_v40  ;;  %v14652_v43 = vadd.f32 %v14518_v7, %v18728_v53  ;;  %v10900_v27 = vpop.f32.mrb[21].mxu1 }
 0x5b8   : > { %v11198_v31 = vpack.c.bf16 %v11155_v17, %v11154_v45  ;;  %v14653_v10 = vadd.f32 %v10900_v27, %v18729_v38  ;;  %v14519_v30 = vpop.f32.mrb[22].mxu1 }
 0x5b9   : > { %v11096_v52 = vadd.f32 %v14652_v43, %v18261_v62  ;;  %v14654_v4 = vadd.f32 %v14519_v30, %v18730_v25  ;;  %v10903_v35 = vpop.f32.mrb[23].mxu1 }
 0x5ba   : > { %v11094_v55 = vadd.f32 %v14653_v10, %v18261_v62  ;;  %v14655_v42 = vadd.f32 %v10903_v35, %v18731_v33  ;;  %14580 = vmatprep.mubr.msk.bf16.mxu0 %vm3154_vm4, %v11198_v31  ;;  %v18740_v31 = vld [vmem:[#allocation44_spill] sm:$0xff] }
 0x5bb   : > { %v11097_v56 = vadd.f32 %v14654_v4, %v18261_v62  ;;  %14581 = vmatmul.mubr.msk.bf16.gmra.mrb[168].mxu0 %vm3154_vm4, %v11199_v58  ;;  %v11160_v41 = vmax.f32 %v11096_v52, 0.0  ;;  %v18741_v52 = vld [vmem:[#allocation45_spill] sm:$0xff] }
 0x5bc   : > { %v11095_v57 = vadd.f32 %v14655_v42, %v18261_v62  ;;  %v11158_v37 = vmax.f32 %v11094_v55, 0.0  ;;  %v18742_v55 = vld [vmem:[#allocation46_spill] sm:$0xff] }
 0x5bd   : > { %v11161_v12 = vmax.f32 %v11097_v56, 0.0 }
 0x5be   : > { %v11159_v13 = vmax.f32 %v11095_v57, 0.0  ;;  %v14522_v20 = vpop.f32.mrb[24].mxu1  ;;  %v18743_v57 = vld [vmem:[#allocation47_spill] sm:$0xff] }
 0x5bf   : > { %v11201_v23 = vpack.c.bf16 %v11161_v12, %v11160_v41  ;;  %v14656_v36 = vadd.f32 %v14522_v20, %v18732_v2  ;;  %v10916_v11 = vpop.f32.mrb[25].mxu1 }
 0x5c0   : > { %v11200_v15 = vpack.c.bf16 %v11159_v13, %v11158_v37  ;;  %v14657_v39 = vadd.f32 %v10916_v11, %v18733_v26  ;;  %v14523_v22 = vpop.f32.mrb[26].mxu1 }
 0x5c1   : > { %v11100_v6 = vadd.f32 %v14656_v36, %v18261_v62  ;;  %v14658_v16 = vadd.f32 %v14523_v22, %v18734_v32  ;;  %v10919_v0 = vpop.f32.mrb[27].mxu1 }
 0x5c2   : > { %v11098_v51 = vadd.f32 %v14657_v39, %v18261_v62  ;;  %v14659_v63 = vadd.f32 %v10919_v0, %v18735_v48  ;;  %14584 = vmatprep.mubr.msk.bf16.mxu0 %vm3154_vm4, %v11200_v15  ;;  %v18744_v15 = vld [vmem:[#allocation48_spill] sm:$0xff] }
 0x5c3   : > { %v11101_v3 = vadd.f32 %v14658_v16, %v18261_v62  ;;  %14585 = vmatmul.mubr.msk.bf16.gmra.mrb[172].mxu0 %vm3154_vm4, %v11201_v23  ;;  %v11164_v5 = vmax.f32 %v11100_v6, 0.0  ;;  %v18745_v6 = vld [vmem:[#allocation49_spill] sm:$0xff] }
 0x5c4   : > { %v11099_v9 = vadd.f32 %v14659_v63, %v18261_v62  ;;  %v11162_v14 = vmax.f32 %v11098_v51, 0.0  ;;  %v18746_v51 = vld [vmem:[#allocation50_spill] sm:$0xff] }
 0x5c5   : > { %v11165_v21 = vmax.f32 %v11101_v3, 0.0 }
 0x5c6   : > { %v11163_v47 = vmax.f32 %v11099_v9, 0.0  ;;  %v14526_v49 = vpop.f32.mrb[28].mxu1  ;;  %v18747_v9 = vld [vmem:[#allocation51_spill] sm:$0xff] }
 0x5c7   : > { %v11203_v50 = vpack.c.bf16 %v11165_v21, %v11164_v5  ;;  %v14660_v18 = vadd.f32 %v14526_v49, %v18736_v29  ;;  %v10932_v46 = vpop.f32.mrb[29].mxu1 }
 0x5c8   : > { %v11202_v61 = vpack.c.bf16 %v11163_v47, %v11162_v14  ;;  %v14661_v44 = vadd.f32 %v10932_v46, %v18737_v28  ;;  %v14527_v1 = vpop.f32.mrb[30].mxu1  ;;  %v15586_v28 = vld [vmem:[%s15939_s15 + $0x8] sm:$0xff]  }
 0x5c9   : > { %v11104_v60 = vadd.f32 %v14660_v18, %v18261_v62  ;;  %v14662_v34 = vadd.f32 %v14527_v1, %v18738_v8  ;;  %v10935_v59 = vpop.f32.mrb[31].mxu1  ;;  %v15587_v1 = vld [vmem:[%s15939_s15] sm:$0xff]  }
 0x5ca   : > { %v11102_v24 = vadd.f32 %v14661_v44, %v18261_v62  ;;  %v14663_v40 = vadd.f32 %v10935_v59, %v18739_v19  ;;  %14588 = vmatprep.mubr.msk.bf16.mxu0 %vm3154_vm4, %v11202_v61  ;;  %v18426_v61 = vld [vmem:[%s18616_s6] ss:$0 sm:$0xff]  ;;  %v11620_v44 = vunpack.c.l.bf16 %v15586_v28  ;;  %v11621_v59 = vunpack.c.h.bf16 %v15586_v28 }
 0x5cb   : > { %v11105_v54 = vadd.f32 %v14662_v34, %v18261_v62  ;;  %14589 = vmatmul.mubr.msk.bf16.gmra.mrb[176].mxu0 %vm3154_vm4, %v11203_v50  ;;  %v11168_v17 = vmax.f32 %v11104_v60, 0.0  ;;  %v11618_v60 = vunpack.c.l.bf16 %v15587_v1 }
 0x5cc   : > { %v11103_v45 = vadd.f32 %v14663_v40, %v18261_v62  ;;  %v11166_v58 = vmax.f32 %v11102_v24, 0.0  ;;  %v11619_v24 = vunpack.c.h.bf16 %v15587_v1 }
 0x5cd   : > { %v11169_v7 = vmax.f32 %v11105_v54, 0.0 }
 0x5ce   : > { %v11167_v53 = vmax.f32 %v11103_v45, 0.0  ;;  %v14530_v43 = vpop.f32.mrb[32].mxu1 }
 0x5cf   : > { %v11205_v27 = vpack.c.bf16 %v11169_v7, %v11168_v17  ;;  %v14664_v38 = vadd.f32 %v14530_v43, %v18740_v31  ;;  %v10948_v10 = vpop.f32.mrb[33].mxu1 }
 0x5d0   : > { %v11204_v30 = vpack.c.bf16 %v11167_v53, %v11166_v58  ;;  %v14665_v25 = vadd.f32 %v10948_v10, %v18741_v52  ;;  %v14531_v4 = vpop.f32.mrb[34].mxu1 }
 0x5d1   : > { %v11108_v35 = vadd.f32 %v14664_v38, %v18261_v62  ;;  %v14666_v33 = vadd.f32 %v14531_v4, %v18742_v55  ;;  %v10951_v42 = vpop.f32.mrb[35].mxu1  ;;  %v15588_v38 = vld [vmem:[%s15939_s15 + $0x18] sm:$0xff]   ;;  %v15589_v4 = vld [vmem:[%s15939_s15 + $0x10] sm:$0xff]  }
 0x5d2   : > { %v11106_v56 = vadd.f32 %v14665_v25, %v18261_v62  ;;  %v14667_v41 = vadd.f32 %v10951_v42, %v18743_v57  ;;  %14592 = vmatprep.mubr.msk.bf16.mxu0 %vm3154_vm4, %v11204_v30  ;;  %v11624_v10 = vunpack.c.l.bf16 %v15588_v38 }
 0x5d3   : > { %v11109_v12 = vadd.f32 %v14666_v33, %v18261_v62  ;;  %14593 = vmatmul.mubr.msk.bf16.gmra.mrb[180].mxu0 %vm3154_vm4, %v11205_v27  ;;  %v11172_v13 = vmax.f32 %v11108_v35, 0.0  ;;  %v11622_v35 = vunpack.c.l.bf16 %v15589_v4 }
 0x5d4   : > { %v11107_v37 = vadd.f32 %v14667_v41, %v18261_v62  ;;  %v11170_v23 = vmax.f32 %v11106_v56, 0.0  ;;  %v11625_v56 = vunpack.c.h.bf16 %v15588_v38 }
 0x5d5   : > { %v11173_v20 = vmax.f32 %v11109_v12, 0.0 }
 0x5d6   : > { %v11171_v2 = vmax.f32 %v11107_v37, 0.0  ;;  %v14534_v36 = vpop.f32.mrb[36].mxu1  ;;  %v11623_v37 = vunpack.c.h.bf16 %v15589_v4 }
 0x5d7   : > { %v11207_v11 = vpack.c.bf16 %v11173_v20, %v11172_v13  ;;  %v14668_v26 = vadd.f32 %v14534_v36, %v18744_v15  ;;  %v10964_v39 = vpop.f32.mrb[37].mxu1 }
 0x5d8   : > { %v11206_v22 = vpack.c.bf16 %v11171_v2, %v11170_v23  ;;  %v14669_v32 = vadd.f32 %v10964_v39, %v18745_v6  ;;  %v14535_v16 = vpop.f32.mrb[38].mxu1 }
 0x5d9   : > { %v11112_v0 = vadd.f32 %v14668_v26, %v18261_v62  ;;  %v14670_v48 = vadd.f32 %v14535_v16, %v18746_v51  ;;  %v10967_v63 = vpop.f32.mrb[39].mxu1  ;;  %v15591_v51 = vld [vmem:[%s15939_s15 + $0x20] sm:$0xff]  }
 0x5da   : > { %v11110_v3 = vadd.f32 %v14669_v32, %v18261_v62  ;;  %v14671_v5 = vadd.f32 %v10967_v63, %v18747_v9  ;;  %14596 = vmatprep.mubr.msk.bf16.mxu0 %vm3154_vm4, %v11206_v22  ;;  %v15590_v22 = vld [vmem:[%s15939_s15 + $0x28] sm:$0xff]  }
 0x5db   : > { %v11113_v21 = vadd.f32 %v14670_v48, %v18261_v62  ;;  %14597 = vmatmul.mubr.msk.bf16.gmra.mrb[184].mxu0 %vm3154_vm4, %v11207_v11  ;;  %v11176_v47 = vmax.f32 %v11112_v0, 0.0  ;;  %v11628_v6 = vunpack.c.l.bf16 %v15590_v22  ;;  %v11626_v48 = vunpack.c.l.bf16 %v15591_v51 }
 0x5dc   : > { %v11111_v14 = vadd.f32 %v14671_v5, %v18261_v62  ;;  %v11174_v50 = vmax.f32 %v11110_v3, 0.0  ;;  %v11629_v5 = vunpack.c.h.bf16 %v15590_v22 }
 0x5dd   : > { %v11177_v49 = vmax.f32 %v11113_v21, 0.0 }
 0x5de   : > { %v11175_v29 = vmax.f32 %v11111_v14, 0.0 }
 0x5df   : > { %v11209_v18 = vpack.c.bf16 %v11177_v49, %v11176_v47  ;;  %v11627_v49 = vunpack.c.h.bf16 %v15591_v51 }
 0x5e0   : > { %v11208_v46 = vpack.c.bf16 %v11175_v29, %v11174_v50 }
 0x5e2   : > { %14600 = vmatprep.mubr.msk.bf16.mxu0 %vm3154_vm4, %v11208_v46 }
 0x5e3   : > { %14601 = vmatmul.mubr.msk.bf16.gmra.mrb[188].mxu0 %vm3154_vm4, %v11209_v18 }
 0x63e   : > { %v14542_v62 = vpop.f32.mrb[128].mxu0 }
 0x63f   : > { %v11372_v8 = vadd.f32 %v14542_v62, %v18426_v61  ;;  %v11363_v34 = vpop.f32.mrb[129].mxu0 }
 0x640   : > { %v11364_v19 = vadd.f32 %v18426_v61, %v11363_v34  ;;  %v14543_v40 = vpop.f32.mrb[130].mxu0 }
 0x641   : > { %v11684_v54 = vadd.f32 %v11620_v44, %v11372_v8  ;;  %v11375_v45 = vadd.f32 %v14543_v40, %v18426_v61  ;;  %v11366_v17 = vpop.f32.mrb[131].mxu0  ;;  %v15592_v8 = vld [vmem:[%s15939_s15 + $0x38] sm:$0xff]   ;;  %v15593_v40 = vld [vmem:[%s15939_s15 + $0x30] sm:$0xff]  }
 0x642   : > { %v11682_v7 = vadd.f32 %v11618_v60, %v11364_v19  ;;  %v11367_v58 = vadd.f32 %v18426_v61, %v11366_v17  ;;  %v11632_v34 = vunpack.c.l.bf16 %v15592_v8 }
 0x643   : > { %v11685_v53 = vadd.f32 %v11621_v59, %v11375_v45  ;;  %v11748_v27 = vmax.f32 %v11684_v54, 0.0  ;;  %v11630_v54 = vunpack.c.l.bf16 %v15593_v40 }
 0x644   : > { %v11683_v43 = vadd.f32 %v11619_v24, %v11367_v58  ;;  %v11746_v30 = vmax.f32 %v11682_v7, 0.0  ;;  %v11633_v58 = vunpack.c.h.bf16 %v15592_v8 }
 0x645   : > { %v11749_v31 = vmax.f32 %v11685_v53, 0.0 }
 0x646   : > { %v11747_v52 = vmax.f32 %v11683_v43, 0.0  ;;  %v14546_v25 = vpop.f32.mrb[132].mxu0 }
 0x647   : > { %v13281_v55 = vpack.c.bf16 %v11749_v31, %v11748_v27  ;;  %v11388_v33 = vadd.f32 %v14546_v25, %v18426_v61  ;;  %v11379_v42 = vpop.f32.mrb[133].mxu0  ;;  %v11631_v31 = vunpack.c.h.bf16 %v15593_v40 }
 0x648   : > { %v13276_v57 = vpack.c.bf16 %v11747_v52, %v11746_v30  ;;  %v11380_v41 = vadd.f32 %v18426_v61, %v11379_v42  ;;  %v14547_v12 = vpop.f32.mrb[134].mxu0  ;;  %v15594_v42 = vld [vmem:[%s15939_s15 + $0x48] sm:$0xff]  }
 0x649   : > { %13433 = vst [vmem:[%s18440_s23 + $0x8] sm:$0xff] %v13281_v55   ;;  %v11688_v13 = vadd.f32 %v11624_v10, %v11388_v33  ;;  %v11391_v20 = vadd.f32 %v14547_v12, %v18426_v61  ;;  %v11382_v23 = vpop.f32.mrb[135].mxu0 }
 0x64a   : > { %13277 = vst [vmem:[%s18440_s23] sm:$0xff] %v13276_v57   ;;  %v11686_v2 = vadd.f32 %v11622_v35, %v11380_v41  ;;  %v11383_v36 = vadd.f32 %v18426_v61, %v11382_v23 }
 0x64b   : > { %v11689_v11 = vadd.f32 %v11625_v56, %v11391_v20  ;;  %v11752_v26 = vmax.f32 %v11688_v13, 0.0  ;;  %v11636_v56 = vunpack.c.l.bf16 %v15594_v42 }
 0x64c   : > { %v11687_v15 = vadd.f32 %v11623_v37, %v11383_v36  ;;  %v11750_v32 = vmax.f32 %v11686_v2, 0.0  ;;  %v15595_v37 = vld [vmem:[%s15939_s15 + $0x40] sm:$0xff]   ;;  %v11637_v36 = vunpack.c.h.bf16 %v15594_v42 }
 0x64d   : > { %v11753_v39 = vmax.f32 %v11689_v11, 0.0  ;;  %v11634_v13 = vunpack.c.l.bf16 %v15595_v37 }
 0x64e   : > { %v11751_v16 = vmax.f32 %v11687_v15, 0.0  ;;  %v14550_v0 = vpop.f32.mrb[136].mxu0 }
 0x64f   : > { %v13291_v63 = vpack.c.bf16 %v11753_v39, %v11752_v26  ;;  %v11404_v3 = vadd.f32 %v14550_v0, %v18426_v61  ;;  %v11395_v9 = vpop.f32.mrb[137].mxu0  ;;  %v11635_v39 = vunpack.c.h.bf16 %v15595_v37 }
 0x650   : > { %v13286_v21 = vpack.c.bf16 %v11751_v16, %v11750_v32  ;;  %v11396_v14 = vadd.f32 %v18426_v61, %v11395_v9  ;;  %v14551_v47 = vpop.f32.mrb[138].mxu0  ;;  %v15596_v9 = vld [vmem:[%s15939_s15 + $0x58] sm:$0xff]  }
 0x651   : > { %13435 = vst [vmem:[%s18440_s23 + $0x18] sm:$0xff] %v13291_v63   ;;  %v11692_v50 = vadd.f32 %v11628_v6, %v11404_v3  ;;  %v11407_v29 = vadd.f32 %v14551_v47, %v18426_v61  ;;  %v11398_v18 = vpop.f32.mrb[139].mxu0 }
 0x652   : > { %13434 = vst [vmem:[%s18440_s23 + $0x10] sm:$0xff] %v13286_v21   ;;  %v11690_v46 = vadd.f32 %v11626_v48, %v11396_v14  ;;  %v11399_v28 = vadd.f32 %v18426_v61, %v11398_v18 }
 0x653   : > { %v11693_v44 = vadd.f32 %v11629_v5, %v11407_v29  ;;  %v11756_v60 = vmax.f32 %v11692_v50, 0.0  ;;  %v11640_v5 = vunpack.c.l.bf16 %v15596_v9 }
 0x654   : > { %v11691_v1 = vadd.f32 %v11627_v49, %v11399_v28  ;;  %v11754_v59 = vmax.f32 %v11690_v46, 0.0  ;;  %v15597_v49 = vld [vmem:[%s15939_s15 + $0x50] sm:$0xff]   ;;  %v11641_v28 = vunpack.c.h.bf16 %v15596_v9 }
 0x655   : > { %v11757_v62 = vmax.f32 %v11693_v44, 0.0  ;;  %v11638_v50 = vunpack.c.l.bf16 %v15597_v49 }
 0x656   : > { %v11755_v24 = vmax.f32 %v11691_v1, 0.0  ;;  %v14554_v19 = vpop.f32.mrb[140].mxu0 }
 0x657   : > { %v13301_v45 = vpack.c.bf16 %v11757_v62, %v11756_v60  ;;  %v11420_v17 = vadd.f32 %v14554_v19, %v18426_v61  ;;  %v11411_v7 = vpop.f32.mrb[141].mxu0  ;;  %v11639_v62 = vunpack.c.h.bf16 %v15597_v49 }
 0x658   : > { %v13296_v53 = vpack.c.bf16 %v11755_v24, %v11754_v59  ;;  %v11412_v43 = vadd.f32 %v18426_v61, %v11411_v7  ;;  %v14555_v27 = vpop.f32.mrb[142].mxu0  ;;  %v15598_v7 = vld [vmem:[%s15939_s15 + $0x68] sm:$0xff]  }
 0x659   : > { %13437 = vst [vmem:[%s18440_s23 + $0x28] sm:$0xff] %v13301_v45   ;;  %v11696_v38 = vadd.f32 %v11632_v34, %v11420_v17  ;;  %v11423_v10 = vadd.f32 %v14555_v27, %v18426_v61  ;;  %v11414_v30 = vpop.f32.mrb[143].mxu0 }
 0x65a   : > { %13436 = vst [vmem:[%s18440_s23 + $0x20] sm:$0xff] %v13296_v53   ;;  %v11694_v52 = vadd.f32 %v11630_v54, %v11412_v43  ;;  %v11415_v25 = vadd.f32 %v18426_v61, %v11414_v30 }
 0x65b   : > { %v11697_v4 = vadd.f32 %v11633_v58, %v11423_v10  ;;  %v11760_v55 = vmax.f32 %v11696_v38, 0.0  ;;  %v11644_v58 = vunpack.c.l.bf16 %v15598_v7 }
 0x65c   : > { %v11695_v35 = vadd.f32 %v11631_v31, %v11415_v25  ;;  %v11758_v57 = vmax.f32 %v11694_v52, 0.0  ;;  %v15599_v31 = vld [vmem:[%s15939_s15 + $0x60] sm:$0xff]   ;;  %v11645_v25 = vunpack.c.h.bf16 %v15598_v7 }
 0x65d   : > { %v11761_v33 = vmax.f32 %v11697_v4, 0.0  ;;  %v11642_v38 = vunpack.c.l.bf16 %v15599_v31 }
 0x65e   : > { %v11759_v41 = vmax.f32 %v11695_v35, 0.0  ;;  %v14558_v12 = vpop.f32.mrb[144].mxu0 }
 0x65f   : > { %v13311_v20 = vpack.c.bf16 %v11761_v33, %v11760_v55  ;;  %v11436_v23 = vadd.f32 %v14558_v12, %v18426_v61  ;;  %v11427_v2 = vpop.f32.mrb[145].mxu0  ;;  %v11643_v33 = vunpack.c.h.bf16 %v15599_v31 }
 0x660   : > { %v13306_v11 = vpack.c.bf16 %v11759_v41, %v11758_v57  ;;  %v11428_v15 = vadd.f32 %v18426_v61, %v11427_v2  ;;  %v14559_v26 = vpop.f32.mrb[146].mxu0  ;;  %v15600_v2 = vld [vmem:[%s15939_s15 + $0x78] sm:$0xff]  }
 0x661   : > { %13439 = vst [vmem:[%s18440_s23 + $0x38] sm:$0xff] %v13311_v20   ;;  %v11700_v22 = vadd.f32 %v11636_v56, %v11436_v23  ;;  %v11439_v6 = vadd.f32 %v14559_v26, %v18426_v61  ;;  %v11430_v32 = vpop.f32.mrb[147].mxu0 }
 0x662   : > { %13438 = vst [vmem:[%s18440_s23 + $0x30] sm:$0xff] %v13306_v11   ;;  %v11698_v16 = vadd.f32 %v11634_v13, %v11428_v15  ;;  %v11431_v0 = vadd.f32 %v18426_v61, %v11430_v32 }
 0x663   : > { %v11701_v51 = vadd.f32 %v11637_v36, %v11439_v6  ;;  %v11764_v63 = vmax.f32 %v11700_v22, 0.0  ;;  %v11648_v36 = vunpack.c.l.bf16 %v15600_v2 }
 0x664   : > { %v11699_v48 = vadd.f32 %v11635_v39, %v11431_v0  ;;  %v11762_v21 = vmax.f32 %v11698_v16, 0.0  ;;  %v15601_v39 = vld [vmem:[%s15939_s15 + $0x70] sm:$0xff]   ;;  %v11649_v0 = vunpack.c.h.bf16 %v15600_v2 }
 0x665   : > { %v11765_v3 = vmax.f32 %v11701_v51, 0.0  ;;  %v11646_v22 = vunpack.c.l.bf16 %v15601_v39 }
 0x666   : > { %v11763_v14 = vmax.f32 %v11699_v48, 0.0  ;;  %v14562_v47 = vpop.f32.mrb[148].mxu0 }
 0x667   : > { %v13321_v29 = vpack.c.bf16 %v11765_v3, %v11764_v63  ;;  %v11452_v18 = vadd.f32 %v14562_v47, %v18426_v61  ;;  %v11443_v46 = vpop.f32.mrb[149].mxu0  ;;  %v11647_v3 = vunpack.c.h.bf16 %v15601_v39 }
 0x668   : > { %v13316_v44 = vpack.c.bf16 %v11763_v14, %v11762_v21  ;;  %v11444_v1 = vadd.f32 %v18426_v61, %v11443_v46  ;;  %v14563_v60 = vpop.f32.mrb[150].mxu0  ;;  %v15602_v46 = vld [vmem:[%s15939_s15 + $0x88] sm:$0xff]  }
 0x669   : > { %13441 = vst [vmem:[%s18440_s23 + $0x48] sm:$0xff] %v13321_v29   ;;  %v11704_v8 = vadd.f32 %v11640_v5, %v11452_v18  ;;  %v11455_v34 = vadd.f32 %v14563_v60, %v18426_v61  ;;  %v11446_v59 = vpop.f32.mrb[151].mxu0 }
 0x66a   : > { %13440 = vst [vmem:[%s18440_s23 + $0x40] sm:$0xff] %v13316_v44   ;;  %v11702_v24 = vadd.f32 %v11638_v50, %v11444_v1  ;;  %v11447_v19 = vadd.f32 %v18426_v61, %v11446_v59 }
 0x66b   : > { %v11705_v40 = vadd.f32 %v11641_v28, %v11455_v34  ;;  %v11768_v45 = vmax.f32 %v11704_v8, 0.0  ;;  %v11652_v28 = vunpack.c.l.bf16 %v15602_v46 }
 0x66c   : > { %v11703_v54 = vadd.f32 %v11639_v62, %v11447_v19  ;;  %v11766_v53 = vmax.f32 %v11702_v24, 0.0  ;;  %v15603_v62 = vld [vmem:[%s15939_s15 + $0x80] sm:$0xff]   ;;  %v11653_v19 = vunpack.c.h.bf16 %v15602_v46 }
 0x66d   : > { %v11769_v17 = vmax.f32 %v11705_v40, 0.0  ;;  %v11650_v8 = vunpack.c.l.bf16 %v15603_v62 }
 0x66e   : > { %v11767_v43 = vmax.f32 %v11703_v54, 0.0  ;;  %v14566_v27 = vpop.f32.mrb[152].mxu0 }
 0x66f   : > { %v13331_v10 = vpack.c.bf16 %v11769_v17, %v11768_v45  ;;  %v11468_v30 = vadd.f32 %v14566_v27, %v18426_v61  ;;  %v11459_v52 = vpop.f32.mrb[153].mxu0  ;;  %v11651_v17 = vunpack.c.h.bf16 %v15603_v62 }
 0x670   : > { %v13326_v4 = vpack.c.bf16 %v11767_v43, %v11766_v53  ;;  %v11460_v35 = vadd.f32 %v18426_v61, %v11459_v52  ;;  %v14567_v55 = vpop.f32.mrb[154].mxu0  ;;  %v15604_v52 = vld [vmem:[%s15939_s15 + $0x98] sm:$0xff]  }
 0x671   : > { %13443 = vst [vmem:[%s18440_s23 + $0x58] sm:$0xff] %v13331_v10   ;;  %v11708_v42 = vadd.f32 %v11644_v58, %v11468_v30  ;;  %v11471_v56 = vadd.f32 %v14567_v55, %v18426_v61  ;;  %v11462_v57 = vpop.f32.mrb[155].mxu0 }
 0x672   : > { %13442 = vst [vmem:[%s18440_s23 + $0x50] sm:$0xff] %v13326_v4   ;;  %v11706_v41 = vadd.f32 %v11642_v38, %v11460_v35  ;;  %v11463_v12 = vadd.f32 %v18426_v61, %v11462_v57 }
 0x673   : > { %v11709_v37 = vadd.f32 %v11645_v25, %v11471_v56  ;;  %v11772_v20 = vmax.f32 %v11708_v42, 0.0  ;;  %v11656_v25 = vunpack.c.l.bf16 %v15604_v52 }
 0x674   : > { %v11707_v13 = vadd.f32 %v11643_v33, %v11463_v12  ;;  %v11770_v11 = vmax.f32 %v11706_v41, 0.0  ;;  %v15605_v33 = vld [vmem:[%s15939_s15 + $0x90] sm:$0xff]   ;;  %v11657_v12 = vunpack.c.h.bf16 %v15604_v52 }
 0x675   : > { %v11773_v23 = vmax.f32 %v11709_v37, 0.0  ;;  %v11654_v42 = vunpack.c.l.bf16 %v15605_v33 }
 0x676   : > { %v11771_v15 = vmax.f32 %v11707_v13, 0.0  ;;  %v14570_v26 = vpop.f32.mrb[156].mxu0 }
 0x677   : > { %v13341_v6 = vpack.c.bf16 %v11773_v23, %v11772_v20  ;;  %v11484_v32 = vadd.f32 %v14570_v26, %v18426_v61  ;;  %v11475_v16 = vpop.f32.mrb[157].mxu0  ;;  %v11655_v23 = vunpack.c.h.bf16 %v15605_v33 }
 0x678   : > { %v13336_v51 = vpack.c.bf16 %v11771_v15, %v11770_v11  ;;  %v11476_v48 = vadd.f32 %v18426_v61, %v11475_v16  ;;  %v14571_v63 = vpop.f32.mrb[158].mxu0  ;;  %v15606_v16 = vld [vmem:[%s15939_s15 + $0xa8] sm:$0xff]  }
 0x679   : > { %13445 = vst [vmem:[%s18440_s23 + $0x68] sm:$0xff] %v13341_v6   ;;  %v11712_v9 = vadd.f32 %v11648_v36, %v11484_v32  ;;  %v11487_v5 = vadd.f32 %v14571_v63, %v18426_v61  ;;  %v11478_v21 = vpop.f32.mrb[159].mxu0 }
 0x67a   : > { %13444 = vst [vmem:[%s18440_s23 + $0x60] sm:$0xff] %v13336_v51   ;;  %v11710_v14 = vadd.f32 %v11646_v22, %v11476_v48  ;;  %v11479_v47 = vadd.f32 %v18426_v61, %v11478_v21 }
 0x67b   : > { %v11713_v49 = vadd.f32 %v11649_v0, %v11487_v5  ;;  %v11776_v29 = vmax.f32 %v11712_v9, 0.0  ;;  %v11660_v0 = vunpack.c.l.bf16 %v15606_v16 }
 0x67c   : > { %v11711_v50 = vadd.f32 %v11647_v3, %v11479_v47  ;;  %v11774_v44 = vmax.f32 %v11710_v14, 0.0  ;;  %v15607_v3 = vld [vmem:[%s15939_s15 + $0xa0] sm:$0xff]   ;;  %v11661_v47 = vunpack.c.h.bf16 %v15606_v16 }
 0x67d   : > { %v11777_v18 = vmax.f32 %v11713_v49, 0.0  ;;  %v11658_v9 = vunpack.c.l.bf16 %v15607_v3 }
 0x67e   : > { %v11775_v1 = vmax.f32 %v11711_v50, 0.0  ;;  %v14574_v60 = vpop.f32.mrb[160].mxu0 }
 0x67f   : > { %v13351_v34 = vpack.c.bf16 %v11777_v18, %v11776_v29  ;;  %v11500_v59 = vadd.f32 %v14574_v60, %v18426_v61  ;;  %v11491_v24 = vpop.f32.mrb[161].mxu0  ;;  %v11659_v18 = vunpack.c.h.bf16 %v15607_v3 }
 0x680   : > { %v13346_v40 = vpack.c.bf16 %v11775_v1, %v11774_v44  ;;  %v11492_v54 = vadd.f32 %v18426_v61, %v11491_v24  ;;  %v14575_v45 = vpop.f32.mrb[162].mxu0  ;;  %v15608_v24 = vld [vmem:[%s15939_s15 + $0xb8] sm:$0xff]  }
 0x681   : > { %13447 = vst [vmem:[%s18440_s23 + $0x78] sm:$0xff] %v13351_v34   ;;  %v11716_v7 = vadd.f32 %v11652_v28, %v11500_v59  ;;  %v11503_v58 = vadd.f32 %v14575_v45, %v18426_v61  ;;  %v11494_v53 = vpop.f32.mrb[163].mxu0 }
 0x682   : > { %13446 = vst [vmem:[%s18440_s23 + $0x70] sm:$0xff] %v13346_v40   ;;  %v11714_v43 = vadd.f32 %v11650_v8, %v11492_v54  ;;  %v11495_v27 = vadd.f32 %v18426_v61, %v11494_v53 }
 0x683   : > { %v11717_v31 = vadd.f32 %v11653_v19, %v11503_v58  ;;  %v11780_v10 = vmax.f32 %v11716_v7, 0.0  ;;  %v11664_v19 = vunpack.c.l.bf16 %v15608_v24 }
 0x684   : > { %v11715_v38 = vadd.f32 %v11651_v17, %v11495_v27  ;;  %v11778_v4 = vmax.f32 %v11714_v43, 0.0  ;;  %v15609_v17 = vld [vmem:[%s15939_s15 + $0xb0] sm:$0xff]   ;;  %v11665_v27 = vunpack.c.h.bf16 %v15608_v24 }
 0x685   : > { %v11781_v30 = vmax.f32 %v11717_v31, 0.0  ;;  %v11662_v7 = vunpack.c.l.bf16 %v15609_v17 }
 0x686   : > { %v11779_v35 = vmax.f32 %v11715_v38, 0.0  ;;  %v14578_v55 = vpop.f32.mrb[164].mxu0 }
 0x687   : > { %v13361_v56 = vpack.c.bf16 %v11781_v30, %v11780_v10  ;;  %v11516_v57 = vadd.f32 %v14578_v55, %v18426_v61  ;;  %v11507_v41 = vpop.f32.mrb[165].mxu0  ;;  %v11663_v30 = vunpack.c.h.bf16 %v15609_v17 }
 0x688   : > { %v13356_v37 = vpack.c.bf16 %v11779_v35, %v11778_v4  ;;  %v11508_v13 = vadd.f32 %v18426_v61, %v11507_v41  ;;  %v14579_v20 = vpop.f32.mrb[166].mxu0  ;;  %v15610_v41 = vld [vmem:[%s15939_s15 + $0xc8] sm:$0xff]  }
 0x689   : > { %13449 = vst [vmem:[%s18440_s23 + $0x88] sm:$0xff] %v13361_v56   ;;  %v11720_v2 = vadd.f32 %v11656_v25, %v11516_v57  ;;  %v11519_v36 = vadd.f32 %v14579_v20, %v18426_v61  ;;  %v11510_v11 = vpop.f32.mrb[167].mxu0 }
 0x68a   : > { %13448 = vst [vmem:[%s18440_s23 + $0x80] sm:$0xff] %v13356_v37   ;;  %v11718_v15 = vadd.f32 %v11654_v42, %v11508_v13  ;;  %v11511_v26 = vadd.f32 %v18426_v61, %v11510_v11 }
 0x68b   : > { %v11721_v39 = vadd.f32 %v11657_v12, %v11519_v36  ;;  %v11784_v6 = vmax.f32 %v11720_v2, 0.0  ;;  %v11668_v12 = vunpack.c.l.bf16 %v15610_v41 }
 0x68c   : > { %v11719_v22 = vadd.f32 %v11655_v23, %v11511_v26  ;;  %v11782_v51 = vmax.f32 %v11718_v15, 0.0  ;;  %v15611_v23 = vld [vmem:[%s15939_s15 + $0xc0] sm:$0xff]   ;;  %v11669_v26 = vunpack.c.h.bf16 %v15610_v41 }
 0x68d   : > { %v11785_v32 = vmax.f32 %v11721_v39, 0.0  ;;  %v11666_v2 = vunpack.c.l.bf16 %v15611_v23 }
 0x68e   : > { %v11783_v48 = vmax.f32 %v11719_v22, 0.0  ;;  %v14582_v63 = vpop.f32.mrb[168].mxu0 }
 0x68f   : > { %v13371_v5 = vpack.c.bf16 %v11785_v32, %v11784_v6  ;;  %v11532_v21 = vadd.f32 %v14582_v63, %v18426_v61  ;;  %v11523_v14 = vpop.f32.mrb[169].mxu0  ;;  %v11667_v32 = vunpack.c.h.bf16 %v15611_v23 }
 0x690   : > { %v13366_v49 = vpack.c.bf16 %v11783_v48, %v11782_v51  ;;  %v11524_v50 = vadd.f32 %v18426_v61, %v11523_v14  ;;  %v14583_v29 = vpop.f32.mrb[170].mxu0  ;;  %v15612_v14 = vld [vmem:[%s15939_s15 + $0xd8] sm:$0xff]  }
 0x691   : > { %13451 = vst [vmem:[%s18440_s23 + $0x98] sm:$0xff] %v13371_v5   ;;  %v11724_v46 = vadd.f32 %v11660_v0, %v11532_v21  ;;  %v11535_v28 = vadd.f32 %v14583_v29, %v18426_v61  ;;  %v11526_v44 = vpop.f32.mrb[171].mxu0 }
 0x692   : > { %13450 = vst [vmem:[%s18440_s23 + $0x90] sm:$0xff] %v13366_v49   ;;  %v11722_v1 = vadd.f32 %v11658_v9, %v11524_v50  ;;  %v11527_v60 = vadd.f32 %v18426_v61, %v11526_v44 }
 0x693   : > { %v11725_v62 = vadd.f32 %v11661_v47, %v11535_v28  ;;  %v11788_v34 = vmax.f32 %v11724_v46, 0.0  ;;  %v11672_v47 = vunpack.c.l.bf16 %v15612_v14 }
 0x694   : > { %v11723_v8 = vadd.f32 %v11659_v18, %v11527_v60  ;;  %v11786_v40 = vmax.f32 %v11722_v1, 0.0  ;;  %v15613_v18 = vld [vmem:[%s15939_s15 + $0xd0] sm:$0xff]   ;;  %v11673_v60 = vunpack.c.h.bf16 %v15612_v14 }
 0x695   : > { %v11789_v59 = vmax.f32 %v11725_v62, 0.0  ;;  %v11670_v46 = vunpack.c.l.bf16 %v15613_v18 }
 0x696   : > { %v11787_v54 = vmax.f32 %v11723_v8, 0.0  ;;  %v14586_v45 = vpop.f32.mrb[172].mxu0 }
 0x697   : > { %v13381_v58 = vpack.c.bf16 %v11789_v59, %v11788_v34  ;;  %v11548_v53 = vadd.f32 %v14586_v45, %v18426_v61  ;;  %v11539_v43 = vpop.f32.mrb[173].mxu0  ;;  %v11671_v59 = vunpack.c.h.bf16 %v15613_v18 }
 0x698   : > { %v13376_v31 = vpack.c.bf16 %v11787_v54, %v11786_v40  ;;  %v11540_v38 = vadd.f32 %v18426_v61, %v11539_v43  ;;  %v14587_v10 = vpop.f32.mrb[174].mxu0  ;;  %v15614_v43 = vld [vmem:[%s15939_s15 + $0xe8] sm:$0xff]  }
 0x699   : > { %13453 = vst [vmem:[%s18440_s23 + $0xa8] sm:$0xff] %v13381_v58   ;;  %v11728_v52 = vadd.f32 %v11664_v19, %v11548_v53  ;;  %v11551_v25 = vadd.f32 %v14587_v10, %v18426_v61  ;;  %v11542_v4 = vpop.f32.mrb[175].mxu0 }
 0x69a   : > { %13452 = vst [vmem:[%s18440_s23 + $0xa0] sm:$0xff] %v13376_v31   ;;  %v11726_v35 = vadd.f32 %v11662_v7, %v11540_v38  ;;  %v11543_v55 = vadd.f32 %v18426_v61, %v11542_v4 }
 0x69b   : > { %v11729_v33 = vadd.f32 %v11665_v27, %v11551_v25  ;;  %v11792_v56 = vmax.f32 %v11728_v52, 0.0  ;;  %v11676_v27 = vunpack.c.l.bf16 %v15614_v43 }
 0x69c   : > { %v11727_v42 = vadd.f32 %v11663_v30, %v11543_v55  ;;  %v11790_v37 = vmax.f32 %v11726_v35, 0.0  ;;  %v15615_v30 = vld [vmem:[%s15939_s15 + $0xe0] sm:$0xff]   ;;  %v11677_v55 = vunpack.c.h.bf16 %v15614_v43 }
 0x69d   : > { %v11793_v57 = vmax.f32 %v11729_v33, 0.0  ;;  %v11674_v52 = vunpack.c.l.bf16 %v15615_v30 }
 0x69e   : > { %v11791_v13 = vmax.f32 %v11727_v42, 0.0  ;;  %v14590_v20 = vpop.f32.mrb[176].mxu0 }
 0x69f   : > { %v13391_v36 = vpack.c.bf16 %v11793_v57, %v11792_v56  ;;  %v11564_v11 = vadd.f32 %v14590_v20, %v18426_v61  ;;  %v11555_v15 = vpop.f32.mrb[177].mxu0  ;;  %v11675_v57 = vunpack.c.h.bf16 %v15615_v30 }
 0x6a0   : > { %v13386_v39 = vpack.c.bf16 %v11791_v13, %v11790_v37  ;;  %v11556_v22 = vadd.f32 %v18426_v61, %v11555_v15  ;;  %v14591_v6 = vpop.f32.mrb[178].mxu0  ;;  %v15616_v15 = vld [vmem:[%s15939_s15 + $0xf8] sm:$0xff]  }
 0x6a1   : > { %13455 = vst [vmem:[%s18440_s23 + $0xb8] sm:$0xff] %v13391_v36   ;;  %v11732_v16 = vadd.f32 %v11668_v12, %v11564_v11  ;;  %v11567_v0 = vadd.f32 %v14591_v6, %v18426_v61  ;;  %v11558_v51 = vpop.f32.mrb[179].mxu0 }
 0x6a2   : > { %13454 = vst [vmem:[%s18440_s23 + $0xb0] sm:$0xff] %v13386_v39   ;;  %v11730_v48 = vadd.f32 %v11666_v2, %v11556_v22  ;;  %v11559_v63 = vadd.f32 %v18426_v61, %v11558_v51 }
 0x6a3   : > { %v11733_v3 = vadd.f32 %v11669_v26, %v11567_v0  ;;  %v11796_v5 = vmax.f32 %v11732_v16, 0.0  ;;  %v11680_v26 = vunpack.c.l.bf16 %v15616_v15 }
 0x6a4   : > { %v11731_v9 = vadd.f32 %v11667_v32, %v11559_v63  ;;  %v11794_v49 = vmax.f32 %v11730_v48, 0.0  ;;  %v15617_v32 = vld [vmem:[%s15939_s15 + $0xf0] sm:$0xff]   ;;  %v11681_v63 = vunpack.c.h.bf16 %v15616_v15  ;;  %s12145_s15 = sshll.u32 %s18440_s23, 4  ;;  %s18565_s15 = int_to_ptr.vmem [resolvable:$true] %s12145_s15 }
 0x6a5   : > { %v11797_v21 = vmax.f32 %v11733_v3, 0.0  ;;  %v11678_v16 = vunpack.c.l.bf16 %v15617_v32  ;;  %s15676_s10 = scalar_lea.vmem %s18565_s15, 4096  ;;  %p15683_p11 = scmp.lt.s32.totalorder %s18565_s15, %s15681_s14 }
 0x6a6   : > { %v11795_v50 = vmax.f32 %v11731_v9, 0.0  ;;  %v14594_v29 = vpop.f32.mrb[180].mxu0  ;;  %p15677_p4 = scmp.ne.s32.totalorder %s18565_s15, %s15676_s10  ;;  %p15684_p13 = scmp.lt.s32.totalorder %s15682_s30, %s15676_s10 }
 0x6a7   : > { %v13401_v28 = vpack.c.bf16 %v11797_v21, %v11796_v5  ;;  %v11580_v44 = vadd.f32 %v14594_v29, %v18426_v61  ;;  %v11571_v1 = vpop.f32.mrb[181].mxu0  ;;  %v11679_v21 = vunpack.c.h.bf16 %v15617_v32 }
 0x6a8   : > { %v13396_v62 = vpack.c.bf16 %v11795_v50, %v11794_v49  ;;  %v11572_v8 = vadd.f32 %v18426_v61, %v11571_v1  ;;  %v14595_v34 = vpop.f32.mrb[182].mxu0  ;;  %p15678_p6 = pnand %p15677_p4, %p15882_p12  ;;  %p15685_p3 = por %p15684_p13, %p15683_p11 }
 0x6a9   : > { %13457 = vst [vmem:[%s18440_s23 + $0xc8] sm:$0xff] %v13401_v28   ;;  %v11736_v24 = vadd.f32 %v11672_v47, %v11580_v44  ;;  %v11583_v19 = vadd.f32 %v14595_v34, %v18426_v61  ;;  %v11574_v40 = vpop.f32.mrb[183].mxu0 }
 0x6aa   : > { %13456 = vst [vmem:[%s18440_s23 + $0xc0] sm:$0xff] %v13396_v62   ;;  %v11734_v54 = vadd.f32 %v11670_v46, %v11572_v8  ;;  %v11575_v45 = vadd.f32 %v18426_v61, %v11574_v40  ;;  %p15679_p8 = pneg %p15678_p6 }
 0x6ab   : > { %v11737_v17 = vadd.f32 %v11673_v60, %v11583_v19  ;;  %v11800_v58 = vmax.f32 %v11736_v24, 0.0 }
 0x6ac   : > { %v11735_v7 = vadd.f32 %v11671_v59, %v11575_v45  ;;  %v11798_v31 = vmax.f32 %v11734_v54, 0.0  ;;  %p15686_p7 = pnand %p15685_p3, %p15679_p8 }
 0x6ad   : > { %v11801_v53 = vmax.f32 %v11737_v17, 0.0 }
 0x6ae   : > { %v11799_v38 = vmax.f32 %v11735_v7, 0.0  ;;  %v14598_v10 = vpop.f32.mrb[184].mxu0 }
 0x6af   : > { %v13411_v25 = vpack.c.bf16 %v11801_v53, %v11800_v58  ;;  %v11596_v4 = vadd.f32 %v14598_v10, %v18426_v61  ;;  %v11587_v35 = vpop.f32.mrb[185].mxu0 }
 0x6b0   : > { %v13406_v33 = vpack.c.bf16 %v11799_v38, %v11798_v31  ;;  %v11588_v42 = vadd.f32 %v18426_v61, %v11587_v35  ;;  %v14599_v56 = vpop.f32.mrb[186].mxu0 }
 0x6b1   : > { %13459 = vst [vmem:[%s18440_s23 + $0xd8] sm:$0xff] %v13411_v25   ;;  %v11740_v41 = vadd.f32 %v11676_v27, %v11596_v4  ;;  %v11599_v12 = vadd.f32 %v14599_v56, %v18426_v61  ;;  %v11590_v37 = vpop.f32.mrb[187].mxu0 }
 0x6b2   : > { %13458 = vst [vmem:[%s18440_s23 + $0xd0] sm:$0xff] %v13406_v33   ;;  %v11738_v13 = vadd.f32 %v11674_v52, %v11588_v42  ;;  %v11591_v20 = vadd.f32 %v18426_v61, %v11590_v37 }
 0x6b3   : > { %v11741_v23 = vadd.f32 %v11677_v55, %v11599_v12  ;;  %v11804_v36 = vmax.f32 %v11740_v41, 0.0 }
 0x6b4   : > { %v11739_v2 = vadd.f32 %v11675_v57, %v11591_v20  ;;  %v11802_v39 = vmax.f32 %v11738_v13, 0.0 }
 0x6b5   : > { %v11805_v11 = vmax.f32 %v11741_v23, 0.0 }
 0x6b6   : > { %v11803_v22 = vmax.f32 %v11739_v2, 0.0  ;;  %v14602_v6 = vpop.f32.mrb[188].mxu0 }
 0x6b7   : > { %v13421_v0 = vpack.c.bf16 %v11805_v11, %v11804_v36  ;;  %v11612_v51 = vadd.f32 %v14602_v6, %v18426_v61  ;;  %v11603_v48 = vpop.f32.mrb[189].mxu0 }
 0x6b8   : > { %v13416_v3 = vpack.c.bf16 %v11803_v22, %v11802_v39  ;;  %v11604_v9 = vadd.f32 %v18426_v61, %v11603_v48  ;;  %v14603_v5 = vpop.f32.mrb[190].mxu0 }
 0x6b9   : > { %13461 = vst [vmem:[%s18440_s23 + $0xe8] sm:$0xff] %v13421_v0   ;;  %v11744_v14 = vadd.f32 %v11680_v26, %v11612_v51  ;;  %v11615_v47 = vadd.f32 %v14603_v5, %v18426_v61  ;;  %v11606_v49 = vpop.f32.mrb[191].mxu0 }
 0x6ba   : > { %13460 = vst [vmem:[%s18440_s23 + $0xe0] sm:$0xff] %v13416_v3   ;;  %v11742_v50 = vadd.f32 %v11678_v16, %v11604_v9  ;;  %v11607_v29 = vadd.f32 %v18426_v61, %v11606_v49 }
 0x6bb   : > { %v11745_v18 = vadd.f32 %v11681_v63, %v11615_v47  ;;  %v11808_v28 = vmax.f32 %v11744_v14, 0.0 }
 0x6bc   : > { %v11743_v46 = vadd.f32 %v11679_v21, %v11607_v29  ;;  %v11806_v1 = vmax.f32 %v11742_v50, 0.0 }
 0x6bd   : > { %v11809_v44 = vmax.f32 %v11745_v18, 0.0 }
 0x6be   : > { %v11807_v60 = vmax.f32 %v11743_v46, 0.0 }
 0x6bf   : > { %v13431_v62 = vpack.c.bf16 %v11809_v44, %v11808_v28 }
 0x6c0   : > { %v13426_v61 = vpack.c.bf16 %v11807_v60, %v11806_v1 }
 0x6c1   : > { %13463 = vst [vmem:[%s18440_s23 + $0xf8] sm:$0xff] %v13431_v62  }
 0x6c2   : > { %13462 = vst [vmem:[%s18440_s23 + $0xf0] sm:$0xff] %v13426_v61  }
 0x6c3   : > { %15689 = shalt.err (!%p15686_p7)
}
 0x6c4   : > { %s15690_s17 = scalar_lea.hbm %s18563_s9, 4096  ;;  %s15694_s23 = scalar_lea.hbm %s18617_s7, 16384 }
 0x6c5   : > { %p15691_p9 = scmp.ne.s32.totalorder %s18563_s9, %s15690_s17  ;;  %p15695_p5 = scmp.lt.u32.totalorder %s18563_s9, %s18617_s7 }
 0x6c6   : > { %p15696_p10 = scmp.lt.u32.totalorder %s15694_s23, %s15690_s17  ;;  %p15698_p4 = scmp.lt.u32.totalorder %s15690_s17, %s18563_s9 }
 0x6c7   : > { %p15692_p1 = pnand %p15691_p9, %p15882_p12 }
 0x6c8   : > { %p15697_p2 = por %p15696_p10, %p15695_p5 }
 0x6c9   : > { %p15693_p0 = pneg %p15692_p1 }
 0x6ca   : > { %p15699_p6 = por %p15698_p4, %p15697_p2 }
 0x6cc   : > { %p15700_p8 = pnand %p15699_p6, %p15693_p0 }
 0x6ce   : > { %15703 = shalt.err (!%p15700_p8)
}
 0x6cf   : > { %s15754_s12 = smov 64   ;;  %s15755_s10 = smov 4  }
 0x6d0   : > { %15126 = dma.vmem_to_hbm [thread:$0]  (%p15882_p12), %s18565_s15, 4096, %s18563_s9, %s12131_s28, %s15754_s12, %s15754_s12, %s15755_s10  }
 0x6d1 PF: > { %p15143_p11 = scmp.ge.s32.totalorder %s15746_s27, 2  ;;  %s12160_s16 = sand.u32 1, %s15734_s24  }
 0x6d2   : > { %p18748_p13 = scmp.ne.s32.totalorder %s18623_s8, 0  ;;  %s12161_s14 = scalar_lea.sflag [#allocation5], %s12160_s16 }
 0x6d4   : > { %p15137_p3 = pnand %p15143_p11, %p18748_p13 }
 0x6d6   : > { %15729 = dma.done.wait (!%p15137_p3), %s12161_s14, 4096  }
 0x6d7   : > { %15731 = vsyncadd (!%p15137_p3), %s12161_s14, 4294963200  ;;  %p21_p7 = scmp.ge.s32.totalorder %s15849_s13, 6   ;;  %s18749_s24 = smov %s15738_s25 }
 0x6d8   : > { %s18750_s25 = smov %s15742_s26  ;;  %s18751_s26 = smov %s15878_s18 }
 0x6d9   : > { %s18752_s27 = smov %s15849_s13  ;;  %23 = sbr.rel (!%p21_p7) target bundleno = 6 (0x6), region = 107 }
 0x6e0   :  { %12166 = vsyncpa [#allocation4], 1 }
 0x6e1   :  { %12168 = vsyncpa [#allocation4 + $0x1], 1 }
 0x6e2   :  { %12169 = vsyncpa [#allocation7], 1 }
 0x6e3   :  { %12170 = vsyncpa [#allocation5], 1 }
 0x6e4   :  { %12172 = vsyncpa [#allocation5 + $0x1], 1 }

</bundles_post_ra>
